<compile_context>
chip_gen: v7x
topology: tpu7x:2x2x1
jax: 0.10.0
libtpu: 0.0.40
codegen_flags: <defaults>
</compile_context>

<pallas_src>
import functools

import jax
import jax.numpy as jnp
import numpy as np
from jax.experimental import pallas as pl
from jax.experimental.pallas import tpu as pltpu


def _round_up(x, m):
    return (x + m - 1) // m * m


def _fused_lstm_kernel(x_ref, wemb_ref, *rest, num_layers, seq_len):
    """Entire LstmModel forward in one kernel (everything resident in VMEM).

    rest = (wih_0, whh_0, b_0, ..., wih_{L-1}, whh_{L-1}, b_{L-1},
            wlin, blin, out_ref, proj_sc, xnext_sc)

    Shapes (BP = batch padded to a multiple of 8, H = hidden, C = n_classes):
      x_ref    : (T*BP, D)      time-major flattened (row = t*BP + b)
      wemb_ref : (1, D)
      wih_l    : (8, D_l, H)    index = 4*dir + gate (PyTorch order i,f,g,o),
                                D_0 = D, D_{l>0} = 2H   (W_ih gate block, transposed)
      whh_l    : (8, H, H)      index = 4*dir + gate   (W_hh gate block, transposed)
      b_l      : (8, 1, H)      (b_ih + b_hh) gate block
      wlin     : (2, H, C)      [fwd half, bwd half] of the final Linear
      blin     : (1, C)
      out_ref  : (BP, C)
      proj_sc  : (8, T*BP, H)   VMEM staging for hoisted per-gate input projections
      xnext_sc : (T*BP, 2H)     VMEM scratch for inter-layer activations
    """
    xnext_sc = rest[-1]
    proj_sc = rest[-2]
    out_ref = rest[-3]
    blin_ref = rest[-4]
    wlin_ref = rest[-5]
    layer_refs = rest[:-5]
    assert len(layer_refs) == 3 * num_layers

    T = seq_len
    TBP = x_ref.shape[0]
    BP = TBP // T
    H = wlin_ref.shape[1]

    # Embedding re-weighting fused in (broadcast over last dim).
    x_flat = x_ref[...] * wemb_ref[...]                    # (T*BP, D)

    # Running relu-sums of the last layer's outputs (head folded in).
    sf = jnp.zeros((BP, H), jnp.float32)
    sb = jnp.zeros((BP, H), jnp.float32)

    for l in range(num_layers):
        wih_ref = layer_refs[3 * l + 0]
        whh_ref = layer_refs[3 * l + 1]
        b_ref = layer_refs[3 * l + 2]
        is_last = l + 1 == num_layers

        if l > 0:
            # TODO(synk): inter-layer LSTM dropout is identity at inference.
            x_flat = xnext_sc[...]                         # (T*BP, 2H)

        # Hoisted per-gate input projections (+ fused b_ih+b_hh): 8 MXU
        # matmuls cover all timesteps at once; results staged in VMEM in a
        # gate-major layout so the serial recurrence below only issues small
        # aligned loads (no lane slicing, no big live SSA values to spill).
        for g in range(8):
            proj_sc[g, :, :] = (
                jnp.dot(x_flat, wih_ref[g], preferred_element_type=jnp.float32)
                + b_ref[g])

        # Per-gate recurrent weights: gate extraction on the serial chain
        # never touches the lane dimension.
        w_rec = [whh_ref[g] for g in range(8)]

        hf = jnp.zeros((BP, H), jnp.float32)
        cf = jnp.zeros((BP, H), jnp.float32)
        hb = jnp.zeros((BP, H), jnp.float32)
        cb = jnp.zeros((BP, H), jnp.float32)

        def cell(h, c, t, d):
            r0 = t * BP
            z = [proj_sc[4 * d + k, r0:r0 + BP, :]
                 + jnp.dot(h, w_rec[4 * d + k],
                           preferred_element_type=jnp.float32)
                 for k in range(4)]
            i = jax.nn.sigmoid(z[0])
            f = jax.nn.sigmoid(z[1])
            gg = jnp.tanh(z[2])
            o = jax.nn.sigmoid(z[3])
            c = f * c + i * gg
            h = o * jnp.tanh(c)
            return h, c

        for s in range(T):
            tf, tb = s, T - 1 - s
            # Fwd / bwd chains are independent; interleaving them per step
            # lets the scheduler overlap the two recurrence latencies.
            hf, cf = cell(hf, cf, tf, 0)
            hb, cb = cell(hb, cb, tb, 1)
            if is_last:
                # relu + sum over seq folded into the loop (head below).
                sf = sf + jnp.maximum(hf, 0.0)
                sb = sb + jnp.maximum(hb, 0.0)
            else:
                r0f, r0b = tf * BP, tb * BP
                xnext_sc[r0f:r0f + BP, 0:H] = hf
                xnext_sc[r0b:r0b + BP, H:2 * H] = hb

    # Head: relu -> dropout(identity, eval) -> Linear -> sum over seq, using
    #   sum_t (relu(x_t) @ W + b) = (sum relu_fwd) @ W_f + (sum relu_bwd) @ W_b + T*b
    out_ref[...] = (jnp.dot(sf, wlin_ref[0], preferred_element_type=jnp.float32)
                    + jnp.dot(sb, wlin_ref[1], preferred_element_type=jnp.float32)
                    + jnp.float32(T) * blin_ref[...])


def lstm_model_forward(embeddings, params):
    """embeddings: (B, T, D) float32 -> {'logits': (B, n_classes)}."""
    B, T, D = embeddings.shape
    num_layers = len(params["layers"])
    H = params["lin_w"].shape[1]
    C = params["lin_w"].shape[2]
    BP = _round_up(max(B, 1), 8)                 # pad batch to a sublane multiple

    x = jnp.transpose(embeddings, (1, 0, 2))     # (T, B, D) time-major
    x = jnp.pad(x, ((0, 0), (0, BP - B), (0, 0)))
    x = x.reshape(T * BP, D)                     # row = t*BP + b

    args = [x, params["emb_weights"].reshape(1, D)]
    for layer in params["layers"]:
        args += [layer["wih"], layer["whh"], layer["b"]]
    args += [params["lin_w"], params["lin_b"].reshape(1, C)]

    kernel = functools.partial(_fused_lstm_kernel, num_layers=num_layers, seq_len=T)
    logits_padded = pl.pallas_call(
        kernel,
        out_shape=jax.ShapeDtypeStruct((BP, C), jnp.float32),
        scratch_shapes=[pltpu.VMEM((8, T * BP, H), jnp.float32),   # proj staging
                        pltpu.VMEM((T * BP, 2 * H), jnp.float32)],  # inter-layer acts
    )(*args)
    return {"logits": logits_padded[:B]}


# ----------------------------------------------------------------------------
# Deterministic parameter construction (shapes from LstmModel.__init__).
# Stores both the kernel layout and a canonical PyTorch-like layout (for the
# pure-JAX reference check).
# ----------------------------------------------------------------------------
def make_params(key, emb_dim, hidden, num_layers, n_classes):
    params = {"emb_weights": jnp.ones((emb_dim,), jnp.float32)}  # init to ones

    stdv = 1.0 / float(np.sqrt(hidden))
    layers, canon_layers = [], []
    for l in range(num_layers):
        d_in = emb_dim if l == 0 else 2 * hidden
        wih_blocks, whh_blocks, b_blocks, canon_dirs = [], [], [], []
        for _d in range(2):
            key, k1, k2, k3, k4 = jax.random.split(key, 5)
            w_ih = jax.random.uniform(k1, (4 * hidden, d_in), jnp.float32, -stdv, stdv)
            w_hh = jax.random.uniform(k2, (4 * hidden, hidden), jnp.float32, -stdv, stdv)
            b_ih = jax.random.uniform(k3, (4 * hidden,), jnp.float32, -stdv, stdv)
            b_hh = jax.random.uniform(k4, (4 * hidden,), jnp.float32, -stdv, stdv)
            canon_dirs.append({"w_ih": w_ih, "w_hh": w_hh, "b": b_ih + b_hh})
            b = b_ih + b_hh
            for k in range(4):                               # PyTorch gate order i,f,g,o
                sl = slice(k * hidden, (k + 1) * hidden)
                wih_blocks.append(w_ih[sl, :].T)             # (d_in, H)
                whh_blocks.append(w_hh[sl, :].T)             # (H, H)
                b_blocks.append(b[sl].reshape(1, hidden))    # (1, H)
        layers.append({
            "wih": jnp.stack(wih_blocks),    # (8, d_in, H), index = 4*dir + gate
            "whh": jnp.stack(whh_blocks),    # (8, H, H)
            "b": jnp.stack(b_blocks),        # (8, 1, H)
        })
        canon_layers.append(canon_dirs)
    params["layers"] = layers
    params["canon_layers"] = canon_layers

    stdv_lin = 1.0 / float(np.sqrt(2 * hidden))
    key, k1, k2 = jax.random.split(key, 3)
    w_lin = jax.random.uniform(k1, (n_classes, 2 * hidden), jnp.float32,
                               -stdv_lin, stdv_lin)
    b_lin = jax.random.uniform(k2, (n_classes,), jnp.float32, -stdv_lin, stdv_lin)
    params["lin_w"] = jnp.stack([w_lin[:, :hidden].T, w_lin[:, hidden:].T])  # (2, H, C)
    params["lin_b"] = b_lin
    params["canon_lin"] = {"w": w_lin, "b": b_lin}
    return params


# ----------------------------------------------------------------------------
# Pure-JAX reference (mirrors the PyTorch module in eval mode).
# ----------------------------------------------------------------------------
def lstm_model_reference(embeddings, params):
    x = embeddings * params["emb_weights"]                 # (B, T, D)
    x = jnp.transpose(x, (1, 0, 2))                        # (T, B, D)
    T, B, _ = x.shape
    for layer in params["canon_layers"]:
        outs = []
        for d, p in enumerate(layer):
            H = p["w_hh"].shape[1]
            h = jnp.zeros((B, H), jnp.float32)
            c = jnp.zeros((B, H), jnp.float32)
            hs = [None] * T
            ts = range(T - 1, -1, -1) if d == 1 else range(T)
            for t in ts:
                gates = x[t] @ p["w_ih"].T + h @ p["w_hh"].T + p["b"]
                i = jax.nn.sigmoid(gates[:, 0 * H:1 * H])
                f = jax.nn.sigmoid(gates[:, 1 * H:2 * H])
                g = jnp.tanh(gates[:, 2 * H:3 * H])
                o = jax.nn.sigmoid(gates[:, 3 * H:4 * H])
                c = f * c + i * g
                h = o * jnp.tanh(c)
                hs[t] = h
            outs.append(jnp.stack(hs))                     # (T, B, H)
        x = jnp.concatenate(outs, axis=-1)                 # (T, B, 2H)
    x = jnp.transpose(x, (1, 0, 2))                        # (B, T, 2H)
    x = jax.nn.relu(x)
    w, b = params["canon_lin"]["w"], params["canon_lin"]["b"]
    logits = jnp.einsum("btd,cd->btc", x, w) + b
    return logits.sum(axis=1)


if __name__ == "__main__":
    # TODO(synk): the flair/pretrained embedder (initialize_embeddings) has no
    # Pallas equivalent; the model consumes precomputed embeddings, so
    # synthetic ones are fed here.
    B, T, D = 2, 8, 64          # batch, seq len, summed embedding size
    H = 32                      # lstm_hidden_size
    NUM_LAYERS = 2              # num_lstm_layers
    N_CLASSES = 3

    key = jax.random.PRNGKey(0)
    key, k_emb = jax.random.split(key)
    embeddings = jax.random.normal(k_emb, (B, T, D), jnp.float32)
    params = make_params(key, D, H, NUM_LAYERS, N_CLASSES)

    fwd = jax.jit(functools.partial(lstm_model_forward, params=params))
    out = fwd(embeddings)
    logits = jax.block_until_ready(out["logits"])
    assert logits.shape == (B, N_CLASSES)

    # Correctness check against a pure-JAX reference.
    with jax.default_matmul_precision("highest"):
        ref = jax.jit(functools.partial(lstm_model_reference, params=params))(embeddings)
    ref = jax.block_until_ready(ref)
    np.testing.assert_allclose(np.asarray(logits), np.asarray(ref),
                               rtol=3e-2, atol=3e-2)

    print("KERNEL_OK")
</pallas_src>

<mosaic_0001>
module attributes {stable_mosaic.version = 11 : i64} {
  func.func @_fused_lstm_kernel(%arg0: memref<64x64xf32, #tpu.memory_space<vmem>>, %arg1: memref<1x64xf32, #tpu.memory_space<vmem>>, %arg2: memref<8x64x32xf32, #tpu.memory_space<vmem>>, %arg3: memref<8x32x32xf32, #tpu.memory_space<vmem>>, %arg4: memref<8x1x32xf32, #tpu.memory_space<vmem>>, %arg5: memref<8x64x32xf32, #tpu.memory_space<vmem>>, %arg6: memref<8x32x32xf32, #tpu.memory_space<vmem>>, %arg7: memref<8x1x32xf32, #tpu.memory_space<vmem>>, %arg8: memref<2x32x3xf32, #tpu.memory_space<vmem>>, %arg9: memref<1x3xf32, #tpu.memory_space<vmem>>, %arg10: memref<8x3xf32, #tpu.memory_space<vmem>>, %arg11: memref<8x64x32xf32, #tpu.memory_space<vmem>>, %arg12: memref<64x64xf32, #tpu.memory_space<vmem>>) attributes {dimension_semantics = [], scalar_prefetch = 0 : i64, scratch_operands = 2 : i64, tpu.core_type = #tpu.core_type<tc>} {
    %c0 = arith.constant 0 : index
    %c0_0 = arith.constant 0 : index
    %0 = vector.load %arg0[%c0, %c0_0] : memref<64x64xf32, #tpu.memory_space<vmem>>, vector<64x64xf32>
    %c0_1 = arith.constant 0 : index
    %c0_2 = arith.constant 0 : index
    %1 = vector.load %arg1[%c0_1, %c0_2] : memref<1x64xf32, #tpu.memory_space<vmem>>, vector<1x64xf32>
    %2 = vector.broadcast %1 : vector<1x64xf32> to vector<64x64xf32>
    %3 = arith.mulf %0, %2 : vector<64x64xf32>
    %cst = arith.constant 0.000000e+00 : f32
    %4 = vector.broadcast %cst : f32 to vector<8x32xf32>
    %cst_3 = arith.constant 0.000000e+00 : f32
    %5 = vector.broadcast %cst_3 : f32 to vector<8x32xf32>
    %c0_4 = arith.constant 0 : index
    %c0_5 = arith.constant 0 : index
    %c0_6 = arith.constant 0 : index
    %6 = vector.load %arg2[%c0_4, %c0_5, %c0_6] : memref<8x64x32xf32, #tpu.memory_space<vmem>>, vector<1x64x32xf32>
    %7 = vector.shape_cast %6 : vector<1x64x32xf32> to vector<64x32xf32>
    %cst_7 = arith.constant dense<0.000000e+00> : vector<64x32xf32>
    %8 = tpu.matmul %3, %7, %cst_7 {dimension_numbers = #tpu.dot_dimension_numbers<[1], [0], [0], [1], [0, 0, 1, 1], [], []>} : vector<64x64xf32>, vector<64x32xf32>, vector<64x32xf32> -> vector<64x32xf32>
    %c0_8 = arith.constant 0 : index
    %c0_9 = arith.constant 0 : index
    %c0_10 = arith.constant 0 : index
    %9 = vector.load %arg4[%c0_8, %c0_9, %c0_10] : memref<8x1x32xf32, #tpu.memory_space<vmem>>, vector<1x1x32xf32>
    %10 = vector.shape_cast %9 : vector<1x1x32xf32> to vector<1x32xf32>
    %11 = vector.broadcast %10 : vector<1x32xf32> to vector<64x32xf32>
    %12 = arith.addf %8, %11 : vector<64x32xf32>
    %c0_11 = arith.constant 0 : index
    %c0_12 = arith.constant 0 : index
    %c0_13 = arith.constant 0 : index
    %13 = vector.load %arg11[%c0_11, %c0_12, %c0_13] : memref<8x64x32xf32, #tpu.memory_space<vmem>>, vector<1x64x32xf32>
    %14 = vector.shape_cast %13 : vector<1x64x32xf32> to vector<64x32xf32>
    %15 = vector.shape_cast %12 : vector<64x32xf32> to vector<1x64x32xf32>
    tpu.vector_store %arg11[%c0_11, %c0_12, %c0_13], %15 {strides = array<i32>} : memref<8x64x32xf32, #tpu.memory_space<vmem>>, vector<1x64x32xf32>,
    %c1 = arith.constant 1 : index
    %c0_14 = arith.constant 0 : index
    %c0_15 = arith.constant 0 : index
    %16 = vector.load %arg2[%c1, %c0_14, %c0_15] : memref<8x64x32xf32, #tpu.memory_space<vmem>>, vector<1x64x32xf32>
    %17 = vector.shape_cast %16 : vector<1x64x32xf32> to vector<64x32xf32>
    %cst_16 = arith.constant dense<0.000000e+00> : vector<64x32xf32>
    %18 = tpu.matmul %3, %17, %cst_16 {dimension_numbers = #tpu.dot_dimension_numbers<[1], [0], [0], [1], [0, 0, 1, 1], [], []>} : vector<64x64xf32>, vector<64x32xf32>, vector<64x32xf32> -> vector<64x32xf32>
    %c1_17 = arith.constant 1 : index
    %c0_18 = arith.constant 0 : index
    %c0_19 = arith.constant 0 : index
    %19 = vector.load %arg4[%c1_17, %c0_18, %c0_19] : memref<8x1x32xf32, #tpu.memory_space<vmem>>, vector<1x1x32xf32>
    %20 = vector.shape_cast %19 : vector<1x1x32xf32> to vector<1x32xf32>
    %21 = vector.broadcast %20 : vector<1x32xf32> to vector<64x32xf32>
    %22 = arith.addf %18, %21 : vector<64x32xf32>
    %c1_20 = arith.constant 1 : index
    %c0_21 = arith.constant 0 : index
    %c0_22 = arith.constant 0 : index
    %23 = vector.load %arg11[%c1_20, %c0_21, %c0_22] : memref<8x64x32xf32, #tpu.memory_space<vmem>>, vector<1x64x32xf32>
    %24 = vector.shape_cast %23 : vector<1x64x32xf32> to vector<64x32xf32>
    %25 = vector.shape_cast %22 : vector<64x32xf32> to vector<1x64x32xf32>
    tpu.vector_store %arg11[%c1_20, %c0_21, %c0_22], %25 {strides = array<i32>} : memref<8x64x32xf32, #tpu.memory_space<vmem>>, vector<1x64x32xf32>,
    %c2 = arith.constant 2 : index
    %c0_23 = arith.constant 0 : index
    %c0_24 = arith.constant 0 : index
    %26 = vector.load %arg2[%c2, %c0_23, %c0_24] : memref<8x64x32xf32, #tpu.memory_space<vmem>>, vector<1x64x32xf32>
    %27 = vector.shape_cast %26 : vector<1x64x32xf32> to vector<64x32xf32>
    %cst_25 = arith.constant dense<0.000000e+00> : vector<64x32xf32>
    %28 = tpu.matmul %3, %27, %cst_25 {dimension_numbers = #tpu.dot_dimension_numbers<[1], [0], [0], [1], [0, 0, 1, 1], [], []>} : vector<64x64xf32>, vector<64x32xf32>, vector<64x32xf32> -> vector<64x32xf32>
    %c2_26 = arith.constant 2 : index
    %c0_27 = arith.constant 0 : index
    %c0_28 = arith.constant 0 : index
    %29 = vector.load %arg4[%c2_26, %c0_27, %c0_28] : memref<8x1x32xf32, #tpu.memory_space<vmem>>, vector<1x1x32xf32>
    %30 = vector.shape_cast %29 : vector<1x1x32xf32> to vector<1x32xf32>
    %31 = vector.broadcast %30 : vector<1x32xf32> to vector<64x32xf32>
    %32 = arith.addf %28, %31 : vector<64x32xf32>
    %c2_29 = arith.constant 2 : index
    %c0_30 = arith.constant 0 : index
    %c0_31 = arith.constant 0 : index
    %33 = vector.load %arg11[%c2_29, %c0_30, %c0_31] : memref<8x64x32xf32, #tpu.memory_space<vmem>>, vector<1x64x32xf32>
    %34 = vector.shape_cast %33 : vector<1x64x32xf32> to vector<64x32xf32>
    %35 = vector.shape_cast %32 : vector<64x32xf32> to vector<1x64x32xf32>
    tpu.vector_store %arg11[%c2_29, %c0_30, %c0_31], %35 {strides = array<i32>} : memref<8x64x32xf32, #tpu.memory_space<vmem>>, vector<1x64x32xf32>,
    %c3 = arith.constant 3 : index
    %c0_32 = arith.constant 0 : index
    %c0_33 = arith.constant 0 : index
    %36 = vector.load %arg2[%c3, %c0_32, %c0_33] : memref<8x64x32xf32, #tpu.memory_space<vmem>>, vector<1x64x32xf32>
    %37 = vector.shape_cast %36 : vector<1x64x32xf32> to vector<64x32xf32>
    %cst_34 = arith.constant dense<0.000000e+00> : vector<64x32xf32>
    %38 = tpu.matmul %3, %37, %cst_34 {dimension_numbers = #tpu.dot_dimension_numbers<[1], [0], [0], [1], [0, 0, 1, 1], [], []>} : vector<64x64xf32>, vector<64x32xf32>, vector<64x32xf32> -> vector<64x32xf32>
    %c3_35 = arith.constant 3 : index
    %c0_36 = arith.constant 0 : index
    %c0_37 = arith.constant 0 : index
    %39 = vector.load %arg4[%c3_35, %c0_36, %c0_37] : memref<8x1x32xf32, #tpu.memory_space<vmem>>, vector<1x1x32xf32>
    %40 = vector.shape_cast %39 : vector<1x1x32xf32> to vector<1x32xf32>
    %41 = vector.broadcast %40 : vector<1x32xf32> to vector<64x32xf32>
    %42 = arith.addf %38, %41 : vector<64x32xf32>
    %c3_38 = arith.constant 3 : index
    %c0_39 = arith.constant 0 : index
    %c0_40 = arith.constant 0 : index
    %43 = vector.load %arg11[%c3_38, %c0_39, %c0_40] : memref<8x64x32xf32, #tpu.memory_space<vmem>>, vector<1x64x32xf32>
    %44 = vector.shape_cast %43 : vector<1x64x32xf32> to vector<64x32xf32>
    %45 = vector.shape_cast %42 : vector<64x32xf32> to vector<1x64x32xf32>
    tpu.vector_store %arg11[%c3_38, %c0_39, %c0_40], %45 {strides = array<i32>} : memref<8x64x32xf32, #tpu.memory_space<vmem>>, vector<1x64x32xf32>,
    %c4 = arith.constant 4 : index
    %c0_41 = arith.constant 0 : index
    %c0_42 = arith.constant 0 : index
    %46 = vector.load %arg2[%c4, %c0_41, %c0_42] : memref<8x64x32xf32, #tpu.memory_space<vmem>>, vector<1x64x32xf32>
    %47 = vector.shape_cast %46 : vector<1x64x32xf32> to vector<64x32xf32>
    %cst_43 = arith.constant dense<0.000000e+00> : vector<64x32xf32>
    %48 = tpu.matmul %3, %47, %cst_43 {dimension_numbers = #tpu.dot_dimension_numbers<[1], [0], [0], [1], [0, 0, 1, 1], [], []>} : vector<64x64xf32>, vector<64x32xf32>, vector<64x32xf32> -> vector<64x32xf32>
    %c4_44 = arith.constant 4 : index
    %c0_45 = arith.constant 0 : index
    %c0_46 = arith.constant 0 : index
    %49 = vector.load %arg4[%c4_44, %c0_45, %c0_46] : memref<8x1x32xf32, #tpu.memory_space<vmem>>, vector<1x1x32xf32>
    %50 = vector.shape_cast %49 : vector<1x1x32xf32> to vector<1x32xf32>
    %51 = vector.broadcast %50 : vector<1x32xf32> to vector<64x32xf32>
    %52 = arith.addf %48, %51 : vector<64x32xf32>
    %c4_47 = arith.constant 4 : index
    %c0_48 = arith.constant 0 : index
    %c0_49 = arith.constant 0 : index
    %53 = vector.load %arg11[%c4_47, %c0_48, %c0_49] : memref<8x64x32xf32, #tpu.memory_space<vmem>>, vector<1x64x32xf32>
    %54 = vector.shape_cast %53 : vector<1x64x32xf32> to vector<64x32xf32>
    %55 = vector.shape_cast %52 : vector<64x32xf32> to vector<1x64x32xf32>
    tpu.vector_store %arg11[%c4_47, %c0_48, %c0_49], %55 {strides = array<i32>} : memref<8x64x32xf32, #tpu.memory_space<vmem>>, vector<1x64x32xf32>,
    %c5 = arith.constant 5 : index
    %c0_50 = arith.constant 0 : index
    %c0_51 = arith.constant 0 : index
    %56 = vector.load %arg2[%c5, %c0_50, %c0_51] : memref<8x64x32xf32, #tpu.memory_space<vmem>>, vector<1x64x32xf32>
    %57 = vector.shape_cast %56 : vector<1x64x32xf32> to vector<64x32xf32>
    %cst_52 = arith.constant dense<0.000000e+00> : vector<64x32xf32>
    %58 = tpu.matmul %3, %57, %cst_52 {dimension_numbers = #tpu.dot_dimension_numbers<[1], [0], [0], [1], [0, 0, 1, 1], [], []>} : vector<64x64xf32>, vector<64x32xf32>, vector<64x32xf32> -> vector<64x32xf32>
    %c5_53 = arith.constant 5 : index
    %c0_54 = arith.constant 0 : index
    %c0_55 = arith.constant 0 : index
    %59 = vector.load %arg4[%c5_53, %c0_54, %c0_55] : memref<8x1x32xf32, #tpu.memory_space<vmem>>, vector<1x1x32xf32>
    %60 = vector.shape_cast %59 : vector<1x1x32xf32> to vector<1x32xf32>
    %61 = vector.broadcast %60 : vector<1x32xf32> to vector<64x32xf32>
    %62 = arith.addf %58, %61 : vector<64x32xf32>
    %c5_56 = arith.constant 5 : index
    %c0_57 = arith.constant 0 : index
    %c0_58 = arith.constant 0 : index
    %63 = vector.load %arg11[%c5_56, %c0_57, %c0_58] : memref<8x64x32xf32, #tpu.memory_space<vmem>>, vector<1x64x32xf32>
    %64 = vector.shape_cast %63 : vector<1x64x32xf32> to vector<64x32xf32>
    %65 = vector.shape_cast %62 : vector<64x32xf32> to vector<1x64x32xf32>
    tpu.vector_store %arg11[%c5_56, %c0_57, %c0_58], %65 {strides = array<i32>} : memref<8x64x32xf32, #tpu.memory_space<vmem>>, vector<1x64x32xf32>,
    %c6 = arith.constant 6 : index
    %c0_59 = arith.constant 0 : index
    %c0_60 = arith.constant 0 : index
    %66 = vector.load %arg2[%c6, %c0_59, %c0_60] : memref<8x64x32xf32, #tpu.memory_space<vmem>>, vector<1x64x32xf32>
    %67 = vector.shape_cast %66 : vector<1x64x32xf32> to vector<64x32xf32>
    %cst_61 = arith.constant dense<0.000000e+00> : vector<64x32xf32>
    %68 = tpu.matmul %3, %67, %cst_61 {dimension_numbers = #tpu.dot_dimension_numbers<[1], [0], [0], [1], [0, 0, 1, 1], [], []>} : vector<64x64xf32>, vector<64x32xf32>, vector<64x32xf32> -> vector<64x32xf32>
    %c6_62 = arith.constant 6 : index
    %c0_63 = arith.constant 0 : index
    %c0_64 = arith.constant 0 : index
    %69 = vector.load %arg4[%c6_62, %c0_63, %c0_64] : memref<8x1x32xf32, #tpu.memory_space<vmem>>, vector<1x1x32xf32>
    %70 = vector.shape_cast %69 : vector<1x1x32xf32> to vector<1x32xf32>
    %71 = vector.broadcast %70 : vector<1x32xf32> to vector<64x32xf32>
    %72 = arith.addf %68, %71 : vector<64x32xf32>
    %c6_65 = arith.constant 6 : index
    %c0_66 = arith.constant 0 : index
    %c0_67 = arith.constant 0 : index
    %73 = vector.load %arg11[%c6_65, %c0_66, %c0_67] : memref<8x64x32xf32, #tpu.memory_space<vmem>>, vector<1x64x32xf32>
    %74 = vector.shape_cast %73 : vector<1x64x32xf32> to vector<64x32xf32>
    %75 = vector.shape_cast %72 : vector<64x32xf32> to vector<1x64x32xf32>
    tpu.vector_store %arg11[%c6_65, %c0_66, %c0_67], %75 {strides = array<i32>} : memref<8x64x32xf32, #tpu.memory_space<vmem>>, vector<1x64x32xf32>,
    %c7 = arith.constant 7 : index
    %c0_68 = arith.constant 0 : index
    %c0_69 = arith.constant 0 : index
    %76 = vector.load %arg2[%c7, %c0_68, %c0_69] : memref<8x64x32xf32, #tpu.memory_space<vmem>>, vector<1x64x32xf32>
    %77 = vector.shape_cast %76 : vector<1x64x32xf32> to vector<64x32xf32>
    %cst_70 = arith.constant dense<0.000000e+00> : vector<64x32xf32>
    %78 = tpu.matmul %3, %77, %cst_70 {dimension_numbers = #tpu.dot_dimension_numbers<[1], [0], [0], [1], [0, 0, 1, 1], [], []>} : vector<64x64xf32>, vector<64x32xf32>, vector<64x32xf32> -> vector<64x32xf32>
    %c7_71 = arith.constant 7 : index
    %c0_72 = arith.constant 0 : index
    %c0_73 = arith.constant 0 : index
    %79 = vector.load %arg4[%c7_71, %c0_72, %c0_73] : memref<8x1x32xf32, #tpu.memory_space<vmem>>, vector<1x1x32xf32>
    %80 = vector.shape_cast %79 : vector<1x1x32xf32> to vector<1x32xf32>
    %81 = vector.broadcast %80 : vector<1x32xf32> to vector<64x32xf32>
    %82 = arith.addf %78, %81 : vector<64x32xf32>
    %c7_74 = arith.constant 7 : index
    %c0_75 = arith.constant 0 : index
    %c0_76 = arith.constant 0 : index
    %83 = vector.load %arg11[%c7_74, %c0_75, %c0_76] : memref<8x64x32xf32, #tpu.memory_space<vmem>>, vector<1x64x32xf32>
    %84 = vector.shape_cast %83 : vector<1x64x32xf32> to vector<64x32xf32>
    %85 = vector.shape_cast %82 : vector<64x32xf32> to vector<1x64x32xf32>
    tpu.vector_store %arg11[%c7_74, %c0_75, %c0_76], %85 {strides = array<i32>} : memref<8x64x32xf32, #tpu.memory_space<vmem>>, vector<1x64x32xf32>,
    %c0_77 = arith.constant 0 : index
    %c0_78 = arith.constant 0 : index
    %c0_79 = arith.constant 0 : index
    %86 = vector.load %arg3[%c0_77, %c0_78, %c0_79] : memref<8x32x32xf32, #tpu.memory_space<vmem>>, vector<1x32x32xf32>
    %87 = vector.shape_cast %86 : vector<1x32x32xf32> to vector<32x32xf32>
    %c1_80 = arith.constant 1 : index
    %c0_81 = arith.constant 0 : index
    %c0_82 = arith.constant 0 : index
    %88 = vector.load %arg3[%c1_80, %c0_81, %c0_82] : memref<8x32x32xf32, #tpu.memory_space<vmem>>, vector<1x32x32xf32>
    %89 = vector.shape_cast %88 : vector<1x32x32xf32> to vector<32x32xf32>
    %c2_83 = arith.constant 2 : index
    %c0_84 = arith.constant 0 : index
    %c0_85 = arith.constant 0 : index
    %90 = vector.load %arg3[%c2_83, %c0_84, %c0_85] : memref<8x32x32xf32, #tpu.memory_space<vmem>>, vector<1x32x32xf32>
    %91 = vector.shape_cast %90 : vector<1x32x32xf32> to vector<32x32xf32>
    %c3_86 = arith.constant 3 : index
    %c0_87 = arith.constant 0 : index
    %c0_88 = arith.constant 0 : index
    %92 = vector.load %arg3[%c3_86, %c0_87, %c0_88] : memref<8x32x32xf32, #tpu.memory_space<vmem>>, vector<1x32x32xf32>
    %93 = vector.shape_cast %92 : vector<1x32x32xf32> to vector<32x32xf32>
    %c4_89 = arith.constant 4 : index
    %c0_90 = arith.constant 0 : index
    %c0_91 = arith.constant 0 : index
    %94 = vector.load %arg3[%c4_89, %c0_90, %c0_91] : memref<8x32x32xf32, #tpu.memory_space<vmem>>, vector<1x32x32xf32>
    %95 = vector.shape_cast %94 : vector<1x32x32xf32> to vector<32x32xf32>
    %c5_92 = arith.constant 5 : index
    %c0_93 = arith.constant 0 : index
    %c0_94 = arith.constant 0 : index
    %96 = vector.load %arg3[%c5_92, %c0_93, %c0_94] : memref<8x32x32xf32, #tpu.memory_space<vmem>>, vector<1x32x32xf32>
    %97 = vector.shape_cast %96 : vector<1x32x32xf32> to vector<32x32xf32>
    %c6_95 = arith.constant 6 : index
    %c0_96 = arith.constant 0 : index
    %c0_97 = arith.constant 0 : index
    %98 = vector.load %arg3[%c6_95, %c0_96, %c0_97] : memref<8x32x32xf32, #tpu.memory_space<vmem>>, vector<1x32x32xf32>
    %99 = vector.shape_cast %98 : vector<1x32x32xf32> to vector<32x32xf32>
    %c7_98 = arith.constant 7 : index
    %c0_99 = arith.constant 0 : index
    %c0_100 = arith.constant 0 : index
    %100 = vector.load %arg3[%c7_98, %c0_99, %c0_100] : memref<8x32x32xf32, #tpu.memory_space<vmem>>, vector<1x32x32xf32>
    %101 = vector.shape_cast %100 : vector<1x32x32xf32> to vector<32x32xf32>
    %cst_101 = arith.constant 0.000000e+00 : f32
    %102 = vector.broadcast %cst_101 : f32 to vector<8x32xf32>
    %cst_102 = arith.constant 0.000000e+00 : f32
    %103 = vector.broadcast %cst_102 : f32 to vector<8x32xf32>
    %cst_103 = arith.constant 0.000000e+00 : f32
    %104 = vector.broadcast %cst_103 : f32 to vector<8x32xf32>
    %cst_104 = arith.constant 0.000000e+00 : f32
    %105 = vector.broadcast %cst_104 : f32 to vector<8x32xf32>
    %c0_105 = arith.constant 0 : index
    %c0_106 = arith.constant 0 : index
    %c0_107 = arith.constant 0 : index
    %106 = vector.load %arg11[%c0_105, %c0_106, %c0_107] : memref<8x64x32xf32, #tpu.memory_space<vmem>>, vector<1x8x32xf32>
    %107 = vector.shape_cast %106 : vector<1x8x32xf32> to vector<8x32xf32>
    %cst_108 = arith.constant dense<0.000000e+00> : vector<8x32xf32>
    %108 = tpu.matmul %102, %87, %cst_108 {dimension_numbers = #tpu.dot_dimension_numbers<[1], [0], [0], [1], [0, 0, 1, 1], [], []>} : vector<8x32xf32>, vector<32x32xf32>, vector<8x32xf32> -> vector<8x32xf32>
    %109 = arith.addf %107, %108 : vector<8x32xf32>
    %c1_109 = arith.constant 1 : index
    %c0_110 = arith.constant 0 : index
    %c0_111 = arith.constant 0 : index
    %110 = vector.load %arg11[%c1_109, %c0_110, %c0_111] : memref<8x64x32xf32, #tpu.memory_space<vmem>>, vector<1x8x32xf32>
    %111 = vector.shape_cast %110 : vector<1x8x32xf32> to vector<8x32xf32>
    %cst_112 = arith.constant dense<0.000000e+00> : vector<8x32xf32>
    %112 = tpu.matmul %102, %89, %cst_112 {dimension_numbers = #tpu.dot_dimension_numbers<[1], [0], [0], [1], [0, 0, 1, 1], [], []>} : vector<8x32xf32>, vector<32x32xf32>, vector<8x32xf32> -> vector<8x32xf32>
    %113 = arith.addf %111, %112 : vector<8x32xf32>
    %c2_113 = arith.constant 2 : index
    %c0_114 = arith.constant 0 : index
    %c0_115 = arith.constant 0 : index
    %114 = vector.load %arg11[%c2_113, %c0_114, %c0_115] : memref<8x64x32xf32, #tpu.memory_space<vmem>>, vector<1x8x32xf32>
    %115 = vector.shape_cast %114 : vector<1x8x32xf32> to vector<8x32xf32>
    %cst_116 = arith.constant dense<0.000000e+00> : vector<8x32xf32>
    %116 = tpu.matmul %102, %91, %cst_116 {dimension_numbers = #tpu.dot_dimension_numbers<[1], [0], [0], [1], [0, 0, 1, 1], [], []>} : vector<8x32xf32>, vector<32x32xf32>, vector<8x32xf32> -> vector<8x32xf32>
    %117 = arith.addf %115, %116 : vector<8x32xf32>
    %c3_117 = arith.constant 3 : index
    %c0_118 = arith.constant 0 : index
    %c0_119 = arith.constant 0 : index
    %118 = vector.load %arg11[%c3_117, %c0_118, %c0_119] : memref<8x64x32xf32, #tpu.memory_space<vmem>>, vector<1x8x32xf32>
    %119 = vector.shape_cast %118 : vector<1x8x32xf32> to vector<8x32xf32>
    %cst_120 = arith.constant dense<0.000000e+00> : vector<8x32xf32>
    %120 = tpu.matmul %102, %93, %cst_120 {dimension_numbers = #tpu.dot_dimension_numbers<[1], [0], [0], [1], [0, 0, 1, 1], [], []>} : vector<8x32xf32>, vector<32x32xf32>, vector<8x32xf32> -> vector<8x32xf32>
    %121 = arith.addf %119, %120 : vector<8x32xf32>
    %122 = arith.negf %109 : vector<8x32xf32>
    %123 = math.exp %122 : vector<8x32xf32>
    %cst_121 = arith.constant 1.000000e+00 : f32
    %124 = vector.broadcast %cst_121 : f32 to vector<8x32xf32>
    %125 = arith.addf %124, %123 : vector<8x32xf32>
    %126 = arith.divf %124, %125 : vector<8x32xf32>
    %127 = arith.negf %113 : vector<8x32xf32>
    %128 = math.exp %127 : vector<8x32xf32>
    %cst_122 = arith.constant 1.000000e+00 : f32
    %129 = vector.broadcast %cst_122 : f32 to vector<8x32xf32>
    %130 = arith.addf %129, %128 : vector<8x32xf32>
    %131 = arith.divf %129, %130 : vector<8x32xf32>
    %132 = math.tanh %117 : vector<8x32xf32>
    %133 = arith.negf %121 : vector<8x32xf32>
    %134 = math.exp %133 : vector<8x32xf32>
    %cst_123 = arith.constant 1.000000e+00 : f32
    %135 = vector.broadcast %cst_123 : f32 to vector<8x32xf32>
    %136 = arith.addf %135, %134 : vector<8x32xf32>
    %137 = arith.divf %135, %136 : vector<8x32xf32>
    %138 = arith.mulf %131, %103 : vector<8x32xf32>
    %139 = arith.mulf %126, %132 : vector<8x32xf32>
    %140 = arith.addf %138, %139 : vector<8x32xf32>
    %141 = math.tanh %140 : vector<8x32xf32>
    %142 = arith.mulf %137, %141 : vector<8x32xf32>
    %c4_124 = arith.constant 4 : index
    %c56 = arith.constant 56 : index
    %c0_125 = arith.constant 0 : index
    %143 = vector.load %arg11[%c4_124, %c56, %c0_125] : memref<8x64x32xf32, #tpu.memory_space<vmem>>, vector<1x8x32xf32>
    %144 = vector.shape_cast %143 : vector<1x8x32xf32> to vector<8x32xf32>
    %cst_126 = arith.constant dense<0.000000e+00> : vector<8x32xf32>
    %145 = tpu.matmul %104, %95, %cst_126 {dimension_numbers = #tpu.dot_dimension_numbers<[1], [0], [0], [1], [0, 0, 1, 1], [], []>} : vector<8x32xf32>, vector<32x32xf32>, vector<8x32xf32> -> vector<8x32xf32>
    %146 = arith.addf %144, %145 : vector<8x32xf32>
    %c5_127 = arith.constant 5 : index
    %c56_128 = arith.constant 56 : index
    %c0_129 = arith.constant 0 : index
    %147 = vector.load %arg11[%c5_127, %c56_128, %c0_129] : memref<8x64x32xf32, #tpu.memory_space<vmem>>, vector<1x8x32xf32>
    %148 = vector.shape_cast %147 : vector<1x8x32xf32> to vector<8x32xf32>
    %cst_130 = arith.constant dense<0.000000e+00> : vector<8x32xf32>
    %149 = tpu.matmul %104, %97, %cst_130 {dimension_numbers = #tpu.dot_dimension_numbers<[1], [0], [0], [1], [0, 0, 1, 1], [], []>} : vector<8x32xf32>, vector<32x32xf32>, vector<8x32xf32> -> vector<8x32xf32>
    %150 = arith.addf %148, %149 : vector<8x32xf32>
    %c6_131 = arith.constant 6 : index
    %c56_132 = arith.constant 56 : index
    %c0_133 = arith.constant 0 : index
    %151 = vector.load %arg11[%c6_131, %c56_132, %c0_133] : memref<8x64x32xf32, #tpu.memory_space<vmem>>, vector<1x8x32xf32>
    %152 = vector.shape_cast %151 : vector<1x8x32xf32> to vector<8x32xf32>
    %cst_134 = arith.constant dense<0.000000e+00> : vector<8x32xf32>
    %153 = tpu.matmul %104, %99, %cst_134 {dimension_numbers = #tpu.dot_dimension_numbers<[1], [0], [0], [1], [0, 0, 1, 1], [], []>} : vector<8x32xf32>, vector<32x32xf32>, vector<8x32xf32> -> vector<8x32xf32>
    %154 = arith.addf %152, %153 : vector<8x32xf32>
    %c7_135 = arith.constant 7 : index
    %c56_136 = arith.constant 56 : index
    %c0_137 = arith.constant 0 : index
    %155 = vector.load %arg11[%c7_135, %c56_136, %c0_137] : memref<8x64x32xf32, #tpu.memory_space<vmem>>, vector<1x8x32xf32>
    %156 = vector.shape_cast %155 : vector<1x8x32xf32> to vector<8x32xf32>
    %cst_138 = arith.constant dense<0.000000e+00> : vector<8x32xf32>
    %157 = tpu.matmul %104, %101, %cst_138 {dimension_numbers = #tpu.dot_dimension_numbers<[1], [0], [0], [1], [0, 0, 1, 1], [], []>} : vector<8x32xf32>, vector<32x32xf32>, vector<8x32xf32> -> vector<8x32xf32>
    %158 = arith.addf %156, %157 : vector<8x32xf32>
    %159 = arith.negf %146 : vector<8x32xf32>
    %160 = math.exp %159 : vector<8x32xf32>
    %cst_139 = arith.constant 1.000000e+00 : f32
    %161 = vector.broadcast %cst_139 : f32 to vector<8x32xf32>
    %162 = arith.addf %161, %160 : vector<8x32xf32>
    %163 = arith.divf %161, %162 : vector<8x32xf32>
    %164 = arith.negf %150 : vector<8x32xf32>
    %165 = math.exp %164 : vector<8x32xf32>
    %cst_140 = arith.constant 1.000000e+00 : f32
    %166 = vector.broadcast %cst_140 : f32 to vector<8x32xf32>
    %167 = arith.addf %166, %165 : vector<8x32xf32>
    %168 = arith.divf %166, %167 : vector<8x32xf32>
    %169 = math.tanh %154 : vector<8x32xf32>
    %170 = arith.negf %158 : vector<8x32xf32>
    %171 = math.exp %170 : vector<8x32xf32>
    %cst_141 = arith.constant 1.000000e+00 : f32
    %172 = vector.broadcast %cst_141 : f32 to vector<8x32xf32>
    %173 = arith.addf %172, %171 : vector<8x32xf32>
    %174 = arith.divf %172, %173 : vector<8x32xf32>
    %175 = arith.mulf %168, %105 : vector<8x32xf32>
    %176 = arith.mulf %163, %169 : vector<8x32xf32>
    %177 = arith.addf %175, %176 : vector<8x32xf32>
    %178 = math.tanh %177 : vector<8x32xf32>
    %179 = arith.mulf %174, %178 : vector<8x32xf32>
    %c0_142 = arith.constant 0 : index
    %c0_143 = arith.constant 0 : index
    %180 = vector.load %arg12[%c0_142, %c0_143] : memref<64x64xf32, #tpu.memory_space<vmem>>, vector<8x32xf32>
    tpu.vector_store %arg12[%c0_142, %c0_143], %142 {strides = array<i32>} : memref<64x64xf32, #tpu.memory_space<vmem>>, vector<8x32xf32>,
    %c56_144 = arith.constant 56 : index
    %c32 = arith.constant 32 : index
    %181 = vector.load %arg12[%c56_144, %c32] : memref<64x64xf32, #tpu.memory_space<vmem>>, vector<8x32xf32>
    tpu.vector_store %arg12[%c56_144, %c32], %179 {strides = array<i32>} : memref<64x64xf32, #tpu.memory_space<vmem>>, vector<8x32xf32>,
    %c0_145 = arith.constant 0 : index
    %c8 = arith.constant 8 : index
    %c0_146 = arith.constant 0 : index
    %182 = vector.load %arg11[%c0_145, %c8, %c0_146] : memref<8x64x32xf32, #tpu.memory_space<vmem>>, vector<1x8x32xf32>
    %183 = vector.shape_cast %182 : vector<1x8x32xf32> to vector<8x32xf32>
    %cst_147 = arith.constant dense<0.000000e+00> : vector<8x32xf32>
    %184 = tpu.matmul %142, %87, %cst_147 {dimension_numbers = #tpu.dot_dimension_numbers<[1], [0], [0], [1], [0, 0, 1, 1], [], []>} : vector<8x32xf32>, vector<32x32xf32>, vector<8x32xf32> -> vector<8x32xf32>
    %185 = arith.addf %183, %184 : vector<8x32xf32>
    %c1_148 = arith.constant 1 : index
    %c8_149 = arith.constant 8 : index
    %c0_150 = arith.constant 0 : index
    %186 = vector.load %arg11[%c1_148, %c8_149, %c0_150] : memref<8x64x32xf32, #tpu.memory_space<vmem>>, vector<1x8x32xf32>
    %187 = vector.shape_cast %186 : vector<1x8x32xf32> to vector<8x32xf32>
    %cst_151 = arith.constant dense<0.000000e+00> : vector<8x32xf32>
    %188 = tpu.matmul %142, %89, %cst_151 {dimension_numbers = #tpu.dot_dimension_numbers<[1], [0], [0], [1], [0, 0, 1, 1], [], []>} : vector<8x32xf32>, vector<32x32xf32>, vector<8x32xf32> -> vector<8x32xf32>
    %189 = arith.addf %187, %188 : vector<8x32xf32>
    %c2_152 = arith.constant 2 : index
    %c8_153 = arith.constant 8 : index
    %c0_154 = arith.constant 0 : index
    %190 = vector.load %arg11[%c2_152, %c8_153, %c0_154] : memref<8x64x32xf32, #tpu.memory_space<vmem>>, vector<1x8x32xf32>
    %191 = vector.shape_cast %190 : vector<1x8x32xf32> to vector<8x32xf32>
    %cst_155 = arith.constant dense<0.000000e+00> : vector<8x32xf32>
    %192 = tpu.matmul %142, %91, %cst_155 {dimension_numbers = #tpu.dot_dimension_numbers<[1], [0], [0], [1], [0, 0, 1, 1], [], []>} : vector<8x32xf32>, vector<32x32xf32>, vector<8x32xf32> -> vector<8x32xf32>
    %193 = arith.addf %191, %192 : vector<8x32xf32>
    %c3_156 = arith.constant 3 : index
    %c8_157 = arith.constant 8 : index
    %c0_158 = arith.constant 0 : index
    %194 = vector.load %arg11[%c3_156, %c8_157, %c0_158] : memref<8x64x32xf32, #tpu.memory_space<vmem>>, vector<1x8x32xf32>
    %195 = vector.shape_cast %194 : vector<1x8x32xf32> to vector<8x32xf32>
    %cst_159 = arith.constant dense<0.000000e+00> : vector<8x32xf32>
    %196 = tpu.matmul %142, %93, %cst_159 {dimension_numbers = #tpu.dot_dimension_numbers<[1], [0], [0], [1], [0, 0, 1, 1], [], []>} : vector<8x32xf32>, vector<32x32xf32>, vector<8x32xf32> -> vector<8x32xf32>
    %197 = arith.addf %195, %196 : vector<8x32xf32>
    %198 = arith.negf %185 : vector<8x32xf32>
    %199 = math.exp %198 : vector<8x32xf32>
    %cst_160 = arith.constant 1.000000e+00 : f32
    %200 = vector.broadcast %cst_160 : f32 to vector<8x32xf32>
    %201 = arith.addf %200, %199 : vector<8x32xf32>
    %202 = arith.divf %200, %201 : vector<8x32xf32>
    %203 = arith.negf %189 : vector<8x32xf32>
    %204 = math.exp %203 : vector<8x32xf32>
    %cst_161 = arith.constant 1.000000e+00 : f32
    %205 = vector.broadcast %cst_161 : f32 to vector<8x32xf32>
    %206 = arith.addf %205, %204 : vector<8x32xf32>
    %207 = arith.divf %205, %206 : vector<8x32xf32>
    %208 = math.tanh %193 : vector<8x32xf32>
    %209 = arith.negf %197 : vector<8x32xf32>
    %210 = math.exp %209 : vector<8x32xf32>
    %cst_162 = arith.constant 1.000000e+00 : f32
    %211 = vector.broadcast %cst_162 : f32 to vector<8x32xf32>
    %212 = arith.addf %211, %210 : vector<8x32xf32>
    %213 = arith.divf %211, %212 : vector<8x32xf32>
    %214 = arith.mulf %207, %140 : vector<8x32xf32>
    %215 = arith.mulf %202, %208 : vector<8x32xf32>
    %216 = arith.addf %214, %215 : vector<8x32xf32>
    %217 = math.tanh %216 : vector<8x32xf32>
    %218 = arith.mulf %213, %217 : vector<8x32xf32>
    %c4_163 = arith.constant 4 : index
    %c48 = arith.constant 48 : index
    %c0_164 = arith.constant 0 : index
    %219 = vector.load %arg11[%c4_163, %c48, %c0_164] : memref<8x64x32xf32, #tpu.memory_space<vmem>>, vector<1x8x32xf32>
    %220 = vector.shape_cast %219 : vector<1x8x32xf32> to vector<8x32xf32>
    %cst_165 = arith.constant dense<0.000000e+00> : vector<8x32xf32>
    %221 = tpu.matmul %179, %95, %cst_165 {dimension_numbers = #tpu.dot_dimension_numbers<[1], [0], [0], [1], [0, 0, 1, 1], [], []>} : vector<8x32xf32>, vector<32x32xf32>, vector<8x32xf32> -> vector<8x32xf32>
    %222 = arith.addf %220, %221 : vector<8x32xf32>
    %c5_166 = arith.constant 5 : index
    %c48_167 = arith.constant 48 : index
    %c0_168 = arith.constant 0 : index
    %223 = vector.load %arg11[%c5_166, %c48_167, %c0_168] : memref<8x64x32xf32, #tpu.memory_space<vmem>>, vector<1x8x32xf32>
    %224 = vector.shape_cast %223 : vector<1x8x32xf32> to vector<8x32xf32>
    %cst_169 = arith.constant dense<0.000000e+00> : vector<8x32xf32>
    %225 = tpu.matmul %179, %97, %cst_169 {dimension_numbers = #tpu.dot_dimension_numbers<[1], [0], [0], [1], [0, 0, 1, 1], [], []>} : vector<8x32xf32>, vector<32x32xf32>, vector<8x32xf32> -> vector<8x32xf32>
    %226 = arith.addf %224, %225 : vector<8x32xf32>
    %c6_170 = arith.constant 6 : index
    %c48_171 = arith.constant 48 : index
    %c0_172 = arith.constant 0 : index
    %227 = vector.load %arg11[%c6_170, %c48_171, %c0_172] : memref<8x64x32xf32, #tpu.memory_space<vmem>>, vector<1x8x32xf32>
    %228 = vector.shape_cast %227 : vector<1x8x32xf32> to vector<8x32xf32>
    %cst_173 = arith.constant dense<0.000000e+00> : vector<8x32xf32>
    %229 = tpu.matmul %179, %99, %cst_173 {dimension_numbers = #tpu.dot_dimension_numbers<[1], [0], [0], [1], [0, 0, 1, 1], [], []>} : vector<8x32xf32>, vector<32x32xf32>, vector<8x32xf32> -> vector<8x32xf32>
    %230 = arith.addf %228, %229 : vector<8x32xf32>
    %c7_174 = arith.constant 7 : index
    %c48_175 = arith.constant 48 : index
    %c0_176 = arith.constant 0 : index
    %231 = vector.load %arg11[%c7_174, %c48_175, %c0_176] : memref<8x64x32xf32, #tpu.memory_space<vmem>>, vector<1x8x32xf32>
    %232 = vector.shape_cast %231 : vector<1x8x32xf32> to vector<8x32xf32>
    %cst_177 = arith.constant dense<0.000000e+00> : vector<8x32xf32>
    %233 = tpu.matmul %179, %101, %cst_177 {dimension_numbers = #tpu.dot_dimension_numbers<[1], [0], [0], [1], [0, 0, 1, 1], [], []>} : vector<8x32xf32>, vector<32x32xf32>, vector<8x32xf32> -> vector<8x32xf32>
    %234 = arith.addf %232, %233 : vector<8x32xf32>
    %235 = arith.negf %222 : vector<8x32xf32>
    %236 = math.exp %235 : vector<8x32xf32>
    %cst_178 = arith.constant 1.000000e+00 : f32
    %237 = vector.broadcast %cst_178 : f32 to vector<8x32xf32>
    %238 = arith.addf %237, %236 : vector<8x32xf32>
    %239 = arith.divf %237, %238 : vector<8x32xf32>
    %240 = arith.negf %226 : vector<8x32xf32>
    %241 = math.exp %240 : vector<8x32xf32>
    %cst_179 = arith.constant 1.000000e+00 : f32
    %242 = vector.broadcast %cst_179 : f32 to vector<8x32xf32>
    %243 = arith.addf %242, %241 : vector<8x32xf32>
    %244 = arith.divf %242, %243 : vector<8x32xf32>
    %245 = math.tanh %230 : vector<8x32xf32>
    %246 = arith.negf %234 : vector<8x32xf32>
    %247 = math.exp %246 : vector<8x32xf32>
    %cst_180 = arith.constant 1.000000e+00 : f32
    %248 = vector.broadcast %cst_180 : f32 to vector<8x32xf32>
    %249 = arith.addf %248, %247 : vector<8x32xf32>
    %250 = arith.divf %248, %249 : vector<8x32xf32>
    %251 = arith.mulf %244, %177 : vector<8x32xf32>
    %252 = arith.mulf %239, %245 : vector<8x32xf32>
    %253 = arith.addf %251, %252 : vector<8x32xf32>
    %254 = math.tanh %253 : vector<8x32xf32>
    %255 = arith.mulf %250, %254 : vector<8x32xf32>
    %c8_181 = arith.constant 8 : index
    %c0_182 = arith.constant 0 : index
    %256 = vector.load %arg12[%c8_181, %c0_182] : memref<64x64xf32, #tpu.memory_space<vmem>>, vector<8x32xf32>
    tpu.vector_store %arg12[%c8_181, %c0_182], %218 {strides = array<i32>} : memref<64x64xf32, #tpu.memory_space<vmem>>, vector<8x32xf32>,
    %c48_183 = arith.constant 48 : index
    %c32_184 = arith.constant 32 : index
    %257 = vector.load %arg12[%c48_183, %c32_184] : memref<64x64xf32, #tpu.memory_space<vmem>>, vector<8x32xf32>
    tpu.vector_store %arg12[%c48_183, %c32_184], %255 {strides = array<i32>} : memref<64x64xf32, #tpu.memory_space<vmem>>, vector<8x32xf32>,
    %c0_185 = arith.constant 0 : index
    %c16 = arith.constant 16 : index
    %c0_186 = arith.constant 0 : index
    %258 = vector.load %arg11[%c0_185, %c16, %c0_186] : memref<8x64x32xf32, #tpu.memory_space<vmem>>, vector<1x8x32xf32>
    %259 = vector.shape_cast %258 : vector<1x8x32xf32> to vector<8x32xf32>
    %cst_187 = arith.constant dense<0.000000e+00> : vector<8x32xf32>
    %260 = tpu.matmul %218, %87, %cst_187 {dimension_numbers = #tpu.dot_dimension_numbers<[1], [0], [0], [1], [0, 0, 1, 1], [], []>} : vector<8x32xf32>, vector<32x32xf32>, vector<8x32xf32> -> vector<8x32xf32>
    %261 = arith.addf %259, %260 : vector<8x32xf32>
    %c1_188 = arith.constant 1 : index
    %c16_189 = arith.constant 16 : index
    %c0_190 = arith.constant 0 : index
    %262 = vector.load %arg11[%c1_188, %c16_189, %c0_190] : memref<8x64x32xf32, #tpu.memory_space<vmem>>, vector<1x8x32xf32>
    %263 = vector.shape_cast %262 : vector<1x8x32xf32> to vector<8x32xf32>
    %cst_191 = arith.constant dense<0.000000e+00> : vector<8x32xf32>
    %264 = tpu.matmul %218, %89, %cst_191 {dimension_numbers = #tpu.dot_dimension_numbers<[1], [0], [0], [1], [0, 0, 1, 1], [], []>} : vector<8x32xf32>, vector<32x32xf32>, vector<8x32xf32> -> vector<8x32xf32>
    %265 = arith.addf %263, %264 : vector<8x32xf32>
    %c2_192 = arith.constant 2 : index
    %c16_193 = arith.constant 16 : index
    %c0_194 = arith.constant 0 : index
    %266 = vector.load %arg11[%c2_192, %c16_193, %c0_194] : memref<8x64x32xf32, #tpu.memory_space<vmem>>, vector<1x8x32xf32>
    %267 = vector.shape_cast %266 : vector<1x8x32xf32> to vector<8x32xf32>
    %cst_195 = arith.constant dense<0.000000e+00> : vector<8x32xf32>
    %268 = tpu.matmul %218, %91, %cst_195 {dimension_numbers = #tpu.dot_dimension_numbers<[1], [0], [0], [1], [0, 0, 1, 1], [], []>} : vector<8x32xf32>, vector<32x32xf32>, vector<8x32xf32> -> vector<8x32xf32>
    %269 = arith.addf %267, %268 : vector<8x32xf32>
    %c3_196 = arith.constant 3 : index
    %c16_197 = arith.constant 16 : index
    %c0_198 = arith.constant 0 : index
    %270 = vector.load %arg11[%c3_196, %c16_197, %c0_198] : memref<8x64x32xf32, #tpu.memory_space<vmem>>, vector<1x8x32xf32>
    %271 = vector.shape_cast %270 : vector<1x8x32xf32> to vector<8x32xf32>
    %cst_199 = arith.constant dense<0.000000e+00> : vector<8x32xf32>
    %272 = tpu.matmul %218, %93, %cst_199 {dimension_numbers = #tpu.dot_dimension_numbers<[1], [0], [0], [1], [0, 0, 1, 1], [], []>} : vector<8x32xf32>, vector<32x32xf32>, vector<8x32xf32> -> vector<8x32xf32>
    %273 = arith.addf %271, %272 : vector<8x32xf32>
    %274 = arith.negf %261 : vector<8x32xf32>
    %275 = math.exp %274 : vector<8x32xf32>
    %cst_200 = arith.constant 1.000000e+00 : f32
    %276 = vector.broadcast %cst_200 : f32 to vector<8x32xf32>
    %277 = arith.addf %276, %275 : vector<8x32xf32>
    %278 = arith.divf %276, %277 : vector<8x32xf32>
    %279 = arith.negf %265 : vector<8x32xf32>
    %280 = math.exp %279 : vector<8x32xf32>
    %cst_201 = arith.constant 1.000000e+00 : f32
    %281 = vector.broadcast %cst_201 : f32 to vector<8x32xf32>
    %282 = arith.addf %281, %280 : vector<8x32xf32>
    %283 = arith.divf %281, %282 : vector<8x32xf32>
    %284 = math.tanh %269 : vector<8x32xf32>
    %285 = arith.negf %273 : vector<8x32xf32>
    %286 = math.exp %285 : vector<8x32xf32>
    %cst_202 = arith.constant 1.000000e+00 : f32
    %287 = vector.broadcast %cst_202 : f32 to vector<8x32xf32>
    %288 = arith.addf %287, %286 : vector<8x32xf32>
    %289 = arith.divf %287, %288 : vector<8x32xf32>
    %290 = arith.mulf %283, %216 : vector<8x32xf32>
    %291 = arith.mulf %278, %284 : vector<8x32xf32>
    %292 = arith.addf %290, %291 : vector<8x32xf32>
    %293 = math.tanh %292 : vector<8x32xf32>
    %294 = arith.mulf %289, %293 : vector<8x32xf32>
    %c4_203 = arith.constant 4 : index
    %c40 = arith.constant 40 : index
    %c0_204 = arith.constant 0 : index
    %295 = vector.load %arg11[%c4_203, %c40, %c0_204] : memref<8x64x32xf32, #tpu.memory_space<vmem>>, vector<1x8x32xf32>
    %296 = vector.shape_cast %295 : vector<1x8x32xf32> to vector<8x32xf32>
    %cst_205 = arith.constant dense<0.000000e+00> : vector<8x32xf32>
    %297 = tpu.matmul %255, %95, %cst_205 {dimension_numbers = #tpu.dot_dimension_numbers<[1], [0], [0], [1], [0, 0, 1, 1], [], []>} : vector<8x32xf32>, vector<32x32xf32>, vector<8x32xf32> -> vector<8x32xf32>
    %298 = arith.addf %296, %297 : vector<8x32xf32>
    %c5_206 = arith.constant 5 : index
    %c40_207 = arith.constant 40 : index
    %c0_208 = arith.constant 0 : index
    %299 = vector.load %arg11[%c5_206, %c40_207, %c0_208] : memref<8x64x32xf32, #tpu.memory_space<vmem>>, vector<1x8x32xf32>
    %300 = vector.shape_cast %299 : vector<1x8x32xf32> to vector<8x32xf32>
    %cst_209 = arith.constant dense<0.000000e+00> : vector<8x32xf32>
    %301 = tpu.matmul %255, %97, %cst_209 {dimension_numbers = #tpu.dot_dimension_numbers<[1], [0], [0], [1], [0, 0, 1, 1], [], []>} : vector<8x32xf32>, vector<32x32xf32>, vector<8x32xf32> -> vector<8x32xf32>
    %302 = arith.addf %300, %301 : vector<8x32xf32>
    %c6_210 = arith.constant 6 : index
    %c40_211 = arith.constant 40 : index
    %c0_212 = arith.constant 0 : index
    %303 = vector.load %arg11[%c6_210, %c40_211, %c0_212] : memref<8x64x32xf32, #tpu.memory_space<vmem>>, vector<1x8x32xf32>
    %304 = vector.shape_cast %303 : vector<1x8x32xf32> to vector<8x32xf32>
    %cst_213 = arith.constant dense<0.000000e+00> : vector<8x32xf32>
    %305 = tpu.matmul %255, %99, %cst_213 {dimension_numbers = #tpu.dot_dimension_numbers<[1], [0], [0], [1], [0, 0, 1, 1], [], []>} : vector<8x32xf32>, vector<32x32xf32>, vector<8x32xf32> -> vector<8x32xf32>
    %306 = arith.addf %304, %305 : vector<8x32xf32>
    %c7_214 = arith.constant 7 : index
    %c40_215 = arith.constant 40 : index
    %c0_216 = arith.constant 0 : index
    %307 = vector.load %arg11[%c7_214, %c40_215, %c0_216] : memref<8x64x32xf32, #tpu.memory_space<vmem>>, vector<1x8x32xf32>
    %308 = vector.shape_cast %307 : vector<1x8x32xf32> to vector<8x32xf32>
    %cst_217 = arith.constant dense<0.000000e+00> : vector<8x32xf32>
    %309 = tpu.matmul %255, %101, %cst_217 {dimension_numbers = #tpu.dot_dimension_numbers<[1], [0], [0], [1], [0, 0, 1, 1], [], []>} : vector<8x32xf32>, vector<32x32xf32>, vector<8x32xf32> -> vector<8x32xf32>
    %310 = arith.addf %308, %309 : vector<8x32xf32>
    %311 = arith.negf %298 : vector<8x32xf32>
    %312 = math.exp %311 : vector<8x32xf32>
    %cst_218 = arith.constant 1.000000e+00 : f32
    %313 = vector.broadcast %cst_218 : f32 to vector<8x32xf32>
    %314 = arith.addf %313, %312 : vector<8x32xf32>
    %315 = arith.divf %313, %314 : vector<8x32xf32>
    %316 = arith.negf %302 : vector<8x32xf32>
    %317 = math.exp %316 : vector<8x32xf32>
    %cst_219 = arith.constant 1.000000e+00 : f32
    %318 = vector.broadcast %cst_219 : f32 to vector<8x32xf32>
    %319 = arith.addf %318, %317 : vector<8x32xf32>
    %320 = arith.divf %318, %319 : vector<8x32xf32>
    %321 = math.tanh %306 : vector<8x32xf32>
    %322 = arith.negf %310 : vector<8x32xf32>
    %323 = math.exp %322 : vector<8x32xf32>
    %cst_220 = arith.constant 1.000000e+00 : f32
    %324 = vector.broadcast %cst_220 : f32 to vector<8x32xf32>
    %325 = arith.addf %324, %323 : vector<8x32xf32>
    %326 = arith.divf %324, %325 : vector<8x32xf32>
    %327 = arith.mulf %320, %253 : vector<8x32xf32>
    %328 = arith.mulf %315, %321 : vector<8x32xf32>
    %329 = arith.addf %327, %328 : vector<8x32xf32>
    %330 = math.tanh %329 : vector<8x32xf32>
    %331 = arith.mulf %326, %330 : vector<8x32xf32>
    %c16_221 = arith.constant 16 : index
    %c0_222 = arith.constant 0 : index
    %332 = vector.load %arg12[%c16_221, %c0_222] : memref<64x64xf32, #tpu.memory_space<vmem>>, vector<8x32xf32>
    tpu.vector_store %arg12[%c16_221, %c0_222], %294 {strides = array<i32>} : memref<64x64xf32, #tpu.memory_space<vmem>>, vector<8x32xf32>,
    %c40_223 = arith.constant 40 : index
    %c32_224 = arith.constant 32 : index
    %333 = vector.load %arg12[%c40_223, %c32_224] : memref<64x64xf32, #tpu.memory_space<vmem>>, vector<8x32xf32>
    tpu.vector_store %arg12[%c40_223, %c32_224], %331 {strides = array<i32>} : memref<64x64xf32, #tpu.memory_space<vmem>>, vector<8x32xf32>,
    %c0_225 = arith.constant 0 : index
    %c24 = arith.constant 24 : index
    %c0_226 = arith.constant 0 : index
    %334 = vector.load %arg11[%c0_225, %c24, %c0_226] : memref<8x64x32xf32, #tpu.memory_space<vmem>>, vector<1x8x32xf32>
    %335 = vector.shape_cast %334 : vector<1x8x32xf32> to vector<8x32xf32>
    %cst_227 = arith.constant dense<0.000000e+00> : vector<8x32xf32>
    %336 = tpu.matmul %294, %87, %cst_227 {dimension_numbers = #tpu.dot_dimension_numbers<[1], [0], [0], [1], [0, 0, 1, 1], [], []>} : vector<8x32xf32>, vector<32x32xf32>, vector<8x32xf32> -> vector<8x32xf32>
    %337 = arith.addf %335, %336 : vector<8x32xf32>
    %c1_228 = arith.constant 1 : index
    %c24_229 = arith.constant 24 : index
    %c0_230 = arith.constant 0 : index
    %338 = vector.load %arg11[%c1_228, %c24_229, %c0_230] : memref<8x64x32xf32, #tpu.memory_space<vmem>>, vector<1x8x32xf32>
    %339 = vector.shape_cast %338 : vector<1x8x32xf32> to vector<8x32xf32>
    %cst_231 = arith.constant dense<0.000000e+00> : vector<8x32xf32>
    %340 = tpu.matmul %294, %89, %cst_231 {dimension_numbers = #tpu.dot_dimension_numbers<[1], [0], [0], [1], [0, 0, 1, 1], [], []>} : vector<8x32xf32>, vector<32x32xf32>, vector<8x32xf32> -> vector<8x32xf32>
    %341 = arith.addf %339, %340 : vector<8x32xf32>
    %c2_232 = arith.constant 2 : index
    %c24_233 = arith.constant 24 : index
    %c0_234 = arith.constant 0 : index
    %342 = vector.load %arg11[%c2_232, %c24_233, %c0_234] : memref<8x64x32xf32, #tpu.memory_space<vmem>>, vector<1x8x32xf32>
    %343 = vector.shape_cast %342 : vector<1x8x32xf32> to vector<8x32xf32>
    %cst_235 = arith.constant dense<0.000000e+00> : vector<8x32xf32>
    %344 = tpu.matmul %294, %91, %cst_235 {dimension_numbers = #tpu.dot_dimension_numbers<[1], [0], [0], [1], [0, 0, 1, 1], [], []>} : vector<8x32xf32>, vector<32x32xf32>, vector<8x32xf32> -> vector<8x32xf32>
    %345 = arith.addf %343, %344 : vector<8x32xf32>
    %c3_236 = arith.constant 3 : index
    %c24_237 = arith.constant 24 : index
    %c0_238 = arith.constant 0 : index
    %346 = vector.load %arg11[%c3_236, %c24_237, %c0_238] : memref<8x64x32xf32, #tpu.memory_space<vmem>>, vector<1x8x32xf32>
    %347 = vector.shape_cast %346 : vector<1x8x32xf32> to vector<8x32xf32>
    %cst_239 = arith.constant dense<0.000000e+00> : vector<8x32xf32>
    %348 = tpu.matmul %294, %93, %cst_239 {dimension_numbers = #tpu.dot_dimension_numbers<[1], [0], [0], [1], [0, 0, 1, 1], [], []>} : vector<8x32xf32>, vector<32x32xf32>, vector<8x32xf32> -> vector<8x32xf32>
    %349 = arith.addf %347, %348 : vector<8x32xf32>
    %350 = arith.negf %337 : vector<8x32xf32>
    %351 = math.exp %350 : vector<8x32xf32>
    %cst_240 = arith.constant 1.000000e+00 : f32
    %352 = vector.broadcast %cst_240 : f32 to vector<8x32xf32>
    %353 = arith.addf %352, %351 : vector<8x32xf32>
    %354 = arith.divf %352, %353 : vector<8x32xf32>
    %355 = arith.negf %341 : vector<8x32xf32>
    %356 = math.exp %355 : vector<8x32xf32>
    %cst_241 = arith.constant 1.000000e+00 : f32
    %357 = vector.broadcast %cst_241 : f32 to vector<8x32xf32>
    %358 = arith.addf %357, %356 : vector<8x32xf32>
    %359 = arith.divf %357, %358 : vector<8x32xf32>
    %360 = math.tanh %345 : vector<8x32xf32>
    %361 = arith.negf %349 : vector<8x32xf32>
    %362 = math.exp %361 : vector<8x32xf32>
    %cst_242 = arith.constant 1.000000e+00 : f32
    %363 = vector.broadcast %cst_242 : f32 to vector<8x32xf32>
    %364 = arith.addf %363, %362 : vector<8x32xf32>
    %365 = arith.divf %363, %364 : vector<8x32xf32>
    %366 = arith.mulf %359, %292 : vector<8x32xf32>
    %367 = arith.mulf %354, %360 : vector<8x32xf32>
    %368 = arith.addf %366, %367 : vector<8x32xf32>
    %369 = math.tanh %368 : vector<8x32xf32>
    %370 = arith.mulf %365, %369 : vector<8x32xf32>
    %c4_243 = arith.constant 4 : index
    %c32_244 = arith.constant 32 : index
    %c0_245 = arith.constant 0 : index
    %371 = vector.load %arg11[%c4_243, %c32_244, %c0_245] : memref<8x64x32xf32, #tpu.memory_space<vmem>>, vector<1x8x32xf32>
    %372 = vector.shape_cast %371 : vector<1x8x32xf32> to vector<8x32xf32>
    %cst_246 = arith.constant dense<0.000000e+00> : vector<8x32xf32>
    %373 = tpu.matmul %331, %95, %cst_246 {dimension_numbers = #tpu.dot_dimension_numbers<[1], [0], [0], [1], [0, 0, 1, 1], [], []>} : vector<8x32xf32>, vector<32x32xf32>, vector<8x32xf32> -> vector<8x32xf32>
    %374 = arith.addf %372, %373 : vector<8x32xf32>
    %c5_247 = arith.constant 5 : index
    %c32_248 = arith.constant 32 : index
    %c0_249 = arith.constant 0 : index
    %375 = vector.load %arg11[%c5_247, %c32_248, %c0_249] : memref<8x64x32xf32, #tpu.memory_space<vmem>>, vector<1x8x32xf32>
    %376 = vector.shape_cast %375 : vector<1x8x32xf32> to vector<8x32xf32>
    %cst_250 = arith.constant dense<0.000000e+00> : vector<8x32xf32>
    %377 = tpu.matmul %331, %97, %cst_250 {dimension_numbers = #tpu.dot_dimension_numbers<[1], [0], [0], [1], [0, 0, 1, 1], [], []>} : vector<8x32xf32>, vector<32x32xf32>, vector<8x32xf32> -> vector<8x32xf32>
    %378 = arith.addf %376, %377 : vector<8x32xf32>
    %c6_251 = arith.constant 6 : index
    %c32_252 = arith.constant 32 : index
    %c0_253 = arith.constant 0 : index
    %379 = vector.load %arg11[%c6_251, %c32_252, %c0_253] : memref<8x64x32xf32, #tpu.memory_space<vmem>>, vector<1x8x32xf32>
    %380 = vector.shape_cast %379 : vector<1x8x32xf32> to vector<8x32xf32>
    %cst_254 = arith.constant dense<0.000000e+00> : vector<8x32xf32>
    %381 = tpu.matmul %331, %99, %cst_254 {dimension_numbers = #tpu.dot_dimension_numbers<[1], [0], [0], [1], [0, 0, 1, 1], [], []>} : vector<8x32xf32>, vector<32x32xf32>, vector<8x32xf32> -> vector<8x32xf32>
    %382 = arith.addf %380, %381 : vector<8x32xf32>
    %c7_255 = arith.constant 7 : index
    %c32_256 = arith.constant 32 : index
    %c0_257 = arith.constant 0 : index
    %383 = vector.load %arg11[%c7_255, %c32_256, %c0_257] : memref<8x64x32xf32, #tpu.memory_space<vmem>>, vector<1x8x32xf32>
    %384 = vector.shape_cast %383 : vector<1x8x32xf32> to vector<8x32xf32>
    %cst_258 = arith.constant dense<0.000000e+00> : vector<8x32xf32>
    %385 = tpu.matmul %331, %101, %cst_258 {dimension_numbers = #tpu.dot_dimension_numbers<[1], [0], [0], [1], [0, 0, 1, 1], [], []>} : vector<8x32xf32>, vector<32x32xf32>, vector<8x32xf32> -> vector<8x32xf32>
    %386 = arith.addf %384, %385 : vector<8x32xf32>
    %387 = arith.negf %374 : vector<8x32xf32>
    %388 = math.exp %387 : vector<8x32xf32>
    %cst_259 = arith.constant 1.000000e+00 : f32
    %389 = vector.broadcast %cst_259 : f32 to vector<8x32xf32>
    %390 = arith.addf %389, %388 : vector<8x32xf32>
    %391 = arith.divf %389, %390 : vector<8x32xf32>
    %392 = arith.negf %378 : vector<8x32xf32>
    %393 = math.exp %392 : vector<8x32xf32>
    %cst_260 = arith.constant 1.000000e+00 : f32
    %394 = vector.broadcast %cst_260 : f32 to vector<8x32xf32>
    %395 = arith.addf %394, %393 : vector<8x32xf32>
    %396 = arith.divf %394, %395 : vector<8x32xf32>
    %397 = math.tanh %382 : vector<8x32xf32>
    %398 = arith.negf %386 : vector<8x32xf32>
    %399 = math.exp %398 : vector<8x32xf32>
    %cst_261 = arith.constant 1.000000e+00 : f32
    %400 = vector.broadcast %cst_261 : f32 to vector<8x32xf32>
    %401 = arith.addf %400, %399 : vector<8x32xf32>
    %402 = arith.divf %400, %401 : vector<8x32xf32>
    %403 = arith.mulf %396, %329 : vector<8x32xf32>
    %404 = arith.mulf %391, %397 : vector<8x32xf32>
    %405 = arith.addf %403, %404 : vector<8x32xf32>
    %406 = math.tanh %405 : vector<8x32xf32>
    %407 = arith.mulf %402, %406 : vector<8x32xf32>
    %c24_262 = arith.constant 24 : index
    %c0_263 = arith.constant 0 : index
    %408 = vector.load %arg12[%c24_262, %c0_263] : memref<64x64xf32, #tpu.memory_space<vmem>>, vector<8x32xf32>
    tpu.vector_store %arg12[%c24_262, %c0_263], %370 {strides = array<i32>} : memref<64x64xf32, #tpu.memory_space<vmem>>, vector<8x32xf32>,
    %c32_264 = arith.constant 32 : index
    %c32_265 = arith.constant 32 : index
    %409 = vector.load %arg12[%c32_264, %c32_265] : memref<64x64xf32, #tpu.memory_space<vmem>>, vector<8x32xf32>
    tpu.vector_store %arg12[%c32_264, %c32_265], %407 {strides = array<i32>} : memref<64x64xf32, #tpu.memory_space<vmem>>, vector<8x32xf32>,
    %c0_266 = arith.constant 0 : index
    %c32_267 = arith.constant 32 : index
    %c0_268 = arith.constant 0 : index
    %410 = vector.load %arg11[%c0_266, %c32_267, %c0_268] : memref<8x64x32xf32, #tpu.memory_space<vmem>>, vector<1x8x32xf32>
    %411 = vector.shape_cast %410 : vector<1x8x32xf32> to vector<8x32xf32>
    %cst_269 = arith.constant dense<0.000000e+00> : vector<8x32xf32>
    %412 = tpu.matmul %370, %87, %cst_269 {dimension_numbers = #tpu.dot_dimension_numbers<[1], [0], [0], [1], [0, 0, 1, 1], [], []>} : vector<8x32xf32>, vector<32x32xf32>, vector<8x32xf32> -> vector<8x32xf32>
    %413 = arith.addf %411, %412 : vector<8x32xf32>
    %c1_270 = arith.constant 1 : index
    %c32_271 = arith.constant 32 : index
    %c0_272 = arith.constant 0 : index
    %414 = vector.load %arg11[%c1_270, %c32_271, %c0_272] : memref<8x64x32xf32, #tpu.memory_space<vmem>>, vector<1x8x32xf32>
    %415 = vector.shape_cast %414 : vector<1x8x32xf32> to vector<8x32xf32>
    %cst_273 = arith.constant dense<0.000000e+00> : vector<8x32xf32>
    %416 = tpu.matmul %370, %89, %cst_273 {dimension_numbers = #tpu.dot_dimension_numbers<[1], [0], [0], [1], [0, 0, 1, 1], [], []>} : vector<8x32xf32>, vector<32x32xf32>, vector<8x32xf32> -> vector<8x32xf32>
    %417 = arith.addf %415, %416 : vector<8x32xf32>
    %c2_274 = arith.constant 2 : index
    %c32_275 = arith.constant 32 : index
    %c0_276 = arith.constant 0 : index
    %418 = vector.load %arg11[%c2_274, %c32_275, %c0_276] : memref<8x64x32xf32, #tpu.memory_space<vmem>>, vector<1x8x32xf32>
    %419 = vector.shape_cast %418 : vector<1x8x32xf32> to vector<8x32xf32>
    %cst_277 = arith.constant dense<0.000000e+00> : vector<8x32xf32>
    %420 = tpu.matmul %370, %91, %cst_277 {dimension_numbers = #tpu.dot_dimension_numbers<[1], [0], [0], [1], [0, 0, 1, 1], [], []>} : vector<8x32xf32>, vector<32x32xf32>, vector<8x32xf32> -> vector<8x32xf32>
    %421 = arith.addf %419, %420 : vector<8x32xf32>
    %c3_278 = arith.constant 3 : index
    %c32_279 = arith.constant 32 : index
    %c0_280 = arith.constant 0 : index
    %422 = vector.load %arg11[%c3_278, %c32_279, %c0_280] : memref<8x64x32xf32, #tpu.memory_space<vmem>>, vector<1x8x32xf32>
    %423 = vector.shape_cast %422 : vector<1x8x32xf32> to vector<8x32xf32>
    %cst_281 = arith.constant dense<0.000000e+00> : vector<8x32xf32>
    %424 = tpu.matmul %370, %93, %cst_281 {dimension_numbers = #tpu.dot_dimension_numbers<[1], [0], [0], [1], [0, 0, 1, 1], [], []>} : vector<8x32xf32>, vector<32x32xf32>, vector<8x32xf32> -> vector<8x32xf32>
    %425 = arith.addf %423, %424 : vector<8x32xf32>
    %426 = arith.negf %413 : vector<8x32xf32>
    %427 = math.exp %426 : vector<8x32xf32>
    %cst_282 = arith.constant 1.000000e+00 : f32
    %428 = vector.broadcast %cst_282 : f32 to vector<8x32xf32>
    %429 = arith.addf %428, %427 : vector<8x32xf32>
    %430 = arith.divf %428, %429 : vector<8x32xf32>
    %431 = arith.negf %417 : vector<8x32xf32>
    %432 = math.exp %431 : vector<8x32xf32>
    %cst_283 = arith.constant 1.000000e+00 : f32
    %433 = vector.broadcast %cst_283 : f32 to vector<8x32xf32>
    %434 = arith.addf %433, %432 : vector<8x32xf32>
    %435 = arith.divf %433, %434 : vector<8x32xf32>
    %436 = math.tanh %421 : vector<8x32xf32>
    %437 = arith.negf %425 : vector<8x32xf32>
    %438 = math.exp %437 : vector<8x32xf32>
    %cst_284 = arith.constant 1.000000e+00 : f32
    %439 = vector.broadcast %cst_284 : f32 to vector<8x32xf32>
    %440 = arith.addf %439, %438 : vector<8x32xf32>
    %441 = arith.divf %439, %440 : vector<8x32xf32>
    %442 = arith.mulf %435, %368 : vector<8x32xf32>
    %443 = arith.mulf %430, %436 : vector<8x32xf32>
    %444 = arith.addf %442, %443 : vector<8x32xf32>
    %445 = math.tanh %444 : vector<8x32xf32>
    %446 = arith.mulf %441, %445 : vector<8x32xf32>
    %c4_285 = arith.constant 4 : index
    %c24_286 = arith.constant 24 : index
    %c0_287 = arith.constant 0 : index
    %447 = vector.load %arg11[%c4_285, %c24_286, %c0_287] : memref<8x64x32xf32, #tpu.memory_space<vmem>>, vector<1x8x32xf32>
    %448 = vector.shape_cast %447 : vector<1x8x32xf32> to vector<8x32xf32>
    %cst_288 = arith.constant dense<0.000000e+00> : vector<8x32xf32>
    %449 = tpu.matmul %407, %95, %cst_288 {dimension_numbers = #tpu.dot_dimension_numbers<[1], [0], [0], [1], [0, 0, 1, 1], [], []>} : vector<8x32xf32>, vector<32x32xf32>, vector<8x32xf32> -> vector<8x32xf32>
    %450 = arith.addf %448, %449 : vector<8x32xf32>
    %c5_289 = arith.constant 5 : index
    %c24_290 = arith.constant 24 : index
    %c0_291 = arith.constant 0 : index
    %451 = vector.load %arg11[%c5_289, %c24_290, %c0_291] : memref<8x64x32xf32, #tpu.memory_space<vmem>>, vector<1x8x32xf32>
    %452 = vector.shape_cast %451 : vector<1x8x32xf32> to vector<8x32xf32>
    %cst_292 = arith.constant dense<0.000000e+00> : vector<8x32xf32>
    %453 = tpu.matmul %407, %97, %cst_292 {dimension_numbers = #tpu.dot_dimension_numbers<[1], [0], [0], [1], [0, 0, 1, 1], [], []>} : vector<8x32xf32>, vector<32x32xf32>, vector<8x32xf32> -> vector<8x32xf32>
    %454 = arith.addf %452, %453 : vector<8x32xf32>
    %c6_293 = arith.constant 6 : index
    %c24_294 = arith.constant 24 : index
    %c0_295 = arith.constant 0 : index
    %455 = vector.load %arg11[%c6_293, %c24_294, %c0_295] : memref<8x64x32xf32, #tpu.memory_space<vmem>>, vector<1x8x32xf32>
    %456 = vector.shape_cast %455 : vector<1x8x32xf32> to vector<8x32xf32>
    %cst_296 = arith.constant dense<0.000000e+00> : vector<8x32xf32>
    %457 = tpu.matmul %407, %99, %cst_296 {dimension_numbers = #tpu.dot_dimension_numbers<[1], [0], [0], [1], [0, 0, 1, 1], [], []>} : vector<8x32xf32>, vector<32x32xf32>, vector<8x32xf32> -> vector<8x32xf32>
    %458 = arith.addf %456, %457 : vector<8x32xf32>
    %c7_297 = arith.constant 7 : index
    %c24_298 = arith.constant 24 : index
    %c0_299 = arith.constant 0 : index
    %459 = vector.load %arg11[%c7_297, %c24_298, %c0_299] : memref<8x64x32xf32, #tpu.memory_space<vmem>>, vector<1x8x32xf32>
    %460 = vector.shape_cast %459 : vector<1x8x32xf32> to vector<8x32xf32>
    %cst_300 = arith.constant dense<0.000000e+00> : vector<8x32xf32>
    %461 = tpu.matmul %407, %101, %cst_300 {dimension_numbers = #tpu.dot_dimension_numbers<[1], [0], [0], [1], [0, 0, 1, 1], [], []>} : vector<8x32xf32>, vector<32x32xf32>, vector<8x32xf32> -> vector<8x32xf32>
    %462 = arith.addf %460, %461 : vector<8x32xf32>
    %463 = arith.negf %450 : vector<8x32xf32>
    %464 = math.exp %463 : vector<8x32xf32>
    %cst_301 = arith.constant 1.000000e+00 : f32
    %465 = vector.broadcast %cst_301 : f32 to vector<8x32xf32>
    %466 = arith.addf %465, %464 : vector<8x32xf32>
    %467 = arith.divf %465, %466 : vector<8x32xf32>
    %468 = arith.negf %454 : vector<8x32xf32>
    %469 = math.exp %468 : vector<8x32xf32>
    %cst_302 = arith.constant 1.000000e+00 : f32
    %470 = vector.broadcast %cst_302 : f32 to vector<8x32xf32>
    %471 = arith.addf %470, %469 : vector<8x32xf32>
    %472 = arith.divf %470, %471 : vector<8x32xf32>
    %473 = math.tanh %458 : vector<8x32xf32>
    %474 = arith.negf %462 : vector<8x32xf32>
    %475 = math.exp %474 : vector<8x32xf32>
    %cst_303 = arith.constant 1.000000e+00 : f32
    %476 = vector.broadcast %cst_303 : f32 to vector<8x32xf32>
    %477 = arith.addf %476, %475 : vector<8x32xf32>
    %478 = arith.divf %476, %477 : vector<8x32xf32>
    %479 = arith.mulf %472, %405 : vector<8x32xf32>
    %480 = arith.mulf %467, %473 : vector<8x32xf32>
    %481 = arith.addf %479, %480 : vector<8x32xf32>
    %482 = math.tanh %481 : vector<8x32xf32>
    %483 = arith.mulf %478, %482 : vector<8x32xf32>
    %c32_304 = arith.constant 32 : index
    %c0_305 = arith.constant 0 : index
    %484 = vector.load %arg12[%c32_304, %c0_305] : memref<64x64xf32, #tpu.memory_space<vmem>>, vector<8x32xf32>
    tpu.vector_store %arg12[%c32_304, %c0_305], %446 {strides = array<i32>} : memref<64x64xf32, #tpu.memory_space<vmem>>, vector<8x32xf32>,
    %c24_306 = arith.constant 24 : index
    %c32_307 = arith.constant 32 : index
    %485 = vector.load %arg12[%c24_306, %c32_307] : memref<64x64xf32, #tpu.memory_space<vmem>>, vector<8x32xf32>
    tpu.vector_store %arg12[%c24_306, %c32_307], %483 {strides = array<i32>} : memref<64x64xf32, #tpu.memory_space<vmem>>, vector<8x32xf32>,
    %c0_308 = arith.constant 0 : index
    %c40_309 = arith.constant 40 : index
    %c0_310 = arith.constant 0 : index
    %486 = vector.load %arg11[%c0_308, %c40_309, %c0_310] : memref<8x64x32xf32, #tpu.memory_space<vmem>>, vector<1x8x32xf32>
    %487 = vector.shape_cast %486 : vector<1x8x32xf32> to vector<8x32xf32>
    %cst_311 = arith.constant dense<0.000000e+00> : vector<8x32xf32>
    %488 = tpu.matmul %446, %87, %cst_311 {dimension_numbers = #tpu.dot_dimension_numbers<[1], [0], [0], [1], [0, 0, 1, 1], [], []>} : vector<8x32xf32>, vector<32x32xf32>, vector<8x32xf32> -> vector<8x32xf32>
    %489 = arith.addf %487, %488 : vector<8x32xf32>
    %c1_312 = arith.constant 1 : index
    %c40_313 = arith.constant 40 : index
    %c0_314 = arith.constant 0 : index
    %490 = vector.load %arg11[%c1_312, %c40_313, %c0_314] : memref<8x64x32xf32, #tpu.memory_space<vmem>>, vector<1x8x32xf32>
    %491 = vector.shape_cast %490 : vector<1x8x32xf32> to vector<8x32xf32>
    %cst_315 = arith.constant dense<0.000000e+00> : vector<8x32xf32>
    %492 = tpu.matmul %446, %89, %cst_315 {dimension_numbers = #tpu.dot_dimension_numbers<[1], [0], [0], [1], [0, 0, 1, 1], [], []>} : vector<8x32xf32>, vector<32x32xf32>, vector<8x32xf32> -> vector<8x32xf32>
    %493 = arith.addf %491, %492 : vector<8x32xf32>
    %c2_316 = arith.constant 2 : index
    %c40_317 = arith.constant 40 : index
    %c0_318 = arith.constant 0 : index
    %494 = vector.load %arg11[%c2_316, %c40_317, %c0_318] : memref<8x64x32xf32, #tpu.memory_space<vmem>>, vector<1x8x32xf32>
    %495 = vector.shape_cast %494 : vector<1x8x32xf32> to vector<8x32xf32>
    %cst_319 = arith.constant dense<0.000000e+00> : vector<8x32xf32>
    %496 = tpu.matmul %446, %91, %cst_319 {dimension_numbers = #tpu.dot_dimension_numbers<[1], [0], [0], [1], [0, 0, 1, 1], [], []>} : vector<8x32xf32>, vector<32x32xf32>, vector<8x32xf32> -> vector<8x32xf32>
    %497 = arith.addf %495, %496 : vector<8x32xf32>
    %c3_320 = arith.constant 3 : index
    %c40_321 = arith.constant 40 : index
    %c0_322 = arith.constant 0 : index
    %498 = vector.load %arg11[%c3_320, %c40_321, %c0_322] : memref<8x64x32xf32, #tpu.memory_space<vmem>>, vector<1x8x32xf32>
    %499 = vector.shape_cast %498 : vector<1x8x32xf32> to vector<8x32xf32>
    %cst_323 = arith.constant dense<0.000000e+00> : vector<8x32xf32>
    %500 = tpu.matmul %446, %93, %cst_323 {dimension_numbers = #tpu.dot_dimension_numbers<[1], [0], [0], [1], [0, 0, 1, 1], [], []>} : vector<8x32xf32>, vector<32x32xf32>, vector<8x32xf32> -> vector<8x32xf32>
    %501 = arith.addf %499, %500 : vector<8x32xf32>
    %502 = arith.negf %489 : vector<8x32xf32>
    %503 = math.exp %502 : vector<8x32xf32>
    %cst_324 = arith.constant 1.000000e+00 : f32
    %504 = vector.broadcast %cst_324 : f32 to vector<8x32xf32>
    %505 = arith.addf %504, %503 : vector<8x32xf32>
    %506 = arith.divf %504, %505 : vector<8x32xf32>
    %507 = arith.negf %493 : vector<8x32xf32>
    %508 = math.exp %507 : vector<8x32xf32>
    %cst_325 = arith.constant 1.000000e+00 : f32
    %509 = vector.broadcast %cst_325 : f32 to vector<8x32xf32>
    %510 = arith.addf %509, %508 : vector<8x32xf32>
    %511 = arith.divf %509, %510 : vector<8x32xf32>
    %512 = math.tanh %497 : vector<8x32xf32>
    %513 = arith.negf %501 : vector<8x32xf32>
    %514 = math.exp %513 : vector<8x32xf32>
    %cst_326 = arith.constant 1.000000e+00 : f32
    %515 = vector.broadcast %cst_326 : f32 to vector<8x32xf32>
    %516 = arith.addf %515, %514 : vector<8x32xf32>
    %517 = arith.divf %515, %516 : vector<8x32xf32>
    %518 = arith.mulf %511, %444 : vector<8x32xf32>
    %519 = arith.mulf %506, %512 : vector<8x32xf32>
    %520 = arith.addf %518, %519 : vector<8x32xf32>
    %521 = math.tanh %520 : vector<8x32xf32>
    %522 = arith.mulf %517, %521 : vector<8x32xf32>
    %c4_327 = arith.constant 4 : index
    %c16_328 = arith.constant 16 : index
    %c0_329 = arith.constant 0 : index
    %523 = vector.load %arg11[%c4_327, %c16_328, %c0_329] : memref<8x64x32xf32, #tpu.memory_space<vmem>>, vector<1x8x32xf32>
    %524 = vector.shape_cast %523 : vector<1x8x32xf32> to vector<8x32xf32>
    %cst_330 = arith.constant dense<0.000000e+00> : vector<8x32xf32>
    %525 = tpu.matmul %483, %95, %cst_330 {dimension_numbers = #tpu.dot_dimension_numbers<[1], [0], [0], [1], [0, 0, 1, 1], [], []>} : vector<8x32xf32>, vector<32x32xf32>, vector<8x32xf32> -> vector<8x32xf32>
    %526 = arith.addf %524, %525 : vector<8x32xf32>
    %c5_331 = arith.constant 5 : index
    %c16_332 = arith.constant 16 : index
    %c0_333 = arith.constant 0 : index
    %527 = vector.load %arg11[%c5_331, %c16_332, %c0_333] : memref<8x64x32xf32, #tpu.memory_space<vmem>>, vector<1x8x32xf32>
    %528 = vector.shape_cast %527 : vector<1x8x32xf32> to vector<8x32xf32>
    %cst_334 = arith.constant dense<0.000000e+00> : vector<8x32xf32>
    %529 = tpu.matmul %483, %97, %cst_334 {dimension_numbers = #tpu.dot_dimension_numbers<[1], [0], [0], [1], [0, 0, 1, 1], [], []>} : vector<8x32xf32>, vector<32x32xf32>, vector<8x32xf32> -> vector<8x32xf32>
    %530 = arith.addf %528, %529 : vector<8x32xf32>
    %c6_335 = arith.constant 6 : index
    %c16_336 = arith.constant 16 : index
    %c0_337 = arith.constant 0 : index
    %531 = vector.load %arg11[%c6_335, %c16_336, %c0_337] : memref<8x64x32xf32, #tpu.memory_space<vmem>>, vector<1x8x32xf32>
    %532 = vector.shape_cast %531 : vector<1x8x32xf32> to vector<8x32xf32>
    %cst_338 = arith.constant dense<0.000000e+00> : vector<8x32xf32>
    %533 = tpu.matmul %483, %99, %cst_338 {dimension_numbers = #tpu.dot_dimension_numbers<[1], [0], [0], [1], [0, 0, 1, 1], [], []>} : vector<8x32xf32>, vector<32x32xf32>, vector<8x32xf32> -> vector<8x32xf32>
    %534 = arith.addf %532, %533 : vector<8x32xf32>
    %c7_339 = arith.constant 7 : index
    %c16_340 = arith.constant 16 : index
    %c0_341 = arith.constant 0 : index
    %535 = vector.load %arg11[%c7_339, %c16_340, %c0_341] : memref<8x64x32xf32, #tpu.memory_space<vmem>>, vector<1x8x32xf32>
    %536 = vector.shape_cast %535 : vector<1x8x32xf32> to vector<8x32xf32>
    %cst_342 = arith.constant dense<0.000000e+00> : vector<8x32xf32>
    %537 = tpu.matmul %483, %101, %cst_342 {dimension_numbers = #tpu.dot_dimension_numbers<[1], [0], [0], [1], [0, 0, 1, 1], [], []>} : vector<8x32xf32>, vector<32x32xf32>, vector<8x32xf32> -> vector<8x32xf32>
    %538 = arith.addf %536, %537 : vector<8x32xf32>
    %539 = arith.negf %526 : vector<8x32xf32>
    %540 = math.exp %539 : vector<8x32xf32>
    %cst_343 = arith.constant 1.000000e+00 : f32
    %541 = vector.broadcast %cst_343 : f32 to vector<8x32xf32>
    %542 = arith.addf %541, %540 : vector<8x32xf32>
    %543 = arith.divf %541, %542 : vector<8x32xf32>
    %544 = arith.negf %530 : vector<8x32xf32>
    %545 = math.exp %544 : vector<8x32xf32>
    %cst_344 = arith.constant 1.000000e+00 : f32
    %546 = vector.broadcast %cst_344 : f32 to vector<8x32xf32>
    %547 = arith.addf %546, %545 : vector<8x32xf32>
    %548 = arith.divf %546, %547 : vector<8x32xf32>
    %549 = math.tanh %534 : vector<8x32xf32>
    %550 = arith.negf %538 : vector<8x32xf32>
    %551 = math.exp %550 : vector<8x32xf32>
    %cst_345 = arith.constant 1.000000e+00 : f32
    %552 = vector.broadcast %cst_345 : f32 to vector<8x32xf32>
    %553 = arith.addf %552, %551 : vector<8x32xf32>
    %554 = arith.divf %552, %553 : vector<8x32xf32>
    %555 = arith.mulf %548, %481 : vector<8x32xf32>
    %556 = arith.mulf %543, %549 : vector<8x32xf32>
    %557 = arith.addf %555, %556 : vector<8x32xf32>
    %558 = math.tanh %557 : vector<8x32xf32>
    %559 = arith.mulf %554, %558 : vector<8x32xf32>
    %c40_346 = arith.constant 40 : index
    %c0_347 = arith.constant 0 : index
    %560 = vector.load %arg12[%c40_346, %c0_347] : memref<64x64xf32, #tpu.memory_space<vmem>>, vector<8x32xf32>
    tpu.vector_store %arg12[%c40_346, %c0_347], %522 {strides = array<i32>} : memref<64x64xf32, #tpu.memory_space<vmem>>, vector<8x32xf32>,
    %c16_348 = arith.constant 16 : index
    %c32_349 = arith.constant 32 : index
    %561 = vector.load %arg12[%c16_348, %c32_349] : memref<64x64xf32, #tpu.memory_space<vmem>>, vector<8x32xf32>
    tpu.vector_store %arg12[%c16_348, %c32_349], %559 {strides = array<i32>} : memref<64x64xf32, #tpu.memory_space<vmem>>, vector<8x32xf32>,
    %c0_350 = arith.constant 0 : index
    %c48_351 = arith.constant 48 : index
    %c0_352 = arith.constant 0 : index
    %562 = vector.load %arg11[%c0_350, %c48_351, %c0_352] : memref<8x64x32xf32, #tpu.memory_space<vmem>>, vector<1x8x32xf32>
    %563 = vector.shape_cast %562 : vector<1x8x32xf32> to vector<8x32xf32>
    %cst_353 = arith.constant dense<0.000000e+00> : vector<8x32xf32>
    %564 = tpu.matmul %522, %87, %cst_353 {dimension_numbers = #tpu.dot_dimension_numbers<[1], [0], [0], [1], [0, 0, 1, 1], [], []>} : vector<8x32xf32>, vector<32x32xf32>, vector<8x32xf32> -> vector<8x32xf32>
    %565 = arith.addf %563, %564 : vector<8x32xf32>
    %c1_354 = arith.constant 1 : index
    %c48_355 = arith.constant 48 : index
    %c0_356 = arith.constant 0 : index
    %566 = vector.load %arg11[%c1_354, %c48_355, %c0_356] : memref<8x64x32xf32, #tpu.memory_space<vmem>>, vector<1x8x32xf32>
    %567 = vector.shape_cast %566 : vector<1x8x32xf32> to vector<8x32xf32>
    %cst_357 = arith.constant dense<0.000000e+00> : vector<8x32xf32>
    %568 = tpu.matmul %522, %89, %cst_357 {dimension_numbers = #tpu.dot_dimension_numbers<[1], [0], [0], [1], [0, 0, 1, 1], [], []>} : vector<8x32xf32>, vector<32x32xf32>, vector<8x32xf32> -> vector<8x32xf32>
    %569 = arith.addf %567, %568 : vector<8x32xf32>
    %c2_358 = arith.constant 2 : index
    %c48_359 = arith.constant 48 : index
    %c0_360 = arith.constant 0 : index
    %570 = vector.load %arg11[%c2_358, %c48_359, %c0_360] : memref<8x64x32xf32, #tpu.memory_space<vmem>>, vector<1x8x32xf32>
    %571 = vector.shape_cast %570 : vector<1x8x32xf32> to vector<8x32xf32>
    %cst_361 = arith.constant dense<0.000000e+00> : vector<8x32xf32>
    %572 = tpu.matmul %522, %91, %cst_361 {dimension_numbers = #tpu.dot_dimension_numbers<[1], [0], [0], [1], [0, 0, 1, 1], [], []>} : vector<8x32xf32>, vector<32x32xf32>, vector<8x32xf32> -> vector<8x32xf32>
    %573 = arith.addf %571, %572 : vector<8x32xf32>
    %c3_362 = arith.constant 3 : index
    %c48_363 = arith.constant 48 : index
    %c0_364 = arith.constant 0 : index
    %574 = vector.load %arg11[%c3_362, %c48_363, %c0_364] : memref<8x64x32xf32, #tpu.memory_space<vmem>>, vector<1x8x32xf32>
    %575 = vector.shape_cast %574 : vector<1x8x32xf32> to vector<8x32xf32>
    %cst_365 = arith.constant dense<0.000000e+00> : vector<8x32xf32>
    %576 = tpu.matmul %522, %93, %cst_365 {dimension_numbers = #tpu.dot_dimension_numbers<[1], [0], [0], [1], [0, 0, 1, 1], [], []>} : vector<8x32xf32>, vector<32x32xf32>, vector<8x32xf32> -> vector<8x32xf32>
    %577 = arith.addf %575, %576 : vector<8x32xf32>
    %578 = arith.negf %565 : vector<8x32xf32>
    %579 = math.exp %578 : vector<8x32xf32>
    %cst_366 = arith.constant 1.000000e+00 : f32
    %580 = vector.broadcast %cst_366 : f32 to vector<8x32xf32>
    %581 = arith.addf %580, %579 : vector<8x32xf32>
    %582 = arith.divf %580, %581 : vector<8x32xf32>
    %583 = arith.negf %569 : vector<8x32xf32>
    %584 = math.exp %583 : vector<8x32xf32>
    %cst_367 = arith.constant 1.000000e+00 : f32
    %585 = vector.broadcast %cst_367 : f32 to vector<8x32xf32>
    %586 = arith.addf %585, %584 : vector<8x32xf32>
    %587 = arith.divf %585, %586 : vector<8x32xf32>
    %588 = math.tanh %573 : vector<8x32xf32>
    %589 = arith.negf %577 : vector<8x32xf32>
    %590 = math.exp %589 : vector<8x32xf32>
    %cst_368 = arith.constant 1.000000e+00 : f32
    %591 = vector.broadcast %cst_368 : f32 to vector<8x32xf32>
    %592 = arith.addf %591, %590 : vector<8x32xf32>
    %593 = arith.divf %591, %592 : vector<8x32xf32>
    %594 = arith.mulf %587, %520 : vector<8x32xf32>
    %595 = arith.mulf %582, %588 : vector<8x32xf32>
    %596 = arith.addf %594, %595 : vector<8x32xf32>
    %597 = math.tanh %596 : vector<8x32xf32>
    %598 = arith.mulf %593, %597 : vector<8x32xf32>
    %c4_369 = arith.constant 4 : index
    %c8_370 = arith.constant 8 : index
    %c0_371 = arith.constant 0 : index
    %599 = vector.load %arg11[%c4_369, %c8_370, %c0_371] : memref<8x64x32xf32, #tpu.memory_space<vmem>>, vector<1x8x32xf32>
    %600 = vector.shape_cast %599 : vector<1x8x32xf32> to vector<8x32xf32>
    %cst_372 = arith.constant dense<0.000000e+00> : vector<8x32xf32>
    %601 = tpu.matmul %559, %95, %cst_372 {dimension_numbers = #tpu.dot_dimension_numbers<[1], [0], [0], [1], [0, 0, 1, 1], [], []>} : vector<8x32xf32>, vector<32x32xf32>, vector<8x32xf32> -> vector<8x32xf32>
    %602 = arith.addf %600, %601 : vector<8x32xf32>
    %c5_373 = arith.constant 5 : index
    %c8_374 = arith.constant 8 : index
    %c0_375 = arith.constant 0 : index
    %603 = vector.load %arg11[%c5_373, %c8_374, %c0_375] : memref<8x64x32xf32, #tpu.memory_space<vmem>>, vector<1x8x32xf32>
    %604 = vector.shape_cast %603 : vector<1x8x32xf32> to vector<8x32xf32>
    %cst_376 = arith.constant dense<0.000000e+00> : vector<8x32xf32>
    %605 = tpu.matmul %559, %97, %cst_376 {dimension_numbers = #tpu.dot_dimension_numbers<[1], [0], [0], [1], [0, 0, 1, 1], [], []>} : vector<8x32xf32>, vector<32x32xf32>, vector<8x32xf32> -> vector<8x32xf32>
    %606 = arith.addf %604, %605 : vector<8x32xf32>
    %c6_377 = arith.constant 6 : index
    %c8_378 = arith.constant 8 : index
    %c0_379 = arith.constant 0 : index
    %607 = vector.load %arg11[%c6_377, %c8_378, %c0_379] : memref<8x64x32xf32, #tpu.memory_space<vmem>>, vector<1x8x32xf32>
    %608 = vector.shape_cast %607 : vector<1x8x32xf32> to vector<8x32xf32>
    %cst_380 = arith.constant dense<0.000000e+00> : vector<8x32xf32>
    %609 = tpu.matmul %559, %99, %cst_380 {dimension_numbers = #tpu.dot_dimension_numbers<[1], [0], [0], [1], [0, 0, 1, 1], [], []>} : vector<8x32xf32>, vector<32x32xf32>, vector<8x32xf32> -> vector<8x32xf32>
    %610 = arith.addf %608, %609 : vector<8x32xf32>
    %c7_381 = arith.constant 7 : index
    %c8_382 = arith.constant 8 : index
    %c0_383 = arith.constant 0 : index
    %611 = vector.load %arg11[%c7_381, %c8_382, %c0_383] : memref<8x64x32xf32, #tpu.memory_space<vmem>>, vector<1x8x32xf32>
    %612 = vector.shape_cast %611 : vector<1x8x32xf32> to vector<8x32xf32>
    %cst_384 = arith.constant dense<0.000000e+00> : vector<8x32xf32>
    %613 = tpu.matmul %559, %101, %cst_384 {dimension_numbers = #tpu.dot_dimension_numbers<[1], [0], [0], [1], [0, 0, 1, 1], [], []>} : vector<8x32xf32>, vector<32x32xf32>, vector<8x32xf32> -> vector<8x32xf32>
    %614 = arith.addf %612, %613 : vector<8x32xf32>
    %615 = arith.negf %602 : vector<8x32xf32>
    %616 = math.exp %615 : vector<8x32xf32>
    %cst_385 = arith.constant 1.000000e+00 : f32
    %617 = vector.broadcast %cst_385 : f32 to vector<8x32xf32>
    %618 = arith.addf %617, %616 : vector<8x32xf32>
    %619 = arith.divf %617, %618 : vector<8x32xf32>
    %620 = arith.negf %606 : vector<8x32xf32>
    %621 = math.exp %620 : vector<8x32xf32>
    %cst_386 = arith.constant 1.000000e+00 : f32
    %622 = vector.broadcast %cst_386 : f32 to vector<8x32xf32>
    %623 = arith.addf %622, %621 : vector<8x32xf32>
    %624 = arith.divf %622, %623 : vector<8x32xf32>
    %625 = math.tanh %610 : vector<8x32xf32>
    %626 = arith.negf %614 : vector<8x32xf32>
    %627 = math.exp %626 : vector<8x32xf32>
    %cst_387 = arith.constant 1.000000e+00 : f32
    %628 = vector.broadcast %cst_387 : f32 to vector<8x32xf32>
    %629 = arith.addf %628, %627 : vector<8x32xf32>
    %630 = arith.divf %628, %629 : vector<8x32xf32>
    %631 = arith.mulf %624, %557 : vector<8x32xf32>
    %632 = arith.mulf %619, %625 : vector<8x32xf32>
    %633 = arith.addf %631, %632 : vector<8x32xf32>
    %634 = math.tanh %633 : vector<8x32xf32>
    %635 = arith.mulf %630, %634 : vector<8x32xf32>
    %c48_388 = arith.constant 48 : index
    %c0_389 = arith.constant 0 : index
    %636 = vector.load %arg12[%c48_388, %c0_389] : memref<64x64xf32, #tpu.memory_space<vmem>>, vector<8x32xf32>
    tpu.vector_store %arg12[%c48_388, %c0_389], %598 {strides = array<i32>} : memref<64x64xf32, #tpu.memory_space<vmem>>, vector<8x32xf32>,
    %c8_390 = arith.constant 8 : index
    %c32_391 = arith.constant 32 : index
    %637 = vector.load %arg12[%c8_390, %c32_391] : memref<64x64xf32, #tpu.memory_space<vmem>>, vector<8x32xf32>
    tpu.vector_store %arg12[%c8_390, %c32_391], %635 {strides = array<i32>} : memref<64x64xf32, #tpu.memory_space<vmem>>, vector<8x32xf32>,
    %c0_392 = arith.constant 0 : index
    %c56_393 = arith.constant 56 : index
    %c0_394 = arith.constant 0 : index
    %638 = vector.load %arg11[%c0_392, %c56_393, %c0_394] : memref<8x64x32xf32, #tpu.memory_space<vmem>>, vector<1x8x32xf32>
    %639 = vector.shape_cast %638 : vector<1x8x32xf32> to vector<8x32xf32>
    %cst_395 = arith.constant dense<0.000000e+00> : vector<8x32xf32>
    %640 = tpu.matmul %598, %87, %cst_395 {dimension_numbers = #tpu.dot_dimension_numbers<[1], [0], [0], [1], [0, 0, 1, 1], [], []>} : vector<8x32xf32>, vector<32x32xf32>, vector<8x32xf32> -> vector<8x32xf32>
    %641 = arith.addf %639, %640 : vector<8x32xf32>
    %c1_396 = arith.constant 1 : index
    %c56_397 = arith.constant 56 : index
    %c0_398 = arith.constant 0 : index
    %642 = vector.load %arg11[%c1_396, %c56_397, %c0_398] : memref<8x64x32xf32, #tpu.memory_space<vmem>>, vector<1x8x32xf32>
    %643 = vector.shape_cast %642 : vector<1x8x32xf32> to vector<8x32xf32>
    %cst_399 = arith.constant dense<0.000000e+00> : vector<8x32xf32>
    %644 = tpu.matmul %598, %89, %cst_399 {dimension_numbers = #tpu.dot_dimension_numbers<[1], [0], [0], [1], [0, 0, 1, 1], [], []>} : vector<8x32xf32>, vector<32x32xf32>, vector<8x32xf32> -> vector<8x32xf32>
    %645 = arith.addf %643, %644 : vector<8x32xf32>
    %c2_400 = arith.constant 2 : index
    %c56_401 = arith.constant 56 : index
    %c0_402 = arith.constant 0 : index
    %646 = vector.load %arg11[%c2_400, %c56_401, %c0_402] : memref<8x64x32xf32, #tpu.memory_space<vmem>>, vector<1x8x32xf32>
    %647 = vector.shape_cast %646 : vector<1x8x32xf32> to vector<8x32xf32>
    %cst_403 = arith.constant dense<0.000000e+00> : vector<8x32xf32>
    %648 = tpu.matmul %598, %91, %cst_403 {dimension_numbers = #tpu.dot_dimension_numbers<[1], [0], [0], [1], [0, 0, 1, 1], [], []>} : vector<8x32xf32>, vector<32x32xf32>, vector<8x32xf32> -> vector<8x32xf32>
    %649 = arith.addf %647, %648 : vector<8x32xf32>
    %c3_404 = arith.constant 3 : index
    %c56_405 = arith.constant 56 : index
    %c0_406 = arith.constant 0 : index
    %650 = vector.load %arg11[%c3_404, %c56_405, %c0_406] : memref<8x64x32xf32, #tpu.memory_space<vmem>>, vector<1x8x32xf32>
    %651 = vector.shape_cast %650 : vector<1x8x32xf32> to vector<8x32xf32>
    %cst_407 = arith.constant dense<0.000000e+00> : vector<8x32xf32>
    %652 = tpu.matmul %598, %93, %cst_407 {dimension_numbers = #tpu.dot_dimension_numbers<[1], [0], [0], [1], [0, 0, 1, 1], [], []>} : vector<8x32xf32>, vector<32x32xf32>, vector<8x32xf32> -> vector<8x32xf32>
    %653 = arith.addf %651, %652 : vector<8x32xf32>
    %654 = arith.negf %641 : vector<8x32xf32>
    %655 = math.exp %654 : vector<8x32xf32>
    %cst_408 = arith.constant 1.000000e+00 : f32
    %656 = vector.broadcast %cst_408 : f32 to vector<8x32xf32>
    %657 = arith.addf %656, %655 : vector<8x32xf32>
    %658 = arith.divf %656, %657 : vector<8x32xf32>
    %659 = arith.negf %645 : vector<8x32xf32>
    %660 = math.exp %659 : vector<8x32xf32>
    %cst_409 = arith.constant 1.000000e+00 : f32
    %661 = vector.broadcast %cst_409 : f32 to vector<8x32xf32>
    %662 = arith.addf %661, %660 : vector<8x32xf32>
    %663 = arith.divf %661, %662 : vector<8x32xf32>
    %664 = math.tanh %649 : vector<8x32xf32>
    %665 = arith.negf %653 : vector<8x32xf32>
    %666 = math.exp %665 : vector<8x32xf32>
    %cst_410 = arith.constant 1.000000e+00 : f32
    %667 = vector.broadcast %cst_410 : f32 to vector<8x32xf32>
    %668 = arith.addf %667, %666 : vector<8x32xf32>
    %669 = arith.divf %667, %668 : vector<8x32xf32>
    %670 = arith.mulf %663, %596 : vector<8x32xf32>
    %671 = arith.mulf %658, %664 : vector<8x32xf32>
    %672 = arith.addf %670, %671 : vector<8x32xf32>
    %673 = math.tanh %672 : vector<8x32xf32>
    %674 = arith.mulf %669, %673 : vector<8x32xf32>
    %c4_411 = arith.constant 4 : index
    %c0_412 = arith.constant 0 : index
    %c0_413 = arith.constant 0 : index
    %675 = vector.load %arg11[%c4_411, %c0_412, %c0_413] : memref<8x64x32xf32, #tpu.memory_space<vmem>>, vector<1x8x32xf32>
    %676 = vector.shape_cast %675 : vector<1x8x32xf32> to vector<8x32xf32>
    %cst_414 = arith.constant dense<0.000000e+00> : vector<8x32xf32>
    %677 = tpu.matmul %635, %95, %cst_414 {dimension_numbers = #tpu.dot_dimension_numbers<[1], [0], [0], [1], [0, 0, 1, 1], [], []>} : vector<8x32xf32>, vector<32x32xf32>, vector<8x32xf32> -> vector<8x32xf32>
    %678 = arith.addf %676, %677 : vector<8x32xf32>
    %c5_415 = arith.constant 5 : index
    %c0_416 = arith.constant 0 : index
    %c0_417 = arith.constant 0 : index
    %679 = vector.load %arg11[%c5_415, %c0_416, %c0_417] : memref<8x64x32xf32, #tpu.memory_space<vmem>>, vector<1x8x32xf32>
    %680 = vector.shape_cast %679 : vector<1x8x32xf32> to vector<8x32xf32>
    %cst_418 = arith.constant dense<0.000000e+00> : vector<8x32xf32>
    %681 = tpu.matmul %635, %97, %cst_418 {dimension_numbers = #tpu.dot_dimension_numbers<[1], [0], [0], [1], [0, 0, 1, 1], [], []>} : vector<8x32xf32>, vector<32x32xf32>, vector<8x32xf32> -> vector<8x32xf32>
    %682 = arith.addf %680, %681 : vector<8x32xf32>
    %c6_419 = arith.constant 6 : index
    %c0_420 = arith.constant 0 : index
    %c0_421 = arith.constant 0 : index
    %683 = vector.load %arg11[%c6_419, %c0_420, %c0_421] : memref<8x64x32xf32, #tpu.memory_space<vmem>>, vector<1x8x32xf32>
    %684 = vector.shape_cast %683 : vector<1x8x32xf32> to vector<8x32xf32>
    %cst_422 = arith.constant dense<0.000000e+00> : vector<8x32xf32>
    %685 = tpu.matmul %635, %99, %cst_422 {dimension_numbers = #tpu.dot_dimension_numbers<[1], [0], [0], [1], [0, 0, 1, 1], [], []>} : vector<8x32xf32>, vector<32x32xf32>, vector<8x32xf32> -> vector<8x32xf32>
    %686 = arith.addf %684, %685 : vector<8x32xf32>
    %c7_423 = arith.constant 7 : index
    %c0_424 = arith.constant 0 : index
    %c0_425 = arith.constant 0 : index
    %687 = vector.load %arg11[%c7_423, %c0_424, %c0_425] : memref<8x64x32xf32, #tpu.memory_space<vmem>>, vector<1x8x32xf32>
    %688 = vector.shape_cast %687 : vector<1x8x32xf32> to vector<8x32xf32>
    %cst_426 = arith.constant dense<0.000000e+00> : vector<8x32xf32>
    %689 = tpu.matmul %635, %101, %cst_426 {dimension_numbers = #tpu.dot_dimension_numbers<[1], [0], [0], [1], [0, 0, 1, 1], [], []>} : vector<8x32xf32>, vector<32x32xf32>, vector<8x32xf32> -> vector<8x32xf32>
    %690 = arith.addf %688, %689 : vector<8x32xf32>
    %691 = arith.negf %678 : vector<8x32xf32>
    %692 = math.exp %691 : vector<8x32xf32>
    %cst_427 = arith.constant 1.000000e+00 : f32
    %693 = vector.broadcast %cst_427 : f32 to vector<8x32xf32>
    %694 = arith.addf %693, %692 : vector<8x32xf32>
    %695 = arith.divf %693, %694 : vector<8x32xf32>
    %696 = arith.negf %682 : vector<8x32xf32>
    %697 = math.exp %696 : vector<8x32xf32>
    %cst_428 = arith.constant 1.000000e+00 : f32
    %698 = vector.broadcast %cst_428 : f32 to vector<8x32xf32>
    %699 = arith.addf %698, %697 : vector<8x32xf32>
    %700 = arith.divf %698, %699 : vector<8x32xf32>
    %701 = math.tanh %686 : vector<8x32xf32>
    %702 = arith.negf %690 : vector<8x32xf32>
    %703 = math.exp %702 : vector<8x32xf32>
    %cst_429 = arith.constant 1.000000e+00 : f32
    %704 = vector.broadcast %cst_429 : f32 to vector<8x32xf32>
    %705 = arith.addf %704, %703 : vector<8x32xf32>
    %706 = arith.divf %704, %705 : vector<8x32xf32>
    %707 = arith.mulf %700, %633 : vector<8x32xf32>
    %708 = arith.mulf %695, %701 : vector<8x32xf32>
    %709 = arith.addf %707, %708 : vector<8x32xf32>
    %710 = math.tanh %709 : vector<8x32xf32>
    %711 = arith.mulf %706, %710 : vector<8x32xf32>
    %c56_430 = arith.constant 56 : index
    %c0_431 = arith.constant 0 : index
    %712 = vector.load %arg12[%c56_430, %c0_431] : memref<64x64xf32, #tpu.memory_space<vmem>>, vector<8x32xf32>
    tpu.vector_store %arg12[%c56_430, %c0_431], %674 {strides = array<i32>} : memref<64x64xf32, #tpu.memory_space<vmem>>, vector<8x32xf32>,
    %c0_432 = arith.constant 0 : index
    %c32_433 = arith.constant 32 : index
    %713 = vector.load %arg12[%c0_432, %c32_433] : memref<64x64xf32, #tpu.memory_space<vmem>>, vector<8x32xf32>
    tpu.vector_store %arg12[%c0_432, %c32_433], %711 {strides = array<i32>} : memref<64x64xf32, #tpu.memory_space<vmem>>, vector<8x32xf32>,
    %c0_434 = arith.constant 0 : index
    %c0_435 = arith.constant 0 : index
    %714 = vector.load %arg12[%c0_434, %c0_435] : memref<64x64xf32, #tpu.memory_space<vmem>>, vector<64x64xf32>
    %c0_436 = arith.constant 0 : index
    %c0_437 = arith.constant 0 : index
    %c0_438 = arith.constant 0 : index
    %715 = vector.load %arg5[%c0_436, %c0_437, %c0_438] : memref<8x64x32xf32, #tpu.memory_space<vmem>>, vector<1x64x32xf32>
    %716 = vector.shape_cast %715 : vector<1x64x32xf32> to vector<64x32xf32>
    %cst_439 = arith.constant dense<0.000000e+00> : vector<64x32xf32>
    %717 = tpu.matmul %714, %716, %cst_439 {dimension_numbers = #tpu.dot_dimension_numbers<[1], [0], [0], [1], [0, 0, 1, 1], [], []>} : vector<64x64xf32>, vector<64x32xf32>, vector<64x32xf32> -> vector<64x32xf32>
    %c0_440 = arith.constant 0 : index
    %c0_441 = arith.constant 0 : index
    %c0_442 = arith.constant 0 : index
    %718 = vector.load %arg7[%c0_440, %c0_441, %c0_442] : memref<8x1x32xf32, #tpu.memory_space<vmem>>, vector<1x1x32xf32>
    %719 = vector.shape_cast %718 : vector<1x1x32xf32> to vector<1x32xf32>
    %720 = vector.broadcast %719 : vector<1x32xf32> to vector<64x32xf32>
    %721 = arith.addf %717, %720 : vector<64x32xf32>
    %c0_443 = arith.constant 0 : index
    %c0_444 = arith.constant 0 : index
    %c0_445 = arith.constant 0 : index
    %722 = vector.load %arg11[%c0_443, %c0_444, %c0_445] : memref<8x64x32xf32, #tpu.memory_space<vmem>>, vector<1x64x32xf32>
    %723 = vector.shape_cast %722 : vector<1x64x32xf32> to vector<64x32xf32>
    %724 = vector.shape_cast %721 : vector<64x32xf32> to vector<1x64x32xf32>
    tpu.vector_store %arg11[%c0_443, %c0_444, %c0_445], %724 {strides = array<i32>} : memref<8x64x32xf32, #tpu.memory_space<vmem>>, vector<1x64x32xf32>,
    %c1_446 = arith.constant 1 : index
    %c0_447 = arith.constant 0 : index
    %c0_448 = arith.constant 0 : index
    %725 = vector.load %arg5[%c1_446, %c0_447, %c0_448] : memref<8x64x32xf32, #tpu.memory_space<vmem>>, vector<1x64x32xf32>
    %726 = vector.shape_cast %725 : vector<1x64x32xf32> to vector<64x32xf32>
    %cst_449 = arith.constant dense<0.000000e+00> : vector<64x32xf32>
    %727 = tpu.matmul %714, %726, %cst_449 {dimension_numbers = #tpu.dot_dimension_numbers<[1], [0], [0], [1], [0, 0, 1, 1], [], []>} : vector<64x64xf32>, vector<64x32xf32>, vector<64x32xf32> -> vector<64x32xf32>
    %c1_450 = arith.constant 1 : index
    %c0_451 = arith.constant 0 : index
    %c0_452 = arith.constant 0 : index
    %728 = vector.load %arg7[%c1_450, %c0_451, %c0_452] : memref<8x1x32xf32, #tpu.memory_space<vmem>>, vector<1x1x32xf32>
    %729 = vector.shape_cast %728 : vector<1x1x32xf32> to vector<1x32xf32>
    %730 = vector.broadcast %729 : vector<1x32xf32> to vector<64x32xf32>
    %731 = arith.addf %727, %730 : vector<64x32xf32>
    %c1_453 = arith.constant 1 : index
    %c0_454 = arith.constant 0 : index
    %c0_455 = arith.constant 0 : index
    %732 = vector.load %arg11[%c1_453, %c0_454, %c0_455] : memref<8x64x32xf32, #tpu.memory_space<vmem>>, vector<1x64x32xf32>
    %733 = vector.shape_cast %732 : vector<1x64x32xf32> to vector<64x32xf32>
    %734 = vector.shape_cast %731 : vector<64x32xf32> to vector<1x64x32xf32>
    tpu.vector_store %arg11[%c1_453, %c0_454, %c0_455], %734 {strides = array<i32>} : memref<8x64x32xf32, #tpu.memory_space<vmem>>, vector<1x64x32xf32>,
    %c2_456 = arith.constant 2 : index
    %c0_457 = arith.constant 0 : index
    %c0_458 = arith.constant 0 : index
    %735 = vector.load %arg5[%c2_456, %c0_457, %c0_458] : memref<8x64x32xf32, #tpu.memory_space<vmem>>, vector<1x64x32xf32>
    %736 = vector.shape_cast %735 : vector<1x64x32xf32> to vector<64x32xf32>
    %cst_459 = arith.constant dense<0.000000e+00> : vector<64x32xf32>
    %737 = tpu.matmul %714, %736, %cst_459 {dimension_numbers = #tpu.dot_dimension_numbers<[1], [0], [0], [1], [0, 0, 1, 1], [], []>} : vector<64x64xf32>, vector<64x32xf32>, vector<64x32xf32> -> vector<64x32xf32>
    %c2_460 = arith.constant 2 : index
    %c0_461 = arith.constant 0 : index
    %c0_462 = arith.constant 0 : index
    %738 = vector.load %arg7[%c2_460, %c0_461, %c0_462] : memref<8x1x32xf32, #tpu.memory_space<vmem>>, vector<1x1x32xf32>
    %739 = vector.shape_cast %738 : vector<1x1x32xf32> to vector<1x32xf32>
    %740 = vector.broadcast %739 : vector<1x32xf32> to vector<64x32xf32>
    %741 = arith.addf %737, %740 : vector<64x32xf32>
    %c2_463 = arith.constant 2 : index
    %c0_464 = arith.constant 0 : index
    %c0_465 = arith.constant 0 : index
    %742 = vector.load %arg11[%c2_463, %c0_464, %c0_465] : memref<8x64x32xf32, #tpu.memory_space<vmem>>, vector<1x64x32xf32>
    %743 = vector.shape_cast %742 : vector<1x64x32xf32> to vector<64x32xf32>
    %744 = vector.shape_cast %741 : vector<64x32xf32> to vector<1x64x32xf32>
    tpu.vector_store %arg11[%c2_463, %c0_464, %c0_465], %744 {strides = array<i32>} : memref<8x64x32xf32, #tpu.memory_space<vmem>>, vector<1x64x32xf32>,
    %c3_466 = arith.constant 3 : index
    %c0_467 = arith.constant 0 : index
    %c0_468 = arith.constant 0 : index
    %745 = vector.load %arg5[%c3_466, %c0_467, %c0_468] : memref<8x64x32xf32, #tpu.memory_space<vmem>>, vector<1x64x32xf32>
    %746 = vector.shape_cast %745 : vector<1x64x32xf32> to vector<64x32xf32>
    %cst_469 = arith.constant dense<0.000000e+00> : vector<64x32xf32>
    %747 = tpu.matmul %714, %746, %cst_469 {dimension_numbers = #tpu.dot_dimension_numbers<[1], [0], [0], [1], [0, 0, 1, 1], [], []>} : vector<64x64xf32>, vector<64x32xf32>, vector<64x32xf32> -> vector<64x32xf32>
    %c3_470 = arith.constant 3 : index
    %c0_471 = arith.constant 0 : index
    %c0_472 = arith.constant 0 : index
    %748 = vector.load %arg7[%c3_470, %c0_471, %c0_472] : memref<8x1x32xf32, #tpu.memory_space<vmem>>, vector<1x1x32xf32>
    %749 = vector.shape_cast %748 : vector<1x1x32xf32> to vector<1x32xf32>
    %750 = vector.broadcast %749 : vector<1x32xf32> to vector<64x32xf32>
    %751 = arith.addf %747, %750 : vector<64x32xf32>
    %c3_473 = arith.constant 3 : index
    %c0_474 = arith.constant 0 : index
    %c0_475 = arith.constant 0 : index
    %752 = vector.load %arg11[%c3_473, %c0_474, %c0_475] : memref<8x64x32xf32, #tpu.memory_space<vmem>>, vector<1x64x32xf32>
    %753 = vector.shape_cast %752 : vector<1x64x32xf32> to vector<64x32xf32>
    %754 = vector.shape_cast %751 : vector<64x32xf32> to vector<1x64x32xf32>
    tpu.vector_store %arg11[%c3_473, %c0_474, %c0_475], %754 {strides = array<i32>} : memref<8x64x32xf32, #tpu.memory_space<vmem>>, vector<1x64x32xf32>,
    %c4_476 = arith.constant 4 : index
    %c0_477 = arith.constant 0 : index
    %c0_478 = arith.constant 0 : index
    %755 = vector.load %arg5[%c4_476, %c0_477, %c0_478] : memref<8x64x32xf32, #tpu.memory_space<vmem>>, vector<1x64x32xf32>
    %756 = vector.shape_cast %755 : vector<1x64x32xf32> to vector<64x32xf32>
    %cst_479 = arith.constant dense<0.000000e+00> : vector<64x32xf32>
    %757 = tpu.matmul %714, %756, %cst_479 {dimension_numbers = #tpu.dot_dimension_numbers<[1], [0], [0], [1], [0, 0, 1, 1], [], []>} : vector<64x64xf32>, vector<64x32xf32>, vector<64x32xf32> -> vector<64x32xf32>
    %c4_480 = arith.constant 4 : index
    %c0_481 = arith.constant 0 : index
    %c0_482 = arith.constant 0 : index
    %758 = vector.load %arg7[%c4_480, %c0_481, %c0_482] : memref<8x1x32xf32, #tpu.memory_space<vmem>>, vector<1x1x32xf32>
    %759 = vector.shape_cast %758 : vector<1x1x32xf32> to vector<1x32xf32>
    %760 = vector.broadcast %759 : vector<1x32xf32> to vector<64x32xf32>
    %761 = arith.addf %757, %760 : vector<64x32xf32>
    %c4_483 = arith.constant 4 : index
    %c0_484 = arith.constant 0 : index
    %c0_485 = arith.constant 0 : index
    %762 = vector.load %arg11[%c4_483, %c0_484, %c0_485] : memref<8x64x32xf32, #tpu.memory_space<vmem>>, vector<1x64x32xf32>
    %763 = vector.shape_cast %762 : vector<1x64x32xf32> to vector<64x32xf32>
    %764 = vector.shape_cast %761 : vector<64x32xf32> to vector<1x64x32xf32>
    tpu.vector_store %arg11[%c4_483, %c0_484, %c0_485], %764 {strides = array<i32>} : memref<8x64x32xf32, #tpu.memory_space<vmem>>, vector<1x64x32xf32>,
    %c5_486 = arith.constant 5 : index
    %c0_487 = arith.constant 0 : index
    %c0_488 = arith.constant 0 : index
    %765 = vector.load %arg5[%c5_486, %c0_487, %c0_488] : memref<8x64x32xf32, #tpu.memory_space<vmem>>, vector<1x64x32xf32>
    %766 = vector.shape_cast %765 : vector<1x64x32xf32> to vector<64x32xf32>
    %cst_489 = arith.constant dense<0.000000e+00> : vector<64x32xf32>
    %767 = tpu.matmul %714, %766, %cst_489 {dimension_numbers = #tpu.dot_dimension_numbers<[1], [0], [0], [1], [0, 0, 1, 1], [], []>} : vector<64x64xf32>, vector<64x32xf32>, vector<64x32xf32> -> vector<64x32xf32>
    %c5_490 = arith.constant 5 : index
    %c0_491 = arith.constant 0 : index
    %c0_492 = arith.constant 0 : index
    %768 = vector.load %arg7[%c5_490, %c0_491, %c0_492] : memref<8x1x32xf32, #tpu.memory_space<vmem>>, vector<1x1x32xf32>
    %769 = vector.shape_cast %768 : vector<1x1x32xf32> to vector<1x32xf32>
    %770 = vector.broadcast %769 : vector<1x32xf32> to vector<64x32xf32>
    %771 = arith.addf %767, %770 : vector<64x32xf32>
    %c5_493 = arith.constant 5 : index
    %c0_494 = arith.constant 0 : index
    %c0_495 = arith.constant 0 : index
    %772 = vector.load %arg11[%c5_493, %c0_494, %c0_495] : memref<8x64x32xf32, #tpu.memory_space<vmem>>, vector<1x64x32xf32>
    %773 = vector.shape_cast %772 : vector<1x64x32xf32> to vector<64x32xf32>
    %774 = vector.shape_cast %771 : vector<64x32xf32> to vector<1x64x32xf32>
    tpu.vector_store %arg11[%c5_493, %c0_494, %c0_495], %774 {strides = array<i32>} : memref<8x64x32xf32, #tpu.memory_space<vmem>>, vector<1x64x32xf32>,
    %c6_496 = arith.constant 6 : index
    %c0_497 = arith.constant 0 : index
    %c0_498 = arith.constant 0 : index
    %775 = vector.load %arg5[%c6_496, %c0_497, %c0_498] : memref<8x64x32xf32, #tpu.memory_space<vmem>>, vector<1x64x32xf32>
    %776 = vector.shape_cast %775 : vector<1x64x32xf32> to vector<64x32xf32>
    %cst_499 = arith.constant dense<0.000000e+00> : vector<64x32xf32>
    %777 = tpu.matmul %714, %776, %cst_499 {dimension_numbers = #tpu.dot_dimension_numbers<[1], [0], [0], [1], [0, 0, 1, 1], [], []>} : vector<64x64xf32>, vector<64x32xf32>, vector<64x32xf32> -> vector<64x32xf32>
    %c6_500 = arith.constant 6 : index
    %c0_501 = arith.constant 0 : index
    %c0_502 = arith.constant 0 : index
    %778 = vector.load %arg7[%c6_500, %c0_501, %c0_502] : memref<8x1x32xf32, #tpu.memory_space<vmem>>, vector<1x1x32xf32>
    %779 = vector.shape_cast %778 : vector<1x1x32xf32> to vector<1x32xf32>
    %780 = vector.broadcast %779 : vector<1x32xf32> to vector<64x32xf32>
    %781 = arith.addf %777, %780 : vector<64x32xf32>
    %c6_503 = arith.constant 6 : index
    %c0_504 = arith.constant 0 : index
    %c0_505 = arith.constant 0 : index
    %782 = vector.load %arg11[%c6_503, %c0_504, %c0_505] : memref<8x64x32xf32, #tpu.memory_space<vmem>>, vector<1x64x32xf32>
    %783 = vector.shape_cast %782 : vector<1x64x32xf32> to vector<64x32xf32>
    %784 = vector.shape_cast %781 : vector<64x32xf32> to vector<1x64x32xf32>
    tpu.vector_store %arg11[%c6_503, %c0_504, %c0_505], %784 {strides = array<i32>} : memref<8x64x32xf32, #tpu.memory_space<vmem>>, vector<1x64x32xf32>,
    %c7_506 = arith.constant 7 : index
    %c0_507 = arith.constant 0 : index
    %c0_508 = arith.constant 0 : index
    %785 = vector.load %arg5[%c7_506, %c0_507, %c0_508] : memref<8x64x32xf32, #tpu.memory_space<vmem>>, vector<1x64x32xf32>
    %786 = vector.shape_cast %785 : vector<1x64x32xf32> to vector<64x32xf32>
    %cst_509 = arith.constant dense<0.000000e+00> : vector<64x32xf32>
    %787 = tpu.matmul %714, %786, %cst_509 {dimension_numbers = #tpu.dot_dimension_numbers<[1], [0], [0], [1], [0, 0, 1, 1], [], []>} : vector<64x64xf32>, vector<64x32xf32>, vector<64x32xf32> -> vector<64x32xf32>
    %c7_510 = arith.constant 7 : index
    %c0_511 = arith.constant 0 : index
    %c0_512 = arith.constant 0 : index
    %788 = vector.load %arg7[%c7_510, %c0_511, %c0_512] : memref<8x1x32xf32, #tpu.memory_space<vmem>>, vector<1x1x32xf32>
    %789 = vector.shape_cast %788 : vector<1x1x32xf32> to vector<1x32xf32>
    %790 = vector.broadcast %789 : vector<1x32xf32> to vector<64x32xf32>
    %791 = arith.addf %787, %790 : vector<64x32xf32>
    %c7_513 = arith.constant 7 : index
    %c0_514 = arith.constant 0 : index
    %c0_515 = arith.constant 0 : index
    %792 = vector.load %arg11[%c7_513, %c0_514, %c0_515] : memref<8x64x32xf32, #tpu.memory_space<vmem>>, vector<1x64x32xf32>
    %793 = vector.shape_cast %792 : vector<1x64x32xf32> to vector<64x32xf32>
    %794 = vector.shape_cast %791 : vector<64x32xf32> to vector<1x64x32xf32>
    tpu.vector_store %arg11[%c7_513, %c0_514, %c0_515], %794 {strides = array<i32>} : memref<8x64x32xf32, #tpu.memory_space<vmem>>, vector<1x64x32xf32>,
    %c0_516 = arith.constant 0 : index
    %c0_517 = arith.constant 0 : index
    %c0_518 = arith.constant 0 : index
    %795 = vector.load %arg6[%c0_516, %c0_517, %c0_518] : memref<8x32x32xf32, #tpu.memory_space<vmem>>, vector<1x32x32xf32>
    %796 = vector.shape_cast %795 : vector<1x32x32xf32> to vector<32x32xf32>
    %c1_519 = arith.constant 1 : index
    %c0_520 = arith.constant 0 : index
    %c0_521 = arith.constant 0 : index
    %797 = vector.load %arg6[%c1_519, %c0_520, %c0_521] : memref<8x32x32xf32, #tpu.memory_space<vmem>>, vector<1x32x32xf32>
    %798 = vector.shape_cast %797 : vector<1x32x32xf32> to vector<32x32xf32>
    %c2_522 = arith.constant 2 : index
    %c0_523 = arith.constant 0 : index
    %c0_524 = arith.constant 0 : index
    %799 = vector.load %arg6[%c2_522, %c0_523, %c0_524] : memref<8x32x32xf32, #tpu.memory_space<vmem>>, vector<1x32x32xf32>
    %800 = vector.shape_cast %799 : vector<1x32x32xf32> to vector<32x32xf32>
    %c3_525 = arith.constant 3 : index
    %c0_526 = arith.constant 0 : index
    %c0_527 = arith.constant 0 : index
    %801 = vector.load %arg6[%c3_525, %c0_526, %c0_527] : memref<8x32x32xf32, #tpu.memory_space<vmem>>, vector<1x32x32xf32>
    %802 = vector.shape_cast %801 : vector<1x32x32xf32> to vector<32x32xf32>
    %c4_528 = arith.constant 4 : index
    %c0_529 = arith.constant 0 : index
    %c0_530 = arith.constant 0 : index
    %803 = vector.load %arg6[%c4_528, %c0_529, %c0_530] : memref<8x32x32xf32, #tpu.memory_space<vmem>>, vector<1x32x32xf32>
    %804 = vector.shape_cast %803 : vector<1x32x32xf32> to vector<32x32xf32>
    %c5_531 = arith.constant 5 : index
    %c0_532 = arith.constant 0 : index
    %c0_533 = arith.constant 0 : index
    %805 = vector.load %arg6[%c5_531, %c0_532, %c0_533] : memref<8x32x32xf32, #tpu.memory_space<vmem>>, vector<1x32x32xf32>
    %806 = vector.shape_cast %805 : vector<1x32x32xf32> to vector<32x32xf32>
    %c6_534 = arith.constant 6 : index
    %c0_535 = arith.constant 0 : index
    %c0_536 = arith.constant 0 : index
    %807 = vector.load %arg6[%c6_534, %c0_535, %c0_536] : memref<8x32x32xf32, #tpu.memory_space<vmem>>, vector<1x32x32xf32>
    %808 = vector.shape_cast %807 : vector<1x32x32xf32> to vector<32x32xf32>
    %c7_537 = arith.constant 7 : index
    %c0_538 = arith.constant 0 : index
    %c0_539 = arith.constant 0 : index
    %809 = vector.load %arg6[%c7_537, %c0_538, %c0_539] : memref<8x32x32xf32, #tpu.memory_space<vmem>>, vector<1x32x32xf32>
    %810 = vector.shape_cast %809 : vector<1x32x32xf32> to vector<32x32xf32>
    %cst_540 = arith.constant 0.000000e+00 : f32
    %811 = vector.broadcast %cst_540 : f32 to vector<8x32xf32>
    %cst_541 = arith.constant 0.000000e+00 : f32
    %812 = vector.broadcast %cst_541 : f32 to vector<8x32xf32>
    %cst_542 = arith.constant 0.000000e+00 : f32
    %813 = vector.broadcast %cst_542 : f32 to vector<8x32xf32>
    %cst_543 = arith.constant 0.000000e+00 : f32
    %814 = vector.broadcast %cst_543 : f32 to vector<8x32xf32>
    %c0_544 = arith.constant 0 : index
    %c0_545 = arith.constant 0 : index
    %c0_546 = arith.constant 0 : index
    %815 = vector.load %arg11[%c0_544, %c0_545, %c0_546] : memref<8x64x32xf32, #tpu.memory_space<vmem>>, vector<1x8x32xf32>
    %816 = vector.shape_cast %815 : vector<1x8x32xf32> to vector<8x32xf32>
    %cst_547 = arith.constant dense<0.000000e+00> : vector<8x32xf32>
    %817 = tpu.matmul %811, %796, %cst_547 {dimension_numbers = #tpu.dot_dimension_numbers<[1], [0], [0], [1], [0, 0, 1, 1], [], []>} : vector<8x32xf32>, vector<32x32xf32>, vector<8x32xf32> -> vector<8x32xf32>
    %818 = arith.addf %816, %817 : vector<8x32xf32>
    %c1_548 = arith.constant 1 : index
    %c0_549 = arith.constant 0 : index
    %c0_550 = arith.constant 0 : index
    %819 = vector.load %arg11[%c1_548, %c0_549, %c0_550] : memref<8x64x32xf32, #tpu.memory_space<vmem>>, vector<1x8x32xf32>
    %820 = vector.shape_cast %819 : vector<1x8x32xf32> to vector<8x32xf32>
    %cst_551 = arith.constant dense<0.000000e+00> : vector<8x32xf32>
    %821 = tpu.matmul %811, %798, %cst_551 {dimension_numbers = #tpu.dot_dimension_numbers<[1], [0], [0], [1], [0, 0, 1, 1], [], []>} : vector<8x32xf32>, vector<32x32xf32>, vector<8x32xf32> -> vector<8x32xf32>
    %822 = arith.addf %820, %821 : vector<8x32xf32>
    %c2_552 = arith.constant 2 : index
    %c0_553 = arith.constant 0 : index
    %c0_554 = arith.constant 0 : index
    %823 = vector.load %arg11[%c2_552, %c0_553, %c0_554] : memref<8x64x32xf32, #tpu.memory_space<vmem>>, vector<1x8x32xf32>
    %824 = vector.shape_cast %823 : vector<1x8x32xf32> to vector<8x32xf32>
    %cst_555 = arith.constant dense<0.000000e+00> : vector<8x32xf32>
    %825 = tpu.matmul %811, %800, %cst_555 {dimension_numbers = #tpu.dot_dimension_numbers<[1], [0], [0], [1], [0, 0, 1, 1], [], []>} : vector<8x32xf32>, vector<32x32xf32>, vector<8x32xf32> -> vector<8x32xf32>
    %826 = arith.addf %824, %825 : vector<8x32xf32>
    %c3_556 = arith.constant 3 : index
    %c0_557 = arith.constant 0 : index
    %c0_558 = arith.constant 0 : index
    %827 = vector.load %arg11[%c3_556, %c0_557, %c0_558] : memref<8x64x32xf32, #tpu.memory_space<vmem>>, vector<1x8x32xf32>
    %828 = vector.shape_cast %827 : vector<1x8x32xf32> to vector<8x32xf32>
    %cst_559 = arith.constant dense<0.000000e+00> : vector<8x32xf32>
    %829 = tpu.matmul %811, %802, %cst_559 {dimension_numbers = #tpu.dot_dimension_numbers<[1], [0], [0], [1], [0, 0, 1, 1], [], []>} : vector<8x32xf32>, vector<32x32xf32>, vector<8x32xf32> -> vector<8x32xf32>
    %830 = arith.addf %828, %829 : vector<8x32xf32>
    %831 = arith.negf %818 : vector<8x32xf32>
    %832 = math.exp %831 : vector<8x32xf32>
    %cst_560 = arith.constant 1.000000e+00 : f32
    %833 = vector.broadcast %cst_560 : f32 to vector<8x32xf32>
    %834 = arith.addf %833, %832 : vector<8x32xf32>
    %835 = arith.divf %833, %834 : vector<8x32xf32>
    %836 = arith.negf %822 : vector<8x32xf32>
    %837 = math.exp %836 : vector<8x32xf32>
    %cst_561 = arith.constant 1.000000e+00 : f32
    %838 = vector.broadcast %cst_561 : f32 to vector<8x32xf32>
    %839 = arith.addf %838, %837 : vector<8x32xf32>
    %840 = arith.divf %838, %839 : vector<8x32xf32>
    %841 = math.tanh %826 : vector<8x32xf32>
    %842 = arith.negf %830 : vector<8x32xf32>
    %843 = math.exp %842 : vector<8x32xf32>
    %cst_562 = arith.constant 1.000000e+00 : f32
    %844 = vector.broadcast %cst_562 : f32 to vector<8x32xf32>
    %845 = arith.addf %844, %843 : vector<8x32xf32>
    %846 = arith.divf %844, %845 : vector<8x32xf32>
    %847 = arith.mulf %840, %812 : vector<8x32xf32>
    %848 = arith.mulf %835, %841 : vector<8x32xf32>
    %849 = arith.addf %847, %848 : vector<8x32xf32>
    %850 = math.tanh %849 : vector<8x32xf32>
    %851 = arith.mulf %846, %850 : vector<8x32xf32>
    %c4_563 = arith.constant 4 : index
    %c56_564 = arith.constant 56 : index
    %c0_565 = arith.constant 0 : index
    %852 = vector.load %arg11[%c4_563, %c56_564, %c0_565] : memref<8x64x32xf32, #tpu.memory_space<vmem>>, vector<1x8x32xf32>
    %853 = vector.shape_cast %852 : vector<1x8x32xf32> to vector<8x32xf32>
    %cst_566 = arith.constant dense<0.000000e+00> : vector<8x32xf32>
    %854 = tpu.matmul %813, %804, %cst_566 {dimension_numbers = #tpu.dot_dimension_numbers<[1], [0], [0], [1], [0, 0, 1, 1], [], []>} : vector<8x32xf32>, vector<32x32xf32>, vector<8x32xf32> -> vector<8x32xf32>
    %855 = arith.addf %853, %854 : vector<8x32xf32>
    %c5_567 = arith.constant 5 : index
    %c56_568 = arith.constant 56 : index
    %c0_569 = arith.constant 0 : index
    %856 = vector.load %arg11[%c5_567, %c56_568, %c0_569] : memref<8x64x32xf32, #tpu.memory_space<vmem>>, vector<1x8x32xf32>
    %857 = vector.shape_cast %856 : vector<1x8x32xf32> to vector<8x32xf32>
    %cst_570 = arith.constant dense<0.000000e+00> : vector<8x32xf32>
    %858 = tpu.matmul %813, %806, %cst_570 {dimension_numbers = #tpu.dot_dimension_numbers<[1], [0], [0], [1], [0, 0, 1, 1], [], []>} : vector<8x32xf32>, vector<32x32xf32>, vector<8x32xf32> -> vector<8x32xf32>
    %859 = arith.addf %857, %858 : vector<8x32xf32>
    %c6_571 = arith.constant 6 : index
    %c56_572 = arith.constant 56 : index
    %c0_573 = arith.constant 0 : index
    %860 = vector.load %arg11[%c6_571, %c56_572, %c0_573] : memref<8x64x32xf32, #tpu.memory_space<vmem>>, vector<1x8x32xf32>
    %861 = vector.shape_cast %860 : vector<1x8x32xf32> to vector<8x32xf32>
    %cst_574 = arith.constant dense<0.000000e+00> : vector<8x32xf32>
    %862 = tpu.matmul %813, %808, %cst_574 {dimension_numbers = #tpu.dot_dimension_numbers<[1], [0], [0], [1], [0, 0, 1, 1], [], []>} : vector<8x32xf32>, vector<32x32xf32>, vector<8x32xf32> -> vector<8x32xf32>
    %863 = arith.addf %861, %862 : vector<8x32xf32>
    %c7_575 = arith.constant 7 : index
    %c56_576 = arith.constant 56 : index
    %c0_577 = arith.constant 0 : index
    %864 = vector.load %arg11[%c7_575, %c56_576, %c0_577] : memref<8x64x32xf32, #tpu.memory_space<vmem>>, vector<1x8x32xf32>
    %865 = vector.shape_cast %864 : vector<1x8x32xf32> to vector<8x32xf32>
    %cst_578 = arith.constant dense<0.000000e+00> : vector<8x32xf32>
    %866 = tpu.matmul %813, %810, %cst_578 {dimension_numbers = #tpu.dot_dimension_numbers<[1], [0], [0], [1], [0, 0, 1, 1], [], []>} : vector<8x32xf32>, vector<32x32xf32>, vector<8x32xf32> -> vector<8x32xf32>
    %867 = arith.addf %865, %866 : vector<8x32xf32>
    %868 = arith.negf %855 : vector<8x32xf32>
    %869 = math.exp %868 : vector<8x32xf32>
    %cst_579 = arith.constant 1.000000e+00 : f32
    %870 = vector.broadcast %cst_579 : f32 to vector<8x32xf32>
    %871 = arith.addf %870, %869 : vector<8x32xf32>
    %872 = arith.divf %870, %871 : vector<8x32xf32>
    %873 = arith.negf %859 : vector<8x32xf32>
    %874 = math.exp %873 : vector<8x32xf32>
    %cst_580 = arith.constant 1.000000e+00 : f32
    %875 = vector.broadcast %cst_580 : f32 to vector<8x32xf32>
    %876 = arith.addf %875, %874 : vector<8x32xf32>
    %877 = arith.divf %875, %876 : vector<8x32xf32>
    %878 = math.tanh %863 : vector<8x32xf32>
    %879 = arith.negf %867 : vector<8x32xf32>
    %880 = math.exp %879 : vector<8x32xf32>
    %cst_581 = arith.constant 1.000000e+00 : f32
    %881 = vector.broadcast %cst_581 : f32 to vector<8x32xf32>
    %882 = arith.addf %881, %880 : vector<8x32xf32>
    %883 = arith.divf %881, %882 : vector<8x32xf32>
    %884 = arith.mulf %877, %814 : vector<8x32xf32>
    %885 = arith.mulf %872, %878 : vector<8x32xf32>
    %886 = arith.addf %884, %885 : vector<8x32xf32>
    %887 = math.tanh %886 : vector<8x32xf32>
    %888 = arith.mulf %883, %887 : vector<8x32xf32>
    %cst_582 = arith.constant 0.000000e+00 : f32
    %889 = vector.broadcast %cst_582 : f32 to vector<8x32xf32>
    %890 = arith.maximumf %851, %889 : vector<8x32xf32>
    %891 = arith.addf %4, %890 : vector<8x32xf32>
    %cst_583 = arith.constant 0.000000e+00 : f32
    %892 = vector.broadcast %cst_583 : f32 to vector<8x32xf32>
    %893 = arith.maximumf %888, %892 : vector<8x32xf32>
    %894 = arith.addf %5, %893 : vector<8x32xf32>
    %c0_584 = arith.constant 0 : index
    %c8_585 = arith.constant 8 : index
    %c0_586 = arith.constant 0 : index
    %895 = vector.load %arg11[%c0_584, %c8_585, %c0_586] : memref<8x64x32xf32, #tpu.memory_space<vmem>>, vector<1x8x32xf32>
    %896 = vector.shape_cast %895 : vector<1x8x32xf32> to vector<8x32xf32>
    %cst_587 = arith.constant dense<0.000000e+00> : vector<8x32xf32>
    %897 = tpu.matmul %851, %796, %cst_587 {dimension_numbers = #tpu.dot_dimension_numbers<[1], [0], [0], [1], [0, 0, 1, 1], [], []>} : vector<8x32xf32>, vector<32x32xf32>, vector<8x32xf32> -> vector<8x32xf32>
    %898 = arith.addf %896, %897 : vector<8x32xf32>
    %c1_588 = arith.constant 1 : index
    %c8_589 = arith.constant 8 : index
    %c0_590 = arith.constant 0 : index
    %899 = vector.load %arg11[%c1_588, %c8_589, %c0_590] : memref<8x64x32xf32, #tpu.memory_space<vmem>>, vector<1x8x32xf32>
    %900 = vector.shape_cast %899 : vector<1x8x32xf32> to vector<8x32xf32>
    %cst_591 = arith.constant dense<0.000000e+00> : vector<8x32xf32>
    %901 = tpu.matmul %851, %798, %cst_591 {dimension_numbers = #tpu.dot_dimension_numbers<[1], [0], [0], [1], [0, 0, 1, 1], [], []>} : vector<8x32xf32>, vector<32x32xf32>, vector<8x32xf32> -> vector<8x32xf32>
    %902 = arith.addf %900, %901 : vector<8x32xf32>
    %c2_592 = arith.constant 2 : index
    %c8_593 = arith.constant 8 : index
    %c0_594 = arith.constant 0 : index
    %903 = vector.load %arg11[%c2_592, %c8_593, %c0_594] : memref<8x64x32xf32, #tpu.memory_space<vmem>>, vector<1x8x32xf32>
    %904 = vector.shape_cast %903 : vector<1x8x32xf32> to vector<8x32xf32>
    %cst_595 = arith.constant dense<0.000000e+00> : vector<8x32xf32>
    %905 = tpu.matmul %851, %800, %cst_595 {dimension_numbers = #tpu.dot_dimension_numbers<[1], [0], [0], [1], [0, 0, 1, 1], [], []>} : vector<8x32xf32>, vector<32x32xf32>, vector<8x32xf32> -> vector<8x32xf32>
    %906 = arith.addf %904, %905 : vector<8x32xf32>
    %c3_596 = arith.constant 3 : index
    %c8_597 = arith.constant 8 : index
    %c0_598 = arith.constant 0 : index
    %907 = vector.load %arg11[%c3_596, %c8_597, %c0_598] : memref<8x64x32xf32, #tpu.memory_space<vmem>>, vector<1x8x32xf32>
    %908 = vector.shape_cast %907 : vector<1x8x32xf32> to vector<8x32xf32>
    %cst_599 = arith.constant dense<0.000000e+00> : vector<8x32xf32>
    %909 = tpu.matmul %851, %802, %cst_599 {dimension_numbers = #tpu.dot_dimension_numbers<[1], [0], [0], [1], [0, 0, 1, 1], [], []>} : vector<8x32xf32>, vector<32x32xf32>, vector<8x32xf32> -> vector<8x32xf32>
    %910 = arith.addf %908, %909 : vector<8x32xf32>
    %911 = arith.negf %898 : vector<8x32xf32>
    %912 = math.exp %911 : vector<8x32xf32>
    %cst_600 = arith.constant 1.000000e+00 : f32
    %913 = vector.broadcast %cst_600 : f32 to vector<8x32xf32>
    %914 = arith.addf %913, %912 : vector<8x32xf32>
    %915 = arith.divf %913, %914 : vector<8x32xf32>
    %916 = arith.negf %902 : vector<8x32xf32>
    %917 = math.exp %916 : vector<8x32xf32>
    %cst_601 = arith.constant 1.000000e+00 : f32
    %918 = vector.broadcast %cst_601 : f32 to vector<8x32xf32>
    %919 = arith.addf %918, %917 : vector<8x32xf32>
    %920 = arith.divf %918, %919 : vector<8x32xf32>
    %921 = math.tanh %906 : vector<8x32xf32>
    %922 = arith.negf %910 : vector<8x32xf32>
    %923 = math.exp %922 : vector<8x32xf32>
    %cst_602 = arith.constant 1.000000e+00 : f32
    %924 = vector.broadcast %cst_602 : f32 to vector<8x32xf32>
    %925 = arith.addf %924, %923 : vector<8x32xf32>
    %926 = arith.divf %924, %925 : vector<8x32xf32>
    %927 = arith.mulf %920, %849 : vector<8x32xf32>
    %928 = arith.mulf %915, %921 : vector<8x32xf32>
    %929 = arith.addf %927, %928 : vector<8x32xf32>
    %930 = math.tanh %929 : vector<8x32xf32>
    %931 = arith.mulf %926, %930 : vector<8x32xf32>
    %c4_603 = arith.constant 4 : index
    %c48_604 = arith.constant 48 : index
    %c0_605 = arith.constant 0 : index
    %932 = vector.load %arg11[%c4_603, %c48_604, %c0_605] : memref<8x64x32xf32, #tpu.memory_space<vmem>>, vector<1x8x32xf32>
    %933 = vector.shape_cast %932 : vector<1x8x32xf32> to vector<8x32xf32>
    %cst_606 = arith.constant dense<0.000000e+00> : vector<8x32xf32>
    %934 = tpu.matmul %888, %804, %cst_606 {dimension_numbers = #tpu.dot_dimension_numbers<[1], [0], [0], [1], [0, 0, 1, 1], [], []>} : vector<8x32xf32>, vector<32x32xf32>, vector<8x32xf32> -> vector<8x32xf32>
    %935 = arith.addf %933, %934 : vector<8x32xf32>
    %c5_607 = arith.constant 5 : index
    %c48_608 = arith.constant 48 : index
    %c0_609 = arith.constant 0 : index
    %936 = vector.load %arg11[%c5_607, %c48_608, %c0_609] : memref<8x64x32xf32, #tpu.memory_space<vmem>>, vector<1x8x32xf32>
    %937 = vector.shape_cast %936 : vector<1x8x32xf32> to vector<8x32xf32>
    %cst_610 = arith.constant dense<0.000000e+00> : vector<8x32xf32>
    %938 = tpu.matmul %888, %806, %cst_610 {dimension_numbers = #tpu.dot_dimension_numbers<[1], [0], [0], [1], [0, 0, 1, 1], [], []>} : vector<8x32xf32>, vector<32x32xf32>, vector<8x32xf32> -> vector<8x32xf32>
    %939 = arith.addf %937, %938 : vector<8x32xf32>
    %c6_611 = arith.constant 6 : index
    %c48_612 = arith.constant 48 : index
    %c0_613 = arith.constant 0 : index
    %940 = vector.load %arg11[%c6_611, %c48_612, %c0_613] : memref<8x64x32xf32, #tpu.memory_space<vmem>>, vector<1x8x32xf32>
    %941 = vector.shape_cast %940 : vector<1x8x32xf32> to vector<8x32xf32>
    %cst_614 = arith.constant dense<0.000000e+00> : vector<8x32xf32>
    %942 = tpu.matmul %888, %808, %cst_614 {dimension_numbers = #tpu.dot_dimension_numbers<[1], [0], [0], [1], [0, 0, 1, 1], [], []>} : vector<8x32xf32>, vector<32x32xf32>, vector<8x32xf32> -> vector<8x32xf32>
    %943 = arith.addf %941, %942 : vector<8x32xf32>
    %c7_615 = arith.constant 7 : index
    %c48_616 = arith.constant 48 : index
    %c0_617 = arith.constant 0 : index
    %944 = vector.load %arg11[%c7_615, %c48_616, %c0_617] : memref<8x64x32xf32, #tpu.memory_space<vmem>>, vector<1x8x32xf32>
    %945 = vector.shape_cast %944 : vector<1x8x32xf32> to vector<8x32xf32>
    %cst_618 = arith.constant dense<0.000000e+00> : vector<8x32xf32>
    %946 = tpu.matmul %888, %810, %cst_618 {dimension_numbers = #tpu.dot_dimension_numbers<[1], [0], [0], [1], [0, 0, 1, 1], [], []>} : vector<8x32xf32>, vector<32x32xf32>, vector<8x32xf32> -> vector<8x32xf32>
    %947 = arith.addf %945, %946 : vector<8x32xf32>
    %948 = arith.negf %935 : vector<8x32xf32>
    %949 = math.exp %948 : vector<8x32xf32>
    %cst_619 = arith.constant 1.000000e+00 : f32
    %950 = vector.broadcast %cst_619 : f32 to vector<8x32xf32>
    %951 = arith.addf %950, %949 : vector<8x32xf32>
    %952 = arith.divf %950, %951 : vector<8x32xf32>
    %953 = arith.negf %939 : vector<8x32xf32>
    %954 = math.exp %953 : vector<8x32xf32>
    %cst_620 = arith.constant 1.000000e+00 : f32
    %955 = vector.broadcast %cst_620 : f32 to vector<8x32xf32>
    %956 = arith.addf %955, %954 : vector<8x32xf32>
    %957 = arith.divf %955, %956 : vector<8x32xf32>
    %958 = math.tanh %943 : vector<8x32xf32>
    %959 = arith.negf %947 : vector<8x32xf32>
    %960 = math.exp %959 : vector<8x32xf32>
    %cst_621 = arith.constant 1.000000e+00 : f32
    %961 = vector.broadcast %cst_621 : f32 to vector<8x32xf32>
    %962 = arith.addf %961, %960 : vector<8x32xf32>
    %963 = arith.divf %961, %962 : vector<8x32xf32>
    %964 = arith.mulf %957, %886 : vector<8x32xf32>
    %965 = arith.mulf %952, %958 : vector<8x32xf32>
    %966 = arith.addf %964, %965 : vector<8x32xf32>
    %967 = math.tanh %966 : vector<8x32xf32>
    %968 = arith.mulf %963, %967 : vector<8x32xf32>
    %cst_622 = arith.constant 0.000000e+00 : f32
    %969 = vector.broadcast %cst_622 : f32 to vector<8x32xf32>
    %970 = arith.maximumf %931, %969 : vector<8x32xf32>
    %971 = arith.addf %891, %970 : vector<8x32xf32>
    %cst_623 = arith.constant 0.000000e+00 : f32
    %972 = vector.broadcast %cst_623 : f32 to vector<8x32xf32>
    %973 = arith.maximumf %968, %972 : vector<8x32xf32>
    %974 = arith.addf %894, %973 : vector<8x32xf32>
    %c0_624 = arith.constant 0 : index
    %c16_625 = arith.constant 16 : index
    %c0_626 = arith.constant 0 : index
    %975 = vector.load %arg11[%c0_624, %c16_625, %c0_626] : memref<8x64x32xf32, #tpu.memory_space<vmem>>, vector<1x8x32xf32>
    %976 = vector.shape_cast %975 : vector<1x8x32xf32> to vector<8x32xf32>
    %cst_627 = arith.constant dense<0.000000e+00> : vector<8x32xf32>
    %977 = tpu.matmul %931, %796, %cst_627 {dimension_numbers = #tpu.dot_dimension_numbers<[1], [0], [0], [1], [0, 0, 1, 1], [], []>} : vector<8x32xf32>, vector<32x32xf32>, vector<8x32xf32> -> vector<8x32xf32>
    %978 = arith.addf %976, %977 : vector<8x32xf32>
    %c1_628 = arith.constant 1 : index
    %c16_629 = arith.constant 16 : index
    %c0_630 = arith.constant 0 : index
    %979 = vector.load %arg11[%c1_628, %c16_629, %c0_630] : memref<8x64x32xf32, #tpu.memory_space<vmem>>, vector<1x8x32xf32>
    %980 = vector.shape_cast %979 : vector<1x8x32xf32> to vector<8x32xf32>
    %cst_631 = arith.constant dense<0.000000e+00> : vector<8x32xf32>
    %981 = tpu.matmul %931, %798, %cst_631 {dimension_numbers = #tpu.dot_dimension_numbers<[1], [0], [0], [1], [0, 0, 1, 1], [], []>} : vector<8x32xf32>, vector<32x32xf32>, vector<8x32xf32> -> vector<8x32xf32>
    %982 = arith.addf %980, %981 : vector<8x32xf32>
    %c2_632 = arith.constant 2 : index
    %c16_633 = arith.constant 16 : index
    %c0_634 = arith.constant 0 : index
    %983 = vector.load %arg11[%c2_632, %c16_633, %c0_634] : memref<8x64x32xf32, #tpu.memory_space<vmem>>, vector<1x8x32xf32>
    %984 = vector.shape_cast %983 : vector<1x8x32xf32> to vector<8x32xf32>
    %cst_635 = arith.constant dense<0.000000e+00> : vector<8x32xf32>
    %985 = tpu.matmul %931, %800, %cst_635 {dimension_numbers = #tpu.dot_dimension_numbers<[1], [0], [0], [1], [0, 0, 1, 1], [], []>} : vector<8x32xf32>, vector<32x32xf32>, vector<8x32xf32> -> vector<8x32xf32>
    %986 = arith.addf %984, %985 : vector<8x32xf32>
    %c3_636 = arith.constant 3 : index
    %c16_637 = arith.constant 16 : index
    %c0_638 = arith.constant 0 : index
    %987 = vector.load %arg11[%c3_636, %c16_637, %c0_638] : memref<8x64x32xf32, #tpu.memory_space<vmem>>, vector<1x8x32xf32>
    %988 = vector.shape_cast %987 : vector<1x8x32xf32> to vector<8x32xf32>
    %cst_639 = arith.constant dense<0.000000e+00> : vector<8x32xf32>
    %989 = tpu.matmul %931, %802, %cst_639 {dimension_numbers = #tpu.dot_dimension_numbers<[1], [0], [0], [1], [0, 0, 1, 1], [], []>} : vector<8x32xf32>, vector<32x32xf32>, vector<8x32xf32> -> vector<8x32xf32>
    %990 = arith.addf %988, %989 : vector<8x32xf32>
    %991 = arith.negf %978 : vector<8x32xf32>
    %992 = math.exp %991 : vector<8x32xf32>
    %cst_640 = arith.constant 1.000000e+00 : f32
    %993 = vector.broadcast %cst_640 : f32 to vector<8x32xf32>
    %994 = arith.addf %993, %992 : vector<8x32xf32>
    %995 = arith.divf %993, %994 : vector<8x32xf32>
    %996 = arith.negf %982 : vector<8x32xf32>
    %997 = math.exp %996 : vector<8x32xf32>
    %cst_641 = arith.constant 1.000000e+00 : f32
    %998 = vector.broadcast %cst_641 : f32 to vector<8x32xf32>
    %999 = arith.addf %998, %997 : vector<8x32xf32>
    %1000 = arith.divf %998, %999 : vector<8x32xf32>
    %1001 = math.tanh %986 : vector<8x32xf32>
    %1002 = arith.negf %990 : vector<8x32xf32>
    %1003 = math.exp %1002 : vector<8x32xf32>
    %cst_642 = arith.constant 1.000000e+00 : f32
    %1004 = vector.broadcast %cst_642 : f32 to vector<8x32xf32>
    %1005 = arith.addf %1004, %1003 : vector<8x32xf32>
    %1006 = arith.divf %1004, %1005 : vector<8x32xf32>
    %1007 = arith.mulf %1000, %929 : vector<8x32xf32>
    %1008 = arith.mulf %995, %1001 : vector<8x32xf32>
    %1009 = arith.addf %1007, %1008 : vector<8x32xf32>
    %1010 = math.tanh %1009 : vector<8x32xf32>
    %1011 = arith.mulf %1006, %1010 : vector<8x32xf32>
    %c4_643 = arith.constant 4 : index
    %c40_644 = arith.constant 40 : index
    %c0_645 = arith.constant 0 : index
    %1012 = vector.load %arg11[%c4_643, %c40_644, %c0_645] : memref<8x64x32xf32, #tpu.memory_space<vmem>>, vector<1x8x32xf32>
    %1013 = vector.shape_cast %1012 : vector<1x8x32xf32> to vector<8x32xf32>
    %cst_646 = arith.constant dense<0.000000e+00> : vector<8x32xf32>
    %1014 = tpu.matmul %968, %804, %cst_646 {dimension_numbers = #tpu.dot_dimension_numbers<[1], [0], [0], [1], [0, 0, 1, 1], [], []>} : vector<8x32xf32>, vector<32x32xf32>, vector<8x32xf32> -> vector<8x32xf32>
    %1015 = arith.addf %1013, %1014 : vector<8x32xf32>
    %c5_647 = arith.constant 5 : index
    %c40_648 = arith.constant 40 : index
    %c0_649 = arith.constant 0 : index
    %1016 = vector.load %arg11[%c5_647, %c40_648, %c0_649] : memref<8x64x32xf32, #tpu.memory_space<vmem>>, vector<1x8x32xf32>
    %1017 = vector.shape_cast %1016 : vector<1x8x32xf32> to vector<8x32xf32>
    %cst_650 = arith.constant dense<0.000000e+00> : vector<8x32xf32>
    %1018 = tpu.matmul %968, %806, %cst_650 {dimension_numbers = #tpu.dot_dimension_numbers<[1], [0], [0], [1], [0, 0, 1, 1], [], []>} : vector<8x32xf32>, vector<32x32xf32>, vector<8x32xf32> -> vector<8x32xf32>
    %1019 = arith.addf %1017, %1018 : vector<8x32xf32>
    %c6_651 = arith.constant 6 : index
    %c40_652 = arith.constant 40 : index
    %c0_653 = arith.constant 0 : index
    %1020 = vector.load %arg11[%c6_651, %c40_652, %c0_653] : memref<8x64x32xf32, #tpu.memory_space<vmem>>, vector<1x8x32xf32>
    %1021 = vector.shape_cast %1020 : vector<1x8x32xf32> to vector<8x32xf32>
    %cst_654 = arith.constant dense<0.000000e+00> : vector<8x32xf32>
    %1022 = tpu.matmul %968, %808, %cst_654 {dimension_numbers = #tpu.dot_dimension_numbers<[1], [0], [0], [1], [0, 0, 1, 1], [], []>} : vector<8x32xf32>, vector<32x32xf32>, vector<8x32xf32> -> vector<8x32xf32>
    %1023 = arith.addf %1021, %1022 : vector<8x32xf32>
    %c7_655 = arith.constant 7 : index
    %c40_656 = arith.constant 40 : index
    %c0_657 = arith.constant 0 : index
    %1024 = vector.load %arg11[%c7_655, %c40_656, %c0_657] : memref<8x64x32xf32, #tpu.memory_space<vmem>>, vector<1x8x32xf32>
    %1025 = vector.shape_cast %1024 : vector<1x8x32xf32> to vector<8x32xf32>
    %cst_658 = arith.constant dense<0.000000e+00> : vector<8x32xf32>
    %1026 = tpu.matmul %968, %810, %cst_658 {dimension_numbers = #tpu.dot_dimension_numbers<[1], [0], [0], [1], [0, 0, 1, 1], [], []>} : vector<8x32xf32>, vector<32x32xf32>, vector<8x32xf32> -> vector<8x32xf32>
    %1027 = arith.addf %1025, %1026 : vector<8x32xf32>
    %1028 = arith.negf %1015 : vector<8x32xf32>
    %1029 = math.exp %1028 : vector<8x32xf32>
    %cst_659 = arith.constant 1.000000e+00 : f32
    %1030 = vector.broadcast %cst_659 : f32 to vector<8x32xf32>
    %1031 = arith.addf %1030, %1029 : vector<8x32xf32>
    %1032 = arith.divf %1030, %1031 : vector<8x32xf32>
    %1033 = arith.negf %1019 : vector<8x32xf32>
    %1034 = math.exp %1033 : vector<8x32xf32>
    %cst_660 = arith.constant 1.000000e+00 : f32
    %1035 = vector.broadcast %cst_660 : f32 to vector<8x32xf32>
    %1036 = arith.addf %1035, %1034 : vector<8x32xf32>
    %1037 = arith.divf %1035, %1036 : vector<8x32xf32>
    %1038 = math.tanh %1023 : vector<8x32xf32>
    %1039 = arith.negf %1027 : vector<8x32xf32>
    %1040 = math.exp %1039 : vector<8x32xf32>
    %cst_661 = arith.constant 1.000000e+00 : f32
    %1041 = vector.broadcast %cst_661 : f32 to vector<8x32xf32>
    %1042 = arith.addf %1041, %1040 : vector<8x32xf32>
    %1043 = arith.divf %1041, %1042 : vector<8x32xf32>
    %1044 = arith.mulf %1037, %966 : vector<8x32xf32>
    %1045 = arith.mulf %1032, %1038 : vector<8x32xf32>
    %1046 = arith.addf %1044, %1045 : vector<8x32xf32>
    %1047 = math.tanh %1046 : vector<8x32xf32>
    %1048 = arith.mulf %1043, %1047 : vector<8x32xf32>
    %cst_662 = arith.constant 0.000000e+00 : f32
    %1049 = vector.broadcast %cst_662 : f32 to vector<8x32xf32>
    %1050 = arith.maximumf %1011, %1049 : vector<8x32xf32>
    %1051 = arith.addf %971, %1050 : vector<8x32xf32>
    %cst_663 = arith.constant 0.000000e+00 : f32
    %1052 = vector.broadcast %cst_663 : f32 to vector<8x32xf32>
    %1053 = arith.maximumf %1048, %1052 : vector<8x32xf32>
    %1054 = arith.addf %974, %1053 : vector<8x32xf32>
    %c0_664 = arith.constant 0 : index
    %c24_665 = arith.constant 24 : index
    %c0_666 = arith.constant 0 : index
    %1055 = vector.load %arg11[%c0_664, %c24_665, %c0_666] : memref<8x64x32xf32, #tpu.memory_space<vmem>>, vector<1x8x32xf32>
    %1056 = vector.shape_cast %1055 : vector<1x8x32xf32> to vector<8x32xf32>
    %cst_667 = arith.constant dense<0.000000e+00> : vector<8x32xf32>
    %1057 = tpu.matmul %1011, %796, %cst_667 {dimension_numbers = #tpu.dot_dimension_numbers<[1], [0], [0], [1], [0, 0, 1, 1], [], []>} : vector<8x32xf32>, vector<32x32xf32>, vector<8x32xf32> -> vector<8x32xf32>
    %1058 = arith.addf %1056, %1057 : vector<8x32xf32>
    %c1_668 = arith.constant 1 : index
    %c24_669 = arith.constant 24 : index
    %c0_670 = arith.constant 0 : index
    %1059 = vector.load %arg11[%c1_668, %c24_669, %c0_670] : memref<8x64x32xf32, #tpu.memory_space<vmem>>, vector<1x8x32xf32>
    %1060 = vector.shape_cast %1059 : vector<1x8x32xf32> to vector<8x32xf32>
    %cst_671 = arith.constant dense<0.000000e+00> : vector<8x32xf32>
    %1061 = tpu.matmul %1011, %798, %cst_671 {dimension_numbers = #tpu.dot_dimension_numbers<[1], [0], [0], [1], [0, 0, 1, 1], [], []>} : vector<8x32xf32>, vector<32x32xf32>, vector<8x32xf32> -> vector<8x32xf32>
    %1062 = arith.addf %1060, %1061 : vector<8x32xf32>
    %c2_672 = arith.constant 2 : index
    %c24_673 = arith.constant 24 : index
    %c0_674 = arith.constant 0 : index
    %1063 = vector.load %arg11[%c2_672, %c24_673, %c0_674] : memref<8x64x32xf32, #tpu.memory_space<vmem>>, vector<1x8x32xf32>
    %1064 = vector.shape_cast %1063 : vector<1x8x32xf32> to vector<8x32xf32>
    %cst_675 = arith.constant dense<0.000000e+00> : vector<8x32xf32>
    %1065 = tpu.matmul %1011, %800, %cst_675 {dimension_numbers = #tpu.dot_dimension_numbers<[1], [0], [0], [1], [0, 0, 1, 1], [], []>} : vector<8x32xf32>, vector<32x32xf32>, vector<8x32xf32> -> vector<8x32xf32>
    %1066 = arith.addf %1064, %1065 : vector<8x32xf32>
    %c3_676 = arith.constant 3 : index
    %c24_677 = arith.constant 24 : index
    %c0_678 = arith.constant 0 : index
    %1067 = vector.load %arg11[%c3_676, %c24_677, %c0_678] : memref<8x64x32xf32, #tpu.memory_space<vmem>>, vector<1x8x32xf32>
    %1068 = vector.shape_cast %1067 : vector<1x8x32xf32> to vector<8x32xf32>
    %cst_679 = arith.constant dense<0.000000e+00> : vector<8x32xf32>
    %1069 = tpu.matmul %1011, %802, %cst_679 {dimension_numbers = #tpu.dot_dimension_numbers<[1], [0], [0], [1], [0, 0, 1, 1], [], []>} : vector<8x32xf32>, vector<32x32xf32>, vector<8x32xf32> -> vector<8x32xf32>
    %1070 = arith.addf %1068, %1069 : vector<8x32xf32>
    %1071 = arith.negf %1058 : vector<8x32xf32>
    %1072 = math.exp %1071 : vector<8x32xf32>
    %cst_680 = arith.constant 1.000000e+00 : f32
    %1073 = vector.broadcast %cst_680 : f32 to vector<8x32xf32>
    %1074 = arith.addf %1073, %1072 : vector<8x32xf32>
    %1075 = arith.divf %1073, %1074 : vector<8x32xf32>
    %1076 = arith.negf %1062 : vector<8x32xf32>
    %1077 = math.exp %1076 : vector<8x32xf32>
    %cst_681 = arith.constant 1.000000e+00 : f32
    %1078 = vector.broadcast %cst_681 : f32 to vector<8x32xf32>
    %1079 = arith.addf %1078, %1077 : vector<8x32xf32>
    %1080 = arith.divf %1078, %1079 : vector<8x32xf32>
    %1081 = math.tanh %1066 : vector<8x32xf32>
    %1082 = arith.negf %1070 : vector<8x32xf32>
    %1083 = math.exp %1082 : vector<8x32xf32>
    %cst_682 = arith.constant 1.000000e+00 : f32
    %1084 = vector.broadcast %cst_682 : f32 to vector<8x32xf32>
    %1085 = arith.addf %1084, %1083 : vector<8x32xf32>
    %1086 = arith.divf %1084, %1085 : vector<8x32xf32>
    %1087 = arith.mulf %1080, %1009 : vector<8x32xf32>
    %1088 = arith.mulf %1075, %1081 : vector<8x32xf32>
    %1089 = arith.addf %1087, %1088 : vector<8x32xf32>
    %1090 = math.tanh %1089 : vector<8x32xf32>
    %1091 = arith.mulf %1086, %1090 : vector<8x32xf32>
    %c4_683 = arith.constant 4 : index
    %c32_684 = arith.constant 32 : index
    %c0_685 = arith.constant 0 : index
    %1092 = vector.load %arg11[%c4_683, %c32_684, %c0_685] : memref<8x64x32xf32, #tpu.memory_space<vmem>>, vector<1x8x32xf32>
    %1093 = vector.shape_cast %1092 : vector<1x8x32xf32> to vector<8x32xf32>
    %cst_686 = arith.constant dense<0.000000e+00> : vector<8x32xf32>
    %1094 = tpu.matmul %1048, %804, %cst_686 {dimension_numbers = #tpu.dot_dimension_numbers<[1], [0], [0], [1], [0, 0, 1, 1], [], []>} : vector<8x32xf32>, vector<32x32xf32>, vector<8x32xf32> -> vector<8x32xf32>
    %1095 = arith.addf %1093, %1094 : vector<8x32xf32>
    %c5_687 = arith.constant 5 : index
    %c32_688 = arith.constant 32 : index
    %c0_689 = arith.constant 0 : index
    %1096 = vector.load %arg11[%c5_687, %c32_688, %c0_689] : memref<8x64x32xf32, #tpu.memory_space<vmem>>, vector<1x8x32xf32>
    %1097 = vector.shape_cast %1096 : vector<1x8x32xf32> to vector<8x32xf32>
    %cst_690 = arith.constant dense<0.000000e+00> : vector<8x32xf32>
    %1098 = tpu.matmul %1048, %806, %cst_690 {dimension_numbers = #tpu.dot_dimension_numbers<[1], [0], [0], [1], [0, 0, 1, 1], [], []>} : vector<8x32xf32>, vector<32x32xf32>, vector<8x32xf32> -> vector<8x32xf32>
    %1099 = arith.addf %1097, %1098 : vector<8x32xf32>
    %c6_691 = arith.constant 6 : index
    %c32_692 = arith.constant 32 : index
    %c0_693 = arith.constant 0 : index
    %1100 = vector.load %arg11[%c6_691, %c32_692, %c0_693] : memref<8x64x32xf32, #tpu.memory_space<vmem>>, vector<1x8x32xf32>
    %1101 = vector.shape_cast %1100 : vector<1x8x32xf32> to vector<8x32xf32>
    %cst_694 = arith.constant dense<0.000000e+00> : vector<8x32xf32>
    %1102 = tpu.matmul %1048, %808, %cst_694 {dimension_numbers = #tpu.dot_dimension_numbers<[1], [0], [0], [1], [0, 0, 1, 1], [], []>} : vector<8x32xf32>, vector<32x32xf32>, vector<8x32xf32> -> vector<8x32xf32>
    %1103 = arith.addf %1101, %1102 : vector<8x32xf32>
    %c7_695 = arith.constant 7 : index
    %c32_696 = arith.constant 32 : index
    %c0_697 = arith.constant 0 : index
    %1104 = vector.load %arg11[%c7_695, %c32_696, %c0_697] : memref<8x64x32xf32, #tpu.memory_space<vmem>>, vector<1x8x32xf32>
    %1105 = vector.shape_cast %1104 : vector<1x8x32xf32> to vector<8x32xf32>
    %cst_698 = arith.constant dense<0.000000e+00> : vector<8x32xf32>
    %1106 = tpu.matmul %1048, %810, %cst_698 {dimension_numbers = #tpu.dot_dimension_numbers<[1], [0], [0], [1], [0, 0, 1, 1], [], []>} : vector<8x32xf32>, vector<32x32xf32>, vector<8x32xf32> -> vector<8x32xf32>
    %1107 = arith.addf %1105, %1106 : vector<8x32xf32>
    %1108 = arith.negf %1095 : vector<8x32xf32>
    %1109 = math.exp %1108 : vector<8x32xf32>
    %cst_699 = arith.constant 1.000000e+00 : f32
    %1110 = vector.broadcast %cst_699 : f32 to vector<8x32xf32>
    %1111 = arith.addf %1110, %1109 : vector<8x32xf32>
    %1112 = arith.divf %1110, %1111 : vector<8x32xf32>
    %1113 = arith.negf %1099 : vector<8x32xf32>
    %1114 = math.exp %1113 : vector<8x32xf32>
    %cst_700 = arith.constant 1.000000e+00 : f32
    %1115 = vector.broadcast %cst_700 : f32 to vector<8x32xf32>
    %1116 = arith.addf %1115, %1114 : vector<8x32xf32>
    %1117 = arith.divf %1115, %1116 : vector<8x32xf32>
    %1118 = math.tanh %1103 : vector<8x32xf32>
    %1119 = arith.negf %1107 : vector<8x32xf32>
    %1120 = math.exp %1119 : vector<8x32xf32>
    %cst_701 = arith.constant 1.000000e+00 : f32
    %1121 = vector.broadcast %cst_701 : f32 to vector<8x32xf32>
    %1122 = arith.addf %1121, %1120 : vector<8x32xf32>
    %1123 = arith.divf %1121, %1122 : vector<8x32xf32>
    %1124 = arith.mulf %1117, %1046 : vector<8x32xf32>
    %1125 = arith.mulf %1112, %1118 : vector<8x32xf32>
    %1126 = arith.addf %1124, %1125 : vector<8x32xf32>
    %1127 = math.tanh %1126 : vector<8x32xf32>
    %1128 = arith.mulf %1123, %1127 : vector<8x32xf32>
    %cst_702 = arith.constant 0.000000e+00 : f32
    %1129 = vector.broadcast %cst_702 : f32 to vector<8x32xf32>
    %1130 = arith.maximumf %1091, %1129 : vector<8x32xf32>
    %1131 = arith.addf %1051, %1130 : vector<8x32xf32>
    %cst_703 = arith.constant 0.000000e+00 : f32
    %1132 = vector.broadcast %cst_703 : f32 to vector<8x32xf32>
    %1133 = arith.maximumf %1128, %1132 : vector<8x32xf32>
    %1134 = arith.addf %1054, %1133 : vector<8x32xf32>
    %c0_704 = arith.constant 0 : index
    %c32_705 = arith.constant 32 : index
    %c0_706 = arith.constant 0 : index
    %1135 = vector.load %arg11[%c0_704, %c32_705, %c0_706] : memref<8x64x32xf32, #tpu.memory_space<vmem>>, vector<1x8x32xf32>
    %1136 = vector.shape_cast %1135 : vector<1x8x32xf32> to vector<8x32xf32>
    %cst_707 = arith.constant dense<0.000000e+00> : vector<8x32xf32>
    %1137 = tpu.matmul %1091, %796, %cst_707 {dimension_numbers = #tpu.dot_dimension_numbers<[1], [0], [0], [1], [0, 0, 1, 1], [], []>} : vector<8x32xf32>, vector<32x32xf32>, vector<8x32xf32> -> vector<8x32xf32>
    %1138 = arith.addf %1136, %1137 : vector<8x32xf32>
    %c1_708 = arith.constant 1 : index
    %c32_709 = arith.constant 32 : index
    %c0_710 = arith.constant 0 : index
    %1139 = vector.load %arg11[%c1_708, %c32_709, %c0_710] : memref<8x64x32xf32, #tpu.memory_space<vmem>>, vector<1x8x32xf32>
    %1140 = vector.shape_cast %1139 : vector<1x8x32xf32> to vector<8x32xf32>
    %cst_711 = arith.constant dense<0.000000e+00> : vector<8x32xf32>
    %1141 = tpu.matmul %1091, %798, %cst_711 {dimension_numbers = #tpu.dot_dimension_numbers<[1], [0], [0], [1], [0, 0, 1, 1], [], []>} : vector<8x32xf32>, vector<32x32xf32>, vector<8x32xf32> -> vector<8x32xf32>
    %1142 = arith.addf %1140, %1141 : vector<8x32xf32>
    %c2_712 = arith.constant 2 : index
    %c32_713 = arith.constant 32 : index
    %c0_714 = arith.constant 0 : index
    %1143 = vector.load %arg11[%c2_712, %c32_713, %c0_714] : memref<8x64x32xf32, #tpu.memory_space<vmem>>, vector<1x8x32xf32>
    %1144 = vector.shape_cast %1143 : vector<1x8x32xf32> to vector<8x32xf32>
    %cst_715 = arith.constant dense<0.000000e+00> : vector<8x32xf32>
    %1145 = tpu.matmul %1091, %800, %cst_715 {dimension_numbers = #tpu.dot_dimension_numbers<[1], [0], [0], [1], [0, 0, 1, 1], [], []>} : vector<8x32xf32>, vector<32x32xf32>, vector<8x32xf32> -> vector<8x32xf32>
    %1146 = arith.addf %1144, %1145 : vector<8x32xf32>
    %c3_716 = arith.constant 3 : index
    %c32_717 = arith.constant 32 : index
    %c0_718 = arith.constant 0 : index
    %1147 = vector.load %arg11[%c3_716, %c32_717, %c0_718] : memref<8x64x32xf32, #tpu.memory_space<vmem>>, vector<1x8x32xf32>
    %1148 = vector.shape_cast %1147 : vector<1x8x32xf32> to vector<8x32xf32>
    %cst_719 = arith.constant dense<0.000000e+00> : vector<8x32xf32>
    %1149 = tpu.matmul %1091, %802, %cst_719 {dimension_numbers = #tpu.dot_dimension_numbers<[1], [0], [0], [1], [0, 0, 1, 1], [], []>} : vector<8x32xf32>, vector<32x32xf32>, vector<8x32xf32> -> vector<8x32xf32>
    %1150 = arith.addf %1148, %1149 : vector<8x32xf32>
    %1151 = arith.negf %1138 : vector<8x32xf32>
    %1152 = math.exp %1151 : vector<8x32xf32>
    %cst_720 = arith.constant 1.000000e+00 : f32
    %1153 = vector.broadcast %cst_720 : f32 to vector<8x32xf32>
    %1154 = arith.addf %1153, %1152 : vector<8x32xf32>
    %1155 = arith.divf %1153, %1154 : vector<8x32xf32>
    %1156 = arith.negf %1142 : vector<8x32xf32>
    %1157 = math.exp %1156 : vector<8x32xf32>
    %cst_721 = arith.constant 1.000000e+00 : f32
    %1158 = vector.broadcast %cst_721 : f32 to vector<8x32xf32>
    %1159 = arith.addf %1158, %1157 : vector<8x32xf32>
    %1160 = arith.divf %1158, %1159 : vector<8x32xf32>
    %1161 = math.tanh %1146 : vector<8x32xf32>
    %1162 = arith.negf %1150 : vector<8x32xf32>
    %1163 = math.exp %1162 : vector<8x32xf32>
    %cst_722 = arith.constant 1.000000e+00 : f32
    %1164 = vector.broadcast %cst_722 : f32 to vector<8x32xf32>
    %1165 = arith.addf %1164, %1163 : vector<8x32xf32>
    %1166 = arith.divf %1164, %1165 : vector<8x32xf32>
    %1167 = arith.mulf %1160, %1089 : vector<8x32xf32>
    %1168 = arith.mulf %1155, %1161 : vector<8x32xf32>
    %1169 = arith.addf %1167, %1168 : vector<8x32xf32>
    %1170 = math.tanh %1169 : vector<8x32xf32>
    %1171 = arith.mulf %1166, %1170 : vector<8x32xf32>
    %c4_723 = arith.constant 4 : index
    %c24_724 = arith.constant 24 : index
    %c0_725 = arith.constant 0 : index
    %1172 = vector.load %arg11[%c4_723, %c24_724, %c0_725] : memref<8x64x32xf32, #tpu.memory_space<vmem>>, vector<1x8x32xf32>
    %1173 = vector.shape_cast %1172 : vector<1x8x32xf32> to vector<8x32xf32>
    %cst_726 = arith.constant dense<0.000000e+00> : vector<8x32xf32>
    %1174 = tpu.matmul %1128, %804, %cst_726 {dimension_numbers = #tpu.dot_dimension_numbers<[1], [0], [0], [1], [0, 0, 1, 1], [], []>} : vector<8x32xf32>, vector<32x32xf32>, vector<8x32xf32> -> vector<8x32xf32>
    %1175 = arith.addf %1173, %1174 : vector<8x32xf32>
    %c5_727 = arith.constant 5 : index
    %c24_728 = arith.constant 24 : index
    %c0_729 = arith.constant 0 : index
    %1176 = vector.load %arg11[%c5_727, %c24_728, %c0_729] : memref<8x64x32xf32, #tpu.memory_space<vmem>>, vector<1x8x32xf32>
    %1177 = vector.shape_cast %1176 : vector<1x8x32xf32> to vector<8x32xf32>
    %cst_730 = arith.constant dense<0.000000e+00> : vector<8x32xf32>
    %1178 = tpu.matmul %1128, %806, %cst_730 {dimension_numbers = #tpu.dot_dimension_numbers<[1], [0], [0], [1], [0, 0, 1, 1], [], []>} : vector<8x32xf32>, vector<32x32xf32>, vector<8x32xf32> -> vector<8x32xf32>
    %1179 = arith.addf %1177, %1178 : vector<8x32xf32>
    %c6_731 = arith.constant 6 : index
    %c24_732 = arith.constant 24 : index
    %c0_733 = arith.constant 0 : index
    %1180 = vector.load %arg11[%c6_731, %c24_732, %c0_733] : memref<8x64x32xf32, #tpu.memory_space<vmem>>, vector<1x8x32xf32>
    %1181 = vector.shape_cast %1180 : vector<1x8x32xf32> to vector<8x32xf32>
    %cst_734 = arith.constant dense<0.000000e+00> : vector<8x32xf32>
    %1182 = tpu.matmul %1128, %808, %cst_734 {dimension_numbers = #tpu.dot_dimension_numbers<[1], [0], [0], [1], [0, 0, 1, 1], [], []>} : vector<8x32xf32>, vector<32x32xf32>, vector<8x32xf32> -> vector<8x32xf32>
    %1183 = arith.addf %1181, %1182 : vector<8x32xf32>
    %c7_735 = arith.constant 7 : index
    %c24_736 = arith.constant 24 : index
    %c0_737 = arith.constant 0 : index
    %1184 = vector.load %arg11[%c7_735, %c24_736, %c0_737] : memref<8x64x32xf32, #tpu.memory_space<vmem>>, vector<1x8x32xf32>
    %1185 = vector.shape_cast %1184 : vector<1x8x32xf32> to vector<8x32xf32>
    %cst_738 = arith.constant dense<0.000000e+00> : vector<8x32xf32>
    %1186 = tpu.matmul %1128, %810, %cst_738 {dimension_numbers = #tpu.dot_dimension_numbers<[1], [0], [0], [1], [0, 0, 1, 1], [], []>} : vector<8x32xf32>, vector<32x32xf32>, vector<8x32xf32> -> vector<8x32xf32>
    %1187 = arith.addf %1185, %1186 : vector<8x32xf32>
    %1188 = arith.negf %1175 : vector<8x32xf32>
    %1189 = math.exp %1188 : vector<8x32xf32>
    %cst_739 = arith.constant 1.000000e+00 : f32
    %1190 = vector.broadcast %cst_739 : f32 to vector<8x32xf32>
    %1191 = arith.addf %1190, %1189 : vector<8x32xf32>
    %1192 = arith.divf %1190, %1191 : vector<8x32xf32>
    %1193 = arith.negf %1179 : vector<8x32xf32>
    %1194 = math.exp %1193 : vector<8x32xf32>
    %cst_740 = arith.constant 1.000000e+00 : f32
    %1195 = vector.broadcast %cst_740 : f32 to vector<8x32xf32>
    %1196 = arith.addf %1195, %1194 : vector<8x32xf32>
    %1197 = arith.divf %1195, %1196 : vector<8x32xf32>
    %1198 = math.tanh %1183 : vector<8x32xf32>
    %1199 = arith.negf %1187 : vector<8x32xf32>
    %1200 = math.exp %1199 : vector<8x32xf32>
    %cst_741 = arith.constant 1.000000e+00 : f32
    %1201 = vector.broadcast %cst_741 : f32 to vector<8x32xf32>
    %1202 = arith.addf %1201, %1200 : vector<8x32xf32>
    %1203 = arith.divf %1201, %1202 : vector<8x32xf32>
    %1204 = arith.mulf %1197, %1126 : vector<8x32xf32>
    %1205 = arith.mulf %1192, %1198 : vector<8x32xf32>
    %1206 = arith.addf %1204, %1205 : vector<8x32xf32>
    %1207 = math.tanh %1206 : vector<8x32xf32>
    %1208 = arith.mulf %1203, %1207 : vector<8x32xf32>
    %cst_742 = arith.constant 0.000000e+00 : f32
    %1209 = vector.broadcast %cst_742 : f32 to vector<8x32xf32>
    %1210 = arith.maximumf %1171, %1209 : vector<8x32xf32>
    %1211 = arith.addf %1131, %1210 : vector<8x32xf32>
    %cst_743 = arith.constant 0.000000e+00 : f32
    %1212 = vector.broadcast %cst_743 : f32 to vector<8x32xf32>
    %1213 = arith.maximumf %1208, %1212 : vector<8x32xf32>
    %1214 = arith.addf %1134, %1213 : vector<8x32xf32>
    %c0_744 = arith.constant 0 : index
    %c40_745 = arith.constant 40 : index
    %c0_746 = arith.constant 0 : index
    %1215 = vector.load %arg11[%c0_744, %c40_745, %c0_746] : memref<8x64x32xf32, #tpu.memory_space<vmem>>, vector<1x8x32xf32>
    %1216 = vector.shape_cast %1215 : vector<1x8x32xf32> to vector<8x32xf32>
    %cst_747 = arith.constant dense<0.000000e+00> : vector<8x32xf32>
    %1217 = tpu.matmul %1171, %796, %cst_747 {dimension_numbers = #tpu.dot_dimension_numbers<[1], [0], [0], [1], [0, 0, 1, 1], [], []>} : vector<8x32xf32>, vector<32x32xf32>, vector<8x32xf32> -> vector<8x32xf32>
    %1218 = arith.addf %1216, %1217 : vector<8x32xf32>
    %c1_748 = arith.constant 1 : index
    %c40_749 = arith.constant 40 : index
    %c0_750 = arith.constant 0 : index
    %1219 = vector.load %arg11[%c1_748, %c40_749, %c0_750] : memref<8x64x32xf32, #tpu.memory_space<vmem>>, vector<1x8x32xf32>
    %1220 = vector.shape_cast %1219 : vector<1x8x32xf32> to vector<8x32xf32>
    %cst_751 = arith.constant dense<0.000000e+00> : vector<8x32xf32>
    %1221 = tpu.matmul %1171, %798, %cst_751 {dimension_numbers = #tpu.dot_dimension_numbers<[1], [0], [0], [1], [0, 0, 1, 1], [], []>} : vector<8x32xf32>, vector<32x32xf32>, vector<8x32xf32> -> vector<8x32xf32>
    %1222 = arith.addf %1220, %1221 : vector<8x32xf32>
    %c2_752 = arith.constant 2 : index
    %c40_753 = arith.constant 40 : index
    %c0_754 = arith.constant 0 : index
    %1223 = vector.load %arg11[%c2_752, %c40_753, %c0_754] : memref<8x64x32xf32, #tpu.memory_space<vmem>>, vector<1x8x32xf32>
    %1224 = vector.shape_cast %1223 : vector<1x8x32xf32> to vector<8x32xf32>
    %cst_755 = arith.constant dense<0.000000e+00> : vector<8x32xf32>
    %1225 = tpu.matmul %1171, %800, %cst_755 {dimension_numbers = #tpu.dot_dimension_numbers<[1], [0], [0], [1], [0, 0, 1, 1], [], []>} : vector<8x32xf32>, vector<32x32xf32>, vector<8x32xf32> -> vector<8x32xf32>
    %1226 = arith.addf %1224, %1225 : vector<8x32xf32>
    %c3_756 = arith.constant 3 : index
    %c40_757 = arith.constant 40 : index
    %c0_758 = arith.constant 0 : index
    %1227 = vector.load %arg11[%c3_756, %c40_757, %c0_758] : memref<8x64x32xf32, #tpu.memory_space<vmem>>, vector<1x8x32xf32>
    %1228 = vector.shape_cast %1227 : vector<1x8x32xf32> to vector<8x32xf32>
    %cst_759 = arith.constant dense<0.000000e+00> : vector<8x32xf32>
    %1229 = tpu.matmul %1171, %802, %cst_759 {dimension_numbers = #tpu.dot_dimension_numbers<[1], [0], [0], [1], [0, 0, 1, 1], [], []>} : vector<8x32xf32>, vector<32x32xf32>, vector<8x32xf32> -> vector<8x32xf32>
    %1230 = arith.addf %1228, %1229 : vector<8x32xf32>
    %1231 = arith.negf %1218 : vector<8x32xf32>
    %1232 = math.exp %1231 : vector<8x32xf32>
    %cst_760 = arith.constant 1.000000e+00 : f32
    %1233 = vector.broadcast %cst_760 : f32 to vector<8x32xf32>
    %1234 = arith.addf %1233, %1232 : vector<8x32xf32>
    %1235 = arith.divf %1233, %1234 : vector<8x32xf32>
    %1236 = arith.negf %1222 : vector<8x32xf32>
    %1237 = math.exp %1236 : vector<8x32xf32>
    %cst_761 = arith.constant 1.000000e+00 : f32
    %1238 = vector.broadcast %cst_761 : f32 to vector<8x32xf32>
    %1239 = arith.addf %1238, %1237 : vector<8x32xf32>
    %1240 = arith.divf %1238, %1239 : vector<8x32xf32>
    %1241 = math.tanh %1226 : vector<8x32xf32>
    %1242 = arith.negf %1230 : vector<8x32xf32>
    %1243 = math.exp %1242 : vector<8x32xf32>
    %cst_762 = arith.constant 1.000000e+00 : f32
    %1244 = vector.broadcast %cst_762 : f32 to vector<8x32xf32>
    %1245 = arith.addf %1244, %1243 : vector<8x32xf32>
    %1246 = arith.divf %1244, %1245 : vector<8x32xf32>
    %1247 = arith.mulf %1240, %1169 : vector<8x32xf32>
    %1248 = arith.mulf %1235, %1241 : vector<8x32xf32>
    %1249 = arith.addf %1247, %1248 : vector<8x32xf32>
    %1250 = math.tanh %1249 : vector<8x32xf32>
    %1251 = arith.mulf %1246, %1250 : vector<8x32xf32>
    %c4_763 = arith.constant 4 : index
    %c16_764 = arith.constant 16 : index
    %c0_765 = arith.constant 0 : index
    %1252 = vector.load %arg11[%c4_763, %c16_764, %c0_765] : memref<8x64x32xf32, #tpu.memory_space<vmem>>, vector<1x8x32xf32>
    %1253 = vector.shape_cast %1252 : vector<1x8x32xf32> to vector<8x32xf32>
    %cst_766 = arith.constant dense<0.000000e+00> : vector<8x32xf32>
    %1254 = tpu.matmul %1208, %804, %cst_766 {dimension_numbers = #tpu.dot_dimension_numbers<[1], [0], [0], [1], [0, 0, 1, 1], [], []>} : vector<8x32xf32>, vector<32x32xf32>, vector<8x32xf32> -> vector<8x32xf32>
    %1255 = arith.addf %1253, %1254 : vector<8x32xf32>
    %c5_767 = arith.constant 5 : index
    %c16_768 = arith.constant 16 : index
    %c0_769 = arith.constant 0 : index
    %1256 = vector.load %arg11[%c5_767, %c16_768, %c0_769] : memref<8x64x32xf32, #tpu.memory_space<vmem>>, vector<1x8x32xf32>
    %1257 = vector.shape_cast %1256 : vector<1x8x32xf32> to vector<8x32xf32>
    %cst_770 = arith.constant dense<0.000000e+00> : vector<8x32xf32>
    %1258 = tpu.matmul %1208, %806, %cst_770 {dimension_numbers = #tpu.dot_dimension_numbers<[1], [0], [0], [1], [0, 0, 1, 1], [], []>} : vector<8x32xf32>, vector<32x32xf32>, vector<8x32xf32> -> vector<8x32xf32>
    %1259 = arith.addf %1257, %1258 : vector<8x32xf32>
    %c6_771 = arith.constant 6 : index
    %c16_772 = arith.constant 16 : index
    %c0_773 = arith.constant 0 : index
    %1260 = vector.load %arg11[%c6_771, %c16_772, %c0_773] : memref<8x64x32xf32, #tpu.memory_space<vmem>>, vector<1x8x32xf32>
    %1261 = vector.shape_cast %1260 : vector<1x8x32xf32> to vector<8x32xf32>
    %cst_774 = arith.constant dense<0.000000e+00> : vector<8x32xf32>
    %1262 = tpu.matmul %1208, %808, %cst_774 {dimension_numbers = #tpu.dot_dimension_numbers<[1], [0], [0], [1], [0, 0, 1, 1], [], []>} : vector<8x32xf32>, vector<32x32xf32>, vector<8x32xf32> -> vector<8x32xf32>
    %1263 = arith.addf %1261, %1262 : vector<8x32xf32>
    %c7_775 = arith.constant 7 : index
    %c16_776 = arith.constant 16 : index
    %c0_777 = arith.constant 0 : index
    %1264 = vector.load %arg11[%c7_775, %c16_776, %c0_777] : memref<8x64x32xf32, #tpu.memory_space<vmem>>, vector<1x8x32xf32>
    %1265 = vector.shape_cast %1264 : vector<1x8x32xf32> to vector<8x32xf32>
    %cst_778 = arith.constant dense<0.000000e+00> : vector<8x32xf32>
    %1266 = tpu.matmul %1208, %810, %cst_778 {dimension_numbers = #tpu.dot_dimension_numbers<[1], [0], [0], [1], [0, 0, 1, 1], [], []>} : vector<8x32xf32>, vector<32x32xf32>, vector<8x32xf32> -> vector<8x32xf32>
    %1267 = arith.addf %1265, %1266 : vector<8x32xf32>
    %1268 = arith.negf %1255 : vector<8x32xf32>
    %1269 = math.exp %1268 : vector<8x32xf32>
    %cst_779 = arith.constant 1.000000e+00 : f32
    %1270 = vector.broadcast %cst_779 : f32 to vector<8x32xf32>
    %1271 = arith.addf %1270, %1269 : vector<8x32xf32>
    %1272 = arith.divf %1270, %1271 : vector<8x32xf32>
    %1273 = arith.negf %1259 : vector<8x32xf32>
    %1274 = math.exp %1273 : vector<8x32xf32>
    %cst_780 = arith.constant 1.000000e+00 : f32
    %1275 = vector.broadcast %cst_780 : f32 to vector<8x32xf32>
    %1276 = arith.addf %1275, %1274 : vector<8x32xf32>
    %1277 = arith.divf %1275, %1276 : vector<8x32xf32>
    %1278 = math.tanh %1263 : vector<8x32xf32>
    %1279 = arith.negf %1267 : vector<8x32xf32>
    %1280 = math.exp %1279 : vector<8x32xf32>
    %cst_781 = arith.constant 1.000000e+00 : f32
    %1281 = vector.broadcast %cst_781 : f32 to vector<8x32xf32>
    %1282 = arith.addf %1281, %1280 : vector<8x32xf32>
    %1283 = arith.divf %1281, %1282 : vector<8x32xf32>
    %1284 = arith.mulf %1277, %1206 : vector<8x32xf32>
    %1285 = arith.mulf %1272, %1278 : vector<8x32xf32>
    %1286 = arith.addf %1284, %1285 : vector<8x32xf32>
    %1287 = math.tanh %1286 : vector<8x32xf32>
    %1288 = arith.mulf %1283, %1287 : vector<8x32xf32>
    %cst_782 = arith.constant 0.000000e+00 : f32
    %1289 = vector.broadcast %cst_782 : f32 to vector<8x32xf32>
    %1290 = arith.maximumf %1251, %1289 : vector<8x32xf32>
    %1291 = arith.addf %1211, %1290 : vector<8x32xf32>
    %cst_783 = arith.constant 0.000000e+00 : f32
    %1292 = vector.broadcast %cst_783 : f32 to vector<8x32xf32>
    %1293 = arith.maximumf %1288, %1292 : vector<8x32xf32>
    %1294 = arith.addf %1214, %1293 : vector<8x32xf32>
    %c0_784 = arith.constant 0 : index
    %c48_785 = arith.constant 48 : index
    %c0_786 = arith.constant 0 : index
    %1295 = vector.load %arg11[%c0_784, %c48_785, %c0_786] : memref<8x64x32xf32, #tpu.memory_space<vmem>>, vector<1x8x32xf32>
    %1296 = vector.shape_cast %1295 : vector<1x8x32xf32> to vector<8x32xf32>
    %cst_787 = arith.constant dense<0.000000e+00> : vector<8x32xf32>
    %1297 = tpu.matmul %1251, %796, %cst_787 {dimension_numbers = #tpu.dot_dimension_numbers<[1], [0], [0], [1], [0, 0, 1, 1], [], []>} : vector<8x32xf32>, vector<32x32xf32>, vector<8x32xf32> -> vector<8x32xf32>
    %1298 = arith.addf %1296, %1297 : vector<8x32xf32>
    %c1_788 = arith.constant 1 : index
    %c48_789 = arith.constant 48 : index
    %c0_790 = arith.constant 0 : index
    %1299 = vector.load %arg11[%c1_788, %c48_789, %c0_790] : memref<8x64x32xf32, #tpu.memory_space<vmem>>, vector<1x8x32xf32>
    %1300 = vector.shape_cast %1299 : vector<1x8x32xf32> to vector<8x32xf32>
    %cst_791 = arith.constant dense<0.000000e+00> : vector<8x32xf32>
    %1301 = tpu.matmul %1251, %798, %cst_791 {dimension_numbers = #tpu.dot_dimension_numbers<[1], [0], [0], [1], [0, 0, 1, 1], [], []>} : vector<8x32xf32>, vector<32x32xf32>, vector<8x32xf32> -> vector<8x32xf32>
    %1302 = arith.addf %1300, %1301 : vector<8x32xf32>
    %c2_792 = arith.constant 2 : index
    %c48_793 = arith.constant 48 : index
    %c0_794 = arith.constant 0 : index
    %1303 = vector.load %arg11[%c2_792, %c48_793, %c0_794] : memref<8x64x32xf32, #tpu.memory_space<vmem>>, vector<1x8x32xf32>
    %1304 = vector.shape_cast %1303 : vector<1x8x32xf32> to vector<8x32xf32>
    %cst_795 = arith.constant dense<0.000000e+00> : vector<8x32xf32>
    %1305 = tpu.matmul %1251, %800, %cst_795 {dimension_numbers = #tpu.dot_dimension_numbers<[1], [0], [0], [1], [0, 0, 1, 1], [], []>} : vector<8x32xf32>, vector<32x32xf32>, vector<8x32xf32> -> vector<8x32xf32>
    %1306 = arith.addf %1304, %1305 : vector<8x32xf32>
    %c3_796 = arith.constant 3 : index
    %c48_797 = arith.constant 48 : index
    %c0_798 = arith.constant 0 : index
    %1307 = vector.load %arg11[%c3_796, %c48_797, %c0_798] : memref<8x64x32xf32, #tpu.memory_space<vmem>>, vector<1x8x32xf32>
    %1308 = vector.shape_cast %1307 : vector<1x8x32xf32> to vector<8x32xf32>
    %cst_799 = arith.constant dense<0.000000e+00> : vector<8x32xf32>
    %1309 = tpu.matmul %1251, %802, %cst_799 {dimension_numbers = #tpu.dot_dimension_numbers<[1], [0], [0], [1], [0, 0, 1, 1], [], []>} : vector<8x32xf32>, vector<32x32xf32>, vector<8x32xf32> -> vector<8x32xf32>
    %1310 = arith.addf %1308, %1309 : vector<8x32xf32>
    %1311 = arith.negf %1298 : vector<8x32xf32>
    %1312 = math.exp %1311 : vector<8x32xf32>
    %cst_800 = arith.constant 1.000000e+00 : f32
    %1313 = vector.broadcast %cst_800 : f32 to vector<8x32xf32>
    %1314 = arith.addf %1313, %1312 : vector<8x32xf32>
    %1315 = arith.divf %1313, %1314 : vector<8x32xf32>
    %1316 = arith.negf %1302 : vector<8x32xf32>
    %1317 = math.exp %1316 : vector<8x32xf32>
    %cst_801 = arith.constant 1.000000e+00 : f32
    %1318 = vector.broadcast %cst_801 : f32 to vector<8x32xf32>
    %1319 = arith.addf %1318, %1317 : vector<8x32xf32>
    %1320 = arith.divf %1318, %1319 : vector<8x32xf32>
    %1321 = math.tanh %1306 : vector<8x32xf32>
    %1322 = arith.negf %1310 : vector<8x32xf32>
    %1323 = math.exp %1322 : vector<8x32xf32>
    %cst_802 = arith.constant 1.000000e+00 : f32
    %1324 = vector.broadcast %cst_802 : f32 to vector<8x32xf32>
    %1325 = arith.addf %1324, %1323 : vector<8x32xf32>
    %1326 = arith.divf %1324, %1325 : vector<8x32xf32>
    %1327 = arith.mulf %1320, %1249 : vector<8x32xf32>
    %1328 = arith.mulf %1315, %1321 : vector<8x32xf32>
    %1329 = arith.addf %1327, %1328 : vector<8x32xf32>
    %1330 = math.tanh %1329 : vector<8x32xf32>
    %1331 = arith.mulf %1326, %1330 : vector<8x32xf32>
    %c4_803 = arith.constant 4 : index
    %c8_804 = arith.constant 8 : index
    %c0_805 = arith.constant 0 : index
    %1332 = vector.load %arg11[%c4_803, %c8_804, %c0_805] : memref<8x64x32xf32, #tpu.memory_space<vmem>>, vector<1x8x32xf32>
    %1333 = vector.shape_cast %1332 : vector<1x8x32xf32> to vector<8x32xf32>
    %cst_806 = arith.constant dense<0.000000e+00> : vector<8x32xf32>
    %1334 = tpu.matmul %1288, %804, %cst_806 {dimension_numbers = #tpu.dot_dimension_numbers<[1], [0], [0], [1], [0, 0, 1, 1], [], []>} : vector<8x32xf32>, vector<32x32xf32>, vector<8x32xf32> -> vector<8x32xf32>
    %1335 = arith.addf %1333, %1334 : vector<8x32xf32>
    %c5_807 = arith.constant 5 : index
    %c8_808 = arith.constant 8 : index
    %c0_809 = arith.constant 0 : index
    %1336 = vector.load %arg11[%c5_807, %c8_808, %c0_809] : memref<8x64x32xf32, #tpu.memory_space<vmem>>, vector<1x8x32xf32>
    %1337 = vector.shape_cast %1336 : vector<1x8x32xf32> to vector<8x32xf32>
    %cst_810 = arith.constant dense<0.000000e+00> : vector<8x32xf32>
    %1338 = tpu.matmul %1288, %806, %cst_810 {dimension_numbers = #tpu.dot_dimension_numbers<[1], [0], [0], [1], [0, 0, 1, 1], [], []>} : vector<8x32xf32>, vector<32x32xf32>, vector<8x32xf32> -> vector<8x32xf32>
    %1339 = arith.addf %1337, %1338 : vector<8x32xf32>
    %c6_811 = arith.constant 6 : index
    %c8_812 = arith.constant 8 : index
    %c0_813 = arith.constant 0 : index
    %1340 = vector.load %arg11[%c6_811, %c8_812, %c0_813] : memref<8x64x32xf32, #tpu.memory_space<vmem>>, vector<1x8x32xf32>
    %1341 = vector.shape_cast %1340 : vector<1x8x32xf32> to vector<8x32xf32>
    %cst_814 = arith.constant dense<0.000000e+00> : vector<8x32xf32>
    %1342 = tpu.matmul %1288, %808, %cst_814 {dimension_numbers = #tpu.dot_dimension_numbers<[1], [0], [0], [1], [0, 0, 1, 1], [], []>} : vector<8x32xf32>, vector<32x32xf32>, vector<8x32xf32> -> vector<8x32xf32>
    %1343 = arith.addf %1341, %1342 : vector<8x32xf32>
    %c7_815 = arith.constant 7 : index
    %c8_816 = arith.constant 8 : index
    %c0_817 = arith.constant 0 : index
    %1344 = vector.load %arg11[%c7_815, %c8_816, %c0_817] : memref<8x64x32xf32, #tpu.memory_space<vmem>>, vector<1x8x32xf32>
    %1345 = vector.shape_cast %1344 : vector<1x8x32xf32> to vector<8x32xf32>
    %cst_818 = arith.constant dense<0.000000e+00> : vector<8x32xf32>
    %1346 = tpu.matmul %1288, %810, %cst_818 {dimension_numbers = #tpu.dot_dimension_numbers<[1], [0], [0], [1], [0, 0, 1, 1], [], []>} : vector<8x32xf32>, vector<32x32xf32>, vector<8x32xf32> -> vector<8x32xf32>
    %1347 = arith.addf %1345, %1346 : vector<8x32xf32>
    %1348 = arith.negf %1335 : vector<8x32xf32>
    %1349 = math.exp %1348 : vector<8x32xf32>
    %cst_819 = arith.constant 1.000000e+00 : f32
    %1350 = vector.broadcast %cst_819 : f32 to vector<8x32xf32>
    %1351 = arith.addf %1350, %1349 : vector<8x32xf32>
    %1352 = arith.divf %1350, %1351 : vector<8x32xf32>
    %1353 = arith.negf %1339 : vector<8x32xf32>
    %1354 = math.exp %1353 : vector<8x32xf32>
    %cst_820 = arith.constant 1.000000e+00 : f32
    %1355 = vector.broadcast %cst_820 : f32 to vector<8x32xf32>
    %1356 = arith.addf %1355, %1354 : vector<8x32xf32>
    %1357 = arith.divf %1355, %1356 : vector<8x32xf32>
    %1358 = math.tanh %1343 : vector<8x32xf32>
    %1359 = arith.negf %1347 : vector<8x32xf32>
    %1360 = math.exp %1359 : vector<8x32xf32>
    %cst_821 = arith.constant 1.000000e+00 : f32
    %1361 = vector.broadcast %cst_821 : f32 to vector<8x32xf32>
    %1362 = arith.addf %1361, %1360 : vector<8x32xf32>
    %1363 = arith.divf %1361, %1362 : vector<8x32xf32>
    %1364 = arith.mulf %1357, %1286 : vector<8x32xf32>
    %1365 = arith.mulf %1352, %1358 : vector<8x32xf32>
    %1366 = arith.addf %1364, %1365 : vector<8x32xf32>
    %1367 = math.tanh %1366 : vector<8x32xf32>
    %1368 = arith.mulf %1363, %1367 : vector<8x32xf32>
    %cst_822 = arith.constant 0.000000e+00 : f32
    %1369 = vector.broadcast %cst_822 : f32 to vector<8x32xf32>
    %1370 = arith.maximumf %1331, %1369 : vector<8x32xf32>
    %1371 = arith.addf %1291, %1370 : vector<8x32xf32>
    %cst_823 = arith.constant 0.000000e+00 : f32
    %1372 = vector.broadcast %cst_823 : f32 to vector<8x32xf32>
    %1373 = arith.maximumf %1368, %1372 : vector<8x32xf32>
    %1374 = arith.addf %1294, %1373 : vector<8x32xf32>
    %c0_824 = arith.constant 0 : index
    %c56_825 = arith.constant 56 : index
    %c0_826 = arith.constant 0 : index
    %1375 = vector.load %arg11[%c0_824, %c56_825, %c0_826] : memref<8x64x32xf32, #tpu.memory_space<vmem>>, vector<1x8x32xf32>
    %1376 = vector.shape_cast %1375 : vector<1x8x32xf32> to vector<8x32xf32>
    %cst_827 = arith.constant dense<0.000000e+00> : vector<8x32xf32>
    %1377 = tpu.matmul %1331, %796, %cst_827 {dimension_numbers = #tpu.dot_dimension_numbers<[1], [0], [0], [1], [0, 0, 1, 1], [], []>} : vector<8x32xf32>, vector<32x32xf32>, vector<8x32xf32> -> vector<8x32xf32>
    %1378 = arith.addf %1376, %1377 : vector<8x32xf32>
    %c1_828 = arith.constant 1 : index
    %c56_829 = arith.constant 56 : index
    %c0_830 = arith.constant 0 : index
    %1379 = vector.load %arg11[%c1_828, %c56_829, %c0_830] : memref<8x64x32xf32, #tpu.memory_space<vmem>>, vector<1x8x32xf32>
    %1380 = vector.shape_cast %1379 : vector<1x8x32xf32> to vector<8x32xf32>
    %cst_831 = arith.constant dense<0.000000e+00> : vector<8x32xf32>
    %1381 = tpu.matmul %1331, %798, %cst_831 {dimension_numbers = #tpu.dot_dimension_numbers<[1], [0], [0], [1], [0, 0, 1, 1], [], []>} : vector<8x32xf32>, vector<32x32xf32>, vector<8x32xf32> -> vector<8x32xf32>
    %1382 = arith.addf %1380, %1381 : vector<8x32xf32>
    %c2_832 = arith.constant 2 : index
    %c56_833 = arith.constant 56 : index
    %c0_834 = arith.constant 0 : index
    %1383 = vector.load %arg11[%c2_832, %c56_833, %c0_834] : memref<8x64x32xf32, #tpu.memory_space<vmem>>, vector<1x8x32xf32>
    %1384 = vector.shape_cast %1383 : vector<1x8x32xf32> to vector<8x32xf32>
    %cst_835 = arith.constant dense<0.000000e+00> : vector<8x32xf32>
    %1385 = tpu.matmul %1331, %800, %cst_835 {dimension_numbers = #tpu.dot_dimension_numbers<[1], [0], [0], [1], [0, 0, 1, 1], [], []>} : vector<8x32xf32>, vector<32x32xf32>, vector<8x32xf32> -> vector<8x32xf32>
    %1386 = arith.addf %1384, %1385 : vector<8x32xf32>
    %c3_836 = arith.constant 3 : index
    %c56_837 = arith.constant 56 : index
    %c0_838 = arith.constant 0 : index
    %1387 = vector.load %arg11[%c3_836, %c56_837, %c0_838] : memref<8x64x32xf32, #tpu.memory_space<vmem>>, vector<1x8x32xf32>
    %1388 = vector.shape_cast %1387 : vector<1x8x32xf32> to vector<8x32xf32>
    %cst_839 = arith.constant dense<0.000000e+00> : vector<8x32xf32>
    %1389 = tpu.matmul %1331, %802, %cst_839 {dimension_numbers = #tpu.dot_dimension_numbers<[1], [0], [0], [1], [0, 0, 1, 1], [], []>} : vector<8x32xf32>, vector<32x32xf32>, vector<8x32xf32> -> vector<8x32xf32>
    %1390 = arith.addf %1388, %1389 : vector<8x32xf32>
    %1391 = arith.negf %1378 : vector<8x32xf32>
    %1392 = math.exp %1391 : vector<8x32xf32>
    %cst_840 = arith.constant 1.000000e+00 : f32
    %1393 = vector.broadcast %cst_840 : f32 to vector<8x32xf32>
    %1394 = arith.addf %1393, %1392 : vector<8x32xf32>
    %1395 = arith.divf %1393, %1394 : vector<8x32xf32>
    %1396 = arith.negf %1382 : vector<8x32xf32>
    %1397 = math.exp %1396 : vector<8x32xf32>
    %cst_841 = arith.constant 1.000000e+00 : f32
    %1398 = vector.broadcast %cst_841 : f32 to vector<8x32xf32>
    %1399 = arith.addf %1398, %1397 : vector<8x32xf32>
    %1400 = arith.divf %1398, %1399 : vector<8x32xf32>
    %1401 = math.tanh %1386 : vector<8x32xf32>
    %1402 = arith.negf %1390 : vector<8x32xf32>
    %1403 = math.exp %1402 : vector<8x32xf32>
    %cst_842 = arith.constant 1.000000e+00 : f32
    %1404 = vector.broadcast %cst_842 : f32 to vector<8x32xf32>
    %1405 = arith.addf %1404, %1403 : vector<8x32xf32>
    %1406 = arith.divf %1404, %1405 : vector<8x32xf32>
    %1407 = arith.mulf %1400, %1329 : vector<8x32xf32>
    %1408 = arith.mulf %1395, %1401 : vector<8x32xf32>
    %1409 = arith.addf %1407, %1408 : vector<8x32xf32>
    %1410 = math.tanh %1409 : vector<8x32xf32>
    %1411 = arith.mulf %1406, %1410 : vector<8x32xf32>
    %c4_843 = arith.constant 4 : index
    %c0_844 = arith.constant 0 : index
    %c0_845 = arith.constant 0 : index
    %1412 = vector.load %arg11[%c4_843, %c0_844, %c0_845] : memref<8x64x32xf32, #tpu.memory_space<vmem>>, vector<1x8x32xf32>
    %1413 = vector.shape_cast %1412 : vector<1x8x32xf32> to vector<8x32xf32>
    %cst_846 = arith.constant dense<0.000000e+00> : vector<8x32xf32>
    %1414 = tpu.matmul %1368, %804, %cst_846 {dimension_numbers = #tpu.dot_dimension_numbers<[1], [0], [0], [1], [0, 0, 1, 1], [], []>} : vector<8x32xf32>, vector<32x32xf32>, vector<8x32xf32> -> vector<8x32xf32>
    %1415 = arith.addf %1413, %1414 : vector<8x32xf32>
    %c5_847 = arith.constant 5 : index
    %c0_848 = arith.constant 0 : index
    %c0_849 = arith.constant 0 : index
    %1416 = vector.load %arg11[%c5_847, %c0_848, %c0_849] : memref<8x64x32xf32, #tpu.memory_space<vmem>>, vector<1x8x32xf32>
    %1417 = vector.shape_cast %1416 : vector<1x8x32xf32> to vector<8x32xf32>
    %cst_850 = arith.constant dense<0.000000e+00> : vector<8x32xf32>
    %1418 = tpu.matmul %1368, %806, %cst_850 {dimension_numbers = #tpu.dot_dimension_numbers<[1], [0], [0], [1], [0, 0, 1, 1], [], []>} : vector<8x32xf32>, vector<32x32xf32>, vector<8x32xf32> -> vector<8x32xf32>
    %1419 = arith.addf %1417, %1418 : vector<8x32xf32>
    %c6_851 = arith.constant 6 : index
    %c0_852 = arith.constant 0 : index
    %c0_853 = arith.constant 0 : index
    %1420 = vector.load %arg11[%c6_851, %c0_852, %c0_853] : memref<8x64x32xf32, #tpu.memory_space<vmem>>, vector<1x8x32xf32>
    %1421 = vector.shape_cast %1420 : vector<1x8x32xf32> to vector<8x32xf32>
    %cst_854 = arith.constant dense<0.000000e+00> : vector<8x32xf32>
    %1422 = tpu.matmul %1368, %808, %cst_854 {dimension_numbers = #tpu.dot_dimension_numbers<[1], [0], [0], [1], [0, 0, 1, 1], [], []>} : vector<8x32xf32>, vector<32x32xf32>, vector<8x32xf32> -> vector<8x32xf32>
    %1423 = arith.addf %1421, %1422 : vector<8x32xf32>
    %c7_855 = arith.constant 7 : index
    %c0_856 = arith.constant 0 : index
    %c0_857 = arith.constant 0 : index
    %1424 = vector.load %arg11[%c7_855, %c0_856, %c0_857] : memref<8x64x32xf32, #tpu.memory_space<vmem>>, vector<1x8x32xf32>
    %1425 = vector.shape_cast %1424 : vector<1x8x32xf32> to vector<8x32xf32>
    %cst_858 = arith.constant dense<0.000000e+00> : vector<8x32xf32>
    %1426 = tpu.matmul %1368, %810, %cst_858 {dimension_numbers = #tpu.dot_dimension_numbers<[1], [0], [0], [1], [0, 0, 1, 1], [], []>} : vector<8x32xf32>, vector<32x32xf32>, vector<8x32xf32> -> vector<8x32xf32>
    %1427 = arith.addf %1425, %1426 : vector<8x32xf32>
    %1428 = arith.negf %1415 : vector<8x32xf32>
    %1429 = math.exp %1428 : vector<8x32xf32>
    %cst_859 = arith.constant 1.000000e+00 : f32
    %1430 = vector.broadcast %cst_859 : f32 to vector<8x32xf32>
    %1431 = arith.addf %1430, %1429 : vector<8x32xf32>
    %1432 = arith.divf %1430, %1431 : vector<8x32xf32>
    %1433 = arith.negf %1419 : vector<8x32xf32>
    %1434 = math.exp %1433 : vector<8x32xf32>
    %cst_860 = arith.constant 1.000000e+00 : f32
    %1435 = vector.broadcast %cst_860 : f32 to vector<8x32xf32>
    %1436 = arith.addf %1435, %1434 : vector<8x32xf32>
    %1437 = arith.divf %1435, %1436 : vector<8x32xf32>
    %1438 = math.tanh %1423 : vector<8x32xf32>
    %1439 = arith.negf %1427 : vector<8x32xf32>
    %1440 = math.exp %1439 : vector<8x32xf32>
    %cst_861 = arith.constant 1.000000e+00 : f32
    %1441 = vector.broadcast %cst_861 : f32 to vector<8x32xf32>
    %1442 = arith.addf %1441, %1440 : vector<8x32xf32>
    %1443 = arith.divf %1441, %1442 : vector<8x32xf32>
    %1444 = arith.mulf %1437, %1366 : vector<8x32xf32>
    %1445 = arith.mulf %1432, %1438 : vector<8x32xf32>
    %1446 = arith.addf %1444, %1445 : vector<8x32xf32>
    %1447 = math.tanh %1446 : vector<8x32xf32>
    %1448 = arith.mulf %1443, %1447 : vector<8x32xf32>
    %cst_862 = arith.constant 0.000000e+00 : f32
    %1449 = vector.broadcast %cst_862 : f32 to vector<8x32xf32>
    %1450 = arith.maximumf %1411, %1449 : vector<8x32xf32>
    %1451 = arith.addf %1371, %1450 : vector<8x32xf32>
    %cst_863 = arith.constant 0.000000e+00 : f32
    %1452 = vector.broadcast %cst_863 : f32 to vector<8x32xf32>
    %1453 = arith.maximumf %1448, %1452 : vector<8x32xf32>
    %1454 = arith.addf %1374, %1453 : vector<8x32xf32>
    %c0_864 = arith.constant 0 : index
    %c0_865 = arith.constant 0 : index
    %c0_866 = arith.constant 0 : index
    %1455 = vector.load %arg8[%c0_864, %c0_865, %c0_866] : memref<2x32x3xf32, #tpu.memory_space<vmem>>, vector<1x32x3xf32>
    %1456 = vector.shape_cast %1455 : vector<1x32x3xf32> to vector<32x3xf32>
    %cst_867 = arith.constant dense<0.000000e+00> : vector<8x3xf32>
    %1457 = tpu.matmul %1451, %1456, %cst_867 {dimension_numbers = #tpu.dot_dimension_numbers<[1], [0], [0], [1], [0, 0, 1, 1], [], []>} : vector<8x32xf32>, vector<32x3xf32>, vector<8x3xf32> -> vector<8x3xf32>
    %c1_868 = arith.constant 1 : index
    %c0_869 = arith.constant 0 : index
    %c0_870 = arith.constant 0 : index
    %1458 = vector.load %arg8[%c1_868, %c0_869, %c0_870] : memref<2x32x3xf32, #tpu.memory_space<vmem>>, vector<1x32x3xf32>
    %1459 = vector.shape_cast %1458 : vector<1x32x3xf32> to vector<32x3xf32>
    %cst_871 = arith.constant dense<0.000000e+00> : vector<8x3xf32>
    %1460 = tpu.matmul %1454, %1459, %cst_871 {dimension_numbers = #tpu.dot_dimension_numbers<[1], [0], [0], [1], [0, 0, 1, 1], [], []>} : vector<8x32xf32>, vector<32x3xf32>, vector<8x3xf32> -> vector<8x3xf32>
    %1461 = arith.addf %1457, %1460 : vector<8x3xf32>
    %c0_872 = arith.constant 0 : index
    %c0_873 = arith.constant 0 : index
    %1462 = vector.load %arg9[%c0_872, %c0_873] : memref<1x3xf32, #tpu.memory_space<vmem>>, vector<1x3xf32>
    %cst_874 = arith.constant 8.000000e+00 : f32
    %1463 = vector.broadcast %cst_874 : f32 to vector<1x3xf32>
    %1464 = arith.mulf %1463, %1462 : vector<1x3xf32>
    %1465 = vector.broadcast %1464 : vector<1x3xf32> to vector<8x3xf32>
    %1466 = arith.addf %1461, %1465 : vector<8x3xf32>
    %c0_875 = arith.constant 0 : index
    %c0_876 = arith.constant 0 : index
    %1467 = vector.load %arg10[%c0_875, %c0_876] : memref<8x3xf32, #tpu.memory_space<vmem>>, vector<8x3xf32>
    tpu.vector_store %arg10[%c0_875, %c0_876], %1466 {strides = array<i32>} : memref<8x3xf32, #tpu.memory_space<vmem>>, vector<8x3xf32>,
    return
  }
}

</mosaic_0001>

<bundles_post_ra>
// kernel: lstm_model_forward.1
= control target key start
LH: loop header
LB: loop body
LE: loop exit
PB: predicated region body
PF: predicated region fallthrough
CT: control target
= control target key end

     0   :  { %15 = vsyncpa [#allocation5], 0  ;;  %s19348_s0 = inlined_call_operand.vmem [shape: f32[64,64], index: 0, kind: input, shape index: {}]   ;;  %s19349_s1 = inlined_call_operand.vmem [shape: f32[1,64], index: 1, kind: input, shape index: {}]   ;;  %s19350_s2 = inlined_call_operand.hbm [shape: f32[8,64,32], index: 2, kind: input, shape index: {}]   ;;  %s19351_s3 = inlined_call_operand.hbm [shape: f32[8,32,32], index: 3, kind: input, shape index: {}]   ;;  %s19352_s4 = inlined_call_operand.vmem [shape: f32[8,1,32], index: 4, kind: input, shape index: {}]   ;;  %s19353_s5 = inlined_call_operand.hbm [shape: f32[8,64,32], index: 5, kind: input, shape index: {}]   ;;  %s19354_s6 = inlined_call_operand.hbm [shape: f32[8,32,32], index: 6, kind: input, shape index: {}]   ;;  %s19355_s7 = inlined_call_operand.vmem [shape: f32[8,1,32], index: 7, kind: input, shape index: {}]   ;;  %s19356_s8 = inlined_call_operand.vmem [shape: f32[2,32,3], index: 8, kind: input, shape index: {}]   ;;  %s19357_s9 = inlined_call_operand.vmem [shape: f32[1,3], index: 9, kind: input, shape index: {}]   ;;  %s19358_s10 = inlined_call_operand.vmem [shape: f32[8,3], index: 10, kind: output, shape index: {}]  }
   0x1   :  { %16 = vsyncpa [#allocation7], 0 }
   0x2   :  { %17 = vsyncpa [#allocation10], 0  ;;  %s17459_s13 = smov [#allocation6]   ;;  %s17460_s15 = smov [#allocation4]  }
   0x3   :  { %s39_s14 = sshll.u32 %s17459_s13, 4  ;;  %s27_s16 = sshll.u32 %s17460_s15, 4  ;;  %s40_s14 = int_to_ptr.vmem [resolvable:$true] %s39_s14  ;;  %s17524_s16 = int_to_ptr.vmem [resolvable:$true] %s27_s16 }
   0x4   :  { %s17365_s19 = scalar_lea.hbm %s19351_s3, 4096 }
   0x5   :  { %p17366_p0 = scmp.ne.s32.totalorder %s19351_s3, %s17365_s19  ;;  %p17369_p1 = scmp.lt.u32.totalorder %s17365_s19, %s19351_s3 }
   0x7   :  { %p17371_p2 = pnand %p17369_p1, %p17366_p0 }
   0x9   :  { %17374 = shalt.err (!%p17371_p2)
}
   0xa   :  { %s17375_s24 = scalar_lea.vmem %s40_s14, 4096  ;;  %p17380_p4 = scmp.lt.s32.totalorder %s40_s14, %s40_s14 }
   0xb   :  { %p17376_p3 = scmp.ne.s32.totalorder %s40_s14, %s17375_s24  ;;  %p17381_p5 = scmp.lt.s32.totalorder %s17375_s24, %s17375_s24 }
   0xd   :  { %p17382_p6 = por %p17381_p5, %p17380_p4 }
   0xf   :  { %p17383_p7 = pnand %p17382_p6, %p17376_p3 }
  0x11   :  { %17386 = shalt.err (!%p17383_p7)
}
  0x12   :  { %s17461_s25 = smov 128   ;;  %s17462_s26 = smov 8  }
  0x13   :  { %45 = dma.hbm_to_vmem [thread:$0]  %s19351_s3, 4096, %s40_s14, [#allocation7], %s17461_s25, %s17461_s25, %s17462_s26  }
  0x14   :  { %s17387_s11 = scalar_lea.hbm %s19350_s2, 8192 }
  0x15   :  { %p17388_p8 = scmp.ne.s32.totalorder %s19350_s2, %s17387_s11  ;;  %p17391_p9 = scmp.lt.u32.totalorder %s17387_s11, %s19350_s2 }
  0x17   :  { %p17393_p10 = pnand %p17391_p9, %p17388_p8 }
  0x19   :  { %17396 = shalt.err (!%p17393_p10)
}
  0x1a   :  { %s17397_s18 = scalar_lea.vmem %s17524_s16, 8192  ;;  %p17402_p12 = scmp.lt.s32.totalorder %s17524_s16, %s17524_s16 }
  0x1b   :  { %p17398_p11 = scmp.ne.s32.totalorder %s17524_s16, %s17397_s18  ;;  %p17403_p13 = scmp.lt.s32.totalorder %s17397_s18, %s17397_s18 }
  0x1d   :  { %p17404_p0 = por %p17403_p13, %p17402_p12 }
  0x1f   :  { %p17405_p1 = pnand %p17404_p0, %p17398_p11 }
  0x21   :  { %17408 = shalt.err (!%p17405_p1)
}
  0x22   :  { %33 = dma.hbm_to_vmem [thread:$0]  %s19350_s2, 8192, %s17524_s16, [#allocation5], %s17461_s25, %s17461_s25, %s17462_s26  }
  0x23   :  { %s17463_s19 = smov [#allocation8]   ;;  %s17464_s21 = smov [#allocation9]  }
  0x24   :  { %s53_s20 = sshll.u32 %s17463_s19, 4  ;;  %s65_s22 = sshll.u32 %s17464_s21, 4  ;;  %s54_s20 = int_to_ptr.vmem [resolvable:$true] %s53_s20  ;;  %s17561_s22 = int_to_ptr.vmem [resolvable:$true] %s65_s22 }
  0x25   :  { %s17409_s27 = scalar_lea.hbm %s19353_s5, 8192 }
  0x26   :  { %p17410_p2 = scmp.ne.s32.totalorder %s19353_s5, %s17409_s27  ;;  %p17413_p3 = scmp.lt.u32.totalorder %s17409_s27, %s19353_s5 }
  0x28   :  { %p17415_p4 = pnand %p17413_p3, %p17410_p2 }
  0x2a   :  { %17418 = shalt.err (!%p17415_p4)
}
  0x2b   :  { %s17419_s2 = scalar_lea.vmem %s54_s20, 8192  ;;  %p17424_p6 = scmp.lt.s32.totalorder %s54_s20, %s54_s20 }
  0x2c   :  { %p17420_p5 = scmp.ne.s32.totalorder %s54_s20, %s17419_s2  ;;  %p17425_p7 = scmp.lt.s32.totalorder %s17419_s2, %s17419_s2 }
  0x2e   :  { %p17426_p8 = por %p17425_p7, %p17424_p6 }
  0x30   :  { %p17427_p9 = pnand %p17426_p8, %p17420_p5 }
  0x32   :  { %17430 = shalt.err (!%p17427_p9)
}
  0x33   :  { %59 = dma.hbm_to_vmem [thread:$0]  %s19353_s5, 8192, %s54_s20, [#allocation7], %s17461_s25, %s17461_s25, %s17462_s26  }
  0x34   :  { %s17431_s17 = scalar_lea.hbm %s19354_s6, 4096 }
  0x35   :  { %p17432_p10 = scmp.ne.s32.totalorder %s19354_s6, %s17431_s17  ;;  %p17435_p11 = scmp.lt.u32.totalorder %s17431_s17, %s19354_s6 }
  0x37   :  { %p17437_p12 = pnand %p17435_p11, %p17432_p10 }
  0x39   :  { %17440 = shalt.err (!%p17437_p12)
}
  0x3a   :  { %s17441_s21 = scalar_lea.vmem %s17561_s22, 4096  ;;  %p17446_p0 = scmp.lt.s32.totalorder %s17561_s22, %s17561_s22 }
  0x3b   :  { %p17442_p13 = scmp.ne.s32.totalorder %s17561_s22, %s17441_s21  ;;  %p17447_p1 = scmp.lt.s32.totalorder %s17441_s21, %s17441_s21 }
  0x3d   :  { %p17448_p2 = por %p17447_p1, %p17446_p0 }
  0x3f   :  { %p17449_p3 = pnand %p17448_p2, %p17442_p13 }
  0x41   :  { %17452 = shalt.err (!%p17449_p3)
}
  0x42   :  { %71 = dma.hbm_to_vmem [thread:$0]  %s19354_s6, 4096, %s17561_s22, [#allocation10], %s17461_s25, %s17461_s25, %s17462_s26  }
  0x43   :  { %17453 = dma.done.wait [#allocation5], 8192  }
  0x44   :  { %17454 = vsyncadd [#allocation5], 4294959104 }
  0x45   :  { %17455 = dma.done.wait [#allocation7], 12288  }
  0x46   :  { %17456 = vsyncadd [#allocation7], 4294955008 }
  0x47   :  { %17457 = dma.done.wait [#allocation10], 4096  }
  0x48   :  { %17458 = vsyncadd [#allocation10], 4294963200  ;;  %v113_v0 = vld [vmem:[#allocation4] sm:$0xff]  ;;  %v114_v1 = vld [vmem:[#allocation4 + $0x8] sm:$0xff]  ;;  %vm128_vm0 = vcmask 523264   ;;  %vm17466_vm1 = vmmov 0  }
  0x49   :  { %v268_v2 = vld [vmem:[#allocation4 + $0x40] sm:$0xff]  ;;  %v15807_v3 = vpack.c.bf16 %v114_v1, %v113_v0  ;;  %v269_v4 = vld [vmem:[#allocation4 + $0x48] sm:$0xff]  ;;  %v115_v5 = vld [vmem:[#allocation4 + $0x10] sm:$0xff]  ;;  %vm258_vm2 = vcmask 261120   ;;  %vm1855_vm3 = vcmask 523520   ;;  %vm12641_vm4 = vcmask 23552  }
  0x4a   :  { %v116_v6 = vld [vmem:[#allocation4 + $0x18] sm:$0xff]  ;;  %v15823_v7 = vpack.c.bf16 %v269_v4, %v268_v2  ;;  %v270_v9 = vld [vmem:[#allocation4 + $0x50] sm:$0xff]  ;;  %v117_v11 = vld [vmem:[#allocation4 + $0x20] sm:$0xff] }
  0x4b   :  { %v15811_v8 = vpack.c.bf16 %v116_v6, %v115_v5  ;;  %v271_v10 = vld [vmem:[#allocation4 + $0x58] sm:$0xff]  ;;  %15808 = vmatprep.subr.bf16.mxu0 %v15807_v3  ;;  %v118_v13 = vld [vmem:[#allocation4 + $0x28] sm:$0xff]  ;;  %v272_v14 = vld [vmem:[#allocation4 + $0x60] sm:$0xff] }
  0x4c   :  { %v15827_v12 = vpack.c.bf16 %v271_v10, %v270_v9  ;;  %v273_v15 = vld [vmem:[#allocation4 + $0x68] sm:$0xff]  ;;  %15824 = vmatprep.subr.bf16.mxu1 %v15823_v7  ;;  %15810 = vmatpush3.bf16.msra.mxu0 %v15807_v3  ;;  %v15815_v16 = vpack.c.bf16 %v118_v13, %v117_v11  ;;  %v90_v17 = vld [vmem:[%s19348_s0] sm:$0xff]  ;;  %v119_v20 = vld [vmem:[#allocation4 + $0x30] sm:$0xff] }
  0x4d   :  { %15826 = vmatpush3.bf16.msra.mxu1 %v15823_v7  ;;  %15812 = vmatprep.subr.bf16.mxu0 %v15811_v8  ;;  %v17604_v18 = vld [vmem:[%s19349_s1] ss:$0 sm:$0xff]  ;;  %v15831_v19 = vpack.c.bf16 %v273_v15, %v272_v14  ;;  %v120_v21 = vld [vmem:[#allocation4 + $0x38] sm:$0xff]  ;;  %v274_v23 = vld [vmem:[#allocation4 + $0x70] sm:$0xff] }
  0x4e   :  { %15828 = vmatprep.subr.bf16.mxu1 %v15827_v12  ;;  %v17607_v22 = vmul.f32 %v17604_v18, %v90_v17  ;;  %v275_v24 = vld [vmem:[#allocation4 + $0x78] sm:$0xff]  ;;  %v15819_v25 = vpack.c.bf16 %v120_v21, %v119_v20  ;;  %v399_v27 = vld [vmem:[#allocation4 + $0x80] sm:$0xff]  ;;  %v400_v28 = vld [vmem:[#allocation4 + $0x88] sm:$0xff] }
  0x4f   :  { %v15835_v26 = vpack.c.bf16 %v275_v24, %v274_v23  ;;  %v530_v29 = vld [vmem:[#allocation4 + $0xc0] sm:$0xff]  ;;  %v531_v30 = vld [vmem:[#allocation4 + $0xc8] sm:$0xff]  ;;  %v15839_v32 = vpack.c.bf16 %v400_v28, %v399_v27  ;;  %v92_v34 = vld [vmem:[%s19348_s0 + $0x10] sm:$0xff] }
  0x50   :  { %15814 = vmatpush3.bf16.msra.mxu0 %v15811_v8  ;;  %13945 = vmatprep.mubr.msk.f32.mxu0 %vm128_vm0, %v17607_v22  ;;  %v91_v31 = vld [vmem:[%s19348_s0 + $0x8] sm:$0xff]  ;;  %v15855_v33 = vpack.c.bf16 %v531_v30, %v530_v29  ;;  %v401_v36 = vld [vmem:[#allocation4 + $0x90] sm:$0xff]  ;;  %v402_v37 = vld [vmem:[#allocation4 + $0x98] sm:$0xff]  ;;  %v17626_v41 = vmul.f32 %v17604_v18, %v92_v34 }
  0x51   :  { %15830 = vmatpush3.bf16.msra.mxu1 %v15827_v12  ;;  %15816 = vmatprep.subr.bf16.mxu0 %v15815_v16  ;;  %v17620_v35 = vmul.f32 %v17604_v18, %v91_v31  ;;  %v93_v38 = vld [vmem:[%s19348_s0 + $0x18] sm:$0xff]  ;;  %v532_v39 = vld [vmem:[#allocation4 + $0xd0] sm:$0xff]  ;;  %v15843_v42 = vpack.c.bf16 %v402_v37, %v401_v36  ;;  %v94_v43 = vld [vmem:[%s19348_s0 + $0x20] sm:$0xff] }
  0x52   :  { %15832 = vmatprep.subr.bf16.mxu1 %v15831_v19  ;;  %13973 = vmatprep.mubr.msk.f32.mxu1 %vm128_vm0, %v17607_v22  ;;  %v533_v40 = vld [vmem:[#allocation4 + $0xd8] sm:$0xff]  ;;  %v17634_v44 = vmul.f32 %v17604_v18, %v93_v38  ;;  %v403_v46 = vld [vmem:[#allocation4 + $0xa0] sm:$0xff]  ;;  %v404_v47 = vld [vmem:[#allocation4 + $0xa8] sm:$0xff]  ;;  %v17644_v51 = vmul.f32 %v17604_v18, %v94_v43 }
  0x53   :  { %v15859_v45 = vpack.c.bf16 %v533_v40, %v532_v39  ;;  %v95_v48 = vld [vmem:[%s19348_s0 + $0x28] sm:$0xff]  ;;  %v534_v49 = vld [vmem:[#allocation4 + $0xe0] sm:$0xff]  ;;  %v15847_v52 = vpack.c.bf16 %v404_v47, %v403_v46  ;;  %v96_v53 = vld [vmem:[%s19348_s0 + $0x30] sm:$0xff] }
  0x54   :  { %15818 = vmatpush3.bf16.msra.mxu0 %v15815_v16  ;;  %v535_v50 = vld [vmem:[#allocation4 + $0xe8] sm:$0xff]  ;;  %v17654_v54 = vmul.f32 %v17604_v18, %v95_v48  ;;  %v405_v56 = vld [vmem:[#allocation4 + $0xb0] sm:$0xff]  ;;  %v406_v57 = vld [vmem:[#allocation4 + $0xb8] sm:$0xff]  ;;  %v17664_v61 = vmul.f32 %v17604_v18, %v96_v53 }
  0x55   :  { %15834 = vmatpush3.bf16.msra.mxu1 %v15831_v19  ;;  %15820 = vmatprep.subr.bf16.mxu0 %v15819_v25  ;;  %v15863_v55 = vpack.c.bf16 %v535_v50, %v534_v49  ;;  %v97_v58 = vld [vmem:[%s19348_s0 + $0x38] sm:$0xff]  ;;  %v536_v59 = vld [vmem:[#allocation4 + $0xf0] sm:$0xff]  ;;  %v15851_v62 = vpack.c.bf16 %v406_v57, %v405_v56  ;;  %v661_v1 = vld [vmem:[#allocation4 + $0x100] sm:$0xff] }
  0x56   :  { %15836 = vmatprep.subr.bf16.mxu1 %v15835_v26  ;;  %v537_v60 = vld [vmem:[#allocation4 + $0xf8] sm:$0xff]  ;;  %v17671_v63 = vmul.f32 %v17604_v18, %v97_v58  ;;  %v662_v2 = vld [vmem:[#allocation4 + $0x108] sm:$0xff]  ;;  %v792_v3 = vld [vmem:[#allocation4 + $0x140] sm:$0xff] }
  0x57   :  { %v15867_v0 = vpack.c.bf16 %v537_v60, %v536_v59  ;;  %v793_v4 = vld [vmem:[#allocation4 + $0x148] sm:$0xff]  ;;  %v15871_v5 = vpack.c.bf16 %v662_v2, %v661_v1  ;;  %v663_v7 = vld [vmem:[#allocation4 + $0x110] sm:$0xff]  ;;  %v664_v8 = vld [vmem:[#allocation4 + $0x118] sm:$0xff] }
  0x58   :  { %15822 = vmatpush3.bf16.msra.mxu0 %v15819_v25  ;;  %v15887_v6 = vpack.c.bf16 %v793_v4, %v792_v3  ;;  %v794_v9 = vld [vmem:[#allocation4 + $0x150] sm:$0xff]  ;;  %v795_v10 = vld [vmem:[#allocation4 + $0x158] sm:$0xff]  ;;  %v15875_v11 = vpack.c.bf16 %v664_v8, %v663_v7  ;;  %v665_v13 = vld [vmem:[#allocation4 + $0x120] sm:$0xff] }
  0x59   :  { %15838 = vmatpush3.bf16.msra.mxu1 %v15835_v26  ;;  %15840 = vmatprep.subr.bf16.mxu0 %v15839_v32  ;;  %v15891_v12 = vpack.c.bf16 %v795_v10, %v794_v9  ;;  %v666_v14 = vld [vmem:[#allocation4 + $0x128] sm:$0xff]  ;;  %v796_v15 = vld [vmem:[#allocation4 + $0x160] sm:$0xff]  ;;  %v667_v19 = vld [vmem:[#allocation4 + $0x130] sm:$0xff] }
  0x5a   :  { %15856 = vmatprep.subr.bf16.mxu1 %v15855_v33  ;;  %v797_v16 = vld [vmem:[#allocation4 + $0x168] sm:$0xff]  ;;  %v15879_v17 = vpack.c.bf16 %v666_v14, %v665_v13  ;;  %v668_v20 = vld [vmem:[#allocation4 + $0x138] sm:$0xff]  ;;  %v798_v21 = vld [vmem:[#allocation4 + $0x170] sm:$0xff] }
  0x5b   :  { %13946 = vmatmul.mubr.msk.f32.vlgmr.msra.gmra.mrb[0].mxu0 %vm128_vm0, %v17620_v35  ;;  %v15895_v18 = vpack.c.bf16 %v797_v16, %v796_v15  ;;  %v799_v23 = vld [vmem:[#allocation4 + $0x178] sm:$0xff]  ;;  %v15883_v24 = vpack.c.bf16 %v668_v20, %v667_v19  ;;  %v923_v26 = vld [vmem:[#allocation4 + $0x180] sm:$0xff]  ;;  %v924_v27 = vld [vmem:[#allocation4 + $0x188] sm:$0xff] }
  0x5c   :  { %13974 = vmatmul.mubr.msk.f32.vlgmr.msra.gmra.mrb[0].mxu1 %vm128_vm0, %v17620_v35  ;;  %15842 = vmatpush3.bf16.msra.mxu0 %v15839_v32  ;;  %v15899_v25 = vpack.c.bf16 %v799_v23, %v798_v21  ;;  %v1054_v28 = vld [vmem:[#allocation4 + $0x1c0] sm:$0xff]  ;;  %v1055_v29 = vld [vmem:[#allocation4 + $0x1c8] sm:$0xff]  ;;  %v15903_v30 = vpack.c.bf16 %v924_v27, %v923_v26  ;;  %v925_v32 = vld [vmem:[#allocation4 + $0x190] sm:$0xff] }
  0x5d   :  { %15858 = vmatpush3.bf16.msra.mxu1 %v15855_v33  ;;  %13948 = vmatprep.mubr.msk.f32.mxu0 %vm128_vm0, %v17626_v41  ;;  %v15919_v31 = vpack.c.bf16 %v1055_v29, %v1054_v28  ;;  %v926_v33 = vld [vmem:[#allocation4 + $0x198] sm:$0xff]  ;;  %v1056_v34 = vld [vmem:[#allocation4 + $0x1d0] sm:$0xff]  ;;  %v927_v39 = vld [vmem:[#allocation4 + $0x1a0] sm:$0xff] }
  0x5e   :  { %13976 = vmatprep.mubr.msk.f32.mxu1 %vm128_vm0, %v17626_v41  ;;  %15844 = vmatprep.subr.bf16.mxu0 %v15843_v42  ;;  %v1057_v36 = vld [vmem:[#allocation4 + $0x1d8] sm:$0xff]  ;;  %v15907_v37 = vpack.c.bf16 %v926_v33, %v925_v32  ;;  %v928_v40 = vld [vmem:[#allocation4 + $0x1a8] sm:$0xff]  ;;  %v929_v47 = vld [vmem:[#allocation4 + $0x1b0] sm:$0xff] }
  0x5f   :  { %13949 = vmatmul.mubr.msk.f32.gmra.mrb[2].mxu0 %vm128_vm0, %v17634_v44  ;;  %15860 = vmatprep.subr.bf16.mxu1 %v15859_v45  ;;  %v15923_v38 = vpack.c.bf16 %v1057_v36, %v1056_v34  ;;  %v1059_v43 = vld [vmem:[#allocation4 + $0x1e8] sm:$0xff]  ;;  %v930_v48 = vld [vmem:[#allocation4 + $0x1b8] sm:$0xff]  ;;  %v1060_v49 = vld [vmem:[#allocation4 + $0x1f0] sm:$0xff] }
  0x60   :  { %13977 = vmatmul.mubr.msk.f32.gmra.mrb[2].mxu1 %vm128_vm0, %v17634_v44  ;;  %15846 = vmatpush3.bf16.msra.mxu0 %v15843_v42  ;;  %v1058_v42 = vld [vmem:[#allocation4 + $0x1e0] sm:$0xff]  ;;  %v1061_v50 = vld [vmem:[#allocation4 + $0x1f8] sm:$0xff]  ;;  %v1185_v56 = vld [vmem:[#allocation6 + $0x8] sm:$0xff] }
  0x61   :  { %15862 = vmatpush3.bf16.msra.mxu1 %v15859_v45  ;;  %13951 = vmatprep.mubr.msk.f32.mxu0 %vm128_vm0, %v17644_v51  ;;  %v15911_v45 = vpack.c.bf16 %v928_v40, %v927_v39  ;;  %v15927_v46 = vpack.c.bf16 %v1059_v43, %v1058_v42  ;;  %v15931_v53 = vpack.c.bf16 %v1061_v50, %v1060_v49  ;;  %v1189_v57 = vld [vmem:[#allocation6 + $0x20] sm:$0xff]  ;;  %v1190_v58 = vld [vmem:[#allocation6 + $0x28] sm:$0xff]  ;;  %v1187_v1 = vld [vmem:[#allocation6 + $0x18] sm:$0xff] }
  0x62   :  { %13979 = vmatprep.mubr.msk.f32.mxu1 %vm128_vm0, %v17644_v51  ;;  %15848 = vmatprep.subr.bf16.mxu0 %v15847_v52  ;;  %v17751_v60 = vpack.c.bf16 %v1190_v58, %v1189_v57  ;;  %v1191_v2 = vld [vmem:[#allocation6 + $0x30] sm:$0xff]  ;;  %v1192_v3 = vld [vmem:[#allocation6 + $0x38] sm:$0xff]  ;;  %v1209_v13 = vld [vmem:[#allocation6 + $0xa0] sm:$0xff] }
  0x63   :  { %13952 = vmatmul.mubr.msk.f32.gmra.mrb[4].mxu0 %vm128_vm0, %v17654_v54  ;;  %15864 = vmatprep.subr.bf16.mxu1 %v15863_v55  ;;  %v17770_v4 = vpack.c.bf16 %v1192_v3, %v1191_v2  ;;  %v1197_v7 = vld [vmem:[#allocation6 + $0x58] sm:$0xff]  ;;  %v1201_v8 = vld [vmem:[#allocation6 + $0x70] sm:$0xff]  ;;  %v1210_v14 = vld [vmem:[#allocation6 + $0xa8] sm:$0xff] }
  0x64   :  { %13980 = vmatmul.mubr.msk.f32.gmra.mrb[4].mxu1 %vm128_vm0, %v17654_v54  ;;  %15850 = vmatpush3.bf16.msra.mxu0 %v15847_v52  ;;  %v15915_v52 = vpack.c.bf16 %v930_v48, %v929_v47  ;;  %v1202_v9 = vld [vmem:[#allocation6 + $0x78] sm:$0xff]  ;;  %v17824_v16 = vpack.c.bf16 %v1210_v14, %v1209_v13  ;;  %v1211_v19 = vld [vmem:[#allocation6 + $0xb0] sm:$0xff]  ;;  %v1219_v26 = vld [vmem:[#allocation6 + $0xe0] sm:$0xff] }
  0x65   :  { %15866 = vmatpush3.bf16.msra.mxu1 %v15863_v55  ;;  %13954 = vmatprep.mubr.msk.f32.mxu0 %vm128_vm0, %v17664_v61  ;;  %v1184_v55 = vld [vmem:[#allocation6] sm:$0xff]  ;;  %v17812_v10 = vpack.c.bf16 %v1202_v9, %v1201_v8  ;;  %v1212_v20 = vld [vmem:[#allocation6 + $0xb8] sm:$0xff]  ;;  %v1220_v27 = vld [vmem:[#allocation6 + $0xe8] sm:$0xff] }
  0x66   :  { %13982 = vmatprep.mubr.msk.f32.mxu1 %vm128_vm0, %v17664_v61  ;;  %15852 = vmatprep.subr.bf16.mxu0 %v15851_v62  ;;  %v17747_v59 = vpack.c.bf16 %v1185_v56, %v1184_v55  ;;  %v17834_v23 = vpack.c.bf16 %v1212_v20, %v1211_v19  ;;  %v17846_v29 = vpack.c.bf16 %v1220_v27, %v1219_v26  ;;  %v1221_v32 = vld [vmem:[#allocation6 + $0xf0] sm:$0xff]  ;;  %v1222_v33 = vld [vmem:[#allocation6 + $0xf8] sm:$0xff]  ;;  %v12671_v14 = vld [vmem:[%s19352_s4 + $0x2] ss:$0 sm:$0xff] }
  0x67   :  { %13955 = vmatmul.mubr.msk.f32.gmra.mrb[6].mxu0 %vm128_vm0, %v17671_v63  ;;  %15868 = vmatprep.subr.bf16.mxu1 %v15867_v0  ;;  %v17856_v36 = vpack.c.bf16 %v1222_v33, %v1221_v32 }
  0x68   :  { %13983 = vmatmul.mubr.msk.f32.gmra.mrb[6].mxu1 %vm128_vm0, %v17671_v63  ;;  %15854 = vmatpush3.bf16.msra.mxu0 %v15851_v62  ;;  %v17465_v62 = vmov 0.0|0.0  }
  0x69   :  { %15870 = vmatpush3.bf16.msra.mxu1 %v15867_v0  ;;  %14001 = vmatprep.mubr.msk.f32.mxu0 %vm128_vm0, %v17607_v22  ;;  %v1186_v0 = vld [vmem:[#allocation6 + $0x10] sm:$0xff] }
  0x6a   :  { %14029 = vmatprep.mubr.msk.f32.mxu1 %vm128_vm0, %v17607_v22  ;;  %15872 = vmatprep.subr.bf16.mxu0 %v15871_v5 }
  0x6b   :  { %14002 = vmatmul.mubr.msk.f32.vlgmr.msra.gmra.mrb[8].mxu0 %vm128_vm0, %v17620_v35  ;;  %15888 = vmatprep.subr.bf16.mxu1 %v15887_v6 }
  0x6c   :  { %14030 = vmatmul.mubr.msk.f32.vlgmr.msra.gmra.mrb[8].mxu1 %vm128_vm0, %v17620_v35  ;;  %15874 = vmatpush3.bf16.msra.mxu0 %v15871_v5  ;;  %v17467_v5 = vmov 0.0  }
  0x6d   :  { %15890 = vmatpush3.bf16.msra.mxu1 %v15887_v6  ;;  %14004 = vmatprep.mubr.msk.f32.mxu0 %vm128_vm0, %v17626_v41  ;;  %v1196_v6 = vld [vmem:[#allocation6 + $0x50] sm:$0xff] }
  0x6e   :  { %14032 = vmatprep.mubr.msk.f32.mxu1 %vm128_vm0, %v17626_v41  ;;  %15876 = vmatprep.subr.bf16.mxu0 %v15875_v11 }
  0x6f   :  { %14005 = vmatmul.mubr.msk.f32.gmra.mrb[10].mxu0 %vm128_vm0, %v17634_v44  ;;  %15892 = vmatprep.subr.bf16.mxu1 %v15891_v12 }
  0x70   :  { %14033 = vmatmul.mubr.msk.f32.gmra.mrb[10].mxu1 %vm128_vm0, %v17634_v44  ;;  %15878 = vmatpush3.bf16.msra.mxu0 %v15875_v11  ;;  %v1204_v11 = vld [vmem:[#allocation6 + $0x80] sm:$0xff] }
  0x71   :  { %15894 = vmatpush3.bf16.msra.mxu1 %v15891_v12  ;;  %14007 = vmatprep.mubr.msk.f32.mxu0 %vm128_vm0, %v17644_v51  ;;  %v1205_v12 = vld [vmem:[#allocation6 + $0x88] sm:$0xff] }
  0x72   :  { %14035 = vmatprep.mubr.msk.f32.mxu1 %vm128_vm0, %v17644_v51  ;;  %15880 = vmatprep.subr.bf16.mxu0 %v15879_v17  ;;  %v17820_v15 = vpack.c.bf16 %v1205_v12, %v1204_v11 }
  0x73   :  { %14008 = vmatmul.mubr.msk.f32.gmra.mrb[12].mxu0 %vm128_vm0, %v17654_v54  ;;  %15896 = vmatprep.subr.bf16.mxu1 %v15895_v18 }
  0x74   :  { %14036 = vmatmul.mubr.msk.f32.gmra.mrb[12].mxu1 %vm128_vm0, %v17654_v54  ;;  %15882 = vmatpush3.bf16.msra.mxu0 %v15879_v17  ;;  %v1206_v17 = vld [vmem:[#allocation6 + $0x90] sm:$0xff] }
  0x75   :  { %15898 = vmatpush3.bf16.msra.mxu1 %v15895_v18  ;;  %14010 = vmatprep.mubr.msk.f32.mxu0 %vm128_vm0, %v17664_v61  ;;  %v1207_v18 = vld [vmem:[#allocation6 + $0x98] sm:$0xff] }
  0x76   :  { %14038 = vmatprep.mubr.msk.f32.mxu1 %vm128_vm0, %v17664_v61  ;;  %15884 = vmatprep.subr.bf16.mxu0 %v15883_v24  ;;  %v17830_v21 = vpack.c.bf16 %v1207_v18, %v1206_v17  ;;  %v12681_v18 = vld [vmem:[%s19352_s4 + $0x3] ss:$0 sm:$0xff] }
  0x77   :  { %14011 = vmatmul.mubr.msk.f32.gmra.mrb[14].mxu0 %vm128_vm0, %v17671_v63  ;;  %15900 = vmatprep.subr.bf16.mxu1 %v15899_v25 }
  0x78   :  { %14039 = vmatmul.mubr.msk.f32.gmra.mrb[14].mxu1 %vm128_vm0, %v17671_v63  ;;  %15886 = vmatpush3.bf16.msra.mxu0 %v15883_v24  ;;  %v1214_v24 = vld [vmem:[#allocation6 + $0xc0] sm:$0xff] }
  0x79   :  { %15902 = vmatpush3.bf16.msra.mxu1 %v15899_v25  ;;  %14057 = vmatprep.mubr.msk.f32.mxu0 %vm128_vm0, %v17607_v22  ;;  %v1215_v25 = vld [vmem:[#allocation6 + $0xc8] sm:$0xff] }
  0x7a   :  { %14085 = vmatprep.mubr.msk.f32.mxu1 %vm128_vm0, %v17607_v22  ;;  %15904 = vmatprep.subr.bf16.mxu0 %v15903_v30  ;;  %v17842_v28 = vpack.c.bf16 %v1215_v25, %v1214_v24 }
  0x7b   :  { %14058 = vmatmul.mubr.msk.f32.vlgmr.msra.gmra.mrb[16].mxu0 %vm128_vm0, %v17620_v35  ;;  %15920 = vmatprep.subr.bf16.mxu1 %v15919_v31 }
  0x7c   :  { %14086 = vmatmul.mubr.msk.f32.vlgmr.msra.gmra.mrb[16].mxu1 %vm128_vm0, %v17620_v35  ;;  %15906 = vmatpush3.bf16.msra.mxu0 %v15903_v30  ;;  %v1216_v30 = vld [vmem:[#allocation6 + $0xd0] sm:$0xff] }
  0x7d   :  { %15922 = vmatpush3.bf16.msra.mxu1 %v15919_v31  ;;  %14060 = vmatprep.mubr.msk.f32.mxu0 %vm128_vm0, %v17626_v41  ;;  %v1217_v31 = vld [vmem:[#allocation6 + $0xd8] sm:$0xff] }
  0x7e   :  { %14088 = vmatprep.mubr.msk.f32.mxu1 %vm128_vm0, %v17626_v41  ;;  %15908 = vmatprep.subr.bf16.mxu0 %v15907_v37  ;;  %v17852_v34 = vpack.c.bf16 %v1217_v31, %v1216_v30 }
  0x7f   :  { %14061 = vmatmul.mubr.msk.f32.gmra.mrb[18].mxu0 %vm128_vm0, %v17634_v44  ;;  %15924 = vmatprep.subr.bf16.mxu1 %v15923_v38 }
  0x80   :  { %14089 = vmatmul.mubr.msk.f32.gmra.mrb[18].mxu1 %vm128_vm0, %v17634_v44  ;;  %15910 = vmatpush3.bf16.msra.mxu0 %v15907_v37  ;;  %v12651_v37 = vld [vmem:[%s19352_s4] ss:$0 sm:$0xff] }
  0x81   :  { %15926 = vmatpush3.bf16.msra.mxu1 %v15923_v38  ;;  %14063 = vmatprep.mubr.msk.f32.mxu0 %vm128_vm0, %v17644_v51  ;;  %v12661_v38 = vld [vmem:[%s19352_s4 + $0x1] ss:$0 sm:$0xff] }
  0x82   :  { %14091 = vmatprep.mubr.msk.f32.mxu1 %vm128_vm0, %v17644_v51  ;;  %15912 = vmatprep.subr.bf16.mxu0 %v15911_v45 }
  0x83   :  { %14064 = vmatmul.mubr.msk.f32.gmra.mrb[20].mxu0 %vm128_vm0, %v17654_v54  ;;  %15928 = vmatprep.subr.bf16.mxu1 %v15927_v46 }
  0x84   :  { %14092 = vmatmul.mubr.msk.f32.gmra.mrb[20].mxu1 %vm128_vm0, %v17654_v54  ;;  %15914 = vmatpush3.bf16.msra.mxu0 %v15911_v45 }
  0x85   :  { %15930 = vmatpush3.bf16.msra.mxu1 %v15927_v46  ;;  %14066 = vmatprep.mubr.msk.f32.mxu0 %vm128_vm0, %v17664_v61 }
  0x86   :  { %14094 = vmatprep.mubr.msk.f32.mxu1 %vm128_vm0, %v17664_v61  ;;  %15916 = vmatprep.subr.bf16.mxu0 %v15915_v52 }
  0x87   :  { %14067 = vmatmul.mubr.msk.f32.gmra.mrb[22].mxu0 %vm128_vm0, %v17671_v63  ;;  %15932 = vmatprep.subr.bf16.mxu1 %v15931_v53 }
  0x88   :  { %14095 = vmatmul.mubr.msk.f32.gmra.mrb[22].mxu1 %vm128_vm0, %v17671_v63  ;;  %15918 = vmatpush3.bf16.msra.mxu0 %v15915_v52 }
  0x89   :  { %15934 = vmatpush3.bf16.msra.mxu1 %v15931_v53  ;;  %14113 = vmatprep.mubr.msk.f32.mxu0 %vm128_vm0, %v17607_v22 }
  0x8a   :  { %14141 = vmatprep.mubr.msk.f32.mxu1 %vm128_vm0, %v17607_v22  ;;  %15935 = vmatprep.subr.bf16.mxu0 %v17465_v62  ;;  %v17765_v22 = vpack.c.bf16 %v1187_v1, %v1186_v0 }
  0x8b   :  { %14114 = vmatmul.mubr.msk.f32.vlgmr.msra.gmra.mrb[24].mxu0 %vm128_vm0, %v17620_v35  ;;  %15941 = vmatprep.subr.bf16.mxu1 %v17465_v62 }
  0x8c   :  { %14142 = vmatmul.mubr.msk.f32.vlgmr.msra.gmra.mrb[24].mxu1 %vm128_vm0, %v17620_v35  ;;  %15937 = vmatpush3.bf16.msra.mxu0 %v17747_v59  ;;  %v1194_v35 = vld [vmem:[#allocation6 + $0x40] sm:$0xff] }
  0x8d   :  { %15943 = vmatpush3.bf16.msra.mxu1 %v17751_v60  ;;  %14116 = vmatprep.mubr.msk.f32.mxu0 %vm128_vm0, %v17626_v41 }
  0x8e   :  { %14144 = vmatprep.mubr.msk.f32.mxu1 %vm128_vm0, %v17626_v41  ;;  %15938 = vmatprep.subr.bf16.mxu0 %v17465_v62  ;;  %v1195_v41 = vld [vmem:[#allocation6 + $0x48] sm:$0xff] }
  0x8f   :  { %14117 = vmatmul.mubr.msk.f32.gmra.mrb[26].mxu0 %vm128_vm0, %v17634_v44  ;;  %15944 = vmatprep.subr.bf16.mxu1 %v17465_v62 }
  0x90   :  { %14145 = vmatmul.mubr.msk.f32.gmra.mrb[26].mxu1 %vm128_vm0, %v17634_v44  ;;  %14119 = vmatprep.mubr.msk.f32.mxu0 %vm128_vm0, %v17644_v51  ;;  %v1199_v44 = vld [vmem:[#allocation6 + $0x60] sm:$0xff] }
  0x91   :  { %14147 = vmatprep.mubr.msk.f32.mxu1 %vm128_vm0, %v17644_v51  ;;  %15940 = vmatpush3.bf16.msra.mxu0 %v17765_v22  ;;  %v1200_v51 = vld [vmem:[#allocation6 + $0x68] sm:$0xff] }
  0x92   :  { %15946 = vmatpush3.bf16.msra.mxu1 %v17770_v4  ;;  %15947 = vmatprep.subr.bf16.mxu0 %v17465_v62 }
  0x93   :  { %14120 = vmatmul.mubr.msk.f32.gmra.mrb[28].mxu0 %vm128_vm0, %v17654_v54  ;;  %15953 = vmatprep.subr.bf16.mxu1 %v17465_v62 }
  0x94   :  { %14148 = vmatmul.mubr.msk.f32.gmra.mrb[28].mxu1 %vm128_vm0, %v17654_v54  ;;  %14122 = vmatprep.mubr.msk.f32.mxu0 %vm128_vm0, %v17664_v61  ;;  %v17799_v54 = vpack.c.bf16 %v1195_v41, %v1194_v35 }
  0x95   :  { %14150 = vmatprep.mubr.msk.f32.mxu1 %vm128_vm0, %v17664_v61  ;;  %v17803_v61 = vpack.c.bf16 %v1200_v51, %v1199_v44 }
  0x97   :  { %14123 = vmatmul.mubr.msk.f32.gmra.mrb[30].mxu0 %vm128_vm0, %v17671_v63 }
  0x98   :  { %14151 = vmatmul.mubr.msk.f32.gmra.mrb[30].mxu1 %vm128_vm0, %v17671_v63  ;;  %14161 = vmatprep.mubr.msk.f32.mxu0 %vm17466_vm1, %v17467_v5  ;;  %v17808_v63 = vpack.c.bf16 %v1197_v7, %v1196_v6 }
  0x99   :  { %14172 = vmatprep.mubr.msk.f32.mxu1 %vm17466_vm1, %v17467_v5 }
  0x9b   :  { %14162 = vmatmul.mubr.f32.vlgmr.msra.gmra.mrb[32].mxu0 %v17467_v5 }
  0x9c   :  { %14173 = vmatmul.mubr.f32.vlgmr.msra.gmra.mrb[32].mxu1 %v17467_v5  ;;  %15949 = vmatpush3.bf16.msra.mxu0 %v17799_v54 }
  0x9d   :  { %15955 = vmatpush3.bf16.msra.mxu1 %v17803_v61  ;;  %15950 = vmatprep.subr.bf16.mxu0 %v17465_v62 }
  0x9e   :  { %15956 = vmatprep.subr.bf16.mxu1 %v17465_v62  ;;  %14183 = vmatprep.mubr.msk.f32.mxu0 %vm17466_vm1, %v17467_v5 }
  0x9f   :  { %14194 = vmatprep.mubr.msk.f32.mxu1 %vm17466_vm1, %v17467_v5 }
  0xa0   :  { %15952 = vmatpush3.bf16.msra.mxu0 %v17808_v63 }
  0xa1   :  { %15958 = vmatpush3.bf16.msra.mxu1 %v17812_v10  ;;  %15959 = vmatprep.subr.bf16.mxu0 %v17465_v62 }
  0xa2   :  { %15965 = vmatprep.subr.bf16.mxu1 %v17465_v62 }
  0xa3   :  { %14184 = vmatmul.mubr.f32.vlgmr.msra.gmra.mrb[34].mxu0 %v17467_v5 }
  0xa4   :  { %14195 = vmatmul.mubr.f32.vlgmr.msra.gmra.mrb[34].mxu1 %v17467_v5  ;;  %15961 = vmatpush3.bf16.msra.mxu0 %v17820_v15 }
  0xa5   :  { %15967 = vmatpush3.bf16.msra.mxu1 %v17824_v16  ;;  %15962 = vmatprep.subr.bf16.mxu0 %v17465_v62 }
  0xa6   :  { %15968 = vmatprep.subr.bf16.mxu1 %v17465_v62  ;;  %14205 = vmatprep.mubr.msk.f32.mxu0 %vm17466_vm1, %v17467_v5 }
  0xa7   :  { %14216 = vmatprep.mubr.msk.f32.mxu1 %vm17466_vm1, %v17467_v5 }
  0xa8   :  { %15964 = vmatpush3.bf16.msra.mxu0 %v17830_v21 }
  0xa9   :  { %15970 = vmatpush3.bf16.msra.mxu1 %v17834_v23  ;;  %15971 = vmatprep.subr.bf16.mxu0 %v17465_v62 }
  0xaa   :  { %15977 = vmatprep.subr.bf16.mxu1 %v17465_v62 }
  0xab   :  { %14206 = vmatmul.mubr.f32.vlgmr.msra.gmra.mrb[36].mxu0 %v17467_v5 }
  0xac   :  { %14217 = vmatmul.mubr.f32.vlgmr.msra.gmra.mrb[36].mxu1 %v17467_v5  ;;  %15973 = vmatpush3.bf16.msra.mxu0 %v17842_v28 }
  0xad   :  { %15979 = vmatpush3.bf16.msra.mxu1 %v17846_v29  ;;  %15974 = vmatprep.subr.bf16.mxu0 %v17465_v62 }
  0xae   :  { %15980 = vmatprep.subr.bf16.mxu1 %v17465_v62  ;;  %14227 = vmatprep.mubr.msk.f32.mxu0 %vm17466_vm1, %v17467_v5 }
  0xaf   :  { %14238 = vmatprep.mubr.msk.f32.mxu1 %vm17466_vm1, %v17467_v5 }
  0xb0   :  { %15976 = vmatpush3.bf16.msra.mxu0 %v17852_v34 }
  0xb1   :  { %15982 = vmatpush3.bf16.msra.mxu1 %v17856_v36  ;;  %15983 = vmatprep.subr.bf16.mxu0 %v17465_v62 }
  0xb2   :  { %15989 = vmatprep.subr.bf16.mxu1 %v17465_v62 }
  0xb3   :  { %14228 = vmatmul.mubr.f32.vlgmr.msra.gmra.mrb[38].mxu0 %v17467_v5 }
  0xb4   :  { %14239 = vmatmul.mubr.f32.vlgmr.msra.gmra.mrb[38].mxu1 %v17467_v5  ;;  %15985 = vmatpush3.bf16.msra.mxu0 %v17747_v59 }
  0xb5   :  { %15991 = vmatpush3.bf16.msra.mxu1 %v17751_v60  ;;  %15986 = vmatprep.subr.bf16.mxu0 %v17465_v62 }
  0xb6   :  { %15992 = vmatprep.subr.bf16.mxu1 %v17465_v62  ;;  %14249 = vmatprep.mubr.msk.f32.mxu0 %vm17466_vm1, %v17467_v5 }
  0xb7   :  { %14260 = vmatprep.mubr.msk.f32.mxu1 %vm17466_vm1, %v17467_v5 }
  0xb8   :  { %15988 = vmatpush3.bf16.msra.mxu0 %v17765_v22 }
  0xb9   :  { %15994 = vmatpush3.bf16.msra.mxu1 %v17770_v4  ;;  %15995 = vmatprep.subr.bf16.mxu0 %v17465_v62 }
  0xba   :  { %16001 = vmatprep.subr.bf16.mxu1 %v17465_v62 }
 0x12e   :  { %v13947_v39 = vpop.f32.mrb[0].mxu0 }
 0x12f   :  { %v225_v40 = vadd.f32 %v13947_v39, %v12651_v37  ;;  %v13975_v42 = vpop.f32.mrb[0].mxu1  ;;  %v219_v43 = vpop.f32.mrb[1].mxu0 }
 0x130   :  { %v356_v45 = vadd.f32 %v13975_v42, %v12661_v38  ;;  %v220_v46 = vadd.f32 %v12651_v37, %v219_v43  ;;  %v350_v47 = vpop.f32.mrb[1].mxu1 }
 0x131   :  { %260 = vst.msk [vmem:[#allocation2 + $0x8] sm:$0xff] %vm258_vm2, %v225_v40  ;;  %v351_v48 = vadd.f32 %v12661_v38, %v350_v47 }
 0x132   :  { %391 = vst.msk [vmem:[#allocation2 + $0x48] sm:$0xff] %vm258_vm2, %v356_v45  ;;  %259 = vst.msk [vmem:[#allocation2] sm:$0xff] %vm258_vm2, %v220_v46  ;;  %v13950_v49 = vpop.f32.mrb[2].mxu0 }
 0x133   :  { %390 = vst.msk [vmem:[#allocation2 + $0x40] sm:$0xff] %vm258_vm2, %v351_v48  ;;  %v235_v50 = vadd.f32 %v13950_v49, %v12651_v37  ;;  %v13978_v52 = vpop.f32.mrb[2].mxu1  ;;  %v229_v53 = vpop.f32.mrb[3].mxu0 }
 0x134   :  { %v366_v55 = vadd.f32 %v13978_v52, %v12661_v38  ;;  %v230_v56 = vadd.f32 %v12651_v37, %v229_v53  ;;  %v360_v57 = vpop.f32.mrb[3].mxu1 }
 0x135   :  { %262 = vst.msk [vmem:[#allocation2 + $0x18] sm:$0xff] %vm258_vm2, %v235_v50  ;;  %v361_v58 = vadd.f32 %v12661_v38, %v360_v57 }
 0x136   :  { %393 = vst.msk [vmem:[#allocation2 + $0x58] sm:$0xff] %vm258_vm2, %v366_v55  ;;  %261 = vst.msk [vmem:[#allocation2 + $0x10] sm:$0xff] %vm258_vm2, %v230_v56  ;;  %v13953_v0 = vpop.f32.mrb[4].mxu0 }
 0x137   :  { %392 = vst.msk [vmem:[#allocation2 + $0x50] sm:$0xff] %vm258_vm2, %v361_v58  ;;  %v245_v1 = vadd.f32 %v13953_v0, %v12651_v37  ;;  %v13981_v2 = vpop.f32.mrb[4].mxu1  ;;  %v239_v3 = vpop.f32.mrb[5].mxu0 }
 0x138   :  { %v376_v35 = vadd.f32 %v13981_v2, %v12661_v38  ;;  %v240_v41 = vadd.f32 %v12651_v37, %v239_v3  ;;  %v370_v44 = vpop.f32.mrb[5].mxu1  ;;  %v12691_v3 = vld [vmem:[%s19352_s4 + $0x4] ss:$0 sm:$0xff] }
 0x139   :  { %264 = vst.msk [vmem:[#allocation2 + $0x28] sm:$0xff] %vm258_vm2, %v245_v1  ;;  %v371_v51 = vadd.f32 %v12661_v38, %v370_v44 }
 0x13a   :  { %395 = vst.msk [vmem:[#allocation2 + $0x68] sm:$0xff] %vm258_vm2, %v376_v35  ;;  %263 = vst.msk [vmem:[#allocation2 + $0x20] sm:$0xff] %vm258_vm2, %v240_v41  ;;  %v13956_v6 = vpop.f32.mrb[6].mxu0  ;;  %v12701_v41 = vld [vmem:[%s19352_s4 + $0x5] ss:$0 sm:$0xff] }
 0x13b   :  { %394 = vst.msk [vmem:[#allocation2 + $0x60] sm:$0xff] %vm258_vm2, %v371_v51  ;;  %v255_v7 = vadd.f32 %v13956_v6, %v12651_v37  ;;  %v13984_v8 = vpop.f32.mrb[6].mxu1  ;;  %v249_v9 = vpop.f32.mrb[7].mxu0 }
 0x13c   :  { %v386_v11 = vadd.f32 %v13984_v8, %v12661_v38  ;;  %v250_v12 = vadd.f32 %v12651_v37, %v249_v9  ;;  %v380_v13 = vpop.f32.mrb[7].mxu1 }
 0x13d   :  { %266 = vst.msk [vmem:[#allocation2 + $0x38] sm:$0xff] %vm258_vm2, %v255_v7  ;;  %v381_v17 = vadd.f32 %v12661_v38, %v380_v13 }
 0x13e   :  { %397 = vst.msk [vmem:[#allocation2 + $0x78] sm:$0xff] %vm258_vm2, %v386_v11  ;;  %265 = vst.msk [vmem:[#allocation2 + $0x30] sm:$0xff] %vm258_vm2, %v250_v12  ;;  %v14003_v19 = vpop.f32.mrb[8].mxu0 }
 0x13f   :  { %396 = vst.msk [vmem:[#allocation2 + $0x70] sm:$0xff] %vm258_vm2, %v381_v17  ;;  %v487_v20 = vadd.f32 %v14003_v19, %v12671_v14  ;;  %v14031_v24 = vpop.f32.mrb[8].mxu1  ;;  %v481_v25 = vpop.f32.mrb[9].mxu0 }
 0x140   :  { %v618_v26 = vadd.f32 %v14031_v24, %v12681_v18  ;;  %v482_v27 = vadd.f32 %v12671_v14, %v481_v25  ;;  %v612_v30 = vpop.f32.mrb[9].mxu1 }
 0x141   :  { %522 = vst.msk [vmem:[#allocation2 + $0x88] sm:$0xff] %vm258_vm2, %v487_v20  ;;  %v613_v31 = vadd.f32 %v12681_v18, %v612_v30 }
 0x142   :  { %653 = vst.msk [vmem:[#allocation2 + $0xc8] sm:$0xff] %vm258_vm2, %v618_v26  ;;  %521 = vst.msk [vmem:[#allocation2 + $0x80] sm:$0xff] %vm258_vm2, %v482_v27  ;;  %v14006_v32 = vpop.f32.mrb[10].mxu0 }
 0x143   :  { %652 = vst.msk [vmem:[#allocation2 + $0xc0] sm:$0xff] %vm258_vm2, %v613_v31  ;;  %v497_v33 = vadd.f32 %v14006_v32, %v12671_v14  ;;  %v14034_v37 = vpop.f32.mrb[10].mxu1  ;;  %v491_v38 = vpop.f32.mrb[11].mxu0 }
 0x144   :  { %v628_v39 = vadd.f32 %v14034_v37, %v12681_v18  ;;  %v492_v40 = vadd.f32 %v12671_v14, %v491_v38  ;;  %v622_v42 = vpop.f32.mrb[11].mxu1 }
 0x145   :  { %524 = vst.msk [vmem:[#allocation2 + $0x98] sm:$0xff] %vm258_vm2, %v497_v33  ;;  %v623_v43 = vadd.f32 %v12681_v18, %v622_v42 }
 0x146   :  { %655 = vst.msk [vmem:[#allocation2 + $0xd8] sm:$0xff] %vm258_vm2, %v628_v39  ;;  %523 = vst.msk [vmem:[#allocation2 + $0x90] sm:$0xff] %vm258_vm2, %v492_v40  ;;  %v14009_v45 = vpop.f32.mrb[12].mxu0 }
 0x147   :  { %654 = vst.msk [vmem:[#allocation2 + $0xd0] sm:$0xff] %vm258_vm2, %v623_v43  ;;  %v507_v46 = vadd.f32 %v14009_v45, %v12671_v14  ;;  %v14037_v47 = vpop.f32.mrb[12].mxu1  ;;  %v501_v48 = vpop.f32.mrb[13].mxu0 }
 0x148   :  { %v638_v49 = vadd.f32 %v14037_v47, %v12681_v18  ;;  %v502_v50 = vadd.f32 %v12671_v14, %v501_v48  ;;  %v632_v52 = vpop.f32.mrb[13].mxu1  ;;  %v12711_v48 = vld [vmem:[%s19352_s4 + $0x6] ss:$0 sm:$0xff] }
 0x149   :  { %526 = vst.msk [vmem:[#allocation2 + $0xa8] sm:$0xff] %vm258_vm2, %v507_v46  ;;  %v633_v53 = vadd.f32 %v12681_v18, %v632_v52 }
 0x14a   :  { %657 = vst.msk [vmem:[#allocation2 + $0xe8] sm:$0xff] %vm258_vm2, %v638_v49  ;;  %525 = vst.msk [vmem:[#allocation2 + $0xa0] sm:$0xff] %vm258_vm2, %v502_v50  ;;  %v14012_v55 = vpop.f32.mrb[14].mxu0  ;;  %v12721_v50 = vld [vmem:[%s19352_s4 + $0x7] ss:$0 sm:$0xff]  ;;  %s17468_s4 = smov 32  }
 0x14b   :  { %656 = vst.msk [vmem:[#allocation2 + $0xe0] sm:$0xff] %vm258_vm2, %v633_v53  ;;  %v517_v56 = vadd.f32 %v14012_v55, %v12671_v14  ;;  %v14040_v57 = vpop.f32.mrb[14].mxu1  ;;  %v511_v58 = vpop.f32.mrb[15].mxu0 }
 0x14c   :  { %v648_v0 = vadd.f32 %v14040_v57, %v12681_v18  ;;  %v512_v1 = vadd.f32 %v12671_v14, %v511_v58  ;;  %v642_v2 = vpop.f32.mrb[15].mxu1 }
 0x14d   :  { %528 = vst.msk [vmem:[#allocation2 + $0xb8] sm:$0xff] %vm258_vm2, %v517_v56  ;;  %v643_v35 = vadd.f32 %v12681_v18, %v642_v2 }
 0x14e   :  { %659 = vst.msk [vmem:[#allocation2 + $0xf8] sm:$0xff] %vm258_vm2, %v648_v0  ;;  %527 = vst.msk [vmem:[#allocation2 + $0xb0] sm:$0xff] %vm258_vm2, %v512_v1  ;;  %v14059_v44 = vpop.f32.mrb[16].mxu0 }
 0x14f   :  { %658 = vst.msk [vmem:[#allocation2 + $0xf0] sm:$0xff] %vm258_vm2, %v643_v35  ;;  %v749_v51 = vadd.f32 %v14059_v44, %v12691_v3  ;;  %v14087_v6 = vpop.f32.mrb[16].mxu1  ;;  %v743_v7 = vpop.f32.mrb[17].mxu0 }
 0x150   :  { %v880_v8 = vadd.f32 %v14087_v6, %v12701_v41  ;;  %v744_v9 = vadd.f32 %v12691_v3, %v743_v7  ;;  %v874_v11 = vpop.f32.mrb[17].mxu1 }
 0x151   :  { %784 = vst.msk [vmem:[#allocation2 + $0x108] sm:$0xff] %vm258_vm2, %v749_v51  ;;  %v875_v12 = vadd.f32 %v12701_v41, %v874_v11 }
 0x152   :  { %915 = vst.msk [vmem:[#allocation2 + $0x148] sm:$0xff] %vm258_vm2, %v880_v8  ;;  %783 = vst.msk [vmem:[#allocation2 + $0x100] sm:$0xff] %vm258_vm2, %v744_v9  ;;  %v14062_v13 = vpop.f32.mrb[18].mxu0 }
 0x153   :  { %914 = vst.msk [vmem:[#allocation2 + $0x140] sm:$0xff] %vm258_vm2, %v875_v12  ;;  %v759_v14 = vadd.f32 %v14062_v13, %v12691_v3  ;;  %v14090_v17 = vpop.f32.mrb[18].mxu1  ;;  %v753_v18 = vpop.f32.mrb[19].mxu0 }
 0x154   :  { %v890_v19 = vadd.f32 %v14090_v17, %v12701_v41  ;;  %v754_v20 = vadd.f32 %v12691_v3, %v753_v18  ;;  %v884_v24 = vpop.f32.mrb[19].mxu1 }
 0x155   :  { %786 = vst.msk [vmem:[#allocation2 + $0x118] sm:$0xff] %vm258_vm2, %v759_v14  ;;  %v885_v25 = vadd.f32 %v12701_v41, %v884_v24 }
 0x156   :  { %917 = vst.msk [vmem:[#allocation2 + $0x158] sm:$0xff] %vm258_vm2, %v890_v19  ;;  %785 = vst.msk [vmem:[#allocation2 + $0x110] sm:$0xff] %vm258_vm2, %v754_v20  ;;  %v14065_v26 = vpop.f32.mrb[20].mxu0 }
 0x157   :  { %916 = vst.msk [vmem:[#allocation2 + $0x150] sm:$0xff] %vm258_vm2, %v885_v25  ;;  %v769_v27 = vadd.f32 %v14065_v26, %v12691_v3  ;;  %v14093_v30 = vpop.f32.mrb[20].mxu1  ;;  %v763_v31 = vpop.f32.mrb[21].mxu0 }
 0x158   :  { %v900_v32 = vadd.f32 %v14093_v30, %v12701_v41  ;;  %v764_v33 = vadd.f32 %v12691_v3, %v763_v31  ;;  %v894_v37 = vpop.f32.mrb[21].mxu1 }
 0x159   :  { %788 = vst.msk [vmem:[#allocation2 + $0x128] sm:$0xff] %vm258_vm2, %v769_v27  ;;  %v895_v38 = vadd.f32 %v12701_v41, %v894_v37 }
 0x15a   :  { %919 = vst.msk [vmem:[#allocation2 + $0x168] sm:$0xff] %vm258_vm2, %v900_v32  ;;  %787 = vst.msk [vmem:[#allocation2 + $0x120] sm:$0xff] %vm258_vm2, %v764_v33  ;;  %v14068_v39 = vpop.f32.mrb[22].mxu0  ;;  %v1223_v32 = vld [vmem:[#allocation2] sm:$0xff] }
 0x15b   :  { %918 = vst.msk [vmem:[#allocation2 + $0x160] sm:$0xff] %vm258_vm2, %v895_v38  ;;  %v779_v40 = vadd.f32 %v14068_v39, %v12691_v3  ;;  %v14096_v42 = vpop.f32.mrb[22].mxu1  ;;  %v773_v43 = vpop.f32.mrb[23].mxu0  ;;  %v1298_v38 = vld [vmem:[#allocation2 + $0x40] sm:$0xff] }
 0x15c   :  { %v910_v45 = vadd.f32 %v14096_v42, %v12701_v41  ;;  %v774_v46 = vadd.f32 %v12691_v3, %v773_v43  ;;  %v904_v47 = vpop.f32.mrb[23].mxu1 }
 0x15d   :  { %790 = vst.msk [vmem:[#allocation2 + $0x138] sm:$0xff] %vm258_vm2, %v779_v40  ;;  %v905_v49 = vadd.f32 %v12701_v41, %v904_v47 }
 0x15e   :  { %921 = vst.msk [vmem:[#allocation2 + $0x178] sm:$0xff] %vm258_vm2, %v910_v45  ;;  %789 = vst.msk [vmem:[#allocation2 + $0x130] sm:$0xff] %vm258_vm2, %v774_v46  ;;  %v14115_v52 = vpop.f32.mrb[24].mxu0 }
 0x15f   :  { %920 = vst.msk [vmem:[#allocation2 + $0x170] sm:$0xff] %vm258_vm2, %v905_v49  ;;  %v1011_v53 = vadd.f32 %v14115_v52, %v12711_v48  ;;  %v14143_v55 = vpop.f32.mrb[24].mxu1  ;;  %v1005_v56 = vpop.f32.mrb[25].mxu0 }
 0x160   :  { %v1142_v57 = vadd.f32 %v14143_v55, %v12721_v50  ;;  %v1006_v58 = vadd.f32 %v12711_v48, %v1005_v56  ;;  %v1136_v0 = vpop.f32.mrb[25].mxu1  ;;  %v1370_v55 = vld [vmem:[#allocation2 + $0x80] sm:$0xff] }
 0x161   :  { %1046 = vst.msk [vmem:[#allocation2 + $0x188] sm:$0xff] %vm258_vm2, %v1011_v53  ;;  %v1137_v1 = vadd.f32 %v12721_v50, %v1136_v0 }
 0x162   :  { %1177 = vst.msk [vmem:[#allocation2 + $0x1c8] sm:$0xff] %vm258_vm2, %v1142_v57  ;;  %1045 = vst.msk [vmem:[#allocation2 + $0x180] sm:$0xff] %vm258_vm2, %v1006_v58  ;;  %v14118_v2 = vpop.f32.mrb[26].mxu0 }
 0x163   :  { %1176 = vst.msk [vmem:[#allocation2 + $0x1c0] sm:$0xff] %vm258_vm2, %v1137_v1  ;;  %v1021_v3 = vadd.f32 %v14118_v2, %v12711_v48  ;;  %v14146_v35 = vpop.f32.mrb[26].mxu1  ;;  %v1015_v41 = vpop.f32.mrb[27].mxu0 }
 0x164   :  { %v1152_v44 = vadd.f32 %v14146_v35, %v12721_v50  ;;  %v1016_v51 = vadd.f32 %v12711_v48, %v1015_v41  ;;  %v1146_v6 = vpop.f32.mrb[27].mxu1  ;;  %v1538_v2 = vld [vmem:[#allocation2 + $0x138] sm:$0xff] }
 0x165   :  { %1048 = vst.msk [vmem:[#allocation2 + $0x198] sm:$0xff] %vm258_vm2, %v1021_v3  ;;  %v1147_v7 = vadd.f32 %v12721_v50, %v1146_v6 }
 0x166   :  { %1179 = vst.msk [vmem:[#allocation2 + $0x1d8] sm:$0xff] %vm258_vm2, %v1152_v44  ;;  %1047 = vst.msk [vmem:[#allocation2 + $0x190] sm:$0xff] %vm258_vm2, %v1016_v51  ;;  %v14121_v8 = vpop.f32.mrb[28].mxu0  ;;  %v1610_v44 = vld [vmem:[#allocation2 + $0x178] sm:$0xff] }
 0x167   :  { %1178 = vst.msk [vmem:[#allocation2 + $0x1d0] sm:$0xff] %vm258_vm2, %v1147_v7  ;;  %v1031_v9 = vadd.f32 %v14121_v8, %v12711_v48  ;;  %v14149_v11 = vpop.f32.mrb[28].mxu1  ;;  %v1025_v12 = vpop.f32.mrb[29].mxu0 }
 0x168   :  { %v1162_v13 = vadd.f32 %v14149_v11, %v12721_v50  ;;  %v1026_v14 = vadd.f32 %v12711_v48, %v1025_v12  ;;  %v1156_v17 = vpop.f32.mrb[29].mxu1 }
 0x169   :  { %1050 = vst.msk [vmem:[#allocation2 + $0x1a8] sm:$0xff] %vm258_vm2, %v1031_v9  ;;  %v1157_v18 = vadd.f32 %v12721_v50, %v1156_v17 }
 0x16a   :  { %1181 = vst.msk [vmem:[#allocation2 + $0x1e8] sm:$0xff] %vm258_vm2, %v1162_v13  ;;  %1049 = vst.msk [vmem:[#allocation2 + $0x1a0] sm:$0xff] %vm258_vm2, %v1026_v14  ;;  %v14124_v19 = vpop.f32.mrb[30].mxu0 }
 0x16b   :  { %1180 = vst.msk [vmem:[#allocation2 + $0x1e0] sm:$0xff] %vm258_vm2, %v1157_v18  ;;  %v1041_v20 = vadd.f32 %v14124_v19, %v12711_v48  ;;  %v14152_v24 = vpop.f32.mrb[30].mxu1  ;;  %v1035_v25 = vpop.f32.mrb[31].mxu0 }
 0x16c   :  { %v1172_v26 = vadd.f32 %v14152_v24, %v12721_v50  ;;  %v1036_v27 = vadd.f32 %v12711_v48, %v1035_v25  ;;  %v1166_v30 = vpop.f32.mrb[31].mxu1  ;;  %v1442_v48 = vld [vmem:[#allocation2 + $0xc0] sm:$0xff] }
 0x16d   :  { %1052 = vst.msk [vmem:[#allocation2 + $0x1b8] sm:$0xff] %vm258_vm2, %v1041_v20  ;;  %v1167_v31 = vadd.f32 %v12721_v50, %v1166_v30 }
 0x16e   :  { %1183 = vst.msk [vmem:[#allocation2 + $0x1f8] sm:$0xff] %vm258_vm2, %v1172_v26  ;;  %1051 = vst.msk [vmem:[#allocation2 + $0x1b0] sm:$0xff] %vm258_vm2, %v1036_v27  ;;  %v1293_v33 = vpop.f32.mrb[32].mxu0 }
 0x16f   :  { %1182 = vst.msk [vmem:[#allocation2 + $0x1f0] sm:$0xff] %vm258_vm2, %v1167_v31  ;;  %v1297_v37 = vadd.f32 %v1293_v33, %v1223_v32  ;;  %v1365_v39 = vpop.f32.mrb[32].mxu1  ;;  %v14163_v40 = vpop.f32.mrb[33].mxu0 }
 0x170   :  { %v1369_v42 = vadd.f32 %v1365_v39, %v1298_v38  ;;  %v14174_v43 = vpop.f32.mrb[33].mxu1 }
 0x171   :  { %v12730_v45 = vmul.f32 -1.442695, %v1297_v37 }
 0x172   :  { %v12731_v46 = vmul.f32 -1.442695, %v1369_v42 }
 0x173   :  { %16853 = vpow2.f32 %v12730_v45 }
 0x174   :  { %16855 = vpow2.f32 %v12731_v46  ;;  %v1682_v26 = vld [vmem:[#allocation2 + $0x1b8] sm:$0xff] }
 0x175   :  { %v1754_v14 = vld [vmem:[#allocation2 + $0x1f8] sm:$0xff] }
 0x176   :  { %v1437_v47 = vpop.f32.mrb[34].mxu0 }
 0x177   :  { %v1509_v49 = vpop.f32.mrb[34].mxu1  ;;  %v14185_v50 = vpop.f32.mrb[35].mxu0  ;;  %v1441_v57 = vadd.f32 %v1437_v47, %v1370_v55 }
 0x178   :  { %v1513_v52 = vadd.f32 %v1509_v49, %v1442_v48  ;;  %v14196_v53 = vpop.f32.mrb[35].mxu1 }
 0x17a   :  { %v12732_v56 = vmul.f32 -1.442695, %v1513_v52 }
 0x17c   :  { %16857 = vpow2.f32 %v12732_v56 }
 0x17d   :  { %v16854_v58 = vpop.eup %16853  ;;  %16859 = vtanh.f32 %v1441_v57 }
 0x17e   :  { %v16856_v0 = vpop.eup %16855  ;;  %v1517_v1 = vadd.f32 1.0, %v16854_v58  ;;  %v1605_v3 = vpop.f32.mrb[36].mxu0 }
 0x17f   :  { %v1523_v35 = vadd.f32 1.0, %v16856_v0  ;;  %v1609_v41 = vadd.f32 %v1605_v3, %v1538_v2  ;;  %v1677_v51 = vpop.f32.mrb[36].mxu1  ;;  %v14207_v6 = vpop.f32.mrb[37].mxu0  ;;  %v1857_v2 = vld [vmem:[#allocation2 + $0x8] sm:$0xff] }
 0x180   :  { %16861 = vrcp.f32 %v1517_v1  ;;  %v1681_v7 = vadd.f32 %v1677_v51, %v1610_v44  ;;  %v14218_v8 = vpop.f32.mrb[37].mxu1 }
 0x181   :  { %16863 = vrcp.f32 %v1523_v35  ;;  %v12733_v9 = vmul.f32 -1.442695, %v1609_v41  ;;  %v1932_v35 = vld [vmem:[#allocation2 + $0x48] sm:$0xff] }
 0x182   :  { %v12734_v11 = vmul.f32 -1.442695, %v1681_v7 }
 0x183   :  { %16865 = vpow2.f32 %v12733_v9 }
 0x184   :  { %16867 = vpow2.f32 %v12734_v11 }
 0x186   :  { %v16858_v12 = vpop.eup %16857  ;;  %v1749_v13 = vpop.f32.mrb[38].mxu0 }
 0x187   :  { %v1821_v17 = vpop.f32.mrb[38].mxu1  ;;  %v14229_v18 = vpop.f32.mrb[39].mxu0  ;;  %v1530_v25 = vadd.f32 1.0, %v16858_v12  ;;  %v1753_v30 = vadd.f32 %v1749_v13, %v1682_v26  ;;  %v2076_v12 = vld [vmem:[#allocation2 + $0xc8] sm:$0xff] }
 0x188   :  { %v1825_v19 = vadd.f32 %v1821_v17, %v1754_v14  ;;  %v14240_v20 = vpop.f32.mrb[39].mxu1  ;;  %v16860_v24 = vpop.eup %16859 }
 0x189   :  { %16869 = vrcp.f32 %v1530_v25  ;;  %v2004_v20 = vld [vmem:[#allocation2 + $0x88] sm:$0xff] }
 0x18a   :  { %v16862_v27 = vpop.eup %16861  ;;  %v12735_v33 = vmul.f32 -1.442695, %v1825_v19  ;;  %16871 = vtanh.f32 %v1753_v30 }
 0x18b   :  { %v16864_v31 = vpop.eup %16863  ;;  %v1534_v32 = vmul.f32 %v16862_v27, %v16860_v24 }
 0x18c   :  { %v1533_v37 = vmul.f32 0.0, %v16864_v31  ;;  %16873 = vpow2.f32 %v12735_v33  ;;  %v2172_v31 = vld [vmem:[#allocation2 + $0x130] sm:$0xff] }
 0x18d   :  { %v16866_v38 = vpop.eup %16865  ;;  %v2246_v33 = vld [vmem:[#allocation2 + $0x170] sm:$0xff] }
 0x18e   :  { %v16868_v39 = vpop.eup %16867  ;;  %v17969_v40 = vadd.f32 %v1534_v32, %v1533_v37  ;;  %v1829_v42 = vadd.f32 1.0, %v16866_v38 }
 0x18f   :  { %v1835_v43 = vadd.f32 1.0, %v16868_v39 }
 0x190   :  { %16875 = vtanh.f32 %v17969_v40 }
 0x191   :  { %16877 = vrcp.f32 %v1829_v42 }
 0x192   :  { %16879 = vrcp.f32 %v1835_v43 }
 0x193   :  { %v16870_v45 = vpop.eup %16869 }
 0x194   :  { %v16872_v46 = vpop.eup %16871 }
 0x196   :  { %v16874_v47 = vpop.eup %16873 }
 0x197   :  { %v1842_v55 = vadd.f32 1.0, %v16874_v47 }
 0x199   :  { %16881 = vrcp.f32 %v1842_v55 }
 0x19a   :  { %v16876_v48 = vpop.eup %16875 }
 0x19b   :  { %v16878_v49 = vpop.eup %16877  ;;  %v1537_v50 = vmul.f32 %v16876_v48, %v16870_v45 }
 0x19c   :  { %v16880_v52 = vpop.eup %16879  ;;  %v1846_v53 = vmul.f32 %v16878_v49, %v16872_v46  ;;  %v2390_v49 = vld [vmem:[#allocation2 + $0x1f0] sm:$0xff] }
 0x19d   :  { %v1845_v56 = vmul.f32 0.0, %v16880_v52  ;;  %14250 = vmatmul.mubr.msk.f32.vlgmr.msra.gmra.mrb[40].mxu0 %vm258_vm2, %v1537_v50  ;;  %1850 = vst.msk [vmem:[#allocation3] sm:$0xff] %vm258_vm2, %v1537_v50  ;;  %14261 = vmatmul.mubr.msk.f32.vlgmr.msra.gmra.mrb[40].mxu1 %vm258_vm2, %v1537_v50 }
 0x19e   :  { %15997 = vmatpush3.bf16.msra.mxu0 %v17799_v54  ;;  %16003 = vmatpush3.bf16.msra.mxu1 %v17803_v61 }
 0x19f   :  { %v17977_v57 = vadd.f32 %v1846_v53, %v1845_v56  ;;  %15998 = vmatprep.subr.bf16.mxu0 %v17465_v62  ;;  %16004 = vmatprep.subr.bf16.mxu1 %v17465_v62 }
 0x1a0   :  { %14271 = vmatprep.mubr.msk.f32.mxu0 %vm17466_vm1, %v17467_v5  ;;  %14282 = vmatprep.mubr.msk.f32.mxu1 %vm17466_vm1, %v17467_v5 }
 0x1a1   :  { %16883 = vtanh.f32 %v17977_v57 }
 0x1a2   :  { %16000 = vmatpush3.bf16.msra.mxu0 %v17808_v63  ;;  %16006 = vmatpush3.bf16.msra.mxu1 %v17812_v10 }
 0x1a3   :  { %16007 = vmatprep.subr.bf16.mxu0 %v17465_v62  ;;  %16013 = vmatprep.subr.bf16.mxu1 %v17465_v62  ;;  %v16882_v58 = vpop.eup %16881 }
 0x1a5   :  { %14272 = vmatmul.mubr.msk.f32.vlgmr.msra.gmra.mrb[42].mxu0 %vm258_vm2, %v1537_v50  ;;  %14283 = vmatmul.mubr.msk.f32.vlgmr.msra.gmra.mrb[42].mxu1 %vm258_vm2, %v1537_v50 }
 0x1a6   :  { %16009 = vmatpush3.bf16.msra.mxu0 %v17820_v15  ;;  %16015 = vmatpush3.bf16.msra.mxu1 %v17824_v16 }
 0x1a7   :  { %16010 = vmatprep.subr.bf16.mxu0 %v17465_v62  ;;  %16016 = vmatprep.subr.bf16.mxu1 %v17465_v62 }
 0x1a8   :  { %14293 = vmatprep.mubr.msk.f32.mxu0 %vm17466_vm1, %v17467_v5  ;;  %14304 = vmatprep.mubr.msk.f32.mxu1 %vm17466_vm1, %v17467_v5 }
 0x1aa   :  { %16012 = vmatpush3.bf16.msra.mxu0 %v17830_v21  ;;  %16018 = vmatpush3.bf16.msra.mxu1 %v17834_v23 }
 0x1ab   :  { %v16884_v0 = vpop.eup %16883  ;;  %16019 = vmatprep.subr.bf16.mxu0 %v17465_v62  ;;  %16025 = vmatprep.subr.bf16.mxu1 %v17465_v62 }
 0x1ac   :  { %v18004_v1 = vmul.f32 %v16884_v0, %v16882_v58  ;;  %v2318_v0 = vld [vmem:[#allocation2 + $0x1b0] sm:$0xff] }
 0x1ae   :  { %14294 = vmatmul.mubr.msk.f32.vlgmr.msra.gmra.mrb[44].mxu0 %vm258_vm2, %v18004_v1  ;;  %14305 = vmatmul.mubr.msk.f32.vlgmr.msra.gmra.mrb[44].mxu1 %vm258_vm2, %v18004_v1 }
 0x1af   :  { %16021 = vmatpush3.bf16.msra.mxu0 %v17842_v28  ;;  %16027 = vmatpush3.bf16.msra.mxu1 %v17846_v29 }
 0x1b0   :  { %16022 = vmatprep.subr.bf16.mxu0 %v17465_v62  ;;  %16028 = vmatprep.subr.bf16.mxu1 %v17465_v62 }
 0x1b1   :  { %14315 = vmatprep.mubr.msk.f32.mxu0 %vm17466_vm1, %v17467_v5  ;;  %14326 = vmatprep.mubr.msk.f32.mxu1 %vm17466_vm1, %v17467_v5 }
 0x1b3   :  { %16024 = vmatpush3.bf16.msra.mxu0 %v17852_v34  ;;  %16030 = vmatpush3.bf16.msra.mxu1 %v17856_v36 }
 0x1b4   :  { %16031 = vmatprep.subr.bf16.mxu0 %v17465_v62  ;;  %16037 = vmatprep.subr.bf16.mxu1 %v17465_v62 }
 0x1b6   :  { %14316 = vmatmul.mubr.msk.f32.vlgmr.msra.gmra.mrb[46].mxu0 %vm258_vm2, %v18004_v1  ;;  %14327 = vmatmul.mubr.msk.f32.vlgmr.msra.gmra.mrb[46].mxu1 %vm258_vm2, %v18004_v1 }
 0x1b7   :  { %16033 = vmatpush3.bf16.msra.mxu0 %v17747_v59  ;;  %16039 = vmatpush3.bf16.msra.mxu1 %v17751_v60 }
 0x1b8   :  { %16034 = vmatprep.subr.bf16.mxu0 %v17465_v62  ;;  %16040 = vmatprep.subr.bf16.mxu1 %v17465_v62 }
 0x1b9   :  { %14337 = vmatprep.mubr.msk.f32.mxu0 %vm17466_vm1, %v17467_v5  ;;  %14348 = vmatprep.mubr.msk.f32.mxu1 %vm17466_vm1, %v17467_v5 }
 0x1bb   :  { %16036 = vmatpush3.bf16.msra.mxu0 %v17765_v22  ;;  %16042 = vmatpush3.bf16.msra.mxu1 %v17770_v4 }
 0x1bc   :  { %16043 = vmatprep.subr.bf16.mxu0 %v17465_v62  ;;  %16049 = vmatprep.subr.bf16.mxu1 %v17465_v62 }
 0x270   :  { %v1927_v3 = vpop.f32.mrb[40].mxu0  ;;  %v1999_v41 = vpop.f32.mrb[40].mxu1 }
 0x271   :  { %v1931_v44 = vadd.f32 %v1927_v3, %v1857_v2  ;;  %v2003_v51 = vadd.f32 %v1999_v41, %v1932_v35  ;;  %v14251_v6 = vpop.f32.mrb[41].mxu0  ;;  %v14262_v7 = vpop.f32.mrb[41].mxu1 }
 0x273   :  { %v12740_v8 = vmul.f32 -1.442695, %v1931_v44  ;;  %v12741_v9 = vmul.f32 -1.442695, %v2003_v51 }
 0x275   :  { %16885 = vpow2.f32 %v12740_v8 }
 0x276   :  { %16887 = vpow2.f32 %v12741_v9 }
 0x278   :  { %v2071_v11 = vpop.f32.mrb[42].mxu0  ;;  %v2143_v13 = vpop.f32.mrb[42].mxu1 }
 0x279   :  { %v2147_v14 = vadd.f32 %v2143_v13, %v2076_v12  ;;  %v14273_v17 = vpop.f32.mrb[43].mxu0  ;;  %v14284_v18 = vpop.f32.mrb[43].mxu1  ;;  %v2075_v24 = vadd.f32 %v2071_v11, %v2004_v20 }
 0x27b   :  { %v12742_v19 = vmul.f32 -1.442695, %v2147_v14 }
 0x27d   :  { %16889 = vpow2.f32 %v12742_v19 }
 0x27e   :  { %16891 = vtanh.f32 %v2075_v24 }
 0x27f   :  { %v16886_v25 = vpop.eup %16885 }
 0x280   :  { %v16888_v26 = vpop.eup %16887  ;;  %v2151_v27 = vadd.f32 1.0, %v16886_v25 }
 0x281   :  { %v2157_v30 = vadd.f32 1.0, %v16888_v26  ;;  %v2241_v32 = vpop.f32.mrb[44].mxu0  ;;  %v2313_v37 = vpop.f32.mrb[44].mxu1 }
 0x282   :  { %16893 = vrcp.f32 %v2151_v27  ;;  %v2245_v38 = vadd.f32 %v2241_v32, %v2172_v31  ;;  %v2317_v39 = vadd.f32 %v2313_v37, %v2246_v33  ;;  %v14295_v42 = vpop.f32.mrb[45].mxu0  ;;  %v14306_v43 = vpop.f32.mrb[45].mxu1  ;;  %v2492_v31 = vld [vmem:[#allocation2 + $0x10] sm:$0xff] }
 0x283   :  { %16895 = vrcp.f32 %v2157_v30  ;;  %v2567_v33 = vld [vmem:[#allocation2 + $0x50] sm:$0xff] }
 0x284   :  { %v12747_v45 = vmul.f32 -1.442695, %v2245_v38  ;;  %v12748_v46 = vmul.f32 -1.442695, %v2317_v39 }
 0x286   :  { %16897 = vpow2.f32 %v12747_v45 }
 0x287   :  { %16899 = vpow2.f32 %v12748_v46  ;;  %v16890_v47 = vpop.eup %16889 }
 0x288   :  { %v16892_v56 = vpop.eup %16891  ;;  %v2164_v58 = vadd.f32 1.0, %v16890_v47 }
 0x289   :  { %v2385_v48 = vpop.f32.mrb[46].mxu0  ;;  %v2457_v50 = vpop.f32.mrb[46].mxu1 }
 0x28a   :  { %v2461_v52 = vadd.f32 %v2457_v50, %v2390_v49  ;;  %v14317_v53 = vpop.f32.mrb[47].mxu0  ;;  %v14328_v55 = vpop.f32.mrb[47].mxu1  ;;  %v2389_v3 = vadd.f32 %v2385_v48, %v2318_v0  ;;  %16901 = vrcp.f32 %v2164_v58  ;;  %v2711_v48 = vld [vmem:[#allocation2 + $0xd0] sm:$0xff] }
 0x28c   :  { %v16894_v2 = vpop.eup %16893  ;;  %v12749_v44 = vmul.f32 -1.442695, %v2461_v52  ;;  %16903 = vtanh.f32 %v2389_v3 }
 0x28d   :  { %v16896_v35 = vpop.eup %16895  ;;  %v2168_v41 = vmul.f32 %v16894_v2, %v16892_v56  ;;  %v2639_v56 = vld [vmem:[#allocation2 + $0x90] sm:$0xff] }
 0x28e   :  { %v2167_v51 = vmul.f32 %v16896_v35, %v17969_v40  ;;  %16905 = vpow2.f32 %v12749_v44 }
 0x290   :  { %v16898_v6 = vpop.eup %16897  ;;  %v18039_v7 = vadd.f32 %v2168_v41, %v2167_v51  ;;  %v2807_v41 = vld [vmem:[#allocation2 + $0x128] sm:$0xff] }
 0x291   :  { %v16900_v8 = vpop.eup %16899  ;;  %v2465_v9 = vadd.f32 1.0, %v16898_v6  ;;  %v2881_v51 = vld [vmem:[#allocation2 + $0x168] sm:$0xff] }
 0x292   :  { %16907 = vtanh.f32 %v18039_v7  ;;  %v2471_v11 = vadd.f32 1.0, %v16900_v8 }
 0x293   :  { %16909 = vrcp.f32 %v2465_v9 }
 0x294   :  { %16911 = vrcp.f32 %v2471_v11  ;;  %v16902_v12 = vpop.eup %16901 }
 0x296   :  { %v16904_v13 = vpop.eup %16903 }
 0x298   :  { %v16906_v14 = vpop.eup %16905 }
 0x299   :  { %v2478_v24 = vadd.f32 1.0, %v16906_v14 }
 0x29b   :  { %16913 = vrcp.f32 %v2478_v24 }
 0x29c   :  { %v16908_v17 = vpop.eup %16907 }
 0x29d   :  { %v16910_v18 = vpop.eup %16909  ;;  %v2171_v19 = vmul.f32 %v16908_v17, %v16902_v12 }
 0x29e   :  { %v16912_v40 = vpop.eup %16911  ;;  %v2482_v20 = vmul.f32 %v16910_v18, %v16904_v13 }
 0x29f   :  { %v2481_v25 = vmul.f32 %v16912_v40, %v17977_v57  ;;  %14338 = vmatmul.mubr.msk.f32.vlgmr.msra.gmra.mrb[48].mxu0 %vm258_vm2, %v2171_v19  ;;  %2486 = vst.msk [vmem:[#allocation3 + $0x8] sm:$0xff] %vm258_vm2, %v2171_v19  ;;  %14349 = vmatmul.mubr.msk.f32.vlgmr.msra.gmra.mrb[48].mxu1 %vm258_vm2, %v2171_v19 }
 0x2a0   :  { %16045 = vmatpush3.bf16.msra.mxu0 %v17799_v54  ;;  %16051 = vmatpush3.bf16.msra.mxu1 %v17803_v61 }
 0x2a1   :  { %v18048_v26 = vadd.f32 %v2482_v20, %v2481_v25  ;;  %16046 = vmatprep.subr.bf16.mxu0 %v17465_v62  ;;  %16052 = vmatprep.subr.bf16.mxu1 %v17465_v62 }
 0x2a2   :  { %14359 = vmatprep.mubr.msk.f32.mxu0 %vm17466_vm1, %v17467_v5  ;;  %14370 = vmatprep.mubr.msk.f32.mxu1 %vm17466_vm1, %v17467_v5 }
 0x2a3   :  { %16915 = vtanh.f32 %v18048_v26 }
 0x2a4   :  { %16048 = vmatpush3.bf16.msra.mxu0 %v17808_v63  ;;  %16054 = vmatpush3.bf16.msra.mxu1 %v17812_v10 }
 0x2a5   :  { %16055 = vmatprep.subr.bf16.mxu0 %v17465_v62  ;;  %16061 = vmatprep.subr.bf16.mxu1 %v17465_v62  ;;  %v16914_v57 = vpop.eup %16913 }
 0x2a7   :  { %14360 = vmatmul.mubr.msk.f32.vlgmr.msra.gmra.mrb[50].mxu0 %vm258_vm2, %v2171_v19  ;;  %14371 = vmatmul.mubr.msk.f32.vlgmr.msra.gmra.mrb[50].mxu1 %vm258_vm2, %v2171_v19  ;;  %v3025_v19 = vld [vmem:[#allocation2 + $0x1e8] sm:$0xff] }
 0x2a8   :  { %16057 = vmatpush3.bf16.msra.mxu0 %v17820_v15  ;;  %16063 = vmatpush3.bf16.msra.mxu1 %v17824_v16 }
 0x2a9   :  { %16058 = vmatprep.subr.bf16.mxu0 %v17465_v62  ;;  %16064 = vmatprep.subr.bf16.mxu1 %v17465_v62 }
 0x2aa   :  { %14381 = vmatprep.mubr.msk.f32.mxu0 %vm17466_vm1, %v17467_v5  ;;  %14392 = vmatprep.mubr.msk.f32.mxu1 %vm17466_vm1, %v17467_v5 }
 0x2ac   :  { %16060 = vmatpush3.bf16.msra.mxu0 %v17830_v21  ;;  %16066 = vmatpush3.bf16.msra.mxu1 %v17834_v23 }
 0x2ad   :  { %v16916_v27 = vpop.eup %16915  ;;  %16067 = vmatprep.subr.bf16.mxu0 %v17465_v62  ;;  %16073 = vmatprep.subr.bf16.mxu1 %v17465_v62 }
 0x2ae   :  { %v18075_v30 = vmul.f32 %v16916_v27, %v16914_v57 }
 0x2b0   :  { %14382 = vmatmul.mubr.msk.f32.vlgmr.msra.gmra.mrb[52].mxu0 %vm258_vm2, %v18075_v30  ;;  %14393 = vmatmul.mubr.msk.f32.vlgmr.msra.gmra.mrb[52].mxu1 %vm258_vm2, %v18075_v30 }
 0x2b1   :  { %16069 = vmatpush3.bf16.msra.mxu0 %v17842_v28  ;;  %16075 = vmatpush3.bf16.msra.mxu1 %v17846_v29 }
 0x2b2   :  { %16070 = vmatprep.subr.bf16.mxu0 %v17465_v62  ;;  %16076 = vmatprep.subr.bf16.mxu1 %v17465_v62 }
 0x2b3   :  { %14403 = vmatprep.mubr.msk.f32.mxu0 %vm17466_vm1, %v17467_v5  ;;  %14414 = vmatprep.mubr.msk.f32.mxu1 %vm17466_vm1, %v17467_v5 }
 0x2b5   :  { %16072 = vmatpush3.bf16.msra.mxu0 %v17852_v34  ;;  %16078 = vmatpush3.bf16.msra.mxu1 %v17856_v36 }
 0x2b6   :  { %16079 = vmatprep.subr.bf16.mxu0 %v17465_v62  ;;  %16085 = vmatprep.subr.bf16.mxu1 %v17465_v62 }
 0x2b8   :  { %14404 = vmatmul.mubr.msk.f32.vlgmr.msra.gmra.mrb[54].mxu0 %vm258_vm2, %v18075_v30  ;;  %14415 = vmatmul.mubr.msk.f32.vlgmr.msra.gmra.mrb[54].mxu1 %vm258_vm2, %v18075_v30 }
 0x2b9   :  { %16081 = vmatpush3.bf16.msra.mxu0 %v17747_v59  ;;  %16087 = vmatpush3.bf16.msra.mxu1 %v17751_v60 }
 0x2ba   :  { %16082 = vmatprep.subr.bf16.mxu0 %v17465_v62  ;;  %16088 = vmatprep.subr.bf16.mxu1 %v17465_v62 }
 0x2bb   :  { %14425 = vmatprep.mubr.msk.f32.mxu0 %vm17466_vm1, %v17467_v5  ;;  %14436 = vmatprep.mubr.msk.f32.mxu1 %vm17466_vm1, %v17467_v5 }
 0x2bd   :  { %16084 = vmatpush3.bf16.msra.mxu0 %v17765_v22  ;;  %16090 = vmatpush3.bf16.msra.mxu1 %v17770_v4 }
 0x2be   :  { %16091 = vmatprep.subr.bf16.mxu0 %v17465_v62  ;;  %16097 = vmatprep.subr.bf16.mxu1 %v17465_v62 }
 0x372   :  { %v2562_v32 = vpop.f32.mrb[48].mxu0  ;;  %v2634_v37 = vpop.f32.mrb[48].mxu1 }
 0x373   :  { %v2566_v38 = vadd.f32 %v2562_v32, %v2492_v31  ;;  %v2638_v39 = vadd.f32 %v2634_v37, %v2567_v33  ;;  %v14339_v42 = vpop.f32.mrb[49].mxu0  ;;  %v14350_v43 = vpop.f32.mrb[49].mxu1  ;;  %v2953_v31 = vld [vmem:[#allocation2 + $0x1a8] sm:$0xff] }
 0x375   :  { %v12754_v45 = vmul.f32 -1.442695, %v2566_v38  ;;  %v12755_v46 = vmul.f32 -1.442695, %v2638_v39 }
 0x377   :  { %16917 = vpow2.f32 %v12754_v45 }
 0x378   :  { %16919 = vpow2.f32 %v12755_v46 }
 0x37a   :  { %v2706_v47 = vpop.f32.mrb[50].mxu0  ;;  %v2778_v49 = vpop.f32.mrb[50].mxu1 }
 0x37b   :  { %v2782_v50 = vadd.f32 %v2778_v49, %v2711_v48  ;;  %v14361_v52 = vpop.f32.mrb[51].mxu0  ;;  %v14372_v53 = vpop.f32.mrb[51].mxu1  ;;  %v2710_v58 = vadd.f32 %v2706_v47, %v2639_v56 }
 0x37d   :  { %v12756_v55 = vmul.f32 -1.442695, %v2782_v50 }
 0x37f   :  { %16921 = vpow2.f32 %v12756_v55 }
 0x380   :  { %16923 = vtanh.f32 %v2710_v58 }
 0x381   :  { %v16918_v0 = vpop.eup %16917 }
 0x382   :  { %v16920_v2 = vpop.eup %16919  ;;  %v2786_v3 = vadd.f32 1.0, %v16918_v0 }
 0x383   :  { %v2792_v35 = vadd.f32 1.0, %v16920_v2  ;;  %v2876_v44 = vpop.f32.mrb[52].mxu0  ;;  %v2948_v6 = vpop.f32.mrb[52].mxu1 }
 0x384   :  { %16925 = vrcp.f32 %v2786_v3  ;;  %v2880_v8 = vadd.f32 %v2876_v44, %v2807_v41  ;;  %v2952_v9 = vadd.f32 %v2948_v6, %v2881_v51  ;;  %v14383_v11 = vpop.f32.mrb[53].mxu0  ;;  %v14394_v12 = vpop.f32.mrb[53].mxu1  ;;  %v3127_v44 = vld [vmem:[#allocation2 + $0x18] sm:$0xff] }
 0x385   :  { %16927 = vrcp.f32 %v2792_v35  ;;  %v3202_v6 = vld [vmem:[#allocation2 + $0x58] sm:$0xff] }
 0x386   :  { %v12761_v13 = vmul.f32 -1.442695, %v2880_v8  ;;  %v12762_v14 = vmul.f32 -1.442695, %v2952_v9 }
 0x388   :  { %16929 = vpow2.f32 %v12761_v13 }
 0x389   :  { %16931 = vpow2.f32 %v12762_v14  ;;  %v16922_v17 = vpop.eup %16921 }
 0x38a   :  { %v16924_v57 = vpop.eup %16923  ;;  %v2799_v27 = vadd.f32 1.0, %v16922_v17 }
 0x38b   :  { %v3020_v18 = vpop.f32.mrb[54].mxu0  ;;  %v3092_v40 = vpop.f32.mrb[54].mxu1 }
 0x38c   :  { %v3096_v20 = vadd.f32 %v3092_v40, %v3025_v19  ;;  %v14405_v24 = vpop.f32.mrb[55].mxu0  ;;  %v14416_v25 = vpop.f32.mrb[55].mxu1  ;;  %v3024_v33 = vadd.f32 %v3020_v18, %v2953_v31  ;;  %16933 = vrcp.f32 %v2799_v27  ;;  %v3346_v19 = vld [vmem:[#allocation2 + $0xd8] sm:$0xff] }
 0x38d   :  { %v3274_v27 = vld [vmem:[#allocation2 + $0x98] sm:$0xff] }
 0x38e   :  { %v16926_v32 = vpop.eup %16925  ;;  %v12763_v39 = vmul.f32 -1.442695, %v3096_v20  ;;  %16935 = vtanh.f32 %v3024_v33 }
 0x38f   :  { %v16928_v37 = vpop.eup %16927  ;;  %v2803_v38 = vmul.f32 %v16926_v32, %v16924_v57 }
 0x390   :  { %v2802_v42 = vmul.f32 %v16928_v37, %v18039_v7  ;;  %16937 = vpow2.f32 %v12763_v39  ;;  %v3442_v39 = vld [vmem:[#allocation2 + $0x120] sm:$0xff] }
 0x392   :  { %v16930_v43 = vpop.eup %16929  ;;  %v18110_v45 = vadd.f32 %v2803_v38, %v2802_v42 }
 0x393   :  { %v16932_v46 = vpop.eup %16931  ;;  %v3100_v47 = vadd.f32 1.0, %v16930_v43  ;;  %v3516_v43 = vld [vmem:[#allocation2 + $0x160] sm:$0xff] }
 0x394   :  { %16939 = vtanh.f32 %v18110_v45  ;;  %v3106_v48 = vadd.f32 1.0, %v16932_v46 }
 0x395   :  { %16941 = vrcp.f32 %v3100_v47 }
 0x396   :  { %16943 = vrcp.f32 %v3106_v48  ;;  %v16934_v49 = vpop.eup %16933 }
 0x398   :  { %v16936_v50 = vpop.eup %16935 }
 0x39a   :  { %v16938_v52 = vpop.eup %16937 }
 0x39b   :  { %v3113_v0 = vadd.f32 1.0, %v16938_v52 }
 0x39d   :  { %16945 = vrcp.f32 %v3113_v0 }
 0x39e   :  { %v16940_v53 = vpop.eup %16939 }
 0x39f   :  { %v16942_v55 = vpop.eup %16941  ;;  %v2806_v56 = vmul.f32 %v16940_v53, %v16934_v49 }
 0x3a0   :  { %v16944_v7 = vpop.eup %16943  ;;  %v3117_v58 = vmul.f32 %v16942_v55, %v16936_v50 }
 0x3a1   :  { %v3116_v2 = vmul.f32 %v16944_v7, %v18048_v26  ;;  %14426 = vmatmul.mubr.msk.f32.vlgmr.msra.gmra.mrb[56].mxu0 %vm258_vm2, %v2806_v56  ;;  %3121 = vst.msk [vmem:[#allocation3 + $0x10] sm:$0xff] %vm258_vm2, %v2806_v56  ;;  %14437 = vmatmul.mubr.msk.f32.vlgmr.msra.gmra.mrb[56].mxu1 %vm258_vm2, %v2806_v56  ;;  %v3660_v7 = vld [vmem:[#allocation2 + $0x1e0] sm:$0xff] }
 0x3a2   :  { %16093 = vmatpush3.bf16.msra.mxu0 %v17799_v54  ;;  %16099 = vmatpush3.bf16.msra.mxu1 %v17803_v61 }
 0x3a3   :  { %v18119_v3 = vadd.f32 %v3117_v58, %v3116_v2  ;;  %16094 = vmatprep.subr.bf16.mxu0 %v17465_v62  ;;  %16100 = vmatprep.subr.bf16.mxu1 %v17465_v62 }
 0x3a4   :  { %14447 = vmatprep.mubr.msk.f32.mxu0 %vm17466_vm1, %v17467_v5  ;;  %14458 = vmatprep.mubr.msk.f32.mxu1 %vm17466_vm1, %v17467_v5 }
 0x3a5   :  { %16947 = vtanh.f32 %v18119_v3 }
 0x3a6   :  { %16096 = vmatpush3.bf16.msra.mxu0 %v17808_v63  ;;  %16102 = vmatpush3.bf16.msra.mxu1 %v17812_v10 }
 0x3a7   :  { %16103 = vmatprep.subr.bf16.mxu0 %v17465_v62  ;;  %16109 = vmatprep.subr.bf16.mxu1 %v17465_v62  ;;  %v16946_v26 = vpop.eup %16945 }
 0x3a9   :  { %14448 = vmatmul.mubr.msk.f32.vlgmr.msra.gmra.mrb[58].mxu0 %vm258_vm2, %v2806_v56  ;;  %14459 = vmatmul.mubr.msk.f32.vlgmr.msra.gmra.mrb[58].mxu1 %vm258_vm2, %v2806_v56 }
 0x3aa   :  { %16105 = vmatpush3.bf16.msra.mxu0 %v17820_v15  ;;  %16111 = vmatpush3.bf16.msra.mxu1 %v17824_v16 }
 0x3ab   :  { %16106 = vmatprep.subr.bf16.mxu0 %v17465_v62  ;;  %16112 = vmatprep.subr.bf16.mxu1 %v17465_v62 }
 0x3ac   :  { %14469 = vmatprep.mubr.msk.f32.mxu0 %vm17466_vm1, %v17467_v5  ;;  %14480 = vmatprep.mubr.msk.f32.mxu1 %vm17466_vm1, %v17467_v5 }
 0x3ae   :  { %16108 = vmatpush3.bf16.msra.mxu0 %v17830_v21  ;;  %16114 = vmatpush3.bf16.msra.mxu1 %v17834_v23 }
 0x3af   :  { %v16948_v35 = vpop.eup %16947  ;;  %16115 = vmatprep.subr.bf16.mxu0 %v17465_v62  ;;  %16121 = vmatprep.subr.bf16.mxu1 %v17465_v62 }
 0x3b0   :  { %v18146_v41 = vmul.f32 %v16948_v35, %v16946_v26 }
 0x3b2   :  { %14470 = vmatmul.mubr.msk.f32.vlgmr.msra.gmra.mrb[60].mxu0 %vm258_vm2, %v18146_v41  ;;  %14481 = vmatmul.mubr.msk.f32.vlgmr.msra.gmra.mrb[60].mxu1 %vm258_vm2, %v18146_v41 }
 0x3b3   :  { %16117 = vmatpush3.bf16.msra.mxu0 %v17842_v28  ;;  %16123 = vmatpush3.bf16.msra.mxu1 %v17846_v29 }
 0x3b4   :  { %16118 = vmatprep.subr.bf16.mxu0 %v17465_v62  ;;  %16124 = vmatprep.subr.bf16.mxu1 %v17465_v62 }
 0x3b5   :  { %14491 = vmatprep.mubr.msk.f32.mxu0 %vm17466_vm1, %v17467_v5  ;;  %14502 = vmatprep.mubr.msk.f32.mxu1 %vm17466_vm1, %v17467_v5 }
 0x3b7   :  { %16120 = vmatpush3.bf16.msra.mxu0 %v17852_v34  ;;  %16126 = vmatpush3.bf16.msra.mxu1 %v17856_v36 }
 0x3b8   :  { %16127 = vmatprep.subr.bf16.mxu0 %v17465_v62  ;;  %16133 = vmatprep.subr.bf16.mxu1 %v17465_v62 }
 0x3ba   :  { %14492 = vmatmul.mubr.msk.f32.vlgmr.msra.gmra.mrb[62].mxu0 %vm258_vm2, %v18146_v41  ;;  %14503 = vmatmul.mubr.msk.f32.vlgmr.msra.gmra.mrb[62].mxu1 %vm258_vm2, %v18146_v41 }
 0x3bb   :  { %16129 = vmatpush3.bf16.msra.mxu0 %v17747_v59  ;;  %16135 = vmatpush3.bf16.msra.mxu1 %v17751_v60 }
 0x3bc   :  { %16130 = vmatprep.subr.bf16.mxu0 %v17465_v62  ;;  %16136 = vmatprep.subr.bf16.mxu1 %v17465_v62 }
 0x3bd   :  { %14513 = vmatprep.mubr.msk.f32.mxu0 %vm17466_vm1, %v17467_v5  ;;  %14524 = vmatprep.mubr.msk.f32.mxu1 %vm17466_vm1, %v17467_v5 }
 0x3bf   :  { %16132 = vmatpush3.bf16.msra.mxu0 %v17765_v22  ;;  %16138 = vmatpush3.bf16.msra.mxu1 %v17770_v4 }
 0x3c0   :  { %16139 = vmatprep.subr.bf16.mxu0 %v17465_v62  ;;  %16145 = vmatprep.subr.bf16.mxu1 %v17465_v62 }
 0x474   :  { %v3197_v51 = vpop.f32.mrb[56].mxu0  ;;  %v3269_v8 = vpop.f32.mrb[56].mxu1 }
 0x475   :  { %v3201_v9 = vadd.f32 %v3197_v51, %v3127_v44  ;;  %v3273_v11 = vadd.f32 %v3269_v8, %v3202_v6  ;;  %v14427_v12 = vpop.f32.mrb[57].mxu0  ;;  %v14438_v13 = vpop.f32.mrb[57].mxu1  ;;  %v3588_v51 = vld [vmem:[#allocation2 + $0x1a0] sm:$0xff] }
 0x477   :  { %v12768_v14 = vmul.f32 -1.442695, %v3201_v9  ;;  %v12769_v17 = vmul.f32 -1.442695, %v3273_v11 }
 0x479   :  { %16949 = vpow2.f32 %v12768_v14 }
 0x47a   :  { %16951 = vpow2.f32 %v12769_v17 }
 0x47c   :  { %v3341_v18 = vpop.f32.mrb[58].mxu0  ;;  %v3413_v40 = vpop.f32.mrb[58].mxu1 }
 0x47d   :  { %v3417_v20 = vadd.f32 %v3413_v40, %v3346_v19  ;;  %v14449_v24 = vpop.f32.mrb[59].mxu0  ;;  %v14460_v25 = vpop.f32.mrb[59].mxu1  ;;  %v3345_v31 = vadd.f32 %v3341_v18, %v3274_v27 }
 0x47f   :  { %v12770_v57 = vmul.f32 -1.442695, %v3417_v20 }
 0x481   :  { %16953 = vpow2.f32 %v12770_v57 }
 0x482   :  { %16955 = vtanh.f32 %v3345_v31 }
 0x483   :  { %v16950_v32 = vpop.eup %16949 }
 0x484   :  { %v16952_v33 = vpop.eup %16951  ;;  %v3421_v37 = vadd.f32 1.0, %v16950_v32 }
 0x485   :  { %v3427_v38 = vadd.f32 1.0, %v16952_v33  ;;  %v3511_v42 = vpop.f32.mrb[60].mxu0  ;;  %v3583_v46 = vpop.f32.mrb[60].mxu1 }
 0x486   :  { %16957 = vrcp.f32 %v3421_v37  ;;  %v3515_v47 = vadd.f32 %v3511_v42, %v3442_v39  ;;  %v3587_v48 = vadd.f32 %v3583_v46, %v3516_v43  ;;  %v14471_v49 = vpop.f32.mrb[61].mxu0  ;;  %v14482_v50 = vpop.f32.mrb[61].mxu1  ;;  %v3762_v43 = vld [vmem:[#allocation2 + $0x20] sm:$0xff] }
 0x487   :  { %16959 = vrcp.f32 %v3427_v38 }
 0x488   :  { %v12775_v52 = vmul.f32 -1.442695, %v3515_v47  ;;  %v12776_v53 = vmul.f32 -1.442695, %v3587_v48  ;;  %v3837_v47 = vld [vmem:[#allocation2 + $0x60] sm:$0xff] }
 0x48a   :  { %16961 = vpow2.f32 %v12775_v52 }
 0x48b   :  { %16963 = vpow2.f32 %v12776_v53  ;;  %v16954_v55 = vpop.eup %16953 }
 0x48c   :  { %v16956_v35 = vpop.eup %16955  ;;  %v3434_v44 = vadd.f32 1.0, %v16954_v55 }
 0x48d   :  { %v3655_v56 = vpop.f32.mrb[62].mxu0  ;;  %v3727_v58 = vpop.f32.mrb[62].mxu1 }
 0x48e   :  { %v3731_v0 = vadd.f32 %v3727_v58, %v3660_v7  ;;  %v14493_v2 = vpop.f32.mrb[63].mxu0  ;;  %v14504_v26 = vpop.f32.mrb[63].mxu1  ;;  %v3659_v8 = vadd.f32 %v3655_v56, %v3588_v51  ;;  %16965 = vrcp.f32 %v3434_v44  ;;  %v3981_v58 = vld [vmem:[#allocation2 + $0xe0] sm:$0xff] }
 0x48f   :  { %v3909_v51 = vld [vmem:[#allocation2 + $0xa0] sm:$0xff] }
 0x490   :  { %v16958_v6 = vpop.eup %16957  ;;  %v12777_v12 = vmul.f32 -1.442695, %v3731_v0  ;;  %16967 = vtanh.f32 %v3659_v8 }
 0x491   :  { %v16960_v9 = vpop.eup %16959  ;;  %v3438_v11 = vmul.f32 %v16958_v6, %v16956_v35 }
 0x492   :  { %v3437_v13 = vmul.f32 %v16960_v9, %v18110_v45  ;;  %16969 = vpow2.f32 %v12777_v12 }
 0x494   :  { %v16962_v14 = vpop.eup %16961  ;;  %v18181_v17 = vadd.f32 %v3438_v11, %v3437_v13  ;;  %v4077_v13 = vld [vmem:[#allocation2 + $0x118] sm:$0xff] }
 0x495   :  { %v16964_v18 = vpop.eup %16963  ;;  %v3735_v19 = vadd.f32 1.0, %v16962_v14 }
 0x496   :  { %16971 = vtanh.f32 %v18181_v17  ;;  %v3741_v40 = vadd.f32 1.0, %v16964_v18  ;;  %v4151_v18 = vld [vmem:[#allocation2 + $0x158] sm:$0xff] }
 0x497   :  { %16973 = vrcp.f32 %v3735_v19 }
 0x498   :  { %16975 = vrcp.f32 %v3741_v40  ;;  %v16966_v20 = vpop.eup %16965 }
 0x49a   :  { %v16968_v24 = vpop.eup %16967 }
 0x49c   :  { %v16970_v25 = vpop.eup %16969 }
 0x49d   :  { %v3748_v33 = vadd.f32 1.0, %v16970_v25 }
 0x49f   :  { %16977 = vrcp.f32 %v3748_v33 }
 0x4a0   :  { %v16972_v57 = vpop.eup %16971 }
 0x4a1   :  { %v16974_v27 = vpop.eup %16973  ;;  %v3441_v31 = vmul.f32 %v16972_v57, %v16966_v20 }
 0x4a2   :  { %v16976_v45 = vpop.eup %16975  ;;  %v3752_v32 = vmul.f32 %v16974_v27, %v16968_v24 }
 0x4a3   :  { %v3751_v37 = vmul.f32 %v16976_v45, %v18119_v3  ;;  %14514 = vmatmul.mubr.msk.f32.vlgmr.msra.gmra.mrb[64].mxu0 %vm258_vm2, %v3441_v31  ;;  %3756 = vst.msk [vmem:[#allocation3 + $0x18] sm:$0xff] %vm258_vm2, %v3441_v31  ;;  %14525 = vmatmul.mubr.msk.f32.vlgmr.msra.gmra.mrb[64].mxu1 %vm258_vm2, %v3441_v31 }
 0x4a4   :  { %16141 = vmatpush3.bf16.msra.mxu0 %v17799_v54  ;;  %16147 = vmatpush3.bf16.msra.mxu1 %v17803_v61 }
 0x4a5   :  { %v18190_v38 = vadd.f32 %v3752_v32, %v3751_v37  ;;  %16142 = vmatprep.subr.bf16.mxu0 %v17465_v62  ;;  %16148 = vmatprep.subr.bf16.mxu1 %v17465_v62  ;;  %v4295_v32 = vld [vmem:[#allocation2 + $0x1d8] sm:$0xff] }
 0x4a6   :  { %14535 = vmatprep.mubr.msk.f32.mxu0 %vm17466_vm1, %v17467_v5  ;;  %14546 = vmatprep.mubr.msk.f32.mxu1 %vm17466_vm1, %v17467_v5 }
 0x4a7   :  { %16979 = vtanh.f32 %v18190_v38 }
 0x4a8   :  { %16144 = vmatpush3.bf16.msra.mxu0 %v17808_v63  ;;  %16150 = vmatpush3.bf16.msra.mxu1 %v17812_v10 }
 0x4a9   :  { %16151 = vmatprep.subr.bf16.mxu0 %v17465_v62  ;;  %16157 = vmatprep.subr.bf16.mxu1 %v17465_v62  ;;  %v16978_v3 = vpop.eup %16977 }
 0x4ab   :  { %14536 = vmatmul.mubr.msk.f32.vlgmr.msra.gmra.mrb[66].mxu0 %vm258_vm2, %v3441_v31  ;;  %14547 = vmatmul.mubr.msk.f32.vlgmr.msra.gmra.mrb[66].mxu1 %vm258_vm2, %v3441_v31 }
 0x4ac   :  { %16153 = vmatpush3.bf16.msra.mxu0 %v17820_v15  ;;  %16159 = vmatpush3.bf16.msra.mxu1 %v17824_v16 }
 0x4ad   :  { %16154 = vmatprep.subr.bf16.mxu0 %v17465_v62  ;;  %16160 = vmatprep.subr.bf16.mxu1 %v17465_v62 }
 0x4ae   :  { %14557 = vmatprep.mubr.msk.f32.mxu0 %vm17466_vm1, %v17467_v5  ;;  %14568 = vmatprep.mubr.msk.f32.mxu1 %vm17466_vm1, %v17467_v5 }
 0x4b0   :  { %16156 = vmatpush3.bf16.msra.mxu0 %v17830_v21  ;;  %16162 = vmatpush3.bf16.msra.mxu1 %v17834_v23 }
 0x4b1   :  { %v16980_v39 = vpop.eup %16979  ;;  %16163 = vmatprep.subr.bf16.mxu0 %v17465_v62  ;;  %16169 = vmatprep.subr.bf16.mxu1 %v17465_v62 }
 0x4b2   :  { %v18217_v42 = vmul.f32 %v16980_v39, %v16978_v3 }
 0x4b4   :  { %14558 = vmatmul.mubr.msk.f32.vlgmr.msra.gmra.mrb[68].mxu0 %vm258_vm2, %v18217_v42  ;;  %14569 = vmatmul.mubr.msk.f32.vlgmr.msra.gmra.mrb[68].mxu1 %vm258_vm2, %v18217_v42 }
 0x4b5   :  { %16165 = vmatpush3.bf16.msra.mxu0 %v17842_v28  ;;  %16171 = vmatpush3.bf16.msra.mxu1 %v17846_v29 }
 0x4b6   :  { %16166 = vmatprep.subr.bf16.mxu0 %v17465_v62  ;;  %16172 = vmatprep.subr.bf16.mxu1 %v17465_v62 }
 0x4b7   :  { %14579 = vmatprep.mubr.msk.f32.mxu0 %vm17466_vm1, %v17467_v5  ;;  %14590 = vmatprep.mubr.msk.f32.mxu1 %vm17466_vm1, %v17467_v5 }
 0x4b9   :  { %16168 = vmatpush3.bf16.msra.mxu0 %v17852_v34  ;;  %16174 = vmatpush3.bf16.msra.mxu1 %v17856_v36 }
 0x4ba   :  { %16175 = vmatprep.subr.bf16.mxu0 %v17465_v62  ;;  %16181 = vmatprep.subr.bf16.mxu1 %v17465_v62 }
 0x4bc   :  { %14580 = vmatmul.mubr.msk.f32.vlgmr.msra.gmra.mrb[70].mxu0 %vm258_vm2, %v18217_v42  ;;  %14591 = vmatmul.mubr.msk.f32.vlgmr.msra.gmra.mrb[70].mxu1 %vm258_vm2, %v18217_v42 }
 0x4bd   :  { %16177 = vmatpush3.bf16.msra.mxu0 %v17747_v59  ;;  %16183 = vmatpush3.bf16.msra.mxu1 %v17751_v60 }
 0x4be   :  { %16178 = vmatprep.subr.bf16.mxu0 %v17465_v62  ;;  %16184 = vmatprep.subr.bf16.mxu1 %v17465_v62 }
 0x4bf   :  { %14601 = vmatprep.mubr.msk.f32.mxu0 %vm17466_vm1, %v17467_v5  ;;  %14612 = vmatprep.mubr.msk.f32.mxu1 %vm17466_vm1, %v17467_v5 }
 0x4c1   :  { %16180 = vmatpush3.bf16.msra.mxu0 %v17765_v22  ;;  %16186 = vmatpush3.bf16.msra.mxu1 %v17770_v4 }
 0x4c2   :  { %16187 = vmatprep.subr.bf16.mxu0 %v17465_v62  ;;  %16193 = vmatprep.subr.bf16.mxu1 %v17465_v62 }
 0x576   :  { %v3832_v46 = vpop.f32.mrb[64].mxu0  ;;  %v3904_v48 = vpop.f32.mrb[64].mxu1 }
 0x577   :  { %v3836_v49 = vadd.f32 %v3832_v46, %v3762_v43  ;;  %v3908_v50 = vadd.f32 %v3904_v48, %v3837_v47  ;;  %v14515_v52 = vpop.f32.mrb[65].mxu0  ;;  %v14526_v53 = vpop.f32.mrb[65].mxu1  ;;  %v4223_v47 = vld [vmem:[#allocation2 + $0x198] sm:$0xff] }
 0x579   :  { %v12782_v55 = vmul.f32 -1.442695, %v3836_v49  ;;  %v12783_v56 = vmul.f32 -1.442695, %v3908_v50 }
 0x57b   :  { %16981 = vpow2.f32 %v12782_v55 }
 0x57c   :  { %16983 = vpow2.f32 %v12783_v56 }
 0x57e   :  { %v3976_v7 = vpop.f32.mrb[66].mxu0  ;;  %v4048_v0 = vpop.f32.mrb[66].mxu1 }
 0x57f   :  { %v4052_v2 = vadd.f32 %v4048_v0, %v3981_v58  ;;  %v14537_v26 = vpop.f32.mrb[67].mxu0  ;;  %v14548_v35 = vpop.f32.mrb[67].mxu1  ;;  %v3980_v6 = vadd.f32 %v3976_v7, %v3909_v51 }
 0x581   :  { %v12784_v44 = vmul.f32 -1.442695, %v4052_v2 }
 0x583   :  { %16985 = vpow2.f32 %v12784_v44 }
 0x584   :  { %16987 = vtanh.f32 %v3980_v6 }
 0x585   :  { %v16982_v8 = vpop.eup %16981 }
 0x586   :  { %v16984_v9 = vpop.eup %16983  ;;  %v4056_v11 = vadd.f32 1.0, %v16982_v8 }
 0x587   :  { %v4062_v12 = vadd.f32 1.0, %v16984_v9  ;;  %v4146_v14 = vpop.f32.mrb[68].mxu0  ;;  %v4218_v19 = vpop.f32.mrb[68].mxu1 }
 0x588   :  { %16989 = vrcp.f32 %v4056_v11  ;;  %v4150_v40 = vadd.f32 %v4146_v14, %v4077_v13  ;;  %v4222_v20 = vadd.f32 %v4218_v19, %v4151_v18  ;;  %v14559_v24 = vpop.f32.mrb[69].mxu0  ;;  %v14570_v25 = vpop.f32.mrb[69].mxu1  ;;  %v4397_v19 = vld [vmem:[#allocation2 + $0x28] sm:$0xff] }
 0x589   :  { %16991 = vrcp.f32 %v4062_v12 }
 0x58a   :  { %v12789_v57 = vmul.f32 -1.442695, %v4150_v40  ;;  %v12790_v27 = vmul.f32 -1.442695, %v4222_v20  ;;  %v4472_v20 = vld [vmem:[#allocation2 + $0x68] sm:$0xff] }
 0x58c   :  { %16993 = vpow2.f32 %v12789_v57 }
 0x58d   :  { %16995 = vpow2.f32 %v12790_v27  ;;  %v16986_v31 = vpop.eup %16985 }
 0x58e   :  { %v16988_v43 = vpop.eup %16987  ;;  %v4069_v46 = vadd.f32 1.0, %v16986_v31 }
 0x58f   :  { %v4290_v45 = vpop.f32.mrb[70].mxu0  ;;  %v4362_v33 = vpop.f32.mrb[70].mxu1 }
 0x590   :  { %v4366_v37 = vadd.f32 %v4362_v33, %v4295_v32  ;;  %v14581_v3 = vpop.f32.mrb[71].mxu0  ;;  %v14592_v39 = vpop.f32.mrb[71].mxu1  ;;  %v4294_v49 = vadd.f32 %v4290_v45, %v4223_v47  ;;  %16997 = vrcp.f32 %v4069_v46 }
 0x592   :  { %v16990_v48 = vpop.eup %16989  ;;  %v12791_v53 = vmul.f32 -1.442695, %v4366_v37  ;;  %16999 = vtanh.f32 %v4294_v49  ;;  %v4616_v37 = vld [vmem:[#allocation2 + $0xe8] sm:$0xff] }
 0x593   :  { %v16992_v50 = vpop.eup %16991  ;;  %v4073_v52 = vmul.f32 %v16990_v48, %v16988_v43  ;;  %v4544_v48 = vld [vmem:[#allocation2 + $0xa8] sm:$0xff] }
 0x594   :  { %v4072_v55 = vmul.f32 %v16992_v50, %v18181_v17  ;;  %17001 = vpow2.f32 %v12791_v53 }
 0x596   :  { %v16994_v56 = vpop.eup %16993  ;;  %v18252_v7 = vadd.f32 %v4073_v52, %v4072_v55 }
 0x597   :  { %v16996_v58 = vpop.eup %16995  ;;  %v4370_v0 = vadd.f32 1.0, %v16994_v56  ;;  %v4712_v56 = vld [vmem:[#allocation2 + $0x110] sm:$0xff] }
 0x598   :  { %17003 = vtanh.f32 %v18252_v7  ;;  %v4376_v2 = vadd.f32 1.0, %v16996_v58 }
 0x599   :  { %17005 = vrcp.f32 %v4370_v0  ;;  %v4786_v0 = vld [vmem:[#allocation2 + $0x150] sm:$0xff] }
 0x59a   :  { %17007 = vrcp.f32 %v4376_v2  ;;  %v16998_v26 = vpop.eup %16997 }
 0x59c   :  { %v17000_v35 = vpop.eup %16999 }
 0x59e   :  { %v17002_v44 = vpop.eup %17001 }
 0x59f   :  { %v4383_v11 = vadd.f32 1.0, %v17002_v44 }
 0x5a1   :  { %17009 = vrcp.f32 %v4383_v11 }
 0x5a2   :  { %v17004_v51 = vpop.eup %17003 }
 0x5a3   :  { %v17006_v6 = vpop.eup %17005  ;;  %v18255_v8 = vmul.f32 %v17004_v51, %v16998_v26 }
 0x5a4   :  { %v17008_v17 = vpop.eup %17007  ;;  %v4387_v9 = vmul.f32 %v17006_v6, %v17000_v35 }
 0x5a5   :  { %v4386_v12 = vmul.f32 %v17008_v17, %v18190_v38  ;;  %14602 = vmatmul.mubr.msk.f32.vlgmr.msra.gmra.mrb[72].mxu0 %vm258_vm2, %v18255_v8  ;;  %14613 = vmatmul.mubr.msk.f32.vlgmr.msra.gmra.mrb[72].mxu1 %vm258_vm2, %v18255_v8 }
 0x5a6   :  { %16189 = vmatpush3.bf16.msra.mxu0 %v17799_v54  ;;  %16195 = vmatpush3.bf16.msra.mxu1 %v17803_v61 }
 0x5a7   :  { %v18264_v13 = vadd.f32 %v4387_v9, %v4386_v12  ;;  %16190 = vmatprep.subr.bf16.mxu0 %v17465_v62  ;;  %16196 = vmatprep.subr.bf16.mxu1 %v17465_v62  ;;  %v4930_v12 = vld [vmem:[#allocation2 + $0x1d0] sm:$0xff] }
 0x5a8   :  { %14623 = vmatprep.mubr.msk.f32.mxu0 %vm17466_vm1, %v17467_v5  ;;  %14634 = vmatprep.mubr.msk.f32.mxu1 %vm17466_vm1, %v17467_v5 }
 0x5a9   :  { %17011 = vtanh.f32 %v18264_v13 }
 0x5aa   :  { %16192 = vmatpush3.bf16.msra.mxu0 %v17808_v63  ;;  %16198 = vmatpush3.bf16.msra.mxu1 %v17812_v10 }
 0x5ab   :  { %16199 = vmatprep.subr.bf16.mxu0 %v17465_v62  ;;  %16205 = vmatprep.subr.bf16.mxu1 %v17465_v62  ;;  %v17010_v38 = vpop.eup %17009 }
 0x5ad   :  { %14624 = vmatmul.mubr.msk.f32.vlgmr.msra.gmra.mrb[74].mxu0 %vm258_vm2, %v18255_v8  ;;  %14635 = vmatmul.mubr.msk.f32.vlgmr.msra.gmra.mrb[74].mxu1 %vm258_vm2, %v18255_v8 }
 0x5ae   :  { %16201 = vmatpush3.bf16.msra.mxu0 %v17820_v15  ;;  %16207 = vmatpush3.bf16.msra.mxu1 %v17824_v16 }
 0x5af   :  { %16202 = vmatprep.subr.bf16.mxu0 %v17465_v62  ;;  %16208 = vmatprep.subr.bf16.mxu1 %v17465_v62 }
 0x5b0   :  { %14645 = vmatprep.mubr.msk.f32.mxu0 %vm17466_vm1, %v17467_v5  ;;  %14656 = vmatprep.mubr.msk.f32.mxu1 %vm17466_vm1, %v17467_v5 }
 0x5b2   :  { %16204 = vmatpush3.bf16.msra.mxu0 %v17830_v21  ;;  %16210 = vmatpush3.bf16.msra.mxu1 %v17834_v23 }
 0x5b3   :  { %v17012_v14 = vpop.eup %17011  ;;  %16211 = vmatprep.subr.bf16.mxu0 %v17465_v62  ;;  %16217 = vmatprep.subr.bf16.mxu1 %v17465_v62 }
 0x5b4   :  { %v18293_v18 = vmul.f32 %v17012_v14, %v17010_v38 }
 0x5b6   :  { %14646 = vmatmul.mubr.msk.f32.vlgmr.msra.gmra.mrb[76].mxu0 %vm258_vm2, %v18293_v18  ;;  %14657 = vmatmul.mubr.msk.f32.vlgmr.msra.gmra.mrb[76].mxu1 %vm258_vm2, %v18293_v18 }
 0x5b7   :  { %16213 = vmatpush3.bf16.msra.mxu0 %v17842_v28  ;;  %16219 = vmatpush3.bf16.msra.mxu1 %v17846_v29 }
 0x5b8   :  { %16214 = vmatprep.subr.bf16.mxu0 %v17465_v62  ;;  %16220 = vmatprep.subr.bf16.mxu1 %v17465_v62 }
 0x5b9   :  { %14667 = vmatprep.mubr.msk.f32.mxu0 %vm17466_vm1, %v17467_v5  ;;  %14678 = vmatprep.mubr.msk.f32.mxu1 %vm17466_vm1, %v17467_v5 }
 0x5bb   :  { %16216 = vmatpush3.bf16.msra.mxu0 %v17852_v34  ;;  %16222 = vmatpush3.bf16.msra.mxu1 %v17856_v36 }
 0x5bc   :  { %16223 = vmatprep.subr.bf16.mxu0 %v17465_v62  ;;  %16229 = vmatprep.subr.bf16.mxu1 %v17465_v62 }
 0x5be   :  { %14668 = vmatmul.mubr.msk.f32.vlgmr.msra.gmra.mrb[78].mxu0 %vm258_vm2, %v18293_v18  ;;  %14679 = vmatmul.mubr.msk.f32.vlgmr.msra.gmra.mrb[78].mxu1 %vm258_vm2, %v18293_v18 }
 0x5bf   :  { %16225 = vmatpush3.bf16.msra.mxu0 %v17747_v59  ;;  %16231 = vmatpush3.bf16.msra.mxu1 %v17751_v60 }
 0x5c0   :  { %16226 = vmatprep.subr.bf16.mxu0 %v17465_v62  ;;  %16232 = vmatprep.subr.bf16.mxu1 %v17465_v62 }
 0x5c1   :  { %14689 = vmatprep.mubr.msk.f32.mxu0 %vm17466_vm1, %v17467_v5  ;;  %14700 = vmatprep.mubr.msk.f32.mxu1 %vm17466_vm1, %v17467_v5 }
 0x5c3   :  { %16228 = vmatpush3.bf16.msra.mxu0 %v17765_v22  ;;  %16234 = vmatpush3.bf16.msra.mxu1 %v17770_v4 }
 0x5c4   :  { %16235 = vmatprep.subr.bf16.mxu0 %v17465_v62  ;;  %16241 = vmatprep.subr.bf16.mxu1 %v17465_v62 }
 0x678   :  { %v4467_v40 = vpop.f32.mrb[72].mxu0  ;;  %v4539_v24 = vpop.f32.mrb[72].mxu1 }
 0x679   :  { %v4471_v25 = vadd.f32 %v4467_v40, %v4397_v19  ;;  %v4543_v57 = vadd.f32 %v4539_v24, %v4472_v20  ;;  %v14603_v27 = vpop.f32.mrb[73].mxu0  ;;  %v14614_v31 = vpop.f32.mrb[73].mxu1 }
 0x67b   :  { %v12796_v45 = vmul.f32 -1.442695, %v4471_v25  ;;  %v12797_v32 = vmul.f32 -1.442695, %v4543_v57  ;;  %v4858_v25 = vld [vmem:[#allocation2 + $0x190] sm:$0xff] }
 0x67d   :  { %17013 = vpow2.f32 %v12796_v45 }
 0x67e   :  { %17015 = vpow2.f32 %v12797_v32 }
 0x680   :  { %v4611_v33 = vpop.f32.mrb[74].mxu0  ;;  %v4683_v3 = vpop.f32.mrb[74].mxu1 }
 0x681   :  { %v4687_v39 = vadd.f32 %v4683_v3, %v4616_v37  ;;  %v14625_v43 = vpop.f32.mrb[75].mxu0  ;;  %v14636_v46 = vpop.f32.mrb[75].mxu1  ;;  %v4615_v49 = vadd.f32 %v4611_v33, %v4544_v48 }
 0x683   :  { %v12798_v47 = vmul.f32 -1.442695, %v4687_v39 }
 0x685   :  { %17017 = vpow2.f32 %v12798_v47 }
 0x686   :  { %17019 = vtanh.f32 %v4615_v49 }
 0x687   :  { %v17014_v50 = vpop.eup %17013 }
 0x688   :  { %v17016_v52 = vpop.eup %17015  ;;  %v4691_v53 = vadd.f32 1.0, %v17014_v50 }
 0x689   :  { %v4697_v55 = vadd.f32 1.0, %v17016_v52  ;;  %v4781_v58 = vpop.f32.mrb[76].mxu0  ;;  %v4853_v2 = vpop.f32.mrb[76].mxu1 }
 0x68a   :  { %17021 = vrcp.f32 %v4691_v53  ;;  %v4785_v26 = vadd.f32 %v4781_v58, %v4712_v56  ;;  %v4857_v35 = vadd.f32 %v4853_v2, %v4786_v0  ;;  %v14647_v44 = vpop.f32.mrb[77].mxu0  ;;  %v14658_v51 = vpop.f32.mrb[77].mxu1 }
 0x68b   :  { %17023 = vrcp.f32 %v4697_v55 }
 0x68c   :  { %v12803_v6 = vmul.f32 -1.442695, %v4785_v26  ;;  %v12804_v17 = vmul.f32 -1.442695, %v4857_v35 }
 0x68e   :  { %17025 = vpow2.f32 %v12803_v6 }
 0x68f   :  { %17027 = vpow2.f32 %v12804_v17  ;;  %v17018_v9 = vpop.eup %17017 }
 0x690   :  { %v17020_v20 = vpop.eup %17019  ;;  %v4704_v24 = vadd.f32 1.0, %v17018_v9 }
 0x691   :  { %v4925_v11 = vpop.f32.mrb[78].mxu0  ;;  %v4997_v38 = vpop.f32.mrb[78].mxu1 }
 0x692   :  { %v5001_v14 = vadd.f32 %v4997_v38, %v4930_v12  ;;  %v14669_v19 = vpop.f32.mrb[79].mxu0  ;;  %v14680_v40 = vpop.f32.mrb[79].mxu1  ;;  %v4929_v27 = vadd.f32 %v4925_v11, %v4858_v25  ;;  %17029 = vrcp.f32 %v4704_v24  ;;  %v5251_v38 = vld [vmem:[#allocation2 + $0xf0] sm:$0xff] }
 0x693   :  { %v5179_v25 = vld [vmem:[#allocation2 + $0xb0] sm:$0xff] }
 0x694   :  { %v17022_v57 = vpop.eup %17021  ;;  %v12805_v32 = vmul.f32 -1.442695, %v5001_v14  ;;  %17031 = vtanh.f32 %v4929_v27 }
 0x695   :  { %v17024_v31 = vpop.eup %17023  ;;  %v4708_v45 = vmul.f32 %v17022_v57, %v17020_v20 }
 0x696   :  { %v4707_v33 = vmul.f32 %v17024_v31, %v18252_v7  ;;  %17033 = vpow2.f32 %v12805_v32 }
 0x698   :  { %v17026_v37 = vpop.eup %17025  ;;  %v18328_v3 = vadd.f32 %v4708_v45, %v4707_v33  ;;  %v5347_v33 = vld [vmem:[#allocation2 + $0x108] sm:$0xff] }
 0x699   :  { %v17028_v39 = vpop.eup %17027  ;;  %v5005_v43 = vadd.f32 1.0, %v17026_v37 }
 0x69a   :  { %17035 = vtanh.f32 %v18328_v3  ;;  %v5011_v46 = vadd.f32 1.0, %v17028_v39 }
 0x69b   :  { %17037 = vrcp.f32 %v5005_v43  ;;  %v5421_v43 = vld [vmem:[#allocation2 + $0x148] sm:$0xff] }
 0x69c   :  { %17039 = vrcp.f32 %v5011_v46  ;;  %v17030_v47 = vpop.eup %17029 }
 0x69e   :  { %v17032_v48 = vpop.eup %17031 }
 0x6a0   :  { %v17034_v49 = vpop.eup %17033 }
 0x6a1   :  { %v5018_v56 = vadd.f32 1.0, %v17034_v49 }
 0x6a3   :  { %17041 = vrcp.f32 %v5018_v56 }
 0x6a4   :  { %v17036_v50 = vpop.eup %17035 }
 0x6a5   :  { %v17038_v52 = vpop.eup %17037  ;;  %v18331_v53 = vmul.f32 %v17036_v50, %v17030_v47 }
 0x6a6   :  { %v17040_v7 = vpop.eup %17039  ;;  %v5022_v55 = vmul.f32 %v17038_v52, %v17032_v48 }
 0x6a7   :  { %v5021_v58 = vmul.f32 %v17040_v7, %v18264_v13  ;;  %14690 = vmatmul.mubr.msk.f32.vlgmr.msra.gmra.mrb[80].mxu0 %vm258_vm2, %v18331_v53  ;;  %14701 = vmatmul.mubr.msk.f32.vlgmr.msra.gmra.mrb[80].mxu1 %vm258_vm2, %v18331_v53 }
 0x6a8   :  { %16237 = vmatpush3.bf16.msra.mxu0 %v17799_v54  ;;  %16243 = vmatpush3.bf16.msra.mxu1 %v17803_v61 }
 0x6a9   :  { %v18340_v0 = vadd.f32 %v5022_v55, %v5021_v58  ;;  %16238 = vmatprep.subr.bf16.mxu0 %v17465_v62  ;;  %16244 = vmatprep.subr.bf16.mxu1 %v17465_v62  ;;  %v5565_v55 = vld [vmem:[#allocation2 + $0x1c8] sm:$0xff] }
 0x6aa   :  { %14711 = vmatprep.mubr.msk.f32.mxu0 %vm17466_vm1, %v17467_v5  ;;  %14722 = vmatprep.mubr.msk.f32.mxu1 %vm17466_vm1, %v17467_v5 }
 0x6ab   :  { %17043 = vtanh.f32 %v18340_v0 }
 0x6ac   :  { %16240 = vmatpush3.bf16.msra.mxu0 %v17808_v63  ;;  %16246 = vmatpush3.bf16.msra.mxu1 %v17812_v10 }
 0x6ad   :  { %16247 = vmatprep.subr.bf16.mxu0 %v17465_v62  ;;  %16253 = vmatprep.subr.bf16.mxu1 %v17465_v62  ;;  %v17042_v13 = vpop.eup %17041 }
 0x6af   :  { %14712 = vmatmul.mubr.msk.f32.vlgmr.msra.gmra.mrb[82].mxu0 %vm258_vm2, %v18331_v53  ;;  %14723 = vmatmul.mubr.msk.f32.vlgmr.msra.gmra.mrb[82].mxu1 %vm258_vm2, %v18331_v53 }
 0x6b0   :  { %16249 = vmatpush3.bf16.msra.mxu0 %v17820_v15  ;;  %16255 = vmatpush3.bf16.msra.mxu1 %v17824_v16 }
 0x6b1   :  { %16250 = vmatprep.subr.bf16.mxu0 %v17465_v62  ;;  %16256 = vmatprep.subr.bf16.mxu1 %v17465_v62 }
 0x6b2   :  { %14733 = vmatprep.mubr.msk.f32.mxu0 %vm17466_vm1, %v17467_v5  ;;  %14744 = vmatprep.mubr.msk.f32.mxu1 %vm17466_vm1, %v17467_v5 }
 0x6b4   :  { %16252 = vmatpush3.bf16.msra.mxu0 %v17830_v21  ;;  %16258 = vmatpush3.bf16.msra.mxu1 %v17834_v23 }
 0x6b5   :  { %v17044_v2 = vpop.eup %17043  ;;  %16259 = vmatprep.subr.bf16.mxu0 %v17465_v62  ;;  %16265 = vmatprep.subr.bf16.mxu1 %v17465_v62 }
 0x6b6   :  { %v5025_v26 = vmul.f32 %v17044_v2, %v17042_v13 }
 0x6b8   :  { %5028 = vrot.lane.b32.xlu1 %v5025_v26, %s17468_s4  ;;  %14734 = vmatmul.mubr.msk.f32.vlgmr.msra.gmra.mrb[84].mxu0 %vm258_vm2, %v5025_v26 }
 0x6b9   :  { %14745 = vmatmul.mubr.msk.f32.vlgmr.msra.gmra.mrb[84].mxu1 %vm258_vm2, %v5025_v26  ;;  %16261 = vmatpush3.bf16.msra.mxu0 %v17842_v28 }
 0x6ba   :  { %16267 = vmatpush3.bf16.msra.mxu1 %v17846_v29  ;;  %16262 = vmatprep.subr.bf16.mxu0 %v17465_v62 }
 0x6bb   :  { %16268 = vmatprep.subr.bf16.mxu1 %v17465_v62  ;;  %14755 = vmatprep.mubr.msk.f32.mxu0 %vm17466_vm1, %v17467_v5 }
 0x6bc   :  { %4393 = vrot.lane.b32.xlu1 %v18293_v18, %s17468_s4  ;;  %14766 = vmatprep.mubr.msk.f32.mxu1 %vm17466_vm1, %v17467_v5  ;;  %v5107_v18 = vld [vmem:[#allocation2 + $0x70] sm:$0xff] }
 0x6bd   :  { %16264 = vmatpush3.bf16.msra.mxu0 %v17852_v34 }
 0x6be   :  { %16270 = vmatpush3.bf16.msra.mxu1 %v17856_v36  ;;  %16271 = vmatprep.subr.bf16.mxu0 %v17465_v62 }
 0x6bf   :  { %16277 = vmatprep.subr.bf16.mxu1 %v17465_v62 }
 0x6c0   :  { %3123 = vrot.lane.b32.xlu1 %v18146_v41, %s17468_s4  ;;  %14756 = vmatmul.mubr.msk.f32.vlgmr.msra.gmra.mrb[86].mxu0 %vm258_vm2, %v5025_v26 }
 0x6c1   :  { %14767 = vmatmul.mubr.msk.f32.vlgmr.msra.gmra.mrb[86].mxu1 %vm258_vm2, %v5025_v26  ;;  %16273 = vmatpush3.bf16.msra.mxu0 %v17747_v59  ;;  %v5493_v26 = vld [vmem:[#allocation2 + $0x188] sm:$0xff] }
 0x6c2   :  { %16279 = vmatpush3.bf16.msra.mxu1 %v17751_v60  ;;  %16274 = vmatprep.subr.bf16.mxu0 %v17465_v62 }
 0x6c3   :  { %16280 = vmatprep.subr.bf16.mxu1 %v17465_v62  ;;  %14777 = vmatprep.mubr.msk.f32.mxu0 %vm17466_vm1, %v17467_v5 }
 0x6c4   :  { %1852 = vrot.lane.b32.xlu1 %v18004_v1, %s17468_s4  ;;  %14788 = vmatprep.mubr.msk.f32.mxu1 %vm17466_vm1, %v17467_v5 }
 0x6c5   :  { %16276 = vmatpush3.bf16.msra.mxu0 %v17765_v22 }
 0x6c6   :  { %16282 = vmatpush3.bf16.msra.mxu1 %v17770_v4  ;;  %16283 = vmatprep.subr.bf16.mxu0 %v17465_v62  ;;  %v5032_v4 = vld [vmem:[#allocation2 + $0x30] sm:$0xff] }
 0x6c7   :  { %16289 = vmatprep.subr.bf16.mxu1 %v17465_v62 }
 0x72a   :  { %v5029_v59 = vpop.permute.xlu1 %5028 }
 0x72b   :  { %5031 = vst.msk [vmem:[#allocation3 + $0x10] sm:$0xff] %vm1855_vm3, %v5029_v59 }
 0x72e   :  { %v4394_v60 = vpop.permute.xlu1 %4393 }
 0x72f   :  { %4396 = vst.msk [vmem:[#allocation3 + $0x18] sm:$0xff] %vm1855_vm3, %v4394_v60 }
 0x732   :  { %v3124_v41 = vpop.permute.xlu1 %3123 }
 0x733   :  { %3126 = vst.msk [vmem:[#allocation3 + $0x28] sm:$0xff] %vm1855_vm3, %v3124_v41 }
 0x734   :  { %5026 = vst.msk [vmem:[#allocation3 + $0x28] sm:$0xff] %vm258_vm2, %v18331_v53 }
 0x736   :  { %v1853_v22 = vpop.permute.xlu1 %1852 }
 0x737   :  { %1856 = vst.msk [vmem:[#allocation3 + $0x38] sm:$0xff] %vm1855_vm3, %v1853_v22 }
 0x77a   :  { %v5102_v1 = vpop.f32.mrb[80].mxu0  ;;  %v5174_v35 = vpop.f32.mrb[80].mxu1 }
 0x77b   :  { %v5106_v44 = vadd.f32 %v5102_v1, %v5032_v4  ;;  %v5178_v51 = vadd.f32 %v5174_v35, %v5107_v18  ;;  %v14691_v6 = vpop.f32.mrb[81].mxu0  ;;  %v14702_v17 = vpop.f32.mrb[81].mxu1 }
 0x77d   :  { %v12810_v9 = vmul.f32 -1.442695, %v5106_v44  ;;  %v12811_v11 = vmul.f32 -1.442695, %v5178_v51 }
 0x77f   :  { %17045 = vpow2.f32 %v12810_v9 }
 0x780   :  { %17047 = vpow2.f32 %v12811_v11 }
 0x782   :  { %v5246_v12 = vpop.f32.mrb[82].mxu0  ;;  %v5318_v14 = vpop.f32.mrb[82].mxu1 }
 0x783   :  { %v5322_v19 = vadd.f32 %v5318_v14, %v5251_v38  ;;  %v14713_v40 = vpop.f32.mrb[83].mxu0  ;;  %v14724_v20 = vpop.f32.mrb[83].mxu1  ;;  %v5250_v57 = vadd.f32 %v5246_v12, %v5179_v25 }
 0x785   :  { %v12812_v24 = vmul.f32 -1.442695, %v5322_v19 }
 0x787   :  { %17049 = vpow2.f32 %v12812_v24 }
 0x788   :  { %17051 = vtanh.f32 %v5250_v57 }
 0x789   :  { %v17046_v27 = vpop.eup %17045 }
 0x78a   :  { %v17048_v31 = vpop.eup %17047  ;;  %v5326_v45 = vadd.f32 1.0, %v17046_v27 }
 0x78b   :  { %v5332_v32 = vadd.f32 1.0, %v17048_v31  ;;  %v5416_v37 = vpop.f32.mrb[84].mxu0 }
 0x78c   :  { %17053 = vrcp.f32 %v5326_v45  ;;  %v5420_v39 = vadd.f32 %v5416_v37, %v5347_v33  ;;  %v5488_v46 = vpop.f32.mrb[84].mxu1  ;;  %v14735_v47 = vpop.f32.mrb[85].mxu0 }
 0x78d   :  { %17055 = vrcp.f32 %v5332_v32  ;;  %v5492_v48 = vadd.f32 %v5488_v46, %v5421_v43  ;;  %v14746_v49 = vpop.f32.mrb[85].mxu1  ;;  %v5886_v43 = vld [vmem:[#allocation2 + $0xf8] sm:$0xff] }
 0x78e   :  { %v12817_v50 = vmul.f32 -1.442695, %v5420_v39 }
 0x78f   :  { %v12818_v52 = vmul.f32 -1.442695, %v5492_v48 }
 0x790   :  { %17057 = vpow2.f32 %v12817_v50 }
 0x791   :  { %17059 = vpow2.f32 %v12818_v52  ;;  %v17050_v53 = vpop.eup %17049  ;;  %v5814_v52 = vld [vmem:[#allocation2 + $0xb8] sm:$0xff] }
 0x792   :  { %v17052_v13 = vpop.eup %17051  ;;  %v5339_v2 = vadd.f32 1.0, %v17050_v53 }
 0x793   :  { %v5560_v7 = vpop.f32.mrb[86].mxu0 }
 0x794   :  { %v5632_v56 = vpop.f32.mrb[86].mxu1  ;;  %v14757_v58 = vpop.f32.mrb[87].mxu0  ;;  %v5564_v22 = vadd.f32 %v5560_v7, %v5493_v26  ;;  %17061 = vrcp.f32 %v5339_v2  ;;  %v6056_v26 = vld [vmem:[#allocation2 + $0x140] sm:$0xff] }
 0x795   :  { %v5636_v59 = vadd.f32 %v5632_v56, %v5565_v55  ;;  %v14768_v60 = vpop.f32.mrb[87].mxu1 }
 0x796   :  { %v17054_v41 = vpop.eup %17053  ;;  %17063 = vtanh.f32 %v5564_v22 }
 0x797   :  { %v17056_v4 = vpop.eup %17055  ;;  %v5343_v1 = vmul.f32 %v17054_v41, %v17052_v13  ;;  %v12819_v18 = vmul.f32 -1.442695, %v5636_v59  ;;  %v5982_v13 = vld [vmem:[#allocation2 + $0x100] sm:$0xff] }
 0x798   :  { %v5342_v35 = vmul.f32 %v17056_v4, %v18328_v3 }
 0x799   :  { %17065 = vpow2.f32 %v12819_v18 }
 0x79a   :  { %v17058_v44 = vpop.eup %17057  ;;  %v18411_v51 = vadd.f32 %v5343_v1, %v5342_v35 }
 0x79b   :  { %v17060_v6 = vpop.eup %17059  ;;  %v5640_v17 = vadd.f32 1.0, %v17058_v44 }
 0x79c   :  { %17067 = vtanh.f32 %v18411_v51  ;;  %v5646_v9 = vadd.f32 1.0, %v17060_v6  ;;  %v6200_v6 = vld [vmem:[#allocation2 + $0x1c0] sm:$0xff] }
 0x79d   :  { %17069 = vrcp.f32 %v5640_v17 }
 0x79e   :  { %17071 = vrcp.f32 %v5646_v9  ;;  %v17062_v11 = vpop.eup %17061 }
 0x7a0   :  { %v17064_v12 = vpop.eup %17063 }
 0x7a3   :  { %v17066_v38 = vpop.eup %17065 }
 0x7a4   :  { %v5653_v24 = vadd.f32 1.0, %v17066_v38 }
 0x7a6   :  { %v17068_v14 = vpop.eup %17067  ;;  %17073 = vrcp.f32 %v5653_v24 }
 0x7a7   :  { %v17070_v19 = vpop.eup %17069  ;;  %v18414_v40 = vmul.f32 %v17068_v14, %v17062_v11 }
 0x7a8   :  { %v17072_v3 = vpop.eup %17071  ;;  %v5657_v20 = vmul.f32 %v17070_v19, %v17064_v12  ;;  %v6128_v19 = vld [vmem:[#allocation2 + $0x180] sm:$0xff] }
 0x7a9   :  { %v5656_v25 = vmul.f32 %v17072_v3, %v18340_v0  ;;  %14778 = vmatmul.mubr.msk.f32.vlgmr.msra.gmra.mrb[88].mxu0 %vm258_vm2, %v18414_v40  ;;  %14789 = vmatmul.mubr.msk.f32.vlgmr.msra.gmra.mrb[88].mxu1 %vm258_vm2, %v18414_v40  ;;  %v5742_v0 = vld [vmem:[#allocation2 + $0x78] sm:$0xff] }
 0x7aa   :  { %16285 = vmatpush3.bf16.msra.mxu0 %v17799_v54  ;;  %16291 = vmatpush3.bf16.msra.mxu1 %v17803_v61 }
 0x7ab   :  { %v18423_v57 = vadd.f32 %v5657_v20, %v5656_v25  ;;  %16286 = vmatprep.subr.bf16.mxu0 %v17465_v62  ;;  %16292 = vmatprep.subr.bf16.mxu1 %v17465_v62 }
 0x7ac   :  { %14799 = vmatprep.mubr.msk.f32.mxu0 %vm17466_vm1, %v17467_v5  ;;  %14810 = vmatprep.mubr.msk.f32.mxu1 %vm17466_vm1, %v17467_v5 }
 0x7ad   :  { %17075 = vtanh.f32 %v18423_v57 }
 0x7ae   :  { %16288 = vmatpush3.bf16.msra.mxu0 %v17808_v63  ;;  %16294 = vmatpush3.bf16.msra.mxu1 %v17812_v10  ;;  %v6310_v10 = vld [vmem:[#allocation8] sm:$0xff] }
 0x7af   :  { %16295 = vmatprep.subr.bf16.mxu0 %v17465_v62  ;;  %16301 = vmatprep.subr.bf16.mxu1 %v17465_v62 }
 0x7b0   :  { %v17074_v54 = vpop.eup %17073 }
 0x7b1   :  { %14800 = vmatmul.mubr.msk.f32.vlgmr.msra.gmra.mrb[90].mxu0 %vm258_vm2, %v18414_v40  ;;  %14811 = vmatmul.mubr.msk.f32.vlgmr.msra.gmra.mrb[90].mxu1 %vm258_vm2, %v18414_v40 }
 0x7b2   :  { %16297 = vmatpush3.bf16.msra.mxu0 %v17820_v15  ;;  %16303 = vmatpush3.bf16.msra.mxu1 %v17824_v16  ;;  %v6311_v15 = vld [vmem:[#allocation8 + $0x8] sm:$0xff]  ;;  %v6463_v16 = vld [vmem:[#allocation8 + $0x40] sm:$0xff] }
 0x7b3   :  { %16298 = vmatprep.subr.bf16.mxu0 %v17465_v62  ;;  %16304 = vmatprep.subr.bf16.mxu1 %v17465_v62 }
 0x7b4   :  { %14821 = vmatprep.mubr.msk.f32.mxu0 %vm17466_vm1, %v17467_v5  ;;  %14832 = vmatprep.mubr.msk.f32.mxu1 %vm17466_vm1, %v17467_v5 }
 0x7b6   :  { %16300 = vmatpush3.bf16.msra.mxu0 %v17830_v21  ;;  %16306 = vmatpush3.bf16.msra.mxu1 %v17834_v23  ;;  %v16319_v21 = vpack.c.bf16 %v6311_v15, %v6310_v10  ;;  %v6464_v23 = vld [vmem:[#allocation8 + $0x48] sm:$0xff] }
 0x7b7   :  { %v17076_v61 = vpop.eup %17075  ;;  %16307 = vmatprep.subr.bf16.mxu0 %v17465_v62  ;;  %16313 = vmatprep.subr.bf16.mxu1 %v17465_v62 }
 0x7b8   :  { %v18452_v63 = vmul.f32 %v17076_v61, %v17074_v54 }
 0x7ba   :  { %14822 = vmatmul.mubr.msk.f32.vlgmr.msra.gmra.mrb[92].mxu0 %vm258_vm2, %v18452_v63  ;;  %14833 = vmatmul.mubr.msk.f32.vlgmr.msra.gmra.mrb[92].mxu1 %vm258_vm2, %v18452_v63 }
 0x7bb   :  { %16309 = vmatpush3.bf16.msra.mxu0 %v17842_v28  ;;  %16315 = vmatpush3.bf16.msra.mxu1 %v17846_v29  ;;  %v16335_v28 = vpack.c.bf16 %v6464_v23, %v6463_v16  ;;  %v5667_v29 = vld [vmem:[#allocation2 + $0x38] sm:$0xff] }
 0x7bc   :  { %16310 = vmatprep.subr.bf16.mxu0 %v17465_v62  ;;  %16316 = vmatprep.subr.bf16.mxu1 %v17465_v62 }
 0x7bd   :  { %14843 = vmatprep.mubr.msk.f32.mxu0 %vm17466_vm1, %v17467_v5  ;;  %14854 = vmatprep.mubr.msk.f32.mxu1 %vm17466_vm1, %v17467_v5 }
 0x7bf   :  { %16312 = vmatpush3.bf16.msra.mxu0 %v17852_v34  ;;  %16318 = vmatpush3.bf16.msra.mxu1 %v17856_v36 }
 0x7c0   :  { %16320 = vmatprep.subr.bf16.mxu0 %v16319_v21  ;;  %16336 = vmatprep.subr.bf16.mxu1 %v16335_v28 }
 0x7c2   :  { %14844 = vmatmul.mubr.msk.f32.vlgmr.msra.gmra.mrb[94].mxu0 %vm258_vm2, %v18452_v63  ;;  %14855 = vmatmul.mubr.msk.f32.vlgmr.msra.gmra.mrb[94].mxu1 %vm258_vm2, %v18452_v63 }
 0x7c3   :  { %16322 = vmatpush3.bf16.msra.mxu0 %v16319_v21  ;;  %16338 = vmatpush3.bf16.msra.mxu1 %v16335_v28 }
 0x87c   :  { %v5737_v34 = vpop.f32.mrb[88].mxu0  ;;  %v5809_v36 = vpop.f32.mrb[88].mxu1 }
 0x87d   :  { %v5741_v27 = vadd.f32 %v5737_v34, %v5667_v29  ;;  %v5813_v31 = vadd.f32 %v5809_v36, %v5742_v0  ;;  %v14779_v45 = vpop.f32.mrb[89].mxu0  ;;  %v14790_v32 = vpop.f32.mrb[89].mxu1 }
 0x87f   :  { %v12824_v33 = vmul.f32 -1.442695, %v5741_v27  ;;  %v12825_v37 = vmul.f32 -1.442695, %v5813_v31 }
 0x881   :  { %17077 = vpow2.f32 %v12824_v33  ;;  %v6312_v33 = vld [vmem:[#allocation8 + $0x10] sm:$0xff] }
 0x882   :  { %17079 = vpow2.f32 %v12825_v37  ;;  %v6313_v37 = vld [vmem:[#allocation8 + $0x18] sm:$0xff] }
 0x884   :  { %v5881_v39 = vpop.f32.mrb[90].mxu0  ;;  %v5953_v46 = vpop.f32.mrb[90].mxu1 }
 0x885   :  { %v5957_v47 = vadd.f32 %v5953_v46, %v5886_v43  ;;  %v14801_v48 = vpop.f32.mrb[91].mxu0  ;;  %v14812_v49 = vpop.f32.mrb[91].mxu1  ;;  %v5885_v53 = vadd.f32 %v5881_v39, %v5814_v52  ;;  %v6465_v39 = vld [vmem:[#allocation8 + $0x50] sm:$0xff]  ;;  %v16323_v46 = vpack.c.bf16 %v6313_v37, %v6312_v33  ;;  %v6467_v52 = vld [vmem:[#allocation8 + $0x60] sm:$0xff] }
 0x886   :  { %v6314_v49 = vld [vmem:[#allocation8 + $0x20] sm:$0xff] }
 0x887   :  { %v12826_v50 = vmul.f32 -1.442695, %v5957_v47  ;;  %v6466_v47 = vld [vmem:[#allocation8 + $0x58] sm:$0xff]  ;;  %16324 = vmatprep.subr.bf16.mxu0 %v16323_v46 }
 0x888   :  { %v16339_v48 = vpack.c.bf16 %v6466_v47, %v6465_v39  ;;  %16326 = vmatpush3.bf16.msra.mxu0 %v16323_v46  ;;  %v6855_v39 = vld [vmem:[#allocation8 + $0x110] sm:$0xff]  ;;  %v6986_v47 = vld [vmem:[#allocation8 + $0x158] sm:$0xff] }
 0x889   :  { %17081 = vpow2.f32 %v12826_v50  ;;  %v6315_v50 = vld [vmem:[#allocation8 + $0x28] sm:$0xff]  ;;  %v6985_v46 = vld [vmem:[#allocation8 + $0x150] sm:$0xff] }
 0x88a   :  { %17083 = vtanh.f32 %v5885_v53  ;;  %16340 = vmatprep.subr.bf16.mxu1 %v16339_v48  ;;  %v16327_v53 = vpack.c.bf16 %v6315_v50, %v6314_v49  ;;  %v16403_v49 = vpack.c.bf16 %v6986_v47, %v6985_v46  ;;  %v6857_v50 = vld [vmem:[#allocation8 + $0x120] sm:$0xff]  ;;  %v7390_v46 = vld [vmem:[#allocation9 + $0x78] sm:$0xff] }
 0x88b   :  { %v17078_v7 = vpop.eup %17077  ;;  %16342 = vmatpush3.bf16.msra.mxu1 %v16339_v48 }
 0x88c   :  { %v17080_v55 = vpop.eup %17079  ;;  %v5961_v56 = vadd.f32 1.0, %v17078_v7  ;;  %v6468_v7 = vld [vmem:[#allocation8 + $0x68] sm:$0xff]  ;;  %16328 = vmatprep.subr.bf16.mxu0 %v16327_v53 }
 0x88d   :  { %v5967_v58 = vadd.f32 1.0, %v17080_v55  ;;  %v6051_v2 = vpop.f32.mrb[92].mxu0  ;;  %v6123_v59 = vpop.f32.mrb[92].mxu1  ;;  %v16343_v55 = vpack.c.bf16 %v6468_v7, %v6467_v52  ;;  %16330 = vmatpush3.bf16.msra.mxu0 %v16327_v53  ;;  %v6858_v52 = vld [vmem:[#allocation8 + $0x128] sm:$0xff]  ;;  %v6987_v53 = vld [vmem:[#allocation8 + $0x160] sm:$0xff] }
 0x88e   :  { %17085 = vrcp.f32 %v5961_v56  ;;  %v6055_v60 = vadd.f32 %v6051_v2, %v5982_v13  ;;  %v6127_v41 = vadd.f32 %v6123_v59, %v6056_v26  ;;  %v14823_v22 = vpop.f32.mrb[93].mxu0  ;;  %v14834_v4 = vpop.f32.mrb[93].mxu1  ;;  %v6317_v56 = vld [vmem:[#allocation8 + $0x38] sm:$0xff]  ;;  %v6988_v7 = vld [vmem:[#allocation8 + $0x168] sm:$0xff] }
 0x88f   :  { %17087 = vrcp.f32 %v5967_v58  ;;  %16344 = vmatprep.subr.bf16.mxu1 %v16343_v55  ;;  %v6469_v58 = vld [vmem:[#allocation8 + $0x70] sm:$0xff]  ;;  %v6470_v2 = vld [vmem:[#allocation8 + $0x78] sm:$0xff]  ;;  %v6723_v22 = vld [vmem:[#allocation8 + $0xc0] sm:$0xff] }
 0x890   :  { %v12831_v1 = vmul.f32 -1.442695, %v6055_v60  ;;  %v12832_v18 = vmul.f32 -1.442695, %v6127_v41  ;;  %16346 = vmatpush3.bf16.msra.mxu1 %v16343_v55  ;;  %v16347_v26 = vpack.c.bf16 %v6470_v2, %v6469_v58  ;;  %v6593_v60 = vld [vmem:[#allocation8 + $0x80] sm:$0xff]  ;;  %v6594_v41 = vld [vmem:[#allocation8 + $0x88] sm:$0xff]  ;;  %v16391_v55 = vpack.c.bf16 %v6858_v52, %v6857_v50 }
 0x891   :  { %v6860_v58 = vld [vmem:[#allocation8 + $0x138] sm:$0xff]  ;;  %v7397_v50 = vld [vmem:[#allocation9 + $0xa0] sm:$0xff]  ;;  %v7398_v52 = vld [vmem:[#allocation9 + $0xa8] sm:$0xff] }
 0x892   :  { %17089 = vpow2.f32 %v12831_v1  ;;  %16348 = vmatprep.subr.bf16.mxu1 %v16347_v26  ;;  %v16351_v1 = vpack.c.bf16 %v6594_v41, %v6593_v60  ;;  %v6990_v2 = vld [vmem:[#allocation8 + $0x178] sm:$0xff]  ;;  %v7113_v60 = vld [vmem:[#allocation8 + $0x180] sm:$0xff]  ;;  %v7114_v41 = vld [vmem:[#allocation8 + $0x188] sm:$0xff] }
 0x893   :  { %17091 = vpow2.f32 %v12832_v18  ;;  %v17082_v35 = vpop.eup %17081  ;;  %v6724_v18 = vld [vmem:[#allocation8 + $0xc8] sm:$0xff] }
 0x894   :  { %v17084_v38 = vpop.eup %17083  ;;  %v5974_v14 = vadd.f32 1.0, %v17082_v35  ;;  %16350 = vmatpush3.bf16.msra.mxu1 %v16347_v26 }
 0x895   :  { %v6195_v44 = vpop.f32.mrb[94].mxu0  ;;  %v6267_v17 = vpop.f32.mrb[94].mxu1 }
 0x896   :  { %v6271_v9 = vadd.f32 %v6267_v17, %v6200_v6  ;;  %v14845_v11 = vpop.f32.mrb[95].mxu0  ;;  %v14856_v12 = vpop.f32.mrb[95].mxu1  ;;  %v6199_v20 = vadd.f32 %v6195_v44, %v6128_v19  ;;  %17093 = vrcp.f32 %v5974_v14  ;;  %v16367_v44 = vpack.c.bf16 %v6724_v18, %v6723_v22  ;;  %v18495_v19 = vld [vmem:[#allocation3 + $0x10] sm:$0xff]  ;;  %v7243_v22 = vld [vmem:[#allocation8 + $0x1c0] sm:$0xff] }
 0x897   :  { %v6595_v12 = vld [vmem:[#allocation8 + $0x90] sm:$0xff] }
 0x898   :  { %v17086_v3 = vpop.eup %17085  ;;  %v12833_v54 = vmul.f32 -1.442695, %v6271_v9  ;;  %17095 = vtanh.f32 %v6199_v20  ;;  %16368 = vmatprep.subr.bf16.mxu1 %v16367_v44 }
 0x899   :  { %v17088_v24 = vpop.eup %17087  ;;  %v5978_v25 = vmul.f32 %v17086_v3, %v17084_v38 }
 0x89a   :  { %v5977_v61 = vmul.f32 %v17088_v24, %v18411_v51  ;;  %17097 = vpow2.f32 %v12833_v54  ;;  %v6597_v24 = vld [vmem:[#allocation8 + $0xa0] sm:$0xff] }
 0x89b   :  { %v6727_v54 = vld [vmem:[#allocation8 + $0xe0] sm:$0xff] }
 0x89c   :  { %v17090_v10 = vpop.eup %17089  ;;  %v5979_v15 = vadd.f32 %v5978_v25, %v5977_v61  ;;  %v6598_v25 = vld [vmem:[#allocation8 + $0xa8] sm:$0xff] }
 0x89d   :  { %v17092_v16 = vpop.eup %17091  ;;  %v6275_v21 = vadd.f32 1.0, %v17090_v10  ;;  %v6728_v61 = vld [vmem:[#allocation8 + $0xe8] sm:$0xff]  ;;  %v16359_v10 = vpack.c.bf16 %v6598_v25, %v6597_v24  ;;  %v7119_v24 = vld [vmem:[#allocation8 + $0x1b0] sm:$0xff]  ;;  %v7120_v25 = vld [vmem:[#allocation8 + $0x1b8] sm:$0xff] }
 0x89e   :  { %17099 = vtanh.f32 %v5979_v15  ;;  %v6281_v23 = vadd.f32 1.0, %v17092_v16  ;;  %v16375_v15 = vpack.c.bf16 %v6728_v61, %v6727_v54  ;;  %v6599_v16 = vld [vmem:[#allocation8 + $0xb0] sm:$0xff]  ;;  %v7250_v61 = vld [vmem:[#allocation8 + $0x1f8] sm:$0xff] }
 0x89f   :  { %17101 = vrcp.f32 %v6275_v21  ;;  %v6600_v21 = vld [vmem:[#allocation8 + $0xb8] sm:$0xff]  ;;  %v7249_v54 = vld [vmem:[#allocation8 + $0x1f0] sm:$0xff] }
 0x8a0   :  { %17103 = vrcp.f32 %v6281_v23  ;;  %v17094_v28 = vpop.eup %17093  ;;  %v6729_v23 = vld [vmem:[#allocation8 + $0xf0] sm:$0xff] }
 0x8a2   :  { %v17096_v29 = vpop.eup %17095 }
 0x8a4   :  { %v17098_v34 = vpop.eup %17097 }
 0x8a5   :  { %v6288_v51 = vadd.f32 1.0, %v17098_v34  ;;  %v16363_v34 = vpack.c.bf16 %v6600_v21, %v6599_v16  ;;  %v7372_v16 = vld [vmem:[#allocation9] sm:$0xff]  ;;  %v7373_v21 = vld [vmem:[#allocation9 + $0x8] sm:$0xff] }
 0x8a7   :  { %17105 = vrcp.f32 %v6288_v51  ;;  %v6984_v51 = vld [vmem:[#allocation8 + $0x148] sm:$0xff] }
 0x8a8   :  { %v17100_v0 = vpop.eup %17099 }
 0x8a9   :  { %v17102_v36 = vpop.eup %17101  ;;  %v5981_v27 = vmul.f32 %v17100_v0, %v17094_v28  ;;  %v6730_v28 = vld [vmem:[#allocation8 + $0xf8] sm:$0xff] }
 0x8aa   :  { %v17104_v31 = vpop.eup %17103  ;;  %v6292_v45 = vmul.f32 %v17102_v36, %v17096_v29  ;;  %v18520_v29 = vld [vmem:[#allocation3 + $0x28] sm:$0xff]  ;;  %v16379_v0 = vpack.c.bf16 %v6730_v28, %v6729_v23  ;;  %v6853_v36 = vld [vmem:[#allocation8 + $0x100] sm:$0xff] }
 0x8ab   :  { %6296 = vst.msk [vmem:[#allocation3 + $0x38] sm:$0xff] %vm258_vm2, %v5981_v27  ;;  %v6291_v32 = vmul.f32 %v17104_v31, %v18423_v57  ;;  %v6316_v57 = vld [vmem:[#allocation8 + $0x30] sm:$0xff]  ;;  %v6854_v27 = vld [vmem:[#allocation8 + $0x108] sm:$0xff]  ;;  %v7377_v23 = vld [vmem:[#allocation9 + $0x20] sm:$0xff] }
 0x8ac   :  { %v16331_v13 = vpack.c.bf16 %v6317_v56, %v6316_v57  ;;  %v16383_v33 = vpack.c.bf16 %v6854_v27, %v6853_v36  ;;  %v16407_v57 = vpack.c.bf16 %v6988_v7, %v6987_v53  ;;  %v6859_v56 = vld [vmem:[#allocation8 + $0x130] sm:$0xff]  ;;  %v7378_v28 = vld [vmem:[#allocation9 + $0x28] sm:$0xff]  ;;  %v7375_v27 = vld [vmem:[#allocation9 + $0x18] sm:$0xff]  ;;  %v18678_v7 = vpack.c.bf16 %v7398_v52, %v7397_v50 }
 0x8ad   :  { %v6293_v43 = vadd.f32 %v6292_v45, %v6291_v32  ;;  %v6983_v45 = vld [vmem:[#allocation8 + $0x140] sm:$0xff]  ;;  %v16395_v26 = vpack.c.bf16 %v6860_v58, %v6859_v56  ;;  %v7374_v36 = vld [vmem:[#allocation9 + $0x10] sm:$0xff]  ;;  %v7400_v58 = vld [vmem:[#allocation9 + $0xb8] sm:$0xff] }
 0x8ae   :  { %16332 = vmatprep.subr.bf16.mxu0 %v16331_v13  ;;  %v16399_v37 = vpack.c.bf16 %v6984_v51, %v6983_v45  ;;  %v7379_v45 = vld [vmem:[#allocation9 + $0x30] sm:$0xff]  ;;  %v7380_v51 = vld [vmem:[#allocation9 + $0x38] sm:$0xff] }
 0x8af   :  { %17107 = vtanh.f32 %v6293_v43  ;;  %16334 = vmatpush3.bf16.msra.mxu0 %v16331_v13  ;;  %v6856_v43 = vld [vmem:[#allocation8 + $0x118] sm:$0xff]  ;;  %v6989_v13 = vld [vmem:[#allocation8 + $0x170] sm:$0xff] }
 0x8b0   :  { %16352 = vmatprep.subr.bf16.mxu0 %v16351_v1  ;;  %v16387_v48 = vpack.c.bf16 %v6856_v43, %v6855_v39  ;;  %v7385_v39 = vld [vmem:[#allocation9 + $0x58] sm:$0xff]  ;;  %v7389_v43 = vld [vmem:[#allocation9 + $0x70] sm:$0xff] }
 0x8b1   :  { %v17106_v59 = vpop.eup %17105  ;;  %v18666_v47 = vpack.c.bf16 %v7390_v46, %v7389_v43  ;;  %v7399_v56 = vld [vmem:[#allocation9 + $0xb0] sm:$0xff] }
 0x8b2   :  { %v18532_v32 = vld [vmem:[#allocation3 + $0x38] sm:$0xff] }
 0x8b9   :  { %v17108_v4 = vpop.eup %17107 }
 0x8ba   :  { %v6295_v35 = vmul.f32 %v17108_v4, %v17106_v59  ;;  %v16411_v59 = vpack.c.bf16 %v6990_v2, %v6989_v13  ;;  %v7244_v4 = vld [vmem:[#allocation8 + $0x1c8] sm:$0xff]  ;;  %v18688_v2 = vpack.c.bf16 %v7400_v58, %v7399_v56 }
 0x8bb   :  { %v16431_v18 = vpack.c.bf16 %v7244_v4, %v7243_v22 }
 0x8bc   :  { %6298 = vrot.lane.b32.xlu0 %v6295_v35, %s17468_s4  ;;  %v7115_v35 = vld [vmem:[#allocation8 + $0x190] sm:$0xff] }
 0x8c0   :  { %5663 = vrot.lane.b32.xlu0 %v18452_v63, %s17468_s4  ;;  %v6726_v63 = vld [vmem:[#allocation8 + $0xd8] sm:$0xff] }
 0x8c4   :  { %3758 = vrot.lane.b32.xlu0 %v18217_v42, %s17468_s4  ;;  %v6596_v42 = vld [vmem:[#allocation8 + $0x98] sm:$0xff] }
 0x8c5   :  { %v16355_v3 = vpack.c.bf16 %v6596_v42, %v6595_v12  ;;  %v7117_v42 = vld [vmem:[#allocation8 + $0x1a0] sm:$0xff] }
 0x8c8   :  { %2488 = vrot.lane.b32.xlu0 %v18075_v30, %s17468_s4  ;;  %v6725_v30 = vld [vmem:[#allocation8 + $0xd0] sm:$0xff] }
 0x8c9   :  { %v16371_v20 = vpack.c.bf16 %v6726_v63, %v6725_v30  ;;  %v7118_v30 = vld [vmem:[#allocation8 + $0x1a8] sm:$0xff]  ;;  %v7247_v63 = vld [vmem:[#allocation8 + $0x1e0] sm:$0xff] }
 0x92e   :  { %v6299_v6 = vpop.permute.xlu0 %6298 }
 0x92f   :  { %6301 = vst.msk [vmem:[#allocation3] sm:$0xff] %vm1855_vm3, %v6299_v6  ;;  %v7245_v6 = vld [vmem:[#allocation8 + $0x1d0] sm:$0xff] }
 0x932   :  { %v5664_v17 = vpop.permute.xlu0 %5663 }
 0x933   :  { %5666 = vst.msk [vmem:[#allocation3 + $0x8] sm:$0xff] %vm1855_vm3, %v5664_v17  ;;  %v7246_v17 = vld [vmem:[#allocation8 + $0x1d8] sm:$0xff] }
 0x934   :  { %v16435_v12 = vpack.c.bf16 %v7246_v17, %v7245_v6 }
 0x936   :  { %v3759_v9 = vpop.permute.xlu0 %3758  ;;  %v18484_v11 = vld [vmem:[#allocation3] sm:$0xff] }
 0x937   :  { %3761 = vst.msk [vmem:[#allocation3 + $0x20] sm:$0xff] %vm1855_vm3, %v3759_v9  ;;  %14873 = vmatprep.mubr.msk.f32.mxu0 %vm128_vm0, %v18484_v11  ;;  %14901 = vmatprep.mubr.msk.f32.mxu1 %vm128_vm0, %v18484_v11 }
 0x938   :  { %4391 = vst.msk [vmem:[#allocation3 + $0x20] sm:$0xff] %vm258_vm2, %v18255_v8  ;;  %v18508_v8 = vld [vmem:[#allocation3 + $0x18] sm:$0xff] }
 0x93a   :  { %v2489_v38 = vpop.permute.xlu0 %2488  ;;  %v18493_v14 = vld [vmem:[#allocation3 + $0x8] sm:$0xff] }
 0x93b   :  { %2491 = vst.msk [vmem:[#allocation3 + $0x30] sm:$0xff] %vm1855_vm3, %v2489_v38  ;;  %14874 = vmatmul.mubr.msk.f32.vlgmr.msra.gmra.mrb[96].mxu0 %vm128_vm0, %v18493_v14  ;;  %14902 = vmatmul.mubr.msk.f32.vlgmr.msra.gmra.mrb[96].mxu1 %vm128_vm0, %v18493_v14  ;;  %v7248_v38 = vld [vmem:[#allocation8 + $0x1e8] sm:$0xff] }
 0x93c   :  { %5661 = vst.msk [vmem:[#allocation3 + $0x30] sm:$0xff] %vm258_vm2, %v18414_v40  ;;  %14876 = vmatprep.mubr.msk.f32.mxu0 %vm128_vm0, %v18495_v19  ;;  %14904 = vmatprep.mubr.msk.f32.mxu1 %vm128_vm0, %v18495_v19 }
 0x93d   :  { %16354 = vmatpush3.bf16.msra.mxu0 %v16351_v1  ;;  %16370 = vmatpush3.bf16.msra.mxu1 %v16367_v44  ;;  %v16415_v1 = vpack.c.bf16 %v7114_v41, %v7113_v60  ;;  %v7116_v44 = vld [vmem:[#allocation8 + $0x198] sm:$0xff]  ;;  %v7407_v60 = vld [vmem:[#allocation9 + $0xe0] sm:$0xff]  ;;  %v7408_v41 = vld [vmem:[#allocation9 + $0xe8] sm:$0xff] }
 0x93e   :  { %16356 = vmatprep.subr.bf16.mxu0 %v16355_v3  ;;  %16372 = vmatprep.subr.bf16.mxu1 %v16371_v20  ;;  %v16419_v9 = vpack.c.bf16 %v7116_v44, %v7115_v35  ;;  %v18700_v4 = vpack.c.bf16 %v7408_v41, %v7407_v60  ;;  %v7409_v35 = vld [vmem:[#allocation9 + $0xf0] sm:$0xff]  ;;  %v7410_v44 = vld [vmem:[#allocation9 + $0xf8] sm:$0xff] }
 0x93f   :  { %14877 = vmatmul.mubr.msk.f32.gmra.mrb[98].mxu0 %vm128_vm0, %v18508_v8  ;;  %14905 = vmatmul.mubr.msk.f32.gmra.mrb[98].mxu1 %vm128_vm0, %v18508_v8  ;;  %v18514_v40 = vld [vmem:[#allocation3 + $0x20] sm:$0xff]  ;;  %v18710_v17 = vpack.c.bf16 %v7410_v44, %v7409_v35 }
 0x940   :  { %14879 = vmatprep.mubr.msk.f32.mxu0 %vm128_vm0, %v18514_v40  ;;  %14907 = vmatprep.mubr.msk.f32.mxu1 %vm128_vm0, %v18514_v40 }
 0x941   :  { %16358 = vmatpush3.bf16.msra.mxu0 %v16355_v3  ;;  %16374 = vmatpush3.bf16.msra.mxu1 %v16371_v20  ;;  %v16423_v3 = vpack.c.bf16 %v7118_v30, %v7117_v42  ;;  %v16439_v20 = vpack.c.bf16 %v7248_v38, %v7247_v63 }
 0x942   :  { %16360 = vmatprep.subr.bf16.mxu0 %v16359_v10  ;;  %16376 = vmatprep.subr.bf16.mxu1 %v16375_v15 }
 0x943   :  { %14880 = vmatmul.mubr.msk.f32.gmra.mrb[100].mxu0 %vm128_vm0, %v18520_v29  ;;  %14908 = vmatmul.mubr.msk.f32.gmra.mrb[100].mxu1 %vm128_vm0, %v18520_v29  ;;  %v18526_v31 = vld [vmem:[#allocation3 + $0x30] sm:$0xff] }
 0x944   :  { %14882 = vmatprep.mubr.msk.f32.mxu0 %vm128_vm0, %v18526_v31  ;;  %14910 = vmatprep.mubr.msk.f32.mxu1 %vm128_vm0, %v18526_v31 }
 0x945   :  { %16362 = vmatpush3.bf16.msra.mxu0 %v16359_v10  ;;  %16378 = vmatpush3.bf16.msra.mxu1 %v16375_v15  ;;  %v16427_v10 = vpack.c.bf16 %v7120_v25, %v7119_v24  ;;  %v16443_v15 = vpack.c.bf16 %v7250_v61, %v7249_v54 }
 0x946   :  { %16364 = vmatprep.subr.bf16.mxu0 %v16363_v34  ;;  %16380 = vmatprep.subr.bf16.mxu1 %v16379_v0 }
 0x947   :  { %14883 = vmatmul.mubr.msk.f32.gmra.mrb[102].mxu0 %vm128_vm0, %v18532_v32  ;;  %14911 = vmatmul.mubr.msk.f32.gmra.mrb[102].mxu1 %vm128_vm0, %v18532_v32 }
 0x948   :  { %14929 = vmatprep.mubr.msk.f32.mxu0 %vm128_vm0, %v18484_v11  ;;  %14957 = vmatprep.mubr.msk.f32.mxu1 %vm128_vm0, %v18484_v11 }
 0x949   :  { %16366 = vmatpush3.bf16.msra.mxu0 %v16363_v34  ;;  %16382 = vmatpush3.bf16.msra.mxu1 %v16379_v0  ;;  %v18608_v34 = vpack.c.bf16 %v7373_v21, %v7372_v16  ;;  %v18610_v0 = vpack.c.bf16 %v7378_v28, %v7377_v23 }
 0x94a   :  { %16384 = vmatprep.subr.bf16.mxu0 %v16383_v33  ;;  %16400 = vmatprep.subr.bf16.mxu1 %v16399_v37 }
 0x94c   :  { %14930 = vmatmul.mubr.msk.f32.vlgmr.msra.gmra.mrb[104].mxu0 %vm128_vm0, %v18493_v14  ;;  %14958 = vmatmul.mubr.msk.f32.vlgmr.msra.gmra.mrb[104].mxu1 %vm128_vm0, %v18493_v14 }
 0x94d   :  { %14932 = vmatprep.mubr.msk.f32.mxu0 %vm128_vm0, %v18495_v19  ;;  %14960 = vmatprep.mubr.msk.f32.mxu1 %vm128_vm0, %v18495_v19 }
 0x94e   :  { %16386 = vmatpush3.bf16.msra.mxu0 %v16383_v33  ;;  %16402 = vmatpush3.bf16.msra.mxu1 %v16399_v37  ;;  %v18624_v33 = vpack.c.bf16 %v7380_v51, %v7379_v45 }
 0x94f   :  { %16388 = vmatprep.subr.bf16.mxu0 %v16387_v48  ;;  %16404 = vmatprep.subr.bf16.mxu1 %v16403_v49 }
 0x950   :  { %14933 = vmatmul.mubr.msk.f32.gmra.mrb[106].mxu0 %vm128_vm0, %v18508_v8  ;;  %14961 = vmatmul.mubr.msk.f32.gmra.mrb[106].mxu1 %vm128_vm0, %v18508_v8 }
 0x951   :  { %14935 = vmatprep.mubr.msk.f32.mxu0 %vm128_vm0, %v18514_v40  ;;  %14963 = vmatprep.mubr.msk.f32.mxu1 %vm128_vm0, %v18514_v40 }
 0x952   :  { %16390 = vmatpush3.bf16.msra.mxu0 %v16387_v48  ;;  %16406 = vmatpush3.bf16.msra.mxu1 %v16403_v49  ;;  %v7392_v48 = vld [vmem:[#allocation9 + $0x80] sm:$0xff]  ;;  %v7393_v49 = vld [vmem:[#allocation9 + $0x88] sm:$0xff] }
 0x953   :  { %16392 = vmatprep.subr.bf16.mxu0 %v16391_v55  ;;  %16408 = vmatprep.subr.bf16.mxu1 %v16407_v57  ;;  %v18676_v53 = vpack.c.bf16 %v7393_v49, %v7392_v48 }
 0x954   :  { %14936 = vmatmul.mubr.msk.f32.gmra.mrb[108].mxu0 %vm128_vm0, %v18520_v29  ;;  %14964 = vmatmul.mubr.msk.f32.gmra.mrb[108].mxu1 %vm128_vm0, %v18520_v29 }
 0x955   :  { %14938 = vmatprep.mubr.msk.f32.mxu0 %vm128_vm0, %v18526_v31  ;;  %14966 = vmatprep.mubr.msk.f32.mxu1 %vm128_vm0, %v18526_v31 }
 0x956   :  { %16394 = vmatpush3.bf16.msra.mxu0 %v16391_v55  ;;  %16410 = vmatpush3.bf16.msra.mxu1 %v16407_v57  ;;  %v7394_v55 = vld [vmem:[#allocation9 + $0x90] sm:$0xff]  ;;  %v7395_v57 = vld [vmem:[#allocation9 + $0x98] sm:$0xff] }
 0x957   :  { %16396 = vmatprep.subr.bf16.mxu0 %v16395_v26  ;;  %16412 = vmatprep.subr.bf16.mxu1 %v16411_v59  ;;  %v18686_v13 = vpack.c.bf16 %v7395_v57, %v7394_v55  ;;  %v12854_v55 = vld [vmem:[%s19355_s7 + $0x2] ss:$0 sm:$0xff]  ;;  %v12864_v57 = vld [vmem:[%s19355_s7 + $0x3] ss:$0 sm:$0xff] }
 0x958   :  { %14939 = vmatmul.mubr.msk.f32.gmra.mrb[110].mxu0 %vm128_vm0, %v18532_v32  ;;  %14967 = vmatmul.mubr.msk.f32.gmra.mrb[110].mxu1 %vm128_vm0, %v18532_v32 }
 0x959   :  { %14985 = vmatprep.mubr.msk.f32.mxu0 %vm128_vm0, %v18484_v11  ;;  %15013 = vmatprep.mubr.msk.f32.mxu1 %vm128_vm0, %v18484_v11 }
 0x95a   :  { %16398 = vmatpush3.bf16.msra.mxu0 %v16395_v26  ;;  %16414 = vmatpush3.bf16.msra.mxu1 %v16411_v59  ;;  %v7402_v26 = vld [vmem:[#allocation9 + $0xc0] sm:$0xff]  ;;  %v7403_v59 = vld [vmem:[#allocation9 + $0xc8] sm:$0xff] }
 0x95b   :  { %16416 = vmatprep.subr.bf16.mxu0 %v16415_v1  ;;  %16432 = vmatprep.subr.bf16.mxu1 %v16431_v18  ;;  %v18698_v22 = vpack.c.bf16 %v7403_v59, %v7402_v26 }
 0x95d   :  { %14986 = vmatmul.mubr.msk.f32.vlgmr.msra.gmra.mrb[112].mxu0 %vm128_vm0, %v18493_v14  ;;  %15014 = vmatmul.mubr.msk.f32.vlgmr.msra.gmra.mrb[112].mxu1 %vm128_vm0, %v18493_v14 }
 0x95e   :  { %14988 = vmatprep.mubr.msk.f32.mxu0 %vm128_vm0, %v18495_v19  ;;  %15016 = vmatprep.mubr.msk.f32.mxu1 %vm128_vm0, %v18495_v19 }
 0x95f   :  { %16418 = vmatpush3.bf16.msra.mxu0 %v16415_v1  ;;  %16434 = vmatpush3.bf16.msra.mxu1 %v16431_v18  ;;  %v7404_v1 = vld [vmem:[#allocation9 + $0xd0] sm:$0xff]  ;;  %v7405_v18 = vld [vmem:[#allocation9 + $0xd8] sm:$0xff] }
 0x960   :  { %16420 = vmatprep.subr.bf16.mxu0 %v16419_v9  ;;  %16436 = vmatprep.subr.bf16.mxu1 %v16435_v12  ;;  %v18708_v6 = vpack.c.bf16 %v7405_v18, %v7404_v1 }
 0x961   :  { %14989 = vmatmul.mubr.msk.f32.gmra.mrb[114].mxu0 %vm128_vm0, %v18508_v8  ;;  %15017 = vmatmul.mubr.msk.f32.gmra.mrb[114].mxu1 %vm128_vm0, %v18508_v8 }
 0x962   :  { %14991 = vmatprep.mubr.msk.f32.mxu0 %vm128_vm0, %v18514_v40  ;;  %15019 = vmatprep.mubr.msk.f32.mxu1 %vm128_vm0, %v18514_v40 }
 0x963   :  { %16422 = vmatpush3.bf16.msra.mxu0 %v16419_v9  ;;  %16438 = vmatpush3.bf16.msra.mxu1 %v16435_v12  ;;  %v12834_v9 = vld [vmem:[%s19355_s7] ss:$0 sm:$0xff]  ;;  %v12844_v12 = vld [vmem:[%s19355_s7 + $0x1] ss:$0 sm:$0xff] }
 0x964   :  { %16424 = vmatprep.subr.bf16.mxu0 %v16423_v3  ;;  %16440 = vmatprep.subr.bf16.mxu1 %v16439_v20 }
 0x965   :  { %14992 = vmatmul.mubr.msk.f32.gmra.mrb[116].mxu0 %vm128_vm0, %v18520_v29  ;;  %15020 = vmatmul.mubr.msk.f32.gmra.mrb[116].mxu1 %vm128_vm0, %v18520_v29 }
 0x966   :  { %14994 = vmatprep.mubr.msk.f32.mxu0 %vm128_vm0, %v18526_v31  ;;  %15022 = vmatprep.mubr.msk.f32.mxu1 %vm128_vm0, %v18526_v31 }
 0x967   :  { %16426 = vmatpush3.bf16.msra.mxu0 %v16423_v3  ;;  %16442 = vmatpush3.bf16.msra.mxu1 %v16439_v20 }
 0x968   :  { %16428 = vmatprep.subr.bf16.mxu0 %v16427_v10  ;;  %16444 = vmatprep.subr.bf16.mxu1 %v16443_v15 }
 0x969   :  { %14995 = vmatmul.mubr.msk.f32.gmra.mrb[118].mxu0 %vm128_vm0, %v18532_v32  ;;  %15023 = vmatmul.mubr.msk.f32.gmra.mrb[118].mxu1 %vm128_vm0, %v18532_v32 }
 0x96a   :  { %15041 = vmatprep.mubr.msk.f32.mxu0 %vm128_vm0, %v18484_v11  ;;  %15069 = vmatprep.mubr.msk.f32.mxu1 %vm128_vm0, %v18484_v11  ;;  %v18622_v11 = vpack.c.bf16 %v7375_v27, %v7374_v36 }
 0x96b   :  { %16430 = vmatpush3.bf16.msra.mxu0 %v16427_v10  ;;  %16446 = vmatpush3.bf16.msra.mxu1 %v16443_v15 }
 0x96c   :  { %16447 = vmatprep.subr.bf16.mxu0 %v17465_v62  ;;  %16453 = vmatprep.subr.bf16.mxu1 %v17465_v62 }
 0x96e   :  { %15042 = vmatmul.mubr.msk.f32.vlgmr.msra.gmra.mrb[120].mxu0 %vm128_vm0, %v18493_v14  ;;  %15070 = vmatmul.mubr.msk.f32.vlgmr.msra.gmra.mrb[120].mxu1 %vm128_vm0, %v18493_v14  ;;  %v7382_v14 = vld [vmem:[#allocation9 + $0x40] sm:$0xff] }
 0x96f   :  { %15044 = vmatprep.mubr.msk.f32.mxu0 %vm128_vm0, %v18495_v19  ;;  %15072 = vmatprep.mubr.msk.f32.mxu1 %vm128_vm0, %v18495_v19  ;;  %v7383_v19 = vld [vmem:[#allocation9 + $0x48] sm:$0xff] }
 0x970   :  { %16449 = vmatpush3.bf16.msra.mxu0 %v18608_v34  ;;  %16455 = vmatpush3.bf16.msra.mxu1 %v18610_v0 }
 0x971   :  { %16450 = vmatprep.subr.bf16.mxu0 %v17465_v62  ;;  %16456 = vmatprep.subr.bf16.mxu1 %v17465_v62 }
 0x972   :  { %15045 = vmatmul.mubr.msk.f32.gmra.mrb[122].mxu0 %vm128_vm0, %v18508_v8  ;;  %15073 = vmatmul.mubr.msk.f32.gmra.mrb[122].mxu1 %vm128_vm0, %v18508_v8  ;;  %v7387_v8 = vld [vmem:[#allocation9 + $0x60] sm:$0xff] }
 0x973   :  { %15047 = vmatprep.mubr.msk.f32.mxu0 %vm128_vm0, %v18514_v40  ;;  %15075 = vmatprep.mubr.msk.f32.mxu1 %vm128_vm0, %v18514_v40  ;;  %v7388_v40 = vld [vmem:[#allocation9 + $0x68] sm:$0xff] }
 0x974   :  { %16452 = vmatpush3.bf16.msra.mxu0 %v18622_v11  ;;  %16458 = vmatpush3.bf16.msra.mxu1 %v18624_v33  ;;  %v18658_v37 = vpack.c.bf16 %v7388_v40, %v7387_v8 }
 0x975   :  { %16459 = vmatprep.subr.bf16.mxu0 %v17465_v62  ;;  %16465 = vmatprep.subr.bf16.mxu1 %v17465_v62 }
 0x976   :  { %15048 = vmatmul.mubr.msk.f32.gmra.mrb[124].mxu0 %vm128_vm0, %v18520_v29  ;;  %15076 = vmatmul.mubr.msk.f32.gmra.mrb[124].mxu1 %vm128_vm0, %v18520_v29  ;;  %v18656_v29 = vpack.c.bf16 %v7383_v19, %v7382_v14 }
 0x977   :  { %15050 = vmatprep.mubr.msk.f32.mxu0 %vm128_vm0, %v18526_v31  ;;  %15078 = vmatprep.mubr.msk.f32.mxu1 %vm128_vm0, %v18526_v31  ;;  %v7384_v31 = vld [vmem:[#allocation9 + $0x50] sm:$0xff] }
 0x97a   :  { %15051 = vmatmul.mubr.msk.f32.gmra.mrb[126].mxu0 %vm128_vm0, %v18532_v32  ;;  %15079 = vmatmul.mubr.msk.f32.gmra.mrb[126].mxu1 %vm128_vm0, %v18532_v32  ;;  %v18664_v32 = vpack.c.bf16 %v7385_v39, %v7384_v31 }
 0x97b   :  { %15089 = vmatprep.mubr.msk.f32.mxu0 %vm17466_vm1, %v17467_v5  ;;  %15100 = vmatprep.mubr.msk.f32.mxu1 %vm17466_vm1, %v17467_v5 }
 0x97e   :  { %15090 = vmatmul.mubr.f32.vlgmr.msra.gmra.mrb[128].mxu0 %v17467_v5  ;;  %15101 = vmatmul.mubr.f32.vlgmr.msra.gmra.mrb[128].mxu1 %v17467_v5 }
 0x97f   :  { %16461 = vmatpush3.bf16.msra.mxu0 %v18656_v29  ;;  %16467 = vmatpush3.bf16.msra.mxu1 %v18658_v37 }
 0x980   :  { %16462 = vmatprep.subr.bf16.mxu0 %v17465_v62  ;;  %16468 = vmatprep.subr.bf16.mxu1 %v17465_v62 }
 0x981   :  { %15111 = vmatprep.mubr.msk.f32.mxu0 %vm17466_vm1, %v17467_v5  ;;  %15122 = vmatprep.mubr.msk.f32.mxu1 %vm17466_vm1, %v17467_v5 }
 0x983   :  { %16464 = vmatpush3.bf16.msra.mxu0 %v18664_v32  ;;  %16470 = vmatpush3.bf16.msra.mxu1 %v18666_v47 }
 0x984   :  { %16471 = vmatprep.subr.bf16.mxu0 %v17465_v62  ;;  %16477 = vmatprep.subr.bf16.mxu1 %v17465_v62 }
 0x986   :  { %15112 = vmatmul.mubr.f32.vlgmr.msra.gmra.mrb[130].mxu0 %v17467_v5  ;;  %15123 = vmatmul.mubr.f32.vlgmr.msra.gmra.mrb[130].mxu1 %v17467_v5 }
 0x987   :  { %16473 = vmatpush3.bf16.msra.mxu0 %v18676_v53  ;;  %16479 = vmatpush3.bf16.msra.mxu1 %v18678_v7 }
 0x988   :  { %16474 = vmatprep.subr.bf16.mxu0 %v17465_v62  ;;  %16480 = vmatprep.subr.bf16.mxu1 %v17465_v62 }
 0x989   :  { %15133 = vmatprep.mubr.msk.f32.mxu0 %vm17466_vm1, %v17467_v5  ;;  %15144 = vmatprep.mubr.msk.f32.mxu1 %vm17466_vm1, %v17467_v5 }
 0x98b   :  { %16476 = vmatpush3.bf16.msra.mxu0 %v18686_v13  ;;  %16482 = vmatpush3.bf16.msra.mxu1 %v18688_v2 }
 0x98c   :  { %16483 = vmatprep.subr.bf16.mxu0 %v17465_v62  ;;  %16489 = vmatprep.subr.bf16.mxu1 %v17465_v62 }
 0x98e   :  { %15134 = vmatmul.mubr.f32.vlgmr.msra.gmra.mrb[132].mxu0 %v17467_v5  ;;  %15145 = vmatmul.mubr.f32.vlgmr.msra.gmra.mrb[132].mxu1 %v17467_v5 }
 0x98f   :  { %16485 = vmatpush3.bf16.msra.mxu0 %v18698_v22  ;;  %16491 = vmatpush3.bf16.msra.mxu1 %v18700_v4 }
 0x990   :  { %16486 = vmatprep.subr.bf16.mxu0 %v17465_v62  ;;  %16492 = vmatprep.subr.bf16.mxu1 %v17465_v62 }
 0x991   :  { %15155 = vmatprep.mubr.msk.f32.mxu0 %vm17466_vm1, %v17467_v5  ;;  %15166 = vmatprep.mubr.msk.f32.mxu1 %vm17466_vm1, %v17467_v5 }
 0x993   :  { %16488 = vmatpush3.bf16.msra.mxu0 %v18708_v6  ;;  %16494 = vmatpush3.bf16.msra.mxu1 %v18710_v17 }
 0x994   :  { %16495 = vmatprep.subr.bf16.mxu0 %v17465_v62  ;;  %16501 = vmatprep.subr.bf16.mxu1 %v17465_v62 }
 0x996   :  { %15156 = vmatmul.mubr.f32.vlgmr.msra.gmra.mrb[134].mxu0 %v17467_v5  ;;  %15167 = vmatmul.mubr.f32.vlgmr.msra.gmra.mrb[134].mxu1 %v17467_v5 }
 0x997   :  { %16497 = vmatpush3.bf16.msra.mxu0 %v18608_v34  ;;  %16503 = vmatpush3.bf16.msra.mxu1 %v18610_v0 }
 0x998   :  { %16498 = vmatprep.subr.bf16.mxu0 %v17465_v62  ;;  %16504 = vmatprep.subr.bf16.mxu1 %v17465_v62 }
 0x999   :  { %15177 = vmatprep.mubr.msk.f32.mxu0 %vm17466_vm1, %v17467_v5  ;;  %15188 = vmatprep.mubr.msk.f32.mxu1 %vm17466_vm1, %v17467_v5 }
 0x99b   :  { %16500 = vmatpush3.bf16.msra.mxu0 %v18622_v11  ;;  %16506 = vmatpush3.bf16.msra.mxu1 %v18624_v33 }
 0x99c   :  { %16507 = vmatprep.subr.bf16.mxu0 %v17465_v62  ;;  %16513 = vmatprep.subr.bf16.mxu1 %v17465_v62 }
 0xa0e   :  { %v14875_v42 = vpop.f32.mrb[96].mxu0  ;;  %v14903_v30 = vpop.f32.mrb[96].mxu1 }
 0xa0f   :  { %v6421_v63 = vadd.f32 %v14875_v42, %v12834_v9  ;;  %v6551_v38 = vadd.f32 %v14903_v30, %v12844_v12  ;;  %v6415_v3 = vpop.f32.mrb[97].mxu0  ;;  %v6545_v20 = vpop.f32.mrb[97].mxu1 }
 0xa10   :  { %v6416_v24 = vadd.f32 %v12834_v9, %v6415_v3  ;;  %v6546_v25 = vadd.f32 %v12844_v12, %v6545_v20 }
 0xa11   :  { %6455 = vst.msk [vmem:[#allocation2 + $0x8] sm:$0xff] %vm258_vm2, %v6421_v63  ;;  %6585 = vst.msk [vmem:[#allocation2 + $0x48] sm:$0xff] %vm258_vm2, %v6551_v38 }
 0xa12   :  { %6454 = vst.msk [vmem:[#allocation2] sm:$0xff] %vm258_vm2, %v6416_v24  ;;  %6584 = vst.msk [vmem:[#allocation2 + $0x40] sm:$0xff] %vm258_vm2, %v6546_v25  ;;  %v14878_v54 = vpop.f32.mrb[98].mxu0  ;;  %v14906_v61 = vpop.f32.mrb[98].mxu1 }
 0xa13   :  { %v6431_v10 = vadd.f32 %v14878_v54, %v12834_v9  ;;  %v6561_v15 = vadd.f32 %v14906_v61, %v12844_v12  ;;  %v6425_v16 = vpop.f32.mrb[99].mxu0  ;;  %v6555_v21 = vpop.f32.mrb[99].mxu1 }
 0xa14   :  { %v6426_v23 = vadd.f32 %v12834_v9, %v6425_v16  ;;  %v6556_v28 = vadd.f32 %v12844_v12, %v6555_v21 }
 0xa15   :  { %6457 = vst.msk [vmem:[#allocation2 + $0x18] sm:$0xff] %vm258_vm2, %v6431_v10  ;;  %6587 = vst.msk [vmem:[#allocation2 + $0x58] sm:$0xff] %vm258_vm2, %v6561_v15 }
 0xa16   :  { %6456 = vst.msk [vmem:[#allocation2 + $0x10] sm:$0xff] %vm258_vm2, %v6426_v23  ;;  %6586 = vst.msk [vmem:[#allocation2 + $0x50] sm:$0xff] %vm258_vm2, %v6556_v28  ;;  %v14881_v36 = vpop.f32.mrb[100].mxu0  ;;  %v14909_v27 = vpop.f32.mrb[100].mxu1 }
 0xa17   :  { %v6441_v45 = vadd.f32 %v14881_v36, %v12834_v9  ;;  %v6571_v51 = vadd.f32 %v14909_v27, %v12844_v12  ;;  %v6435_v14 = vpop.f32.mrb[101].mxu0  ;;  %v6565_v19 = vpop.f32.mrb[101].mxu1 }
 0xa18   :  { %v6436_v8 = vadd.f32 %v12834_v9, %v6435_v14  ;;  %v6566_v40 = vadd.f32 %v12844_v12, %v6565_v19  ;;  %v12874_v14 = vld [vmem:[%s19355_s7 + $0x4] ss:$0 sm:$0xff]  ;;  %v12884_v19 = vld [vmem:[%s19355_s7 + $0x5] ss:$0 sm:$0xff] }
 0xa19   :  { %6459 = vst.msk [vmem:[#allocation2 + $0x28] sm:$0xff] %vm258_vm2, %v6441_v45  ;;  %6589 = vst.msk [vmem:[#allocation2 + $0x68] sm:$0xff] %vm258_vm2, %v6571_v51 }
 0xa1a   :  { %6458 = vst.msk [vmem:[#allocation2 + $0x20] sm:$0xff] %vm258_vm2, %v6436_v8  ;;  %6588 = vst.msk [vmem:[#allocation2 + $0x60] sm:$0xff] %vm258_vm2, %v6566_v40  ;;  %v14884_v31 = vpop.f32.mrb[102].mxu0  ;;  %v14912_v39 = vpop.f32.mrb[102].mxu1 }
 0xa1b   :  { %v6451_v43 = vadd.f32 %v14884_v31, %v12834_v9  ;;  %v6581_v46 = vadd.f32 %v14912_v39, %v12844_v12  ;;  %v6445_v48 = vpop.f32.mrb[103].mxu0  ;;  %v6575_v49 = vpop.f32.mrb[103].mxu1 }
 0xa1c   :  { %v6446_v50 = vadd.f32 %v12834_v9, %v6445_v48  ;;  %v6576_v52 = vadd.f32 %v12844_v12, %v6575_v49 }
 0xa1d   :  { %6461 = vst.msk [vmem:[#allocation2 + $0x38] sm:$0xff] %vm258_vm2, %v6451_v43  ;;  %6591 = vst.msk [vmem:[#allocation2 + $0x78] sm:$0xff] %vm258_vm2, %v6581_v46 }
 0xa1e   :  { %6460 = vst.msk [vmem:[#allocation2 + $0x30] sm:$0xff] %vm258_vm2, %v6446_v50  ;;  %6590 = vst.msk [vmem:[#allocation2 + $0x70] sm:$0xff] %vm258_vm2, %v6576_v52 }
 0xa1f   :  { %v14931_v56 = vpop.f32.mrb[104].mxu0  ;;  %v14959_v58 = vpop.f32.mrb[104].mxu1 }
 0xa20   :  { %v6681_v26 = vadd.f32 %v14931_v56, %v12854_v55  ;;  %v6811_v59 = vadd.f32 %v14959_v58, %v12864_v57  ;;  %v6675_v60 = vpop.f32.mrb[105].mxu0  ;;  %v6805_v41 = vpop.f32.mrb[105].mxu1 }
 0xa21   :  { %v6676_v1 = vadd.f32 %v12854_v55, %v6675_v60  ;;  %v6806_v18 = vadd.f32 %v12864_v57, %v6805_v41 }
 0xa22   :  { %6715 = vst.msk [vmem:[#allocation2 + $0x88] sm:$0xff] %vm258_vm2, %v6681_v26  ;;  %6845 = vst.msk [vmem:[#allocation2 + $0xc8] sm:$0xff] %vm258_vm2, %v6811_v59 }
 0xa23   :  { %6714 = vst.msk [vmem:[#allocation2 + $0x80] sm:$0xff] %vm258_vm2, %v6676_v1  ;;  %6844 = vst.msk [vmem:[#allocation2 + $0xc0] sm:$0xff] %vm258_vm2, %v6806_v18  ;;  %v14934_v35 = vpop.f32.mrb[106].mxu0  ;;  %v14962_v44 = vpop.f32.mrb[106].mxu1 }
 0xa24   :  { %v6691_v9 = vadd.f32 %v14934_v35, %v12854_v55  ;;  %v6821_v12 = vadd.f32 %v14962_v44, %v12864_v57  ;;  %v6685_v42 = vpop.f32.mrb[107].mxu0  ;;  %v6815_v30 = vpop.f32.mrb[107].mxu1 }
 0xa25   :  { %v6686_v63 = vadd.f32 %v12854_v55, %v6685_v42  ;;  %v6816_v38 = vadd.f32 %v12864_v57, %v6815_v30 }
 0xa26   :  { %6717 = vst.msk [vmem:[#allocation2 + $0x98] sm:$0xff] %vm258_vm2, %v6691_v9  ;;  %6847 = vst.msk [vmem:[#allocation2 + $0xd8] sm:$0xff] %vm258_vm2, %v6821_v12 }
 0xa27   :  { %6716 = vst.msk [vmem:[#allocation2 + $0x90] sm:$0xff] %vm258_vm2, %v6686_v63  ;;  %6846 = vst.msk [vmem:[#allocation2 + $0xd0] sm:$0xff] %vm258_vm2, %v6816_v38  ;;  %v14937_v3 = vpop.f32.mrb[108].mxu0  ;;  %v14965_v20 = vpop.f32.mrb[108].mxu1 }
 0xa28   :  { %v6701_v24 = vadd.f32 %v14937_v3, %v12854_v55  ;;  %v6831_v25 = vadd.f32 %v14965_v20, %v12864_v57  ;;  %v6695_v54 = vpop.f32.mrb[109].mxu0  ;;  %v6825_v61 = vpop.f32.mrb[109].mxu1 }
 0xa29   :  { %v6696_v10 = vadd.f32 %v12854_v55, %v6695_v54  ;;  %v6826_v15 = vadd.f32 %v12864_v57, %v6825_v61  ;;  %v12894_v54 = vld [vmem:[%s19355_s7 + $0x6] ss:$0 sm:$0xff]  ;;  %v12904_v61 = vld [vmem:[%s19355_s7 + $0x7] ss:$0 sm:$0xff] }
 0xa2a   :  { %6719 = vst.msk [vmem:[#allocation2 + $0xa8] sm:$0xff] %vm258_vm2, %v6701_v24  ;;  %6849 = vst.msk [vmem:[#allocation2 + $0xe8] sm:$0xff] %vm258_vm2, %v6831_v25 }
 0xa2b   :  { %6718 = vst.msk [vmem:[#allocation2 + $0xa0] sm:$0xff] %vm258_vm2, %v6696_v10  ;;  %6848 = vst.msk [vmem:[#allocation2 + $0xe0] sm:$0xff] %vm258_vm2, %v6826_v15  ;;  %v14940_v16 = vpop.f32.mrb[110].mxu0  ;;  %v14968_v21 = vpop.f32.mrb[110].mxu1 }
 0xa2c   :  { %v6711_v23 = vadd.f32 %v14940_v16, %v12854_v55  ;;  %v6841_v28 = vadd.f32 %v14968_v21, %v12864_v57  ;;  %v6705_v36 = vpop.f32.mrb[111].mxu0  ;;  %v6835_v27 = vpop.f32.mrb[111].mxu1 }
 0xa2d   :  { %v6706_v45 = vadd.f32 %v12854_v55, %v6705_v36  ;;  %v6836_v51 = vadd.f32 %v12864_v57, %v6835_v27 }
 0xa2e   :  { %6721 = vst.msk [vmem:[#allocation2 + $0xb8] sm:$0xff] %vm258_vm2, %v6711_v23  ;;  %6851 = vst.msk [vmem:[#allocation2 + $0xf8] sm:$0xff] %vm258_vm2, %v6841_v28 }
 0xa2f   :  { %6720 = vst.msk [vmem:[#allocation2 + $0xb0] sm:$0xff] %vm258_vm2, %v6706_v45  ;;  %6850 = vst.msk [vmem:[#allocation2 + $0xf0] sm:$0xff] %vm258_vm2, %v6836_v51 }
 0xa30   :  { %v14987_v8 = vpop.f32.mrb[112].mxu0  ;;  %v15015_v40 = vpop.f32.mrb[112].mxu1 }
 0xa31   :  { %v6941_v31 = vadd.f32 %v14987_v8, %v12874_v14  ;;  %v7071_v39 = vadd.f32 %v15015_v40, %v12884_v19  ;;  %v6935_v43 = vpop.f32.mrb[113].mxu0  ;;  %v7065_v46 = vpop.f32.mrb[113].mxu1 }
 0xa32   :  { %v6936_v48 = vadd.f32 %v12874_v14, %v6935_v43  ;;  %v7066_v49 = vadd.f32 %v12884_v19, %v7065_v46 }
 0xa33   :  { %6975 = vst.msk [vmem:[#allocation2 + $0x108] sm:$0xff] %vm258_vm2, %v6941_v31  ;;  %7105 = vst.msk [vmem:[#allocation2 + $0x148] sm:$0xff] %vm258_vm2, %v7071_v39 }
 0xa34   :  { %6974 = vst.msk [vmem:[#allocation2 + $0x100] sm:$0xff] %vm258_vm2, %v6936_v48  ;;  %7104 = vst.msk [vmem:[#allocation2 + $0x140] sm:$0xff] %vm258_vm2, %v7066_v49  ;;  %v14990_v50 = vpop.f32.mrb[114].mxu0  ;;  %v15018_v52 = vpop.f32.mrb[114].mxu1 }
 0xa35   :  { %v6951_v55 = vadd.f32 %v14990_v50, %v12874_v14  ;;  %v7081_v57 = vadd.f32 %v15018_v52, %v12884_v19  ;;  %v6945_v56 = vpop.f32.mrb[115].mxu0  ;;  %v7075_v58 = vpop.f32.mrb[115].mxu1 }
 0xa36   :  { %v6946_v26 = vadd.f32 %v12874_v14, %v6945_v56  ;;  %v7076_v59 = vadd.f32 %v12884_v19, %v7075_v58 }
 0xa37   :  { %6977 = vst.msk [vmem:[#allocation2 + $0x118] sm:$0xff] %vm258_vm2, %v6951_v55  ;;  %7107 = vst.msk [vmem:[#allocation2 + $0x158] sm:$0xff] %vm258_vm2, %v7081_v57 }
 0xa38   :  { %6976 = vst.msk [vmem:[#allocation2 + $0x110] sm:$0xff] %vm258_vm2, %v6946_v26  ;;  %7106 = vst.msk [vmem:[#allocation2 + $0x150] sm:$0xff] %vm258_vm2, %v7076_v59  ;;  %v14993_v60 = vpop.f32.mrb[116].mxu0  ;;  %v15021_v41 = vpop.f32.mrb[116].mxu1 }
 0xa39   :  { %v6961_v1 = vadd.f32 %v14993_v60, %v12874_v14  ;;  %v7091_v18 = vadd.f32 %v15021_v41, %v12884_v19  ;;  %v6955_v35 = vpop.f32.mrb[117].mxu0  ;;  %v7085_v44 = vpop.f32.mrb[117].mxu1 }
 0xa3a   :  { %v6956_v9 = vadd.f32 %v12874_v14, %v6955_v35  ;;  %v7086_v12 = vadd.f32 %v12884_v19, %v7085_v44  ;;  %v7411_v35 = vld [vmem:[#allocation2] sm:$0xff] }
 0xa3b   :  { %6979 = vst.msk [vmem:[#allocation2 + $0x128] sm:$0xff] %vm258_vm2, %v6961_v1  ;;  %7109 = vst.msk [vmem:[#allocation2 + $0x168] sm:$0xff] %vm258_vm2, %v7091_v18 }
 0xa3c   :  { %6978 = vst.msk [vmem:[#allocation2 + $0x120] sm:$0xff] %vm258_vm2, %v6956_v9  ;;  %7108 = vst.msk [vmem:[#allocation2 + $0x160] sm:$0xff] %vm258_vm2, %v7086_v12  ;;  %v14996_v42 = vpop.f32.mrb[118].mxu0  ;;  %v15024_v30 = vpop.f32.mrb[118].mxu1  ;;  %v7483_v9 = vld [vmem:[#allocation2 + $0x40] sm:$0xff] }
 0xa3d   :  { %v6971_v63 = vadd.f32 %v14996_v42, %v12874_v14  ;;  %v7101_v38 = vadd.f32 %v15024_v30, %v12884_v19  ;;  %v6965_v3 = vpop.f32.mrb[119].mxu0  ;;  %v7095_v20 = vpop.f32.mrb[119].mxu1 }
 0xa3e   :  { %v6966_v24 = vadd.f32 %v12874_v14, %v6965_v3  ;;  %v7096_v25 = vadd.f32 %v12884_v19, %v7095_v20 }
 0xa3f   :  { %6981 = vst.msk [vmem:[#allocation2 + $0x138] sm:$0xff] %vm258_vm2, %v6971_v63  ;;  %7111 = vst.msk [vmem:[#allocation2 + $0x178] sm:$0xff] %vm258_vm2, %v7101_v38 }
 0xa40   :  { %6980 = vst.msk [vmem:[#allocation2 + $0x130] sm:$0xff] %vm258_vm2, %v6966_v24  ;;  %7110 = vst.msk [vmem:[#allocation2 + $0x170] sm:$0xff] %vm258_vm2, %v7096_v25  ;;  %v7627_v25 = vld [vmem:[#allocation2 + $0xc0] sm:$0xff] }
 0xa41   :  { %v15043_v10 = vpop.f32.mrb[120].mxu0  ;;  %v15071_v15 = vpop.f32.mrb[120].mxu1 }
 0xa42   :  { %v7201_v16 = vadd.f32 %v15043_v10, %v12894_v54  ;;  %v7331_v21 = vadd.f32 %v15071_v15, %v12904_v61  ;;  %v7195_v23 = vpop.f32.mrb[121].mxu0  ;;  %v7325_v28 = vpop.f32.mrb[121].mxu1 }
 0xa43   :  { %v7196_v36 = vadd.f32 %v12894_v54, %v7195_v23  ;;  %v7326_v27 = vadd.f32 %v12904_v61, %v7325_v28 }
 0xa44   :  { %7235 = vst.msk [vmem:[#allocation2 + $0x188] sm:$0xff] %vm258_vm2, %v7201_v16  ;;  %7365 = vst.msk [vmem:[#allocation2 + $0x1c8] sm:$0xff] %vm258_vm2, %v7331_v21  ;;  %v7555_v21 = vld [vmem:[#allocation2 + $0x80] sm:$0xff] }
 0xa45   :  { %7234 = vst.msk [vmem:[#allocation2 + $0x180] sm:$0xff] %vm258_vm2, %v7196_v36  ;;  %7364 = vst.msk [vmem:[#allocation2 + $0x1c0] sm:$0xff] %vm258_vm2, %v7326_v27  ;;  %v15046_v45 = vpop.f32.mrb[122].mxu0  ;;  %v15074_v51 = vpop.f32.mrb[122].mxu1 }
 0xa46   :  { %v7211_v14 = vadd.f32 %v15046_v45, %v12894_v54  ;;  %v7341_v19 = vadd.f32 %v15074_v51, %v12904_v61  ;;  %v7205_v8 = vpop.f32.mrb[123].mxu0  ;;  %v7335_v40 = vpop.f32.mrb[123].mxu1  ;;  %v7723_v45 = vld [vmem:[#allocation2 + $0x138] sm:$0xff] }
 0xa47   :  { %v7206_v31 = vadd.f32 %v12894_v54, %v7205_v8  ;;  %v7336_v39 = vadd.f32 %v12904_v61, %v7335_v40 }
 0xa48   :  { %7237 = vst.msk [vmem:[#allocation2 + $0x198] sm:$0xff] %vm258_vm2, %v7211_v14  ;;  %7367 = vst.msk [vmem:[#allocation2 + $0x1d8] sm:$0xff] %vm258_vm2, %v7341_v19  ;;  %v7795_v14 = vld [vmem:[#allocation2 + $0x178] sm:$0xff] }
 0xa49   :  { %7236 = vst.msk [vmem:[#allocation2 + $0x190] sm:$0xff] %vm258_vm2, %v7206_v31  ;;  %7366 = vst.msk [vmem:[#allocation2 + $0x1d0] sm:$0xff] %vm258_vm2, %v7336_v39  ;;  %v15049_v43 = vpop.f32.mrb[124].mxu0  ;;  %v15077_v46 = vpop.f32.mrb[124].mxu1 }
 0xa4a   :  { %v7221_v48 = vadd.f32 %v15049_v43, %v12894_v54  ;;  %v7351_v49 = vadd.f32 %v15077_v46, %v12904_v61  ;;  %v7215_v50 = vpop.f32.mrb[125].mxu0  ;;  %v7345_v52 = vpop.f32.mrb[125].mxu1 }
 0xa4b   :  { %v7216_v55 = vadd.f32 %v12894_v54, %v7215_v50  ;;  %v7346_v57 = vadd.f32 %v12904_v61, %v7345_v52 }
 0xa4c   :  { %7239 = vst.msk [vmem:[#allocation2 + $0x1a8] sm:$0xff] %vm258_vm2, %v7221_v48  ;;  %7369 = vst.msk [vmem:[#allocation2 + $0x1e8] sm:$0xff] %vm258_vm2, %v7351_v49 }
 0xa4d   :  { %7238 = vst.msk [vmem:[#allocation2 + $0x1a0] sm:$0xff] %vm258_vm2, %v7216_v55  ;;  %7368 = vst.msk [vmem:[#allocation2 + $0x1e0] sm:$0xff] %vm258_vm2, %v7346_v57  ;;  %v15052_v56 = vpop.f32.mrb[126].mxu0  ;;  %v15080_v58 = vpop.f32.mrb[126].mxu1 }
 0xa4e   :  { %v7231_v26 = vadd.f32 %v15052_v56, %v12894_v54  ;;  %v7361_v59 = vadd.f32 %v15080_v58, %v12904_v61  ;;  %v7225_v60 = vpop.f32.mrb[127].mxu0  ;;  %v7355_v41 = vpop.f32.mrb[127].mxu1 }
 0xa4f   :  { %v7226_v1 = vadd.f32 %v12894_v54, %v7225_v60  ;;  %v7356_v18 = vadd.f32 %v12904_v61, %v7355_v41 }
 0xa50   :  { %7241 = vst.msk [vmem:[#allocation2 + $0x1b8] sm:$0xff] %vm258_vm2, %v7231_v26  ;;  %7371 = vst.msk [vmem:[#allocation2 + $0x1f8] sm:$0xff] %vm258_vm2, %v7361_v59 }
 0xa51   :  { %7240 = vst.msk [vmem:[#allocation2 + $0x1b0] sm:$0xff] %vm258_vm2, %v7226_v1  ;;  %7370 = vst.msk [vmem:[#allocation2 + $0x1f0] sm:$0xff] %vm258_vm2, %v7356_v18  ;;  %v7478_v44 = vpop.f32.mrb[128].mxu0  ;;  %v7550_v12 = vpop.f32.mrb[128].mxu1 }
 0xa52   :  { %v7482_v42 = vadd.f32 %v7478_v44, %v7411_v35  ;;  %v7554_v30 = vadd.f32 %v7550_v12, %v7483_v9  ;;  %v15091_v63 = vpop.f32.mrb[129].mxu0  ;;  %v15102_v38 = vpop.f32.mrb[129].mxu1 }
 0xa54   :  { %v12913_v3 = vmul.f32 -1.442695, %v7482_v42  ;;  %v12914_v20 = vmul.f32 -1.442695, %v7554_v30 }
 0xa56   :  { %17109 = vpow2.f32 %v12913_v3 }
 0xa57   :  { %17111 = vpow2.f32 %v12914_v20  ;;  %v7939_v52 = vld [vmem:[#allocation2 + $0x1f8] sm:$0xff] }
 0xa58   :  { %v7867_v60 = vld [vmem:[#allocation2 + $0x1b8] sm:$0xff] }
 0xa59   :  { %v7622_v24 = vpop.f32.mrb[130].mxu0  ;;  %v7694_v54 = vpop.f32.mrb[130].mxu1 }
 0xa5a   :  { %v7698_v61 = vadd.f32 %v7694_v54, %v7627_v25  ;;  %v15113_v10 = vpop.f32.mrb[131].mxu0  ;;  %v15124_v15 = vpop.f32.mrb[131].mxu1  ;;  %v7626_v23 = vadd.f32 %v7622_v24, %v7555_v21 }
 0xa5c   :  { %v12915_v16 = vmul.f32 -1.442695, %v7698_v61 }
 0xa5e   :  { %17113 = vpow2.f32 %v12915_v16 }
 0xa5f   :  { %17115 = vtanh.f32 %v7626_v23 }
 0xa60   :  { %v17110_v28 = vpop.eup %17109 }
 0xa61   :  { %v17112_v36 = vpop.eup %17111  ;;  %v7702_v27 = vadd.f32 1.0, %v17110_v28  ;;  %v7790_v51 = vpop.f32.mrb[132].mxu0 }
 0xa62   :  { %v7862_v19 = vpop.f32.mrb[132].mxu1  ;;  %v7708_v8 = vadd.f32 1.0, %v17112_v36  ;;  %v7794_v40 = vadd.f32 %v7790_v51, %v7723_v45  ;;  %v15135_v39 = vpop.f32.mrb[133].mxu0  ;;  %v8039_v45 = vld [vmem:[#allocation2 + $0x8] sm:$0xff] }
 0xa63   :  { %v7866_v31 = vadd.f32 %v7862_v19, %v7795_v14  ;;  %v15146_v43 = vpop.f32.mrb[133].mxu1  ;;  %17117 = vrcp.f32 %v7702_v27  ;;  %v8114_v14 = vld [vmem:[#allocation2 + $0x48] sm:$0xff] }
 0xa64   :  { %17119 = vrcp.f32 %v7708_v8  ;;  %v12916_v46 = vmul.f32 -1.442695, %v7794_v40 }
 0xa65   :  { %v12917_v48 = vmul.f32 -1.442695, %v7866_v31 }
 0xa66   :  { %17121 = vpow2.f32 %v12916_v46 }
 0xa67   :  { %17123 = vpow2.f32 %v12917_v48 }
 0xa68   :  { %v17114_v49 = vpop.eup %17113 }
 0xa69   :  { %v7934_v50 = vpop.f32.mrb[134].mxu0  ;;  %v8006_v55 = vpop.f32.mrb[134].mxu1  ;;  %v7715_v59 = vadd.f32 1.0, %v17114_v49  ;;  %v8258_v49 = vld [vmem:[#allocation2 + $0xc8] sm:$0xff] }
 0xa6a   :  { %v8010_v57 = vadd.f32 %v8006_v55, %v7939_v52  ;;  %v15157_v56 = vpop.f32.mrb[135].mxu0  ;;  %v15168_v58 = vpop.f32.mrb[135].mxu1  ;;  %v7938_v1 = vadd.f32 %v7934_v50, %v7867_v60 }
 0xa6b   :  { %v17116_v26 = vpop.eup %17115  ;;  %17125 = vrcp.f32 %v7715_v59  ;;  %v8186_v58 = vld [vmem:[#allocation2 + $0x88] sm:$0xff] }
 0xa6c   :  { %v12918_v44 = vmul.f32 -1.442695, %v8010_v57  ;;  %17127 = vtanh.f32 %v7938_v1 }
 0xa6d   :  { %v17118_v41 = vpop.eup %17117 }
 0xa6e   :  { %v17120_v18 = vpop.eup %17119  ;;  %v7719_v35 = vmul.f32 %v17118_v41, %v17116_v26  ;;  %17129 = vpow2.f32 %v12918_v44  ;;  %v8429_v44 = vld [vmem:[#allocation2 + $0x170] sm:$0xff] }
 0xa6f   :  { %v7718_v9 = vmul.f32 0.0, %v17120_v18  ;;  %v8354_v18 = vld [vmem:[#allocation2 + $0x130] sm:$0xff] }
 0xa70   :  { %v17122_v12 = vpop.eup %17121 }
 0xa71   :  { %v17124_v42 = vpop.eup %17123  ;;  %v18824_v30 = vadd.f32 %v7719_v35, %v7718_v9  ;;  %v8014_v63 = vadd.f32 1.0, %v17122_v12 }
 0xa72   :  { %v8020_v38 = vadd.f32 1.0, %v17124_v42 }
 0xa73   :  { %17131 = vtanh.f32 %v18824_v30 }
 0xa74   :  { %17133 = vrcp.f32 %v8014_v63 }
 0xa75   :  { %17135 = vrcp.f32 %v8020_v38  ;;  %v17126_v3 = vpop.eup %17125 }
 0xa76   :  { %v17128_v20 = vpop.eup %17127 }
 0xa78   :  { %v17130_v24 = vpop.eup %17129 }
 0xa79   :  { %v8027_v16 = vadd.f32 1.0, %v17130_v24 }
 0xa7b   :  { %17137 = vrcp.f32 %v8027_v16 }
 0xa7d   :  { %v17132_v25 = vpop.eup %17131 }
 0xa7e   :  { %v17134_v54 = vpop.eup %17133  ;;  %v18827_v61 = vmul.f32 %v17132_v25, %v17126_v3 }
 0xa7f   :  { %v17136_v10 = vpop.eup %17135  ;;  %v8031_v15 = vmul.f32 %v17134_v54, %v17128_v20  ;;  %v8573_v54 = vld [vmem:[#allocation2 + $0x1f0] sm:$0xff] }
 0xa80   :  { %v8030_v21 = vmul.f32 0.0, %v17136_v10  ;;  %15178 = vmatmul.mubr.msk.f32.vlgmr.msra.gmra.mrb[136].mxu0 %vm258_vm2, %v18827_v61  ;;  %15189 = vmatmul.mubr.msk.f32.vlgmr.msra.gmra.mrb[136].mxu1 %vm258_vm2, %v18827_v61 }
 0xa81   :  { %16509 = vmatpush3.bf16.msra.mxu0 %v18656_v29  ;;  %16515 = vmatpush3.bf16.msra.mxu1 %v18658_v37 }
 0xa82   :  { %v18835_v23 = vadd.f32 %v8031_v15, %v8030_v21  ;;  %16510 = vmatprep.subr.bf16.mxu0 %v17465_v62  ;;  %16516 = vmatprep.subr.bf16.mxu1 %v17465_v62 }
 0xa83   :  { %15199 = vmatprep.mubr.msk.f32.mxu0 %vm17466_vm1, %v17467_v5  ;;  %15210 = vmatprep.mubr.msk.f32.mxu1 %vm17466_vm1, %v17467_v5 }
 0xa84   :  { %17139 = vtanh.f32 %v18835_v23 }
 0xa85   :  { %16512 = vmatpush3.bf16.msra.mxu0 %v18664_v32  ;;  %16518 = vmatpush3.bf16.msra.mxu1 %v18666_v47  ;;  %v17138_v28 = vpop.eup %17137 }
 0xa86   :  { %16519 = vmatprep.subr.bf16.mxu0 %v17465_v62  ;;  %16525 = vmatprep.subr.bf16.mxu1 %v17465_v62 }
 0xa88   :  { %15200 = vmatmul.mubr.msk.f32.vlgmr.msra.gmra.mrb[138].mxu0 %vm258_vm2, %v18827_v61  ;;  %15211 = vmatmul.mubr.msk.f32.vlgmr.msra.gmra.mrb[138].mxu1 %vm258_vm2, %v18827_v61 }
 0xa89   :  { %16521 = vmatpush3.bf16.msra.mxu0 %v18676_v53  ;;  %16527 = vmatpush3.bf16.msra.mxu1 %v18678_v7 }
 0xa8a   :  { %16522 = vmatprep.subr.bf16.mxu0 %v17465_v62  ;;  %16528 = vmatprep.subr.bf16.mxu1 %v17465_v62 }
 0xa8b   :  { %15221 = vmatprep.mubr.msk.f32.mxu0 %vm17466_vm1, %v17467_v5  ;;  %15232 = vmatprep.mubr.msk.f32.mxu1 %vm17466_vm1, %v17467_v5 }
 0xa8d   :  { %16524 = vmatpush3.bf16.msra.mxu0 %v18686_v13  ;;  %16530 = vmatpush3.bf16.msra.mxu1 %v18688_v2 }
 0xa8e   :  { %v17140_v36 = vpop.eup %17139  ;;  %16531 = vmatprep.subr.bf16.mxu0 %v17465_v62  ;;  %16537 = vmatprep.subr.bf16.mxu1 %v17465_v62 }
 0xa8f   :  { %v18864_v27 = vmul.f32 %v17140_v36, %v17138_v28 }
 0xa91   :  { %15222 = vmatmul.mubr.msk.f32.vlgmr.msra.gmra.mrb[140].mxu0 %vm258_vm2, %v18864_v27  ;;  %15233 = vmatmul.mubr.msk.f32.vlgmr.msra.gmra.mrb[140].mxu1 %vm258_vm2, %v18864_v27 }
 0xa92   :  { %16533 = vmatpush3.bf16.msra.mxu0 %v18698_v22  ;;  %16539 = vmatpush3.bf16.msra.mxu1 %v18700_v4 }
 0xa93   :  { %16534 = vmatprep.subr.bf16.mxu0 %v17465_v62  ;;  %16540 = vmatprep.subr.bf16.mxu1 %v17465_v62 }
 0xa94   :  { %15243 = vmatprep.mubr.msk.f32.mxu0 %vm17466_vm1, %v17467_v5  ;;  %15254 = vmatprep.mubr.msk.f32.mxu1 %vm17466_vm1, %v17467_v5 }
 0xa96   :  { %16536 = vmatpush3.bf16.msra.mxu0 %v18708_v6  ;;  %16542 = vmatpush3.bf16.msra.mxu1 %v18710_v17 }
 0xa97   :  { %16543 = vmatprep.subr.bf16.mxu0 %v17465_v62  ;;  %16549 = vmatprep.subr.bf16.mxu1 %v17465_v62 }
 0xa99   :  { %15244 = vmatmul.mubr.msk.f32.vlgmr.msra.gmra.mrb[142].mxu0 %vm258_vm2, %v18864_v27  ;;  %15255 = vmatmul.mubr.msk.f32.vlgmr.msra.gmra.mrb[142].mxu1 %vm258_vm2, %v18864_v27 }
 0xa9a   :  { %16545 = vmatpush3.bf16.msra.mxu0 %v18608_v34  ;;  %16551 = vmatpush3.bf16.msra.mxu1 %v18610_v0 }
 0xa9b   :  { %16546 = vmatprep.subr.bf16.mxu0 %v17465_v62  ;;  %16552 = vmatprep.subr.bf16.mxu1 %v17465_v62 }
 0xa9c   :  { %15265 = vmatprep.mubr.msk.f32.mxu0 %vm17466_vm1, %v17467_v5  ;;  %15276 = vmatprep.mubr.msk.f32.mxu1 %vm17466_vm1, %v17467_v5 }
 0xa9e   :  { %16548 = vmatpush3.bf16.msra.mxu0 %v18622_v11  ;;  %16554 = vmatpush3.bf16.msra.mxu1 %v18624_v33 }
 0xa9f   :  { %16555 = vmatprep.subr.bf16.mxu0 %v17465_v62  ;;  %16561 = vmatprep.subr.bf16.mxu1 %v17465_v62 }
 0xb53   :  { %v8109_v51 = vpop.f32.mrb[136].mxu0  ;;  %v8181_v19 = vpop.f32.mrb[136].mxu1 }
 0xb54   :  { %v8113_v8 = vadd.f32 %v8109_v51, %v8039_v45  ;;  %v8185_v40 = vadd.f32 %v8181_v19, %v8114_v14  ;;  %v15179_v31 = vpop.f32.mrb[137].mxu0  ;;  %v15190_v39 = vpop.f32.mrb[137].mxu1  ;;  %v8501_v45 = vld [vmem:[#allocation2 + $0x1b0] sm:$0xff] }
 0xb56   :  { %v12923_v43 = vmul.f32 -1.442695, %v8113_v8  ;;  %v12924_v46 = vmul.f32 -1.442695, %v8185_v40 }
 0xb58   :  { %17141 = vpow2.f32 %v12923_v43 }
 0xb59   :  { %17143 = vpow2.f32 %v12924_v46 }
 0xb5b   :  { %v8253_v48 = vpop.f32.mrb[138].mxu0  ;;  %v8325_v50 = vpop.f32.mrb[138].mxu1 }
 0xb5c   :  { %v8329_v52 = vadd.f32 %v8325_v50, %v8258_v49  ;;  %v15201_v55 = vpop.f32.mrb[139].mxu0  ;;  %v15212_v57 = vpop.f32.mrb[139].mxu1  ;;  %v8257_v26 = vadd.f32 %v8253_v48, %v8186_v58 }
 0xb5e   :  { %v12925_v56 = vmul.f32 -1.442695, %v8329_v52 }
 0xb60   :  { %17145 = vpow2.f32 %v12925_v56 }
 0xb61   :  { %17147 = vtanh.f32 %v8257_v26 }
 0xb62   :  { %v17142_v59 = vpop.eup %17141 }
 0xb63   :  { %v17144_v60 = vpop.eup %17143  ;;  %v8333_v41 = vadd.f32 1.0, %v17142_v59 }
 0xb64   :  { %v8339_v1 = vadd.f32 1.0, %v17144_v60  ;;  %v8424_v35 = vpop.f32.mrb[140].mxu0  ;;  %v8496_v9 = vpop.f32.mrb[140].mxu1  ;;  %v8035_v60 = vmax.f32 %v18827_v61, 0.0 }
 0xb65   :  { %17149 = vrcp.f32 %v8333_v41  ;;  %v8428_v12 = vadd.f32 %v8424_v35, %v8354_v18  ;;  %v8500_v42 = vadd.f32 %v8496_v9, %v8429_v44  ;;  %v15223_v63 = vpop.f32.mrb[141].mxu0  ;;  %v15234_v38 = vpop.f32.mrb[141].mxu1  ;;  %v8037_v9 = vmax.f32 %v18864_v27, 0.0  ;;  %v8673_v27 = vld [vmem:[#allocation2 + $0x10] sm:$0xff] }
 0xb66   :  { %17151 = vrcp.f32 %v8339_v1  ;;  %v8748_v38 = vld [vmem:[#allocation2 + $0x50] sm:$0xff] }
 0xb67   :  { %v12930_v3 = vmul.f32 -1.442695, %v8428_v12  ;;  %v12931_v20 = vmul.f32 -1.442695, %v8500_v42 }
 0xb69   :  { %17153 = vpow2.f32 %v12930_v3 }
 0xb6a   :  { %17155 = vpow2.f32 %v12931_v20  ;;  %v17146_v24 = vpop.eup %17145 }
 0xb6b   :  { %v17148_v28 = vpop.eup %17147  ;;  %v8346_v36 = vadd.f32 1.0, %v17146_v24 }
 0xb6c   :  { %v8568_v25 = vpop.f32.mrb[142].mxu0  ;;  %v8640_v10 = vpop.f32.mrb[142].mxu1 }
 0xb6d   :  { %v8644_v15 = vadd.f32 %v8640_v10, %v8573_v54  ;;  %v15245_v16 = vpop.f32.mrb[143].mxu0  ;;  %v15256_v21 = vpop.f32.mrb[143].mxu1  ;;  %v8572_v14 = vadd.f32 %v8568_v25, %v8501_v45  ;;  %17157 = vrcp.f32 %v8346_v36 }
 0xb6e   :  { %v8892_v21 = vld [vmem:[#allocation2 + $0xd0] sm:$0xff] }
 0xb6f   :  { %v17150_v51 = vpop.eup %17149  ;;  %v12932_v40 = vmul.f32 -1.442695, %v8644_v15  ;;  %17159 = vtanh.f32 %v8572_v14 }
 0xb70   :  { %v17152_v19 = vpop.eup %17151  ;;  %v8350_v8 = vmul.f32 %v17150_v51, %v17148_v28 }
 0xb71   :  { %v8349_v31 = vmul.f32 %v17152_v19, %v18824_v30  ;;  %17161 = vpow2.f32 %v12932_v40  ;;  %v8820_v19 = vld [vmem:[#allocation2 + $0x90] sm:$0xff] }
 0xb73   :  { %v17154_v39 = vpop.eup %17153  ;;  %v18899_v43 = vadd.f32 %v8350_v8, %v8349_v31 }
 0xb74   :  { %v17156_v46 = vpop.eup %17155  ;;  %v8648_v48 = vadd.f32 1.0, %v17154_v39 }
 0xb75   :  { %17163 = vtanh.f32 %v18899_v43  ;;  %v8654_v49 = vadd.f32 1.0, %v17156_v46 }
 0xb76   :  { %17165 = vrcp.f32 %v8648_v48  ;;  %v8988_v48 = vld [vmem:[#allocation2 + $0x128] sm:$0xff] }
 0xb77   :  { %17167 = vrcp.f32 %v8654_v49  ;;  %v17158_v50 = vpop.eup %17157 }
 0xb79   :  { %v17160_v52 = vpop.eup %17159 }
 0xb7b   :  { %v17162_v55 = vpop.eup %17161 }
 0xb7c   :  { %v8661_v59 = vadd.f32 1.0, %v17162_v55 }
 0xb7e   :  { %17169 = vrcp.f32 %v8661_v59 }
 0xb7f   :  { %v17164_v57 = vpop.eup %17163 }
 0xb80   :  { %v17166_v56 = vpop.eup %17165  ;;  %v8353_v58 = vmul.f32 %v17164_v57, %v17158_v50  ;;  %v9063_v50 = vld [vmem:[#allocation2 + $0x168] sm:$0xff] }
 0xb81   :  { %v17168_v30 = vpop.eup %17167  ;;  %v8665_v26 = vmul.f32 %v17166_v56, %v17160_v52 }
 0xb82   :  { %v8664_v41 = vmul.f32 %v17168_v30, %v18835_v23  ;;  %v8669_v1 = vmax.f32 %v8353_v58, 0.0  ;;  %15266 = vmatmul.mubr.msk.f32.vlgmr.msra.gmra.mrb[144].mxu0 %vm258_vm2, %v8353_v58  ;;  %15277 = vmatmul.mubr.msk.f32.vlgmr.msra.gmra.mrb[144].mxu1 %vm258_vm2, %v8353_v58 }
 0xb83   :  { %16557 = vmatpush3.bf16.msra.mxu0 %v18656_v29  ;;  %16563 = vmatpush3.bf16.msra.mxu1 %v18658_v37 }
 0xb84   :  { %v18908_v18 = vadd.f32 %v8665_v26, %v8664_v41  ;;  %16558 = vmatprep.subr.bf16.mxu0 %v17465_v62  ;;  %16564 = vmatprep.subr.bf16.mxu1 %v17465_v62  ;;  %v18912_v35 = vadd.f32 %v8669_v1, %v8035_v60  ;;  %v9207_v41 = vld [vmem:[#allocation2 + $0x1e8] sm:$0xff] }
 0xb85   :  { %15287 = vmatprep.mubr.msk.f32.mxu0 %vm17466_vm1, %v17467_v5  ;;  %15298 = vmatprep.mubr.msk.f32.mxu1 %vm17466_vm1, %v17467_v5 }
 0xb86   :  { %17171 = vtanh.f32 %v18908_v18 }
 0xb87   :  { %16560 = vmatpush3.bf16.msra.mxu0 %v18664_v32  ;;  %16566 = vmatpush3.bf16.msra.mxu1 %v18666_v47 }
 0xb88   :  { %16567 = vmatprep.subr.bf16.mxu0 %v17465_v62  ;;  %16573 = vmatprep.subr.bf16.mxu1 %v17465_v62  ;;  %v17170_v61 = vpop.eup %17169 }
 0xb8a   :  { %15288 = vmatmul.mubr.msk.f32.vlgmr.msra.gmra.mrb[146].mxu0 %vm258_vm2, %v8353_v58  ;;  %15299 = vmatmul.mubr.msk.f32.vlgmr.msra.gmra.mrb[146].mxu1 %vm258_vm2, %v8353_v58 }
 0xb8b   :  { %16569 = vmatpush3.bf16.msra.mxu0 %v18676_v53  ;;  %16575 = vmatpush3.bf16.msra.mxu1 %v18678_v7 }
 0xb8c   :  { %16570 = vmatprep.subr.bf16.mxu0 %v17465_v62  ;;  %16576 = vmatprep.subr.bf16.mxu1 %v17465_v62 }
 0xb8d   :  { %15309 = vmatprep.mubr.msk.f32.mxu0 %vm17466_vm1, %v17467_v5  ;;  %15320 = vmatprep.mubr.msk.f32.mxu1 %vm17466_vm1, %v17467_v5 }
 0xb8f   :  { %16572 = vmatpush3.bf16.msra.mxu0 %v18686_v13  ;;  %16578 = vmatpush3.bf16.msra.mxu1 %v18688_v2 }
 0xb90   :  { %v17172_v23 = vpop.eup %17171  ;;  %16579 = vmatprep.subr.bf16.mxu0 %v17465_v62  ;;  %16585 = vmatprep.subr.bf16.mxu1 %v17465_v62 }
 0xb91   :  { %v8668_v44 = vmul.f32 %v17172_v23, %v17170_v61 }
 0xb93   :  { %v8671_v12 = vmax.f32 %v8668_v44, 0.0  ;;  %15310 = vmatmul.mubr.msk.f32.vlgmr.msra.gmra.mrb[148].mxu0 %vm258_vm2, %v8668_v44  ;;  %15321 = vmatmul.mubr.msk.f32.vlgmr.msra.gmra.mrb[148].mxu1 %vm258_vm2, %v8668_v44 }
 0xb94   :  { %16581 = vmatpush3.bf16.msra.mxu0 %v18698_v22  ;;  %16587 = vmatpush3.bf16.msra.mxu1 %v18700_v4 }
 0xb95   :  { %16582 = vmatprep.subr.bf16.mxu0 %v17465_v62  ;;  %16588 = vmatprep.subr.bf16.mxu1 %v17465_v62  ;;  %v18944_v42 = vadd.f32 %v8671_v12, %v8037_v9 }
 0xb96   :  { %15331 = vmatprep.mubr.msk.f32.mxu0 %vm17466_vm1, %v17467_v5  ;;  %15342 = vmatprep.mubr.msk.f32.mxu1 %vm17466_vm1, %v17467_v5 }
 0xb98   :  { %16584 = vmatpush3.bf16.msra.mxu0 %v18708_v6  ;;  %16590 = vmatpush3.bf16.msra.mxu1 %v18710_v17 }
 0xb99   :  { %16591 = vmatprep.subr.bf16.mxu0 %v17465_v62  ;;  %16597 = vmatprep.subr.bf16.mxu1 %v17465_v62 }
 0xb9b   :  { %15332 = vmatmul.mubr.msk.f32.vlgmr.msra.gmra.mrb[150].mxu0 %vm258_vm2, %v8668_v44  ;;  %15343 = vmatmul.mubr.msk.f32.vlgmr.msra.gmra.mrb[150].mxu1 %vm258_vm2, %v8668_v44 }
 0xb9c   :  { %16593 = vmatpush3.bf16.msra.mxu0 %v18608_v34  ;;  %16599 = vmatpush3.bf16.msra.mxu1 %v18610_v0 }
 0xb9d   :  { %16594 = vmatprep.subr.bf16.mxu0 %v17465_v62  ;;  %16600 = vmatprep.subr.bf16.mxu1 %v17465_v62 }
 0xb9e   :  { %15353 = vmatprep.mubr.msk.f32.mxu0 %vm17466_vm1, %v17467_v5  ;;  %15364 = vmatprep.mubr.msk.f32.mxu1 %vm17466_vm1, %v17467_v5 }
 0xba0   :  { %16596 = vmatpush3.bf16.msra.mxu0 %v18622_v11  ;;  %16602 = vmatpush3.bf16.msra.mxu1 %v18624_v33 }
 0xba1   :  { %16603 = vmatprep.subr.bf16.mxu0 %v17465_v62  ;;  %16609 = vmatprep.subr.bf16.mxu1 %v17465_v62 }
 0xc55   :  { %v8743_v63 = vpop.f32.mrb[144].mxu0  ;;  %v8815_v3 = vpop.f32.mrb[144].mxu1 }
 0xc56   :  { %v8747_v20 = vadd.f32 %v8743_v63, %v8673_v27  ;;  %v8819_v24 = vadd.f32 %v8815_v3, %v8748_v38  ;;  %v15267_v25 = vpop.f32.mrb[145].mxu0  ;;  %v15278_v54 = vpop.f32.mrb[145].mxu1  ;;  %v9135_v27 = vld [vmem:[#allocation2 + $0x1a8] sm:$0xff] }
 0xc58   :  { %v12937_v10 = vmul.f32 -1.442695, %v8747_v20  ;;  %v12938_v15 = vmul.f32 -1.442695, %v8819_v24 }
 0xc5a   :  { %17173 = vpow2.f32 %v12937_v10 }
 0xc5b   :  { %17175 = vpow2.f32 %v12938_v15 }
 0xc5d   :  { %v8887_v16 = vpop.f32.mrb[146].mxu0  ;;  %v8959_v28 = vpop.f32.mrb[146].mxu1 }
 0xc5e   :  { %v8963_v36 = vadd.f32 %v8959_v28, %v8892_v21  ;;  %v15289_v45 = vpop.f32.mrb[147].mxu0  ;;  %v15300_v51 = vpop.f32.mrb[147].mxu1  ;;  %v8891_v8 = vadd.f32 %v8887_v16, %v8820_v19 }
 0xc60   :  { %v12939_v14 = vmul.f32 -1.442695, %v8963_v36 }
 0xc62   :  { %17177 = vpow2.f32 %v12939_v14 }
 0xc63   :  { %17179 = vtanh.f32 %v8891_v8 }
 0xc64   :  { %v17174_v40 = vpop.eup %17173 }
 0xc65   :  { %v17176_v31 = vpop.eup %17175  ;;  %v8967_v39 = vadd.f32 1.0, %v17174_v40 }
 0xc66   :  { %v8973_v46 = vadd.f32 1.0, %v17176_v31  ;;  %v9058_v49 = vpop.f32.mrb[148].mxu0  ;;  %v9130_v52 = vpop.f32.mrb[148].mxu1 }
 0xc67   :  { %17181 = vrcp.f32 %v8967_v39  ;;  %v9062_v55 = vadd.f32 %v9058_v49, %v8988_v48  ;;  %v9134_v57 = vadd.f32 %v9130_v52, %v9063_v50  ;;  %v15311_v56 = vpop.f32.mrb[149].mxu0  ;;  %v15322_v58 = vpop.f32.mrb[149].mxu1 }
 0xc68   :  { %17183 = vrcp.f32 %v8973_v46 }
 0xc69   :  { %v12944_v30 = vmul.f32 -1.442695, %v9062_v55  ;;  %v12945_v26 = vmul.f32 -1.442695, %v9134_v57  ;;  %v9382_v57 = vld [vmem:[#allocation2 + $0x58] sm:$0xff] }
 0xc6b   :  { %17185 = vpow2.f32 %v12944_v30 }
 0xc6c   :  { %17187 = vpow2.f32 %v12945_v26  ;;  %v17178_v59 = vpop.eup %17177 }
 0xc6d   :  { %v17180_v9 = vpop.eup %17179  ;;  %v8980_v12 = vadd.f32 1.0, %v17178_v59 }
 0xc6e   :  { %v9202_v60 = vpop.f32.mrb[150].mxu0  ;;  %v9274_v1 = vpop.f32.mrb[150].mxu1 }
 0xc6f   :  { %v9278_v61 = vadd.f32 %v9274_v1, %v9207_v41  ;;  %v15333_v23 = vpop.f32.mrb[151].mxu0  ;;  %v15344_v44 = vpop.f32.mrb[151].mxu1  ;;  %v9206_v38 = vadd.f32 %v9202_v60, %v9135_v27  ;;  %17189 = vrcp.f32 %v8980_v12 }
 0xc71   :  { %v17182_v63 = vpop.eup %17181  ;;  %v12946_v24 = vmul.f32 -1.442695, %v9278_v61  ;;  %17191 = vtanh.f32 %v9206_v38  ;;  %v9526_v61 = vld [vmem:[#allocation2 + $0xd8] sm:$0xff] }
 0xc72   :  { %v17184_v3 = vpop.eup %17183  ;;  %v8984_v20 = vmul.f32 %v17182_v63, %v17180_v9  ;;  %v9454_v63 = vld [vmem:[#allocation2 + $0x98] sm:$0xff] }
 0xc73   :  { %v8983_v25 = vmul.f32 %v17184_v3, %v18899_v43  ;;  %17193 = vpow2.f32 %v12946_v24 }
 0xc75   :  { %v17186_v54 = vpop.eup %17185  ;;  %v18969_v10 = vadd.f32 %v8984_v20, %v8983_v25 }
 0xc76   :  { %v17188_v15 = vpop.eup %17187  ;;  %v9282_v16 = vadd.f32 1.0, %v17186_v54  ;;  %v9622_v54 = vld [vmem:[#allocation2 + $0x120] sm:$0xff] }
 0xc77   :  { %17195 = vtanh.f32 %v18969_v10  ;;  %v9288_v21 = vadd.f32 1.0, %v17188_v15 }
 0xc78   :  { %17197 = vrcp.f32 %v9282_v16  ;;  %v9697_v16 = vld [vmem:[#allocation2 + $0x160] sm:$0xff] }
 0xc79   :  { %17199 = vrcp.f32 %v9288_v21  ;;  %v17190_v28 = vpop.eup %17189 }
 0xc7b   :  { %v17192_v36 = vpop.eup %17191 }
 0xc7d   :  { %v17194_v45 = vpop.eup %17193 }
 0xc7e   :  { %v9295_v40 = vadd.f32 1.0, %v17194_v45 }
 0xc80   :  { %17201 = vrcp.f32 %v9295_v40  ;;  %v9841_v40 = vld [vmem:[#allocation2 + $0x1e0] sm:$0xff] }
 0xc81   :  { %v17196_v51 = vpop.eup %17195 }
 0xc82   :  { %v17198_v14 = vpop.eup %17197  ;;  %v8987_v19 = vmul.f32 %v17196_v51, %v17190_v28 }
 0xc83   :  { %v17200_v43 = vpop.eup %17199  ;;  %v9299_v8 = vmul.f32 %v17198_v14, %v17192_v36 }
 0xc84   :  { %v9298_v31 = vmul.f32 %v17200_v43, %v18908_v18  ;;  %15354 = vmatmul.mubr.msk.f32.vlgmr.msra.gmra.mrb[152].mxu0 %vm258_vm2, %v8987_v19  ;;  %15365 = vmatmul.mubr.msk.f32.vlgmr.msra.gmra.mrb[152].mxu1 %vm258_vm2, %v8987_v19  ;;  %v9303_v39 = vmax.f32 %v8987_v19, 0.0 }
 0xc85   :  { %16605 = vmatpush3.bf16.msra.mxu0 %v18656_v29  ;;  %16611 = vmatpush3.bf16.msra.mxu1 %v18658_v37 }
 0xc86   :  { %v18977_v46 = vadd.f32 %v9299_v8, %v9298_v31  ;;  %16606 = vmatprep.subr.bf16.mxu0 %v17465_v62  ;;  %16612 = vmatprep.subr.bf16.mxu1 %v17465_v62  ;;  %v18982_v48 = vadd.f32 %v9303_v39, %v18912_v35 }
 0xc87   :  { %15375 = vmatprep.mubr.msk.f32.mxu0 %vm17466_vm1, %v17467_v5  ;;  %15386 = vmatprep.mubr.msk.f32.mxu1 %vm17466_vm1, %v17467_v5 }
 0xc88   :  { %17203 = vtanh.f32 %v18977_v46 }
 0xc89   :  { %16608 = vmatpush3.bf16.msra.mxu0 %v18664_v32  ;;  %16614 = vmatpush3.bf16.msra.mxu1 %v18666_v47 }
 0xc8a   :  { %16615 = vmatprep.subr.bf16.mxu0 %v17465_v62  ;;  %16621 = vmatprep.subr.bf16.mxu1 %v17465_v62  ;;  %v17202_v18 = vpop.eup %17201 }
 0xc8c   :  { %15376 = vmatmul.mubr.msk.f32.vlgmr.msra.gmra.mrb[154].mxu0 %vm258_vm2, %v8987_v19  ;;  %15387 = vmatmul.mubr.msk.f32.vlgmr.msra.gmra.mrb[154].mxu1 %vm258_vm2, %v8987_v19 }
 0xc8d   :  { %16617 = vmatpush3.bf16.msra.mxu0 %v18676_v53  ;;  %16623 = vmatpush3.bf16.msra.mxu1 %v18678_v7 }
 0xc8e   :  { %16618 = vmatprep.subr.bf16.mxu0 %v17465_v62  ;;  %16624 = vmatprep.subr.bf16.mxu1 %v17465_v62 }
 0xc8f   :  { %15397 = vmatprep.mubr.msk.f32.mxu0 %vm17466_vm1, %v17467_v5  ;;  %15408 = vmatprep.mubr.msk.f32.mxu1 %vm17466_vm1, %v17467_v5 }
 0xc91   :  { %16620 = vmatpush3.bf16.msra.mxu0 %v18686_v13  ;;  %16626 = vmatpush3.bf16.msra.mxu1 %v18688_v2 }
 0xc92   :  { %v17204_v35 = vpop.eup %17203  ;;  %16627 = vmatprep.subr.bf16.mxu0 %v17465_v62  ;;  %16633 = vmatprep.subr.bf16.mxu1 %v17465_v62 }
 0xc93   :  { %v9302_v49 = vmul.f32 %v17204_v35, %v17202_v18 }
 0xc95   :  { %15398 = vmatmul.mubr.msk.f32.vlgmr.msra.gmra.mrb[156].mxu0 %vm258_vm2, %v9302_v49  ;;  %15409 = vmatmul.mubr.msk.f32.vlgmr.msra.gmra.mrb[156].mxu1 %vm258_vm2, %v9302_v49  ;;  %v9305_v50 = vmax.f32 %v9302_v49, 0.0 }
 0xc96   :  { %16629 = vmatpush3.bf16.msra.mxu0 %v18698_v22  ;;  %16635 = vmatpush3.bf16.msra.mxu1 %v18700_v4 }
 0xc97   :  { %16630 = vmatprep.subr.bf16.mxu0 %v17465_v62  ;;  %16636 = vmatprep.subr.bf16.mxu1 %v17465_v62  ;;  %v19014_v52 = vadd.f32 %v9305_v50, %v18944_v42  ;;  %v9307_v42 = vld [vmem:[#allocation2 + $0x18] sm:$0xff] }
 0xc98   :  { %15419 = vmatprep.mubr.msk.f32.mxu0 %vm17466_vm1, %v17467_v5  ;;  %15430 = vmatprep.mubr.msk.f32.mxu1 %vm17466_vm1, %v17467_v5 }
 0xc9a   :  { %16632 = vmatpush3.bf16.msra.mxu0 %v18708_v6  ;;  %16638 = vmatpush3.bf16.msra.mxu1 %v18710_v17 }
 0xc9b   :  { %16639 = vmatprep.subr.bf16.mxu0 %v17465_v62  ;;  %16645 = vmatprep.subr.bf16.mxu1 %v17465_v62 }
 0xc9d   :  { %15420 = vmatmul.mubr.msk.f32.vlgmr.msra.gmra.mrb[158].mxu0 %vm258_vm2, %v9302_v49  ;;  %15431 = vmatmul.mubr.msk.f32.vlgmr.msra.gmra.mrb[158].mxu1 %vm258_vm2, %v9302_v49 }
 0xc9e   :  { %16641 = vmatpush3.bf16.msra.mxu0 %v18608_v34  ;;  %16647 = vmatpush3.bf16.msra.mxu1 %v18610_v0 }
 0xc9f   :  { %16642 = vmatprep.subr.bf16.mxu0 %v17465_v62  ;;  %16648 = vmatprep.subr.bf16.mxu1 %v17465_v62 }
 0xca0   :  { %15441 = vmatprep.mubr.msk.f32.mxu0 %vm17466_vm1, %v17467_v5  ;;  %15452 = vmatprep.mubr.msk.f32.mxu1 %vm17466_vm1, %v17467_v5 }
 0xca2   :  { %16644 = vmatpush3.bf16.msra.mxu0 %v18622_v11  ;;  %16650 = vmatpush3.bf16.msra.mxu1 %v18624_v33 }
 0xca3   :  { %16651 = vmatprep.subr.bf16.mxu0 %v17465_v62  ;;  %16657 = vmatprep.subr.bf16.mxu1 %v17465_v62 }
 0xd57   :  { %v9377_v55 = vpop.f32.mrb[152].mxu0  ;;  %v9449_v56 = vpop.f32.mrb[152].mxu1 }
 0xd58   :  { %v9381_v58 = vadd.f32 %v9377_v55, %v9307_v42  ;;  %v9453_v30 = vadd.f32 %v9449_v56, %v9382_v57  ;;  %v15355_v26 = vpop.f32.mrb[153].mxu0  ;;  %v15366_v59 = vpop.f32.mrb[153].mxu1  ;;  %v9769_v42 = vld [vmem:[#allocation2 + $0x1a0] sm:$0xff] }
 0xd5a   :  { %v12951_v60 = vmul.f32 -1.442695, %v9381_v58  ;;  %v12952_v41 = vmul.f32 -1.442695, %v9453_v30 }
 0xd5c   :  { %17205 = vpow2.f32 %v12951_v60 }
 0xd5d   :  { %17207 = vpow2.f32 %v12952_v41 }
 0xd5f   :  { %v9521_v1 = vpop.f32.mrb[154].mxu0  ;;  %v9593_v23 = vpop.f32.mrb[154].mxu1 }
 0xd60   :  { %v9597_v44 = vadd.f32 %v9593_v23, %v9526_v61  ;;  %v15377_v9 = vpop.f32.mrb[155].mxu0  ;;  %v15388_v12 = vpop.f32.mrb[155].mxu1  ;;  %v9525_v38 = vadd.f32 %v9521_v1, %v9454_v63 }
 0xd62   :  { %v12953_v27 = vmul.f32 -1.442695, %v9597_v44 }
 0xd64   :  { %17209 = vpow2.f32 %v12953_v27 }
 0xd65   :  { %17211 = vtanh.f32 %v9525_v38 }
 0xd66   :  { %v17206_v3 = vpop.eup %17205 }
 0xd67   :  { %v17208_v20 = vpop.eup %17207  ;;  %v9601_v24 = vadd.f32 1.0, %v17206_v3 }
 0xd68   :  { %v9607_v25 = vadd.f32 1.0, %v17208_v20  ;;  %v9692_v15 = vpop.f32.mrb[156].mxu0  ;;  %v9764_v21 = vpop.f32.mrb[156].mxu1 }
 0xd69   :  { %17213 = vrcp.f32 %v9601_v24  ;;  %v9696_v28 = vadd.f32 %v9692_v15, %v9622_v54  ;;  %v9768_v36 = vadd.f32 %v9764_v21, %v9697_v16  ;;  %v15399_v45 = vpop.f32.mrb[157].mxu0  ;;  %v15410_v51 = vpop.f32.mrb[157].mxu1 }
 0xd6a   :  { %17215 = vrcp.f32 %v9607_v25 }
 0xd6b   :  { %v12958_v14 = vmul.f32 -1.442695, %v9696_v28  ;;  %v12959_v19 = vmul.f32 -1.442695, %v9768_v36  ;;  %v10016_v36 = vld [vmem:[#allocation2 + $0x60] sm:$0xff] }
 0xd6d   :  { %17217 = vpow2.f32 %v12958_v14 }
 0xd6e   :  { %17219 = vpow2.f32 %v12959_v19  ;;  %v17210_v43 = vpop.eup %17209 }
 0xd6f   :  { %v17212_v49 = vpop.eup %17211  ;;  %v9614_v50 = vadd.f32 1.0, %v17210_v43 }
 0xd70   :  { %v9836_v8 = vpop.f32.mrb[158].mxu0  ;;  %v9908_v31 = vpop.f32.mrb[158].mxu1 }
 0xd71   :  { %v9912_v39 = vadd.f32 %v9908_v31, %v9841_v40  ;;  %v15421_v18 = vpop.f32.mrb[159].mxu0  ;;  %v15432_v35 = vpop.f32.mrb[159].mxu1  ;;  %v9840_v57 = vadd.f32 %v9836_v8, %v9769_v42  ;;  %17221 = vrcp.f32 %v9614_v50 }
 0xd73   :  { %v17214_v55 = vpop.eup %17213  ;;  %v12960_v30 = vmul.f32 -1.442695, %v9912_v39  ;;  %17223 = vtanh.f32 %v9840_v57  ;;  %v10160_v39 = vld [vmem:[#allocation2 + $0xe0] sm:$0xff] }
 0xd74   :  { %v17216_v56 = vpop.eup %17215  ;;  %v9618_v58 = vmul.f32 %v17214_v55, %v17212_v49  ;;  %v10088_v55 = vld [vmem:[#allocation2 + $0xa0] sm:$0xff] }
 0xd75   :  { %v9617_v26 = vmul.f32 %v17216_v56, %v18969_v10  ;;  %17225 = vpow2.f32 %v12960_v30 }
 0xd77   :  { %v17218_v59 = vpop.eup %17217  ;;  %v19039_v60 = vadd.f32 %v9618_v58, %v9617_v26 }
 0xd78   :  { %v17220_v41 = vpop.eup %17219  ;;  %v9916_v1 = vadd.f32 1.0, %v17218_v59  ;;  %v10256_v59 = vld [vmem:[#allocation2 + $0x118] sm:$0xff] }
 0xd79   :  { %17227 = vtanh.f32 %v19039_v60  ;;  %v9922_v61 = vadd.f32 1.0, %v17220_v41 }
 0xd7a   :  { %17229 = vrcp.f32 %v9916_v1  ;;  %v10331_v1 = vld [vmem:[#allocation2 + $0x158] sm:$0xff] }
 0xd7b   :  { %17231 = vrcp.f32 %v9922_v61  ;;  %v17222_v23 = vpop.eup %17221 }
 0xd7d   :  { %v17224_v44 = vpop.eup %17223 }
 0xd7f   :  { %v17226_v9 = vpop.eup %17225 }
 0xd80   :  { %v9929_v3 = vadd.f32 1.0, %v17226_v9 }
 0xd82   :  { %17233 = vrcp.f32 %v9929_v3  ;;  %v10475_v3 = vld [vmem:[#allocation2 + $0x1d8] sm:$0xff] }
 0xd83   :  { %v17228_v12 = vpop.eup %17227 }
 0xd84   :  { %v17230_v27 = vpop.eup %17229  ;;  %v9621_v63 = vmul.f32 %v17228_v12, %v17222_v23 }
 0xd85   :  { %v17232_v10 = vpop.eup %17231  ;;  %v9933_v38 = vmul.f32 %v17230_v27, %v17224_v44 }
 0xd86   :  { %v9932_v20 = vmul.f32 %v17232_v10, %v18977_v46  ;;  %15442 = vmatmul.mubr.msk.f32.vlgmr.msra.gmra.mrb[160].mxu0 %vm258_vm2, %v9621_v63  ;;  %15453 = vmatmul.mubr.msk.f32.vlgmr.msra.gmra.mrb[160].mxu1 %vm258_vm2, %v9621_v63  ;;  %v9937_v24 = vmax.f32 %v9621_v63, 0.0 }
 0xd87   :  { %16653 = vmatpush3.bf16.msra.mxu0 %v18656_v29  ;;  %16659 = vmatpush3.bf16.msra.mxu1 %v18658_v37 }
 0xd88   :  { %v19047_v25 = vadd.f32 %v9933_v38, %v9932_v20  ;;  %16654 = vmatprep.subr.bf16.mxu0 %v17465_v62  ;;  %16660 = vmatprep.subr.bf16.mxu1 %v17465_v62  ;;  %v19052_v54 = vadd.f32 %v9937_v24, %v18982_v48 }
 0xd89   :  { %15463 = vmatprep.mubr.msk.f32.mxu0 %vm17466_vm1, %v17467_v5  ;;  %15474 = vmatprep.mubr.msk.f32.mxu1 %vm17466_vm1, %v17467_v5 }
 0xd8a   :  { %17235 = vtanh.f32 %v19047_v25 }
 0xd8b   :  { %16656 = vmatpush3.bf16.msra.mxu0 %v18664_v32  ;;  %16662 = vmatpush3.bf16.msra.mxu1 %v18666_v47 }
 0xd8c   :  { %16663 = vmatprep.subr.bf16.mxu0 %v17465_v62  ;;  %16669 = vmatprep.subr.bf16.mxu1 %v17465_v62  ;;  %v17234_v46 = vpop.eup %17233 }
 0xd8e   :  { %15464 = vmatmul.mubr.msk.f32.vlgmr.msra.gmra.mrb[162].mxu0 %vm258_vm2, %v9621_v63  ;;  %15475 = vmatmul.mubr.msk.f32.vlgmr.msra.gmra.mrb[162].mxu1 %vm258_vm2, %v9621_v63 }
 0xd8f   :  { %16665 = vmatpush3.bf16.msra.mxu0 %v18676_v53  ;;  %16671 = vmatpush3.bf16.msra.mxu1 %v18678_v7 }
 0xd90   :  { %16666 = vmatprep.subr.bf16.mxu0 %v17465_v62  ;;  %16672 = vmatprep.subr.bf16.mxu1 %v17465_v62 }
 0xd91   :  { %15485 = vmatprep.mubr.msk.f32.mxu0 %vm17466_vm1, %v17467_v5  ;;  %15496 = vmatprep.mubr.msk.f32.mxu1 %vm17466_vm1, %v17467_v5 }
 0xd93   :  { %16668 = vmatpush3.bf16.msra.mxu0 %v18686_v13  ;;  %16674 = vmatpush3.bf16.msra.mxu1 %v18688_v2 }
 0xd94   :  { %v17236_v48 = vpop.eup %17235  ;;  %16675 = vmatprep.subr.bf16.mxu0 %v17465_v62  ;;  %16681 = vmatprep.subr.bf16.mxu1 %v17465_v62 }
 0xd95   :  { %v9936_v15 = vmul.f32 %v17236_v48, %v17234_v46 }
 0xd97   :  { %15486 = vmatmul.mubr.msk.f32.vlgmr.msra.gmra.mrb[164].mxu0 %vm258_vm2, %v9936_v15  ;;  %15497 = vmatmul.mubr.msk.f32.vlgmr.msra.gmra.mrb[164].mxu1 %vm258_vm2, %v9936_v15  ;;  %v9939_v16 = vmax.f32 %v9936_v15, 0.0 }
 0xd98   :  { %16677 = vmatpush3.bf16.msra.mxu0 %v18698_v22  ;;  %16683 = vmatpush3.bf16.msra.mxu1 %v18700_v4 }
 0xd99   :  { %16678 = vmatprep.subr.bf16.mxu0 %v17465_v62  ;;  %16684 = vmatprep.subr.bf16.mxu1 %v17465_v62  ;;  %v19084_v21 = vadd.f32 %v9939_v16, %v19014_v52  ;;  %v9941_v52 = vld [vmem:[#allocation2 + $0x20] sm:$0xff] }
 0xd9a   :  { %15507 = vmatprep.mubr.msk.f32.mxu0 %vm17466_vm1, %v17467_v5  ;;  %15518 = vmatprep.mubr.msk.f32.mxu1 %vm17466_vm1, %v17467_v5 }
 0xd9c   :  { %16680 = vmatpush3.bf16.msra.mxu0 %v18708_v6  ;;  %16686 = vmatpush3.bf16.msra.mxu1 %v18710_v17 }
 0xd9d   :  { %16687 = vmatprep.subr.bf16.mxu0 %v17465_v62  ;;  %16693 = vmatprep.subr.bf16.mxu1 %v17465_v62 }
 0xd9f   :  { %15508 = vmatmul.mubr.msk.f32.vlgmr.msra.gmra.mrb[166].mxu0 %vm258_vm2, %v9936_v15  ;;  %15519 = vmatmul.mubr.msk.f32.vlgmr.msra.gmra.mrb[166].mxu1 %vm258_vm2, %v9936_v15 }
 0xda0   :  { %16689 = vmatpush3.bf16.msra.mxu0 %v18608_v34  ;;  %16695 = vmatpush3.bf16.msra.mxu1 %v18610_v0 }
 0xda1   :  { %16690 = vmatprep.subr.bf16.mxu0 %v17465_v62  ;;  %16696 = vmatprep.subr.bf16.mxu1 %v17465_v62 }
 0xda2   :  { %15529 = vmatprep.mubr.msk.f32.mxu0 %vm17466_vm1, %v17467_v5  ;;  %15540 = vmatprep.mubr.msk.f32.mxu1 %vm17466_vm1, %v17467_v5 }
 0xda4   :  { %16692 = vmatpush3.bf16.msra.mxu0 %v18622_v11  ;;  %16698 = vmatpush3.bf16.msra.mxu1 %v18624_v33 }
 0xda5   :  { %16699 = vmatprep.subr.bf16.mxu0 %v17465_v62  ;;  %16705 = vmatprep.subr.bf16.mxu1 %v17465_v62 }
 0xe59   :  { %v10011_v28 = vpop.f32.mrb[160].mxu0  ;;  %v10083_v45 = vpop.f32.mrb[160].mxu1 }
 0xe5a   :  { %v10015_v51 = vadd.f32 %v10011_v28, %v9941_v52  ;;  %v10087_v14 = vadd.f32 %v10083_v45, %v10016_v36  ;;  %v15443_v19 = vpop.f32.mrb[161].mxu0  ;;  %v15454_v43 = vpop.f32.mrb[161].mxu1  ;;  %v10403_v52 = vld [vmem:[#allocation2 + $0x198] sm:$0xff] }
 0xe5c   :  { %v12965_v8 = vmul.f32 -1.442695, %v10015_v51  ;;  %v12966_v40 = vmul.f32 -1.442695, %v10087_v14 }
 0xe5e   :  { %17237 = vpow2.f32 %v12965_v8 }
 0xe5f   :  { %17239 = vpow2.f32 %v12966_v40 }
 0xe61   :  { %v10155_v31 = vpop.f32.mrb[162].mxu0  ;;  %v10227_v18 = vpop.f32.mrb[162].mxu1 }
 0xe62   :  { %v10231_v35 = vadd.f32 %v10227_v18, %v10160_v39  ;;  %v15465_v49 = vpop.f32.mrb[163].mxu0  ;;  %v15476_v50 = vpop.f32.mrb[163].mxu1  ;;  %v10159_v57 = vadd.f32 %v10155_v31, %v10088_v55 }
 0xe64   :  { %v12967_v42 = vmul.f32 -1.442695, %v10231_v35 }
 0xe66   :  { %17241 = vpow2.f32 %v12967_v42 }
 0xe67   :  { %17243 = vtanh.f32 %v10159_v57 }
 0xe68   :  { %v17238_v56 = vpop.eup %17237 }
 0xe69   :  { %v17240_v58 = vpop.eup %17239  ;;  %v10235_v30 = vadd.f32 1.0, %v17238_v56 }
 0xe6a   :  { %v10241_v26 = vadd.f32 1.0, %v17240_v58  ;;  %v10326_v41 = vpop.f32.mrb[164].mxu0  ;;  %v10398_v61 = vpop.f32.mrb[164].mxu1 }
 0xe6b   :  { %17245 = vrcp.f32 %v10235_v30  ;;  %v10330_v23 = vadd.f32 %v10326_v41, %v10256_v59  ;;  %v10402_v44 = vadd.f32 %v10398_v61, %v10331_v1  ;;  %v15487_v9 = vpop.f32.mrb[165].mxu0  ;;  %v15498_v12 = vpop.f32.mrb[165].mxu1 }
 0xe6c   :  { %17247 = vrcp.f32 %v10241_v26 }
 0xe6d   :  { %v12972_v27 = vmul.f32 -1.442695, %v10330_v23  ;;  %v12973_v63 = vmul.f32 -1.442695, %v10402_v44  ;;  %v10650_v44 = vld [vmem:[#allocation2 + $0x68] sm:$0xff] }
 0xe6f   :  { %17249 = vpow2.f32 %v12972_v27 }
 0xe70   :  { %17251 = vpow2.f32 %v12973_v63  ;;  %v17242_v10 = vpop.eup %17241 }
 0xe71   :  { %v17244_v15 = vpop.eup %17243  ;;  %v10248_v16 = vadd.f32 1.0, %v17242_v10 }
 0xe72   :  { %v10470_v38 = vpop.f32.mrb[166].mxu0  ;;  %v10542_v20 = vpop.f32.mrb[166].mxu1 }
 0xe73   :  { %v10546_v24 = vadd.f32 %v10542_v20, %v10475_v3  ;;  %v15509_v46 = vpop.f32.mrb[167].mxu0  ;;  %v15520_v48 = vpop.f32.mrb[167].mxu1  ;;  %v10474_v36 = vadd.f32 %v10470_v38, %v10403_v52  ;;  %17253 = vrcp.f32 %v10248_v16 }
 0xe75   :  { %v17246_v28 = vpop.eup %17245  ;;  %v12974_v14 = vmul.f32 -1.442695, %v10546_v24  ;;  %17255 = vtanh.f32 %v10474_v36  ;;  %v10794_v24 = vld [vmem:[#allocation2 + $0xe8] sm:$0xff] }
 0xe76   :  { %v17248_v45 = vpop.eup %17247  ;;  %v10252_v51 = vmul.f32 %v17246_v28, %v17244_v15  ;;  %v10722_v28 = vld [vmem:[#allocation2 + $0xa8] sm:$0xff] }
 0xe77   :  { %v10251_v19 = vmul.f32 %v17248_v45, %v19039_v60  ;;  %17257 = vpow2.f32 %v12974_v14 }
 0xe79   :  { %v17250_v43 = vpop.eup %17249  ;;  %v19109_v8 = vadd.f32 %v10252_v51, %v10251_v19 }
 0xe7a   :  { %v17252_v40 = vpop.eup %17251  ;;  %v10550_v31 = vadd.f32 1.0, %v17250_v43  ;;  %v10890_v43 = vld [vmem:[#allocation2 + $0x110] sm:$0xff] }
 0xe7b   :  { %17259 = vtanh.f32 %v19109_v8  ;;  %v10556_v39 = vadd.f32 1.0, %v17252_v40 }
 0xe7c   :  { %17261 = vrcp.f32 %v10550_v31  ;;  %v10965_v31 = vld [vmem:[#allocation2 + $0x150] sm:$0xff] }
 0xe7d   :  { %17263 = vrcp.f32 %v10556_v39  ;;  %v17254_v18 = vpop.eup %17253 }
 0xe7f   :  { %v17256_v35 = vpop.eup %17255 }
 0xe81   :  { %v17258_v49 = vpop.eup %17257 }
 0xe82   :  { %v10563_v56 = vadd.f32 1.0, %v17258_v49 }
 0xe84   :  { %17265 = vrcp.f32 %v10563_v56  ;;  %v11109_v56 = vld [vmem:[#allocation2 + $0x1d0] sm:$0xff] }
 0xe85   :  { %v17260_v50 = vpop.eup %17259 }
 0xe86   :  { %v17262_v42 = vpop.eup %17261  ;;  %v10255_v55 = vmul.f32 %v17260_v50, %v17254_v18 }
 0xe87   :  { %v17264_v60 = vpop.eup %17263  ;;  %v10567_v57 = vmul.f32 %v17262_v42, %v17256_v35 }
 0xe88   :  { %v10566_v58 = vmul.f32 %v17264_v60, %v19047_v25  ;;  %15530 = vmatmul.mubr.msk.f32.vlgmr.msra.gmra.mrb[168].mxu0 %vm258_vm2, %v10255_v55  ;;  %15541 = vmatmul.mubr.msk.f32.vlgmr.msra.gmra.mrb[168].mxu1 %vm258_vm2, %v10255_v55  ;;  %v10571_v30 = vmax.f32 %v10255_v55, 0.0 }
 0xe89   :  { %16701 = vmatpush3.bf16.msra.mxu0 %v18656_v29  ;;  %16707 = vmatpush3.bf16.msra.mxu1 %v18658_v37 }
 0xe8a   :  { %v19117_v26 = vadd.f32 %v10567_v57, %v10566_v58  ;;  %16702 = vmatprep.subr.bf16.mxu0 %v17465_v62  ;;  %16708 = vmatprep.subr.bf16.mxu1 %v17465_v62  ;;  %v19122_v59 = vadd.f32 %v10571_v30, %v19052_v54 }
 0xe8b   :  { %15551 = vmatprep.mubr.msk.f32.mxu0 %vm17466_vm1, %v17467_v5  ;;  %15562 = vmatprep.mubr.msk.f32.mxu1 %vm17466_vm1, %v17467_v5 }
 0xe8c   :  { %17267 = vtanh.f32 %v19117_v26 }
 0xe8d   :  { %16704 = vmatpush3.bf16.msra.mxu0 %v18664_v32  ;;  %16710 = vmatpush3.bf16.msra.mxu1 %v18666_v47 }
 0xe8e   :  { %16711 = vmatprep.subr.bf16.mxu0 %v17465_v62  ;;  %16717 = vmatprep.subr.bf16.mxu1 %v17465_v62  ;;  %v17266_v25 = vpop.eup %17265 }
 0xe90   :  { %15552 = vmatmul.mubr.msk.f32.vlgmr.msra.gmra.mrb[170].mxu0 %vm258_vm2, %v10255_v55  ;;  %15563 = vmatmul.mubr.msk.f32.vlgmr.msra.gmra.mrb[170].mxu1 %vm258_vm2, %v10255_v55 }
 0xe91   :  { %16713 = vmatpush3.bf16.msra.mxu0 %v18676_v53  ;;  %16719 = vmatpush3.bf16.msra.mxu1 %v18678_v7 }
 0xe92   :  { %16714 = vmatprep.subr.bf16.mxu0 %v17465_v62  ;;  %16720 = vmatprep.subr.bf16.mxu1 %v17465_v62 }
 0xe93   :  { %15573 = vmatprep.mubr.msk.f32.mxu0 %vm17466_vm1, %v17467_v5  ;;  %15584 = vmatprep.mubr.msk.f32.mxu1 %vm17466_vm1, %v17467_v5 }
 0xe95   :  { %16716 = vmatpush3.bf16.msra.mxu0 %v18686_v13  ;;  %16722 = vmatpush3.bf16.msra.mxu1 %v18688_v2 }
 0xe96   :  { %v17268_v54 = vpop.eup %17267  ;;  %16723 = vmatprep.subr.bf16.mxu0 %v17465_v62  ;;  %16729 = vmatprep.subr.bf16.mxu1 %v17465_v62 }
 0xe97   :  { %v10570_v41 = vmul.f32 %v17268_v54, %v17266_v25 }
 0xe99   :  { %15574 = vmatmul.mubr.msk.f32.vlgmr.msra.gmra.mrb[172].mxu0 %vm258_vm2, %v10570_v41  ;;  %15585 = vmatmul.mubr.msk.f32.vlgmr.msra.gmra.mrb[172].mxu1 %vm258_vm2, %v10570_v41  ;;  %v10573_v1 = vmax.f32 %v10570_v41, 0.0 }
 0xe9a   :  { %16725 = vmatpush3.bf16.msra.mxu0 %v18698_v22  ;;  %16731 = vmatpush3.bf16.msra.mxu1 %v18700_v4 }
 0xe9b   :  { %16726 = vmatprep.subr.bf16.mxu0 %v17465_v62  ;;  %16732 = vmatprep.subr.bf16.mxu1 %v17465_v62  ;;  %v19154_v61 = vadd.f32 %v10573_v1, %v19084_v21  ;;  %v10575_v21 = vld [vmem:[#allocation2 + $0x28] sm:$0xff] }
 0xe9c   :  { %15595 = vmatprep.mubr.msk.f32.mxu0 %vm17466_vm1, %v17467_v5  ;;  %15606 = vmatprep.mubr.msk.f32.mxu1 %vm17466_vm1, %v17467_v5 }
 0xe9e   :  { %16728 = vmatpush3.bf16.msra.mxu0 %v18708_v6  ;;  %16734 = vmatpush3.bf16.msra.mxu1 %v18710_v17 }
 0xe9f   :  { %16735 = vmatprep.subr.bf16.mxu0 %v17465_v62  ;;  %16741 = vmatprep.subr.bf16.mxu1 %v17465_v62 }
 0xea1   :  { %15596 = vmatmul.mubr.msk.f32.vlgmr.msra.gmra.mrb[174].mxu0 %vm258_vm2, %v10570_v41  ;;  %15607 = vmatmul.mubr.msk.f32.vlgmr.msra.gmra.mrb[174].mxu1 %vm258_vm2, %v10570_v41 }
 0xea2   :  { %16737 = vmatpush3.bf16.msra.mxu0 %v18608_v34  ;;  %16743 = vmatpush3.bf16.msra.mxu1 %v18610_v0 }
 0xea3   :  { %16738 = vmatprep.subr.bf16.mxu0 %v17465_v62  ;;  %16744 = vmatprep.subr.bf16.mxu1 %v17465_v62 }
 0xea4   :  { %15617 = vmatprep.mubr.msk.f32.mxu0 %vm17466_vm1, %v17467_v5  ;;  %15628 = vmatprep.mubr.msk.f32.mxu1 %vm17466_vm1, %v17467_v5 }
 0xea6   :  { %16740 = vmatpush3.bf16.msra.mxu0 %v18622_v11  ;;  %16746 = vmatpush3.bf16.msra.mxu1 %v18624_v33 }
 0xea7   :  { %16747 = vmatprep.subr.bf16.mxu0 %v17465_v62  ;;  %16753 = vmatprep.subr.bf16.mxu1 %v17465_v62 }
 0xf5b   :  { %v10645_v23 = vpop.f32.mrb[168].mxu0  ;;  %v10717_v9 = vpop.f32.mrb[168].mxu1 }
 0xf5c   :  { %v10649_v12 = vadd.f32 %v10645_v23, %v10575_v21  ;;  %v10721_v27 = vadd.f32 %v10717_v9, %v10650_v44  ;;  %v15531_v63 = vpop.f32.mrb[169].mxu0  ;;  %v15542_v10 = vpop.f32.mrb[169].mxu1  ;;  %v11037_v21 = vld [vmem:[#allocation2 + $0x190] sm:$0xff] }
 0xf5e   :  { %v12979_v38 = vmul.f32 -1.442695, %v10649_v12  ;;  %v12980_v3 = vmul.f32 -1.442695, %v10721_v27 }
 0xf60   :  { %17269 = vpow2.f32 %v12979_v38 }
 0xf61   :  { %17271 = vpow2.f32 %v12980_v3 }
 0xf63   :  { %v10789_v20 = vpop.f32.mrb[170].mxu0  ;;  %v10861_v46 = vpop.f32.mrb[170].mxu1 }
 0xf64   :  { %v10865_v48 = vadd.f32 %v10861_v46, %v10794_v24  ;;  %v15553_v15 = vpop.f32.mrb[171].mxu0  ;;  %v15564_v16 = vpop.f32.mrb[171].mxu1  ;;  %v10793_v36 = vadd.f32 %v10789_v20, %v10722_v28 }
 0xf66   :  { %v12981_v52 = vmul.f32 -1.442695, %v10865_v48 }
 0xf68   :  { %17273 = vpow2.f32 %v12981_v52 }
 0xf69   :  { %17275 = vtanh.f32 %v10793_v36 }
 0xf6a   :  { %v17270_v45 = vpop.eup %17269 }
 0xf6b   :  { %v17272_v51 = vpop.eup %17271  ;;  %v10869_v14 = vadd.f32 1.0, %v17270_v45 }
 0xf6c   :  { %v10875_v19 = vadd.f32 1.0, %v17272_v51  ;;  %v10960_v40 = vpop.f32.mrb[172].mxu0  ;;  %v11032_v39 = vpop.f32.mrb[172].mxu1 }
 0xf6d   :  { %17277 = vrcp.f32 %v10869_v14  ;;  %v10964_v18 = vadd.f32 %v10960_v40, %v10890_v43  ;;  %v11036_v35 = vadd.f32 %v11032_v39, %v10965_v31  ;;  %v15575_v49 = vpop.f32.mrb[173].mxu0  ;;  %v15586_v50 = vpop.f32.mrb[173].mxu1 }
 0xf6e   :  { %17279 = vrcp.f32 %v10875_v19 }
 0xf6f   :  { %v12986_v42 = vmul.f32 -1.442695, %v10964_v18  ;;  %v12987_v55 = vmul.f32 -1.442695, %v11036_v35 }
 0xf71   :  { %17281 = vpow2.f32 %v12986_v42 }
 0xf72   :  { %17283 = vpow2.f32 %v12987_v55  ;;  %v17274_v60 = vpop.eup %17273 }
 0xf73   :  { %v17276_v41 = vpop.eup %17275  ;;  %v10882_v1 = vadd.f32 1.0, %v17274_v60 }
 0xf74   :  { %v11104_v57 = vpop.f32.mrb[174].mxu0  ;;  %v11176_v58 = vpop.f32.mrb[174].mxu1 }
 0xf75   :  { %v11180_v30 = vadd.f32 %v11176_v58, %v11109_v56  ;;  %v15597_v25 = vpop.f32.mrb[175].mxu0  ;;  %v15608_v54 = vpop.f32.mrb[175].mxu1  ;;  %v11108_v44 = vadd.f32 %v11104_v57, %v11037_v21  ;;  %17285 = vrcp.f32 %v10882_v1 }
 0xf76   :  { %v11356_v54 = vld [vmem:[#allocation2 + $0xb0] sm:$0xff] }
 0xf77   :  { %v17278_v23 = vpop.eup %17277  ;;  %v12988_v27 = vmul.f32 -1.442695, %v11180_v30  ;;  %17287 = vtanh.f32 %v11108_v44 }
 0xf78   :  { %v17280_v9 = vpop.eup %17279  ;;  %v10886_v12 = vmul.f32 %v17278_v23, %v17276_v41 }
 0xf79   :  { %v10885_v63 = vmul.f32 %v17280_v9, %v19109_v8  ;;  %17289 = vpow2.f32 %v12988_v27  ;;  %v11524_v9 = vld [vmem:[#allocation2 + $0x108] sm:$0xff] }
 0xf7a   :  { %v11599_v27 = vld [vmem:[#allocation2 + $0x148] sm:$0xff] }
 0xf7b   :  { %v17282_v10 = vpop.eup %17281  ;;  %v19179_v38 = vadd.f32 %v10886_v12, %v10885_v63 }
 0xf7c   :  { %v17284_v3 = vpop.eup %17283  ;;  %v11184_v20 = vadd.f32 1.0, %v17282_v10 }
 0xf7d   :  { %17291 = vtanh.f32 %v19179_v38  ;;  %v11190_v24 = vadd.f32 1.0, %v17284_v3 }
 0xf7e   :  { %17293 = vrcp.f32 %v11184_v20 }
 0xf7f   :  { %17295 = vrcp.f32 %v11190_v24  ;;  %v17286_v46 = vpop.eup %17285 }
 0xf81   :  { %v17288_v48 = vpop.eup %17287 }
 0xf83   :  { %v17290_v15 = vpop.eup %17289 }
 0xf84   :  { %v11197_v45 = vadd.f32 1.0, %v17290_v15 }
 0xf86   :  { %17297 = vrcp.f32 %v11197_v45 }
 0xf87   :  { %v17292_v16 = vpop.eup %17291 }
 0xf88   :  { %v17294_v52 = vpop.eup %17293  ;;  %v10889_v28 = vmul.f32 %v17292_v16, %v17286_v46 }
 0xf89   :  { %v17296_v8 = vpop.eup %17295  ;;  %v11201_v36 = vmul.f32 %v17294_v52, %v17288_v48  ;;  %v11743_v52 = vld [vmem:[#allocation2 + $0x1c8] sm:$0xff] }
 0xf8a   :  { %v11200_v51 = vmul.f32 %v17296_v8, %v19117_v26  ;;  %15618 = vmatmul.mubr.msk.f32.vlgmr.msra.gmra.mrb[176].mxu0 %vm258_vm2, %v10889_v28  ;;  %15629 = vmatmul.mubr.msk.f32.vlgmr.msra.gmra.mrb[176].mxu1 %vm258_vm2, %v10889_v28  ;;  %v11205_v14 = vmax.f32 %v10889_v28, 0.0 }
 0xf8b   :  { %16749 = vmatpush3.bf16.msra.mxu0 %v18656_v29  ;;  %16755 = vmatpush3.bf16.msra.mxu1 %v18658_v37 }
 0xf8c   :  { %v19187_v19 = vadd.f32 %v11201_v36, %v11200_v51  ;;  %16750 = vmatprep.subr.bf16.mxu0 %v17465_v62  ;;  %16756 = vmatprep.subr.bf16.mxu1 %v17465_v62  ;;  %v19192_v43 = vadd.f32 %v11205_v14, %v19122_v59 }
 0xf8d   :  { %15639 = vmatprep.mubr.msk.f32.mxu0 %vm17466_vm1, %v17467_v5  ;;  %15650 = vmatprep.mubr.msk.f32.mxu1 %vm17466_vm1, %v17467_v5 }
 0xf8e   :  { %17299 = vtanh.f32 %v19187_v19 }
 0xf8f   :  { %16752 = vmatpush3.bf16.msra.mxu0 %v18664_v32  ;;  %16758 = vmatpush3.bf16.msra.mxu1 %v18666_v47 }
 0xf90   :  { %16759 = vmatprep.subr.bf16.mxu0 %v17465_v62  ;;  %16765 = vmatprep.subr.bf16.mxu1 %v17465_v62  ;;  %v17298_v26 = vpop.eup %17297 }
 0xf92   :  { %15640 = vmatmul.mubr.msk.f32.vlgmr.msra.gmra.mrb[178].mxu0 %vm258_vm2, %v10889_v28  ;;  %15651 = vmatmul.mubr.msk.f32.vlgmr.msra.gmra.mrb[178].mxu1 %vm258_vm2, %v10889_v28 }
 0xf93   :  { %16761 = vmatpush3.bf16.msra.mxu0 %v18676_v53  ;;  %16767 = vmatpush3.bf16.msra.mxu1 %v18678_v7 }
 0xf94   :  { %16762 = vmatprep.subr.bf16.mxu0 %v17465_v62  ;;  %16768 = vmatprep.subr.bf16.mxu1 %v17465_v62 }
 0xf95   :  { %15661 = vmatprep.mubr.msk.f32.mxu0 %vm17466_vm1, %v17467_v5  ;;  %15672 = vmatprep.mubr.msk.f32.mxu1 %vm17466_vm1, %v17467_v5 }
 0xf97   :  { %16764 = vmatpush3.bf16.msra.mxu0 %v18686_v13  ;;  %16770 = vmatpush3.bf16.msra.mxu1 %v18688_v2 }
 0xf98   :  { %v17300_v59 = vpop.eup %17299  ;;  %16771 = vmatprep.subr.bf16.mxu0 %v17465_v62  ;;  %16777 = vmatprep.subr.bf16.mxu1 %v17465_v62 }
 0xf99   :  { %v11204_v40 = vmul.f32 %v17300_v59, %v17298_v26  ;;  %v11671_v26 = vld [vmem:[#allocation2 + $0x188] sm:$0xff] }
 0xf9b   :  { %15662 = vmatmul.mubr.msk.f32.vlgmr.msra.gmra.mrb[180].mxu0 %vm258_vm2, %v11204_v40  ;;  %15673 = vmatmul.mubr.msk.f32.vlgmr.msra.gmra.mrb[180].mxu1 %vm258_vm2, %v11204_v40  ;;  %v11207_v31 = vmax.f32 %v11204_v40, 0.0 }
 0xf9c   :  { %16773 = vmatpush3.bf16.msra.mxu0 %v18698_v22  ;;  %16779 = vmatpush3.bf16.msra.mxu1 %v18700_v4 }
 0xf9d   :  { %16774 = vmatprep.subr.bf16.mxu0 %v17465_v62  ;;  %16780 = vmatprep.subr.bf16.mxu1 %v17465_v62  ;;  %v19224_v39 = vadd.f32 %v11207_v31, %v19154_v61  ;;  %v11284_v61 = vld [vmem:[#allocation2 + $0x70] sm:$0xff] }
 0xf9e   :  { %15683 = vmatprep.mubr.msk.f32.mxu0 %vm17466_vm1, %v17467_v5  ;;  %15694 = vmatprep.mubr.msk.f32.mxu1 %vm17466_vm1, %v17467_v5 }
 0xfa0   :  { %16776 = vmatpush3.bf16.msra.mxu0 %v18708_v6  ;;  %16782 = vmatpush3.bf16.msra.mxu1 %v18710_v17 }
 0xfa1   :  { %16783 = vmatprep.subr.bf16.mxu0 %v17465_v62  ;;  %16789 = vmatprep.subr.bf16.mxu1 %v17465_v62 }
 0xfa3   :  { %15684 = vmatmul.mubr.msk.f32.vlgmr.msra.gmra.mrb[182].mxu0 %vm258_vm2, %v11204_v40  ;;  %15695 = vmatmul.mubr.msk.f32.vlgmr.msra.gmra.mrb[182].mxu1 %vm258_vm2, %v11204_v40 }
 0xfa4   :  { %16785 = vmatpush3.bf16.msra.mxu0 %v18608_v34  ;;  %16791 = vmatpush3.bf16.msra.mxu1 %v18610_v0  ;;  %v11209_v34 = vld [vmem:[#allocation2 + $0x30] sm:$0xff] }
 0xfa5   :  { %16786 = vmatprep.subr.bf16.mxu0 %v17465_v62  ;;  %16792 = vmatprep.subr.bf16.mxu1 %v17465_v62 }
 0xfa6   :  { %15705 = vmatprep.mubr.msk.f32.mxu0 %vm17466_vm1, %v17467_v5  ;;  %15716 = vmatprep.mubr.msk.f32.mxu1 %vm17466_vm1, %v17467_v5 }
 0xfa8   :  { %16788 = vmatpush3.bf16.msra.mxu0 %v18622_v11  ;;  %16794 = vmatpush3.bf16.msra.mxu1 %v18624_v33  ;;  %v11428_v11 = vld [vmem:[#allocation2 + $0xf0] sm:$0xff] }
 0xfa9   :  { %16795 = vmatprep.subr.bf16.mxu0 %v17465_v62  ;;  %16801 = vmatprep.subr.bf16.mxu1 %v17465_v62 }
0x105d   :  { %v11279_v0 = vpop.f32.mrb[176].mxu0  ;;  %v11351_v18 = vpop.f32.mrb[176].mxu1 }
0x105e   :  { %v11283_v35 = vadd.f32 %v11279_v0, %v11209_v34  ;;  %v11355_v49 = vadd.f32 %v11351_v18, %v11284_v61  ;;  %v15619_v50 = vpop.f32.mrb[177].mxu0  ;;  %v15630_v42 = vpop.f32.mrb[177].mxu1 }
0x1060   :  { %v12993_v55 = vmul.f32 -1.442695, %v11283_v35  ;;  %v12994_v60 = vmul.f32 -1.442695, %v11355_v49 }
0x1062   :  { %17301 = vpow2.f32 %v12993_v55 }
0x1063   :  { %17303 = vpow2.f32 %v12994_v60 }
0x1065   :  { %v11423_v57 = vpop.f32.mrb[178].mxu0  ;;  %v11495_v56 = vpop.f32.mrb[178].mxu1 }
0x1066   :  { %v11499_v33 = vadd.f32 %v11495_v56, %v11428_v11  ;;  %v15641_v58 = vpop.f32.mrb[179].mxu0  ;;  %v15652_v30 = vpop.f32.mrb[179].mxu1  ;;  %v11427_v41 = vadd.f32 %v11423_v57, %v11356_v54 }
0x1068   :  { %v12995_v25 = vmul.f32 -1.442695, %v11499_v33 }
0x106a   :  { %17305 = vpow2.f32 %v12995_v25 }
0x106b   :  { %17307 = vtanh.f32 %v11427_v41 }
0x106c   :  { %v17302_v1 = vpop.eup %17301 }
0x106d   :  { %v17304_v21 = vpop.eup %17303  ;;  %v11503_v23 = vadd.f32 1.0, %v17302_v1 }
0x106e   :  { %v11509_v44 = vadd.f32 1.0, %v17304_v21  ;;  %v11594_v12 = vpop.f32.mrb[180].mxu0  ;;  %v11666_v63 = vpop.f32.mrb[180].mxu1 }
0x106f   :  { %17309 = vrcp.f32 %v11503_v23  ;;  %v11598_v10 = vadd.f32 %v11594_v12, %v11524_v9  ;;  %v11670_v3 = vadd.f32 %v11666_v63, %v11599_v27  ;;  %v15663_v20 = vpop.f32.mrb[181].mxu0  ;;  %v15674_v24 = vpop.f32.mrb[181].mxu1  ;;  %v11843_v23 = vld [vmem:[#allocation2 + $0x38] sm:$0xff] }
0x1070   :  { %17311 = vrcp.f32 %v11509_v44  ;;  %v11918_v9 = vld [vmem:[#allocation2 + $0x78] sm:$0xff] }
0x1071   :  { %v13000_v46 = vmul.f32 -1.442695, %v11598_v10  ;;  %v13001_v48 = vmul.f32 -1.442695, %v11670_v3 }
0x1073   :  { %17313 = vpow2.f32 %v13000_v46 }
0x1074   :  { %17315 = vpow2.f32 %v13001_v48  ;;  %v17306_v15 = vpop.eup %17305  ;;  %v12062_v48 = vld [vmem:[#allocation2 + $0xf8] sm:$0xff] }
0x1075   :  { %v17308_v51 = vpop.eup %17307  ;;  %v11516_v14 = vadd.f32 1.0, %v17306_v15 }
0x1076   :  { %v11738_v16 = vpop.f32.mrb[182].mxu0  ;;  %v11810_v28 = vpop.f32.mrb[182].mxu1 }
0x1077   :  { %v11814_v8 = vadd.f32 %v11810_v28, %v11743_v52  ;;  %v15685_v36 = vpop.f32.mrb[183].mxu0  ;;  %v15696_v45 = vpop.f32.mrb[183].mxu1  ;;  %v11742_v40 = vadd.f32 %v11738_v16, %v11671_v26  ;;  %17317 = vrcp.f32 %v11516_v14 }
0x1079   :  { %v17310_v59 = vpop.eup %17309  ;;  %v13002_v0 = vmul.f32 -1.442695, %v11814_v8  ;;  %17319 = vtanh.f32 %v11742_v40  ;;  %v11990_v8 = vld [vmem:[#allocation2 + $0xb8] sm:$0xff] }
0x107a   :  { %v17312_v31 = vpop.eup %17311  ;;  %v11520_v34 = vmul.f32 %v17310_v59, %v17308_v51  ;;  %v12158_v59 = vld [vmem:[#allocation2 + $0x100] sm:$0xff] }
0x107b   :  { %v11519_v61 = vmul.f32 %v17312_v31, %v19179_v38  ;;  %17321 = vpow2.f32 %v13002_v0  ;;  %v12233_v31 = vld [vmem:[#allocation2 + $0x140] sm:$0xff] }
0x107d   :  { %v17314_v18 = vpop.eup %17313  ;;  %v19249_v35 = vadd.f32 %v11520_v34, %v11519_v61 }
0x107e   :  { %v17316_v49 = vpop.eup %17315  ;;  %v11818_v50 = vadd.f32 1.0, %v17314_v18 }
0x107f   :  { %17323 = vtanh.f32 %v19249_v35  ;;  %v11824_v42 = vadd.f32 1.0, %v17316_v49 }
0x1080   :  { %17325 = vrcp.f32 %v11818_v50 }
0x1081   :  { %17327 = vrcp.f32 %v11824_v42  ;;  %v17318_v55 = vpop.eup %17317 }
0x1083   :  { %v17320_v60 = vpop.eup %17319 }
0x1085   :  { %v17322_v57 = vpop.eup %17321 }
0x1086   :  { %v11831_v30 = vadd.f32 1.0, %v17322_v57  ;;  %v12377_v57 = vld [vmem:[#allocation2 + $0x1c0] sm:$0xff] }
0x1088   :  { %17329 = vrcp.f32 %v11831_v30 }
0x1089   :  { %v17324_v11 = vpop.eup %17323 }
0x108a   :  { %v17326_v56 = vpop.eup %17325  ;;  %v11523_v33 = vmul.f32 %v17324_v11, %v17318_v55 }
0x108b   :  { %v17328_v38 = vpop.eup %17327  ;;  %v11835_v58 = vmul.f32 %v17326_v56, %v17320_v60 }
0x108c   :  { %v11834_v25 = vmul.f32 %v17328_v38, %v19187_v19  ;;  %15706 = vmatmul.mubr.msk.f32.vlgmr.msra.gmra.mrb[184].mxu0 %vm258_vm2, %v11523_v33  ;;  %15717 = vmatmul.mubr.msk.f32.vlgmr.msra.gmra.mrb[184].mxu1 %vm258_vm2, %v11523_v33  ;;  %v11839_v54 = vmax.f32 %v11523_v33, 0.0  ;;  %v13019_v19 = vld [vmem:[%s19356_s8 + $0x30] sm:$0xff] }
0x108d   :  { %16797 = vmatpush3.bf16.msra.mxu0 %v18656_v29  ;;  %16803 = vmatpush3.bf16.msra.mxu1 %v18658_v37 }
0x108e   :  { %v19257_v41 = vadd.f32 %v11835_v58, %v11834_v25  ;;  %16798 = vmatprep.subr.bf16.mxu0 %v17465_v62  ;;  %16804 = vmatprep.subr.bf16.mxu1 %v17465_v62  ;;  %v19262_v1 = vadd.f32 %v11839_v54, %v19192_v43  ;;  %v12305_v25 = vld [vmem:[#allocation2 + $0x180] sm:$0xff] }
0x108f   :  { %15727 = vmatprep.mubr.msk.f32.mxu0 %vm17466_vm1, %v17467_v5  ;;  %15738 = vmatprep.mubr.msk.f32.mxu1 %vm17466_vm1, %v17467_v5 }
0x1090   :  { %17331 = vtanh.f32 %v19257_v41 }
0x1091   :  { %16800 = vmatpush3.bf16.msra.mxu0 %v18664_v32  ;;  %16806 = vmatpush3.bf16.msra.mxu1 %v18666_v47 }
0x1092   :  { %16807 = vmatprep.subr.bf16.mxu0 %v17465_v62  ;;  %16813 = vmatprep.subr.bf16.mxu1 %v17465_v62  ;;  %v17330_v29 = vpop.eup %17329 }
0x1094   :  { %15728 = vmatmul.mubr.msk.f32.vlgmr.msra.gmra.mrb[186].mxu0 %vm258_vm2, %v11523_v33  ;;  %15739 = vmatmul.mubr.msk.f32.vlgmr.msra.gmra.mrb[186].mxu1 %vm258_vm2, %v11523_v33 }
0x1095   :  { %16809 = vmatpush3.bf16.msra.mxu0 %v18676_v53  ;;  %16815 = vmatpush3.bf16.msra.mxu1 %v18678_v7  ;;  %v12477_v7 = vld [vmem:[%s19356_s8] sm:$0xff] }
0x1096   :  { %16810 = vmatprep.subr.bf16.mxu0 %v17465_v62  ;;  %16816 = vmatprep.subr.bf16.mxu1 %v17465_v62 }
0x1097   :  { %15749 = vmatprep.mubr.msk.f32.mxu0 %vm17466_vm1, %v17467_v5  ;;  %15760 = vmatprep.mubr.msk.f32.mxu1 %vm17466_vm1, %v17467_v5 }
0x1099   :  { %16812 = vmatpush3.bf16.msra.mxu0 %v18686_v13  ;;  %16818 = vmatpush3.bf16.msra.mxu1 %v18688_v2  ;;  %v12478_v13 = vld [vmem:[%s19356_s8 + $0x8] sm:$0xff] }
0x109a   :  { %v17332_v37 = vpop.eup %17331  ;;  %16819 = vmatprep.subr.bf16.mxu0 %v17465_v62  ;;  %16825 = vmatprep.subr.bf16.mxu1 %v17465_v62  ;;  %v16838_v2 = vpack.c.bf16 %v12478_v13, %v12477_v7 }
0x109b   :  { %v11838_v32 = vmul.f32 %v17332_v37, %v17330_v29 }
0x109d   :  { %15750 = vmatmul.mubr.msk.f32.vlgmr.msra.gmra.mrb[188].mxu0 %vm258_vm2, %v11838_v32  ;;  %15761 = vmatmul.mubr.msk.f32.vlgmr.msra.gmra.mrb[188].mxu1 %vm258_vm2, %v11838_v32  ;;  %v11841_v47 = vmax.f32 %v11838_v32, 0.0 }
0x109e   :  { %16821 = vmatpush3.bf16.msra.mxu0 %v18698_v22  ;;  %16827 = vmatpush3.bf16.msra.mxu1 %v18700_v4  ;;  %v12479_v22 = vld [vmem:[%s19356_s8 + $0x10] sm:$0xff] }
0x109f   :  { %16822 = vmatprep.subr.bf16.mxu0 %v17465_v62  ;;  %16828 = vmatprep.subr.bf16.mxu1 %v17465_v62  ;;  %v19294_v53 = vadd.f32 %v11841_v47, %v19224_v39  ;;  %v13020_v39 = vld [vmem:[%s19356_s8 + $0x38] sm:$0xff] }
0x10a0   :  { %15771 = vmatprep.mubr.msk.f32.mxu0 %vm17466_vm1, %v17467_v5  ;;  %15782 = vmatprep.mubr.msk.f32.mxu1 %vm17466_vm1, %v17467_v5  ;;  %v16835_v21 = vpack.c.bf16 %v13020_v39, %v13019_v19 }
0x10a2   :  { %16824 = vmatpush3.bf16.msra.mxu0 %v18708_v6  ;;  %16830 = vmatpush3.bf16.msra.mxu1 %v18710_v17  ;;  %v13017_v6 = vld [vmem:[%s19356_s8 + $0x20] sm:$0xff]  ;;  %v13018_v17 = vld [vmem:[%s19356_s8 + $0x28] sm:$0xff] }
0x10a3   :  { %16837 = vmatprep.subr.bf16.mxu1 %v17465_v62  ;;  %16831 = vmatprep.subr.bf16.mxu0 %v17465_v62  ;;  %v16832_v43 = vpack.c.bf16 %v13018_v17, %v13017_v6 }
0x10a5   :  { %15772 = vmatmul.mubr.msk.f32.vlgmr.msra.gmra.mrb[190].mxu0 %vm258_vm2, %v11838_v32  ;;  %15783 = vmatmul.mubr.msk.f32.vlgmr.msra.gmra.mrb[190].mxu1 %vm258_vm2, %v11838_v32 }
0x10a6   :  { %15804 = vmatprep.mubr.msk.f32.mxu1 %vm17466_vm1, %v17467_v5  ;;  %15793 = vmatprep.mubr.msk.f32.mxu0 %vm17466_vm1, %v17467_v5  ;;  %v12480_v5 = vld [vmem:[%s19356_s8 + $0x18] sm:$0xff] }
0x10a7   :  { %16839 = vmatpush3.bf16.msra.mxu1 %v16838_v2  ;;  %v16841_v4 = vpack.c.bf16 %v12480_v5, %v12479_v22  ;;  %16833 = vmatpush3.bf16.msra.mxu0 %v16832_v43 }
0x10a8   :  { %16840 = vmatprep.subr.bf16.mxu1 %v17465_v62  ;;  %16834 = vmatprep.subr.bf16.mxu0 %v17465_v62 }
0x10ab   :  { %16842 = vmatpush3.bf16.msra.mxu1 %v16841_v4  ;;  %16836 = vmatpush3.bf16.msra.mxu0 %v16835_v21 }
0x115f   :  { %v11913_v44 = vpop.f32.mrb[184].mxu0  ;;  %v11985_v12 = vpop.f32.mrb[184].mxu1 }
0x1160   :  { %v11917_v27 = vadd.f32 %v11913_v44, %v11843_v23  ;;  %v11989_v63 = vadd.f32 %v11985_v12, %v11918_v9  ;;  %v15707_v10 = vpop.f32.mrb[185].mxu0  ;;  %v15718_v3 = vpop.f32.mrb[185].mxu1 }
0x1162   :  { %v13007_v20 = vmul.f32 -1.442695, %v11917_v27  ;;  %v13008_v24 = vmul.f32 -1.442695, %v11989_v63 }
0x1164   :  { %17333 = vpow2.f32 %v13007_v20 }
0x1165   :  { %17335 = vpow2.f32 %v13008_v24 }
0x1167   :  { %v12057_v46 = vpop.f32.mrb[186].mxu0  ;;  %v12129_v15 = vpop.f32.mrb[186].mxu1 }
0x1168   :  { %v12133_v16 = vadd.f32 %v12129_v15, %v12062_v48  ;;  %v15729_v52 = vpop.f32.mrb[187].mxu0  ;;  %v15740_v28 = vpop.f32.mrb[187].mxu1  ;;  %v12061_v36 = vadd.f32 %v12057_v46, %v11990_v8 }
0x116a   :  { %v13009_v62 = vmul.f32 -1.442695, %v12133_v16  ;;  %v12635_v16 = vlaneseq }
0x116c   :  { %17337 = vpow2.f32 %v13009_v62 }
0x116d   :  { %17339 = vtanh.f32 %v12061_v36 }
0x116e   :  { %v17334_v45 = vpop.eup %17333 }
0x116f   :  { %v17336_v51 = vpop.eup %17335  ;;  %v12137_v14 = vadd.f32 1.0, %v17334_v45 }
0x1170   :  { %v12143_v26 = vadd.f32 1.0, %v17336_v51  ;;  %v12228_v40 = vpop.f32.mrb[188].mxu0  ;;  %v12300_v34 = vpop.f32.mrb[188].mxu1 }
0x1171   :  { %17341 = vrcp.f32 %v12137_v14  ;;  %v12232_v0 = vadd.f32 %v12228_v40, %v12158_v59  ;;  %v12304_v61 = vadd.f32 %v12300_v34, %v12233_v31  ;;  %v15751_v18 = vpop.f32.mrb[189].mxu0  ;;  %v15762_v49 = vpop.f32.mrb[189].mxu1 }
0x1172   :  { %17343 = vrcp.f32 %v12143_v26 }
0x1173   :  { %v13014_v50 = vmul.f32 -1.442695, %v12232_v0  ;;  %v13015_v42 = vmul.f32 -1.442695, %v12304_v61 }
0x1175   :  { %17345 = vpow2.f32 %v13014_v50 }
0x1176   :  { %17347 = vpow2.f32 %v13015_v42  ;;  %v17338_v55 = vpop.eup %17337 }
0x1177   :  { %v17340_v58 = vpop.eup %17339  ;;  %v12150_v30 = vadd.f32 1.0, %v17338_v55 }
0x1178   :  { %v12372_v60 = vpop.f32.mrb[190].mxu0  ;;  %v12444_v11 = vpop.f32.mrb[190].mxu1 }
0x1179   :  { %v12448_v56 = vadd.f32 %v12444_v11, %v12377_v57  ;;  %v15773_v33 = vpop.f32.mrb[191].mxu0  ;;  %v15784_v38 = vpop.f32.mrb[191].mxu1  ;;  %v12376_v29 = vadd.f32 %v12372_v60, %v12305_v25  ;;  %17349 = vrcp.f32 %v12150_v30 }
0x117b   :  { %v17342_v54 = vpop.eup %17341  ;;  %v13016_v47 = vmul.f32 -1.442695, %v12448_v56  ;;  %17351 = vtanh.f32 %v12376_v29 }
0x117c   :  { %v17344_v37 = vpop.eup %17343  ;;  %v12154_v32 = vmul.f32 %v17342_v54, %v17340_v58 }
0x117d   :  { %v12153_v7 = vmul.f32 %v17344_v37, %v19249_v35  ;;  %17353 = vpow2.f32 %v13016_v47 }
0x117f   :  { %v17346_v13 = vpop.eup %17345  ;;  %v12155_v2 = vadd.f32 %v12154_v32, %v12153_v7 }
0x1180   :  { %v17348_v22 = vpop.eup %17347  ;;  %v12452_v5 = vadd.f32 1.0, %v17346_v13 }
0x1181   :  { %17355 = vtanh.f32 %v12155_v2  ;;  %v12458_v4 = vadd.f32 1.0, %v17348_v22 }
0x1182   :  { %17357 = vrcp.f32 %v12452_v5 }
0x1183   :  { %17359 = vrcp.f32 %v12458_v4  ;;  %v17350_v6 = vpop.eup %17349 }
0x1185   :  { %v17352_v17 = vpop.eup %17351 }
0x1187   :  { %v17354_v19 = vpop.eup %17353 }
0x1188   :  { %v12465_v35 = vadd.f32 1.0, %v17354_v19 }
0x118a   :  { %17361 = vrcp.f32 %v12465_v35 }
0x118b   :  { %v17356_v43 = vpop.eup %17355 }
0x118c   :  { %v17358_v39 = vpop.eup %17357  ;;  %v12157_v21 = vmul.f32 %v17356_v43, %v17350_v6 }
0x118d   :  { %v17360_v23 = vpop.eup %17359  ;;  %v12469_v44 = vmul.f32 %v17358_v39, %v17352_v17 }
0x118e   :  { %v12468_v9 = vmul.f32 %v17360_v23, %v19257_v41  ;;  %v12473_v12 = vmax.f32 %v12157_v21, 0.0  ;;  %v12636_v41 = vshrl.u32 %v12635_v16, 7 }
0x1190   :  { %v12470_v27 = vadd.f32 %v12469_v44, %v12468_v9  ;;  %v12474_v63 = vadd.f32 %v12473_v12, %v19262_v1  ;;  %v12632_v1 = vld [vmem:[%s19357_s9] sm:$0x1]  ;;  %v12637_v28 = vsub.s32 0, %v12636_v41 }
0x1191   :  { %v12633_v52 = vmul.f32 8.0, %v12632_v1 }
0x1192   :  { %17363 = vtanh.f32 %v12470_v27  ;;  %15805 = vmatmul.mubr.msk.f32.vlgmr.msra.gmra.mrb[192].mxu1 %vm258_vm2, %v12474_v63 }
0x1193   :  { %v12638_v62 = vrot.slane %v12633_v52, %v12637_v28 }
0x1194   :  { %v17362_v10 = vpop.eup %17361 }
0x119c   :  { %v17364_v3 = vpop.eup %17363 }
0x119d   :  { %v12472_v20 = vmul.f32 %v17364_v3, %v17362_v10 }
0x119f   :  { %v12475_v24 = vmax.f32 %v12472_v20, 0.0 }
0x11a1   :  { %v12476_v46 = vadd.f32 %v12475_v24, %v19294_v53 }
0x11a3   :  { %15794 = vmatmul.mubr.msk.f32.vlgmr.msra.gmra.mrb[192].mxu0 %vm258_vm2, %v12476_v46 }
0x1265   :  { %v12628_v48 = vpop.f32.mrb[192].mxu1 }
0x1266   :  { %v15806_v15 = vpop.f32.mrb[193].mxu1 }
0x1276   :  { %v12555_v8 = vpop.f32.mrb[192].mxu0 }
0x1277   :  { %v12629_v36 = vadd.f32 %v12628_v48, %v12555_v8  ;;  %v15795_v45 = vpop.f32.mrb[193].mxu0 }
0x1279   :  { %v12640_v51 = vadd.f32 %v12638_v62, %v12629_v36 }
0x127b   :  { %12642 = vst.msk [vmem:[%s19358_s10] sm:$0xff] %vm12641_vm4, %v12640_v51 }
0x127c   :  { %12647 = vsyncpa [#allocation5], 1 }
0x127d   :  { %12648 = vsyncpa [#allocation7], 1 }
0x127e   :  { %12649 = vsyncpa [#allocation10], 1 }

</bundles_post_ra>
